<compile_context>
chip_gen: v5e
topology: v5e:2x2
jax: 0.10.0
libtpu: 0.0.40
codegen_flags: <defaults>
</compile_context>

<pallas_src>
import functools

import jax
import jax.numpy as jnp
from jax.experimental import pallas as pl
from jax.experimental.pallas import tpu as pltpu


# ---------------------------------------------------------------------------
# In-kernel building blocks
# ---------------------------------------------------------------------------
def _zero_halo_rim(pad_ref):
    """Zero only the 1-element rim of the (B, H+2, W+2, C) halo scratch."""
    B, Hp2, Wp2, C = pad_ref.shape
    dt = pad_ref.dtype
    pad_ref[:, 0:1, :, :] = jnp.zeros((B, 1, Wp2, C), dt)
    pad_ref[:, Hp2 - 1:Hp2, :, :] = jnp.zeros((B, 1, Wp2, C), dt)
    pad_ref[:, :, 0:1, :] = jnp.zeros((B, Hp2, 1, C), dt)
    pad_ref[:, :, Wp2 - 1:Wp2, :] = jnp.zeros((B, Hp2, 1, C), dt)


def _conv3x3_bn_relu(x, pad_ref, w_ref, b_ref):
    """3x3 conv (padding=1) + folded BatchNorm + ReLU on a (B, H, W, Cin) tile.

    x      : (B, H, W, Cin) f32 value
    pad_ref: (B, H+2, W+2, Cin) f32 VMEM halo scratch
    w_ref  : (9, Cin, Cout) f32 weights (BN scale already folded in)
    b_ref  : (1, Cout) f32 bias (conv bias + BN folded)
    """
    B, H, W, Cin = x.shape
    Cout = w_ref.shape[2]

    _zero_halo_rim(pad_ref)                        # rim only; interior below
    pad_ref[:, 1:H + 1, 1:W + 1, :] = x

    acc = jnp.zeros((B * H * W, Cout), jnp.float32)
    for dx in range(3):
        # One shifted slab load per dx (sublane offset handled by the load);
        # the dy shifts below are free major-dim slices of this value.
        xs = pad_ref[:, :, dx:dx + W, :]           # (B, H+2, W, Cin)
        for dy in range(3):
            patch = xs[:, dy:dy + H, :, :].reshape(B * H * W, Cin)
            acc = acc + jnp.dot(patch, w_ref[3 * dy + dx],
                                preferred_element_type=jnp.float32)

    y = jnp.maximum(acc + b_ref[...], 0.0)
    return y.reshape(B, H, W, Cout)


def _maxpool2x2(y, pool_ref):
    """Exact MaxPool2d(kernel=2, stride=2): (B, H, W, C) -> (B, H/2, W/2, C)."""
    B, H, W, C = y.shape
    Hh, Wh = H // 2, W // 2
    # Vertical pairs: leading-dim reshape (layout-free) + VPU max.
    pool_ref[...] = y.reshape(B * Hh, 2, W, C).max(axis=1)     # (B*Hh, W, C)
    # Horizontal pairs: two stride-2 sublane reads + max.
    even = pool_ref[:, pl.ds(0, Wh, stride=2), :]
    odd = pool_ref[:, pl.ds(1, Wh, stride=2), :]
    return jnp.maximum(even, odd).reshape(B, Hh, Wh, C)


# ---------------------------------------------------------------------------
# Fused whole-network kernel (B images per grid step)
# ---------------------------------------------------------------------------
def _pneunet_kernel(*refs):
    # refs: [x] + [w_l, b_l]*8 + [fc1_w, fc1_b, fc2_w, fc2_b]   (21 inputs)
    #       + [out]                                              (1 output)
    #       + [halo]*8 + [pool]*4                                (12 scratch)
    x_ref = refs[0]
    conv_refs = refs[1:17]
    fc1_w_ref, fc1_b_ref, fc2_w_ref, fc2_b_ref = refs[17:21]
    out_ref = refs[21]
    pad_refs = refs[22:30]
    pool_refs = refs[30:34]

    x = x_ref[...]                                             # (B, H, W, Cin0)
    li = 0
    for blk in range(4):
        for _conv in range(2):
            x = _conv3x3_bn_relu(x, pad_refs[li],
                                 conv_refs[2 * li], conv_refs[2 * li + 1])
            li += 1
        x = _maxpool2x2(x, pool_refs[blk])
        # nn.Dropout2d: identity in eval mode.

    # Classifier head: AdaptiveAvgPool2d((1,1)) -> Flatten -> FC -> ReLU -> FC.
    pooled = jnp.mean(x, axis=(1, 2))                          # (B, C)
    h = jnp.dot(pooled, fc1_w_ref[...],
                preferred_element_type=jnp.float32) + fc1_b_ref[...]
    h = jnp.maximum(h, 0.0)
    # nn.Dropout: identity in eval mode.
    logits = jnp.dot(h, fc2_w_ref[...],
                     preferred_element_type=jnp.float32) + fc2_b_ref[...]  # (B, 1)
    out_ref[...] = logits.reshape(1, 1, -1)                    # lane-packed (1,1,B)


def _const_index_map(ndim, n):
    return (0,) * ndim


def _pick_batch_tile(n, max_tile=8):
    """Largest divisor of n (<= max_tile) that still leaves >= 2 grid steps."""
    best = 1
    for b in range(1, min(max_tile, n) + 1):
        if n % b == 0 and (n // b) >= 2:
            best = b
    return best


# ---------------------------------------------------------------------------
# Wrapper: builds specs / scratch and launches the single fused pallas_call
# ---------------------------------------------------------------------------
def pneunet_forward(x_nchw, params, *, batch_tile=8):
    # NCHW -> NHWC once at the boundary (channels on TPU lanes).
    x = jnp.transpose(x_nchw, (0, 2, 3, 1)).astype(jnp.float32)
    N, H, W, Cin0 = x.shape
    B = _pick_batch_tile(N, batch_tile)
    G = N // B

    weight_args = []
    pad_scratch = []
    pool_scratch = []
    h, w = H, W
    for blk in params["blocks"]:
        cout = None
        for (wk, sk, bk) in (("w1", "s1", "b1"), ("w2", "s2", "b2")):
            cw = blk[wk].astype(jnp.float32)                   # (3,3,Cin,Cout) HWIO
            cin, cout = cw.shape[2], cw.shape[3]
            # Fold BN scale into the weights and pre-reshape to (9, Cin, Cout).
            w9 = (cw * blk[sk][None, None, None, :]).reshape(9, cin, cout)
            bias = blk[bk].reshape(1, cout).astype(jnp.float32)
            weight_args += [w9, bias]
            pad_scratch.append(pltpu.VMEM((B, h + 2, w + 2, cin), jnp.float32))
        pool_scratch.append(pltpu.VMEM((B * (h // 2), w, cout), jnp.float32))
        h, w = h // 2, w // 2

    hid = params["fc1_w"].shape[1]
    weight_args += [
        params["fc1_w"].astype(jnp.float32),
        params["fc1_b"].reshape(1, hid).astype(jnp.float32),
        params["fc2_w"].astype(jnp.float32),
        params["fc2_b"].reshape(1, 1).astype(jnp.float32),
    ]

    in_specs = [pl.BlockSpec((B, H, W, Cin0), lambda g: (g, 0, 0, 0))]
    for a in weight_args:
        in_specs.append(
            pl.BlockSpec(a.shape, functools.partial(_const_index_map, a.ndim)))

    out = pl.pallas_call(
        _pneunet_kernel,
        out_shape=jax.ShapeDtypeStruct((G, 1, B), jnp.float32),
        grid=(G,),
        in_specs=in_specs,
        out_specs=pl.BlockSpec((1, 1, B), lambda g: (g, 0, 0)),
        scratch_shapes=pad_scratch + pool_scratch,
        compiler_params=pltpu.CompilerParams(
            dimension_semantics=("parallel",)),
    )(x, *weight_args)
    return out.reshape(N, 1)


# ---------------------------------------------------------------------------
# Deterministic synthetic parameters (BN running stats + conv bias folded).
# Note: synthetic conv weights use HWIO (3,3,Cin,Cout); real PyTorch weights
# (Cout,Cin,3,3) would need a (2,3,1,0) transpose before loading.
# TODO(synk): add a loader that transposes real PyTorch Conv2d weights.
# ---------------------------------------------------------------------------
def _conv_bn_params(key, cin, cout):
    k = jax.random.split(key, 6)
    w = jax.random.normal(k[0], (3, 3, cin, cout), jnp.float32) / jnp.sqrt(9.0 * cin)
    conv_b = 0.01 * jax.random.normal(k[1], (cout,), jnp.float32)
    gamma = 1.0 + 0.1 * jax.random.normal(k[2], (cout,), jnp.float32)
    beta = 0.1 * jax.random.normal(k[3], (cout,), jnp.float32)
    run_mean = 0.1 * jax.random.normal(k[4], (cout,), jnp.float32)
    run_var = jnp.abs(jax.random.normal(k[5], (cout,), jnp.float32)) + 0.5
    eps = 1e-5
    scale = gamma / jnp.sqrt(run_var + eps)
    bias = beta - run_mean * scale + conv_b * scale
    return w, scale, bias


def init_pneunet_params(key, input_shape, hidden_units):
    chans = [input_shape,
             hidden_units, hidden_units,
             hidden_units * 2, hidden_units * 2,
             hidden_units * 4, hidden_units * 4,
             hidden_units * 8, hidden_units * 8]
    keys = jax.random.split(key, 12)
    blocks = []
    ki = 0
    for b in range(4):
        cin1, cout1 = chans[2 * b], chans[2 * b + 1]
        cin2, cout2 = chans[2 * b + 1], chans[2 * b + 2]
        w1, s1, b1 = _conv_bn_params(keys[ki], cin1, cout1); ki += 1
        w2, s2, b2 = _conv_bn_params(keys[ki], cin2, cout2); ki += 1
        blocks.append(dict(w1=w1, s1=s1, b1=b1, w2=w2, s2=s2, b2=b2))
    c_feat = hidden_units * 8
    fc1_w = jax.random.normal(keys[ki], (c_feat, 128), jnp.float32) / jnp.sqrt(float(c_feat)); ki += 1
    fc1_b = 0.01 * jax.random.normal(keys[ki], (128,), jnp.float32); ki += 1
    fc2_w = jax.random.normal(keys[ki], (128, 1), jnp.float32) / jnp.sqrt(128.0); ki += 1
    fc2_b = 0.01 * jax.random.normal(keys[ki], (1,), jnp.float32)
    return dict(blocks=blocks, fc1_w=fc1_w, fc1_b=fc1_b, fc2_w=fc2_w, fc2_b=fc2_b)


if __name__ == "__main__":
    # Small shapes consistent with the module: batch=2, in_channels=4,
    # spatial=16x16, hidden_units=8 (channels 8 -> 16 -> 32 -> 64).
    batch, in_ch, spatial, hidden_units = 2, 4, 16, 8

    x = jax.random.normal(jax.random.PRNGKey(0),
                          (batch, in_ch, spatial, spatial), jnp.float32)
    params = init_pneunet_params(jax.random.PRNGKey(42), in_ch, hidden_units)

    out = jax.jit(functools.partial(pneunet_forward, params=params))(x)
    out = jax.block_until_ready(out)
    assert out.shape == (batch, 1) and out.dtype == jnp.float32
    print("KERNEL_OK")
</pallas_src>

<mosaic_0001>
module attributes {stable_mosaic.version = 11 : i64} {
  func.func @_pneunet_kernel(%arg0: i32, %arg1: memref<1x16x16x4xf32, #tpu.memory_space<vmem>>, %arg2: memref<9x4x8xf32, #tpu.memory_space<vmem>>, %arg3: memref<1x8xf32, #tpu.memory_space<vmem>>, %arg4: memref<9x8x8xf32, #tpu.memory_space<vmem>>, %arg5: memref<1x8xf32, #tpu.memory_space<vmem>>, %arg6: memref<9x8x16xf32, #tpu.memory_space<vmem>>, %arg7: memref<1x16xf32, #tpu.memory_space<vmem>>, %arg8: memref<9x16x16xf32, #tpu.memory_space<vmem>>, %arg9: memref<1x16xf32, #tpu.memory_space<vmem>>, %arg10: memref<9x16x32xf32, #tpu.memory_space<vmem>>, %arg11: memref<1x32xf32, #tpu.memory_space<vmem>>, %arg12: memref<9x32x32xf32, #tpu.memory_space<vmem>>, %arg13: memref<1x32xf32, #tpu.memory_space<vmem>>, %arg14: memref<9x32x64xf32, #tpu.memory_space<vmem>>, %arg15: memref<1x64xf32, #tpu.memory_space<vmem>>, %arg16: memref<9x64x64xf32, #tpu.memory_space<vmem>>, %arg17: memref<1x64xf32, #tpu.memory_space<vmem>>, %arg18: memref<64x128xf32, #tpu.memory_space<vmem>>, %arg19: memref<1x128xf32, #tpu.memory_space<vmem>>, %arg20: memref<128x1xf32, #tpu.memory_space<vmem>>, %arg21: memref<1x1xf32, #tpu.memory_space<vmem>>, %arg22: memref<1x1x1xf32, #tpu.memory_space<vmem>>, %arg23: memref<1x18x18x4xf32, #tpu.memory_space<vmem>>, %arg24: memref<1x18x18x8xf32, #tpu.memory_space<vmem>>, %arg25: memref<1x10x10x8xf32, #tpu.memory_space<vmem>>, %arg26: memref<1x10x10x16xf32, #tpu.memory_space<vmem>>, %arg27: memref<1x6x6x16xf32, #tpu.memory_space<vmem>>, %arg28: memref<1x6x6x32xf32, #tpu.memory_space<vmem>>, %arg29: memref<1x4x4x32xf32, #tpu.memory_space<vmem>>, %arg30: memref<1x4x4x64xf32, #tpu.memory_space<vmem>>, %arg31: memref<8x16x8xf32, #tpu.memory_space<vmem>>, %arg32: memref<4x8x16xf32, #tpu.memory_space<vmem>>, %arg33: memref<2x4x32xf32, #tpu.memory_space<vmem>>, %arg34: memref<1x2x64xf32, #tpu.memory_space<vmem>>) attributes {dimension_semantics = [#tpu.dimension_semantics<parallel>], iteration_bounds = array<i64: 2>, scalar_prefetch = 0 : i64, scratch_operands = 12 : i64, tpu.core_type = #tpu.core_type<tc>, window_params = [{transform_indices = @transform_0, window_bounds = array<i64: 1, 16, 16, 4>}, {pipeline_mode = #tpu.pipeline_mode<synchronous>, transform_indices = @transform_1, window_bounds = array<i64: 9, 4, 8>}, {pipeline_mode = #tpu.pipeline_mode<synchronous>, transform_indices = @transform_2, window_bounds = array<i64: 1, 8>}, {pipeline_mode = #tpu.pipeline_mode<synchronous>, transform_indices = @transform_3, window_bounds = array<i64: 9, 8, 8>}, {pipeline_mode = #tpu.pipeline_mode<synchronous>, transform_indices = @transform_4, window_bounds = array<i64: 1, 8>}, {pipeline_mode = #tpu.pipeline_mode<synchronous>, transform_indices = @transform_5, window_bounds = array<i64: 9, 8, 16>}, {pipeline_mode = #tpu.pipeline_mode<synchronous>, transform_indices = @transform_6, window_bounds = array<i64: 1, 16>}, {pipeline_mode = #tpu.pipeline_mode<synchronous>, transform_indices = @transform_7, window_bounds = array<i64: 9, 16, 16>}, {pipeline_mode = #tpu.pipeline_mode<synchronous>, transform_indices = @transform_8, window_bounds = array<i64: 1, 16>}, {pipeline_mode = #tpu.pipeline_mode<synchronous>, transform_indices = @transform_9, window_bounds = array<i64: 9, 16, 32>}, {pipeline_mode = #tpu.pipeline_mode<synchronous>, transform_indices = @transform_10, window_bounds = array<i64: 1, 32>}, {pipeline_mode = #tpu.pipeline_mode<synchronous>, transform_indices = @transform_11, window_bounds = array<i64: 9, 32, 32>}, {pipeline_mode = #tpu.pipeline_mode<synchronous>, transform_indices = @transform_12, window_bounds = array<i64: 1, 32>}, {pipeline_mode = #tpu.pipeline_mode<synchronous>, transform_indices = @transform_13, window_bounds = array<i64: 9, 32, 64>}, {pipeline_mode = #tpu.pipeline_mode<synchronous>, transform_indices = @transform_14, window_bounds = array<i64: 1, 64>}, {pipeline_mode = #tpu.pipeline_mode<synchronous>, transform_indices = @transform_15, window_bounds = array<i64: 9, 64, 64>}, {pipeline_mode = #tpu.pipeline_mode<synchronous>, transform_indices = @transform_16, window_bounds = array<i64: 1, 64>}, {pipeline_mode = #tpu.pipeline_mode<synchronous>, transform_indices = @transform_17, window_bounds = array<i64: 64, 128>}, {pipeline_mode = #tpu.pipeline_mode<synchronous>, transform_indices = @transform_18, window_bounds = array<i64: 1, 128>}, {pipeline_mode = #tpu.pipeline_mode<synchronous>, transform_indices = @transform_19, window_bounds = array<i64: 128, 1>}, {pipeline_mode = #tpu.pipeline_mode<synchronous>, transform_indices = @transform_20, window_bounds = array<i64: 1, 1>}, {transform_indices = @transform_21, window_bounds = array<i64: 1, 1, 1>}]} {
    %c0 = arith.constant 0 : index
    %c0_0 = arith.constant 0 : index
    %c0_1 = arith.constant 0 : index
    %c0_2 = arith.constant 0 : index
    %0 = vector.load %arg1[%c0, %c0_0, %c0_1, %c0_2] : memref<1x16x16x4xf32, #tpu.memory_space<vmem>>, vector<1x16x16x4xf32>
    %cst = arith.constant 0.000000e+00 : f32
    %1 = vector.broadcast %cst : f32 to vector<1x1x18x4xf32>
    %c0_3 = arith.constant 0 : index
    %c0_4 = arith.constant 0 : index
    %c0_5 = arith.constant 0 : index
    %c0_6 = arith.constant 0 : index
    %2 = vector.load %arg23[%c0_3, %c0_4, %c0_5, %c0_6] : memref<1x18x18x4xf32, #tpu.memory_space<vmem>>, vector<1x1x18x4xf32>
    tpu.vector_store %arg23[%c0_3, %c0_4, %c0_5, %c0_6], %1 {strides = array<i32>} : memref<1x18x18x4xf32, #tpu.memory_space<vmem>>, vector<1x1x18x4xf32>,
    %cst_7 = arith.constant 0.000000e+00 : f32
    %3 = vector.broadcast %cst_7 : f32 to vector<1x1x18x4xf32>
    %c0_8 = arith.constant 0 : index
    %c17 = arith.constant 17 : index
    %c0_9 = arith.constant 0 : index
    %c0_10 = arith.constant 0 : index
    %4 = vector.load %arg23[%c0_8, %c17, %c0_9, %c0_10] : memref<1x18x18x4xf32, #tpu.memory_space<vmem>>, vector<1x1x18x4xf32>
    tpu.vector_store %arg23[%c0_8, %c17, %c0_9, %c0_10], %3 {strides = array<i32>} : memref<1x18x18x4xf32, #tpu.memory_space<vmem>>, vector<1x1x18x4xf32>,
    %cst_11 = arith.constant 0.000000e+00 : f32
    %5 = vector.broadcast %cst_11 : f32 to vector<1x18x1x4xf32>
    %c0_12 = arith.constant 0 : index
    %c0_13 = arith.constant 0 : index
    %c0_14 = arith.constant 0 : index
    %c0_15 = arith.constant 0 : index
    %6 = vector.load %arg23[%c0_12, %c0_13, %c0_14, %c0_15] : memref<1x18x18x4xf32, #tpu.memory_space<vmem>>, vector<1x18x1x4xf32>
    tpu.vector_store %arg23[%c0_12, %c0_13, %c0_14, %c0_15], %5 {strides = array<i32>} : memref<1x18x18x4xf32, #tpu.memory_space<vmem>>, vector<1x18x1x4xf32>,
    %cst_16 = arith.constant 0.000000e+00 : f32
    %7 = vector.broadcast %cst_16 : f32 to vector<1x18x1x4xf32>
    %c0_17 = arith.constant 0 : index
    %c0_18 = arith.constant 0 : index
    %c17_19 = arith.constant 17 : index
    %c0_20 = arith.constant 0 : index
    %8 = vector.load %arg23[%c0_17, %c0_18, %c17_19, %c0_20] : memref<1x18x18x4xf32, #tpu.memory_space<vmem>>, vector<1x18x1x4xf32>
    tpu.vector_store %arg23[%c0_17, %c0_18, %c17_19, %c0_20], %7 {strides = array<i32>} : memref<1x18x18x4xf32, #tpu.memory_space<vmem>>, vector<1x18x1x4xf32>,
    %c0_21 = arith.constant 0 : index
    %c1 = arith.constant 1 : index
    %c1_22 = arith.constant 1 : index
    %c0_23 = arith.constant 0 : index
    %9 = vector.load %arg23[%c0_21, %c1, %c1_22, %c0_23] : memref<1x18x18x4xf32, #tpu.memory_space<vmem>>, vector<1x16x16x4xf32>
    tpu.vector_store %arg23[%c0_21, %c1, %c1_22, %c0_23], %0 {strides = array<i32>} : memref<1x18x18x4xf32, #tpu.memory_space<vmem>>, vector<1x16x16x4xf32>,
    %cst_24 = arith.constant 0.000000e+00 : f32
    %10 = vector.broadcast %cst_24 : f32 to vector<256x8xf32>
    %c0_25 = arith.constant 0 : index
    %c0_26 = arith.constant 0 : index
    %c0_27 = arith.constant 0 : index
    %c0_28 = arith.constant 0 : index
    %11 = vector.load %arg23[%c0_25, %c0_26, %c0_27, %c0_28] : memref<1x18x18x4xf32, #tpu.memory_space<vmem>>, vector<1x18x16x4xf32>
    %12 = vector.extract_strided_slice %11 {offsets = [0, 0, 0, 0], sizes = [1, 16, 16, 4], strides = [1, 1, 1, 1]} : vector<1x18x16x4xf32> to vector<1x16x16x4xf32>
    %13 = vector.shape_cast %12 : vector<1x16x16x4xf32> to vector<256x4xf32>
    %c0_29 = arith.constant 0 : index
    %c0_30 = arith.constant 0 : index
    %c0_31 = arith.constant 0 : index
    %14 = vector.load %arg2[%c0_29, %c0_30, %c0_31] : memref<9x4x8xf32, #tpu.memory_space<vmem>>, vector<1x4x8xf32>
    %15 = vector.shape_cast %14 : vector<1x4x8xf32> to vector<4x8xf32>
    %cst_32 = arith.constant dense<0.000000e+00> : vector<256x8xf32>
    %16 = tpu.matmul %13, %15, %cst_32 {dimension_numbers = #tpu.dot_dimension_numbers<[1], [0], [0], [1], [0, 0, 1, 1], [], []>} : vector<256x4xf32>, vector<4x8xf32>, vector<256x8xf32> -> vector<256x8xf32>
    %17 = arith.addf %10, %16 : vector<256x8xf32>
    %18 = vector.extract_strided_slice %11 {offsets = [0, 1, 0, 0], sizes = [1, 16, 16, 4], strides = [1, 1, 1, 1]} : vector<1x18x16x4xf32> to vector<1x16x16x4xf32>
    %19 = vector.shape_cast %18 : vector<1x16x16x4xf32> to vector<256x4xf32>
    %c3 = arith.constant 3 : index
    %c0_33 = arith.constant 0 : index
    %c0_34 = arith.constant 0 : index
    %20 = vector.load %arg2[%c3, %c0_33, %c0_34] : memref<9x4x8xf32, #tpu.memory_space<vmem>>, vector<1x4x8xf32>
    %21 = vector.shape_cast %20 : vector<1x4x8xf32> to vector<4x8xf32>
    %cst_35 = arith.constant dense<0.000000e+00> : vector<256x8xf32>
    %22 = tpu.matmul %19, %21, %cst_35 {dimension_numbers = #tpu.dot_dimension_numbers<[1], [0], [0], [1], [0, 0, 1, 1], [], []>} : vector<256x4xf32>, vector<4x8xf32>, vector<256x8xf32> -> vector<256x8xf32>
    %23 = arith.addf %17, %22 : vector<256x8xf32>
    %24 = vector.extract_strided_slice %11 {offsets = [0, 2, 0, 0], sizes = [1, 16, 16, 4], strides = [1, 1, 1, 1]} : vector<1x18x16x4xf32> to vector<1x16x16x4xf32>
    %25 = vector.shape_cast %24 : vector<1x16x16x4xf32> to vector<256x4xf32>
    %c6 = arith.constant 6 : index
    %c0_36 = arith.constant 0 : index
    %c0_37 = arith.constant 0 : index
    %26 = vector.load %arg2[%c6, %c0_36, %c0_37] : memref<9x4x8xf32, #tpu.memory_space<vmem>>, vector<1x4x8xf32>
    %27 = vector.shape_cast %26 : vector<1x4x8xf32> to vector<4x8xf32>
    %cst_38 = arith.constant dense<0.000000e+00> : vector<256x8xf32>
    %28 = tpu.matmul %25, %27, %cst_38 {dimension_numbers = #tpu.dot_dimension_numbers<[1], [0], [0], [1], [0, 0, 1, 1], [], []>} : vector<256x4xf32>, vector<4x8xf32>, vector<256x8xf32> -> vector<256x8xf32>
    %29 = arith.addf %23, %28 : vector<256x8xf32>
    %c0_39 = arith.constant 0 : index
    %c0_40 = arith.constant 0 : index
    %c1_41 = arith.constant 1 : index
    %c0_42 = arith.constant 0 : index
    %30 = vector.load %arg23[%c0_39, %c0_40, %c1_41, %c0_42] : memref<1x18x18x4xf32, #tpu.memory_space<vmem>>, vector<1x18x16x4xf32>
    %31 = vector.extract_strided_slice %30 {offsets = [0, 0, 0, 0], sizes = [1, 16, 16, 4], strides = [1, 1, 1, 1]} : vector<1x18x16x4xf32> to vector<1x16x16x4xf32>
    %32 = vector.shape_cast %31 : vector<1x16x16x4xf32> to vector<256x4xf32>
    %c1_43 = arith.constant 1 : index
    %c0_44 = arith.constant 0 : index
    %c0_45 = arith.constant 0 : index
    %33 = vector.load %arg2[%c1_43, %c0_44, %c0_45] : memref<9x4x8xf32, #tpu.memory_space<vmem>>, vector<1x4x8xf32>
    %34 = vector.shape_cast %33 : vector<1x4x8xf32> to vector<4x8xf32>
    %cst_46 = arith.constant dense<0.000000e+00> : vector<256x8xf32>
    %35 = tpu.matmul %32, %34, %cst_46 {dimension_numbers = #tpu.dot_dimension_numbers<[1], [0], [0], [1], [0, 0, 1, 1], [], []>} : vector<256x4xf32>, vector<4x8xf32>, vector<256x8xf32> -> vector<256x8xf32>
    %36 = arith.addf %29, %35 : vector<256x8xf32>
    %37 = vector.extract_strided_slice %30 {offsets = [0, 1, 0, 0], sizes = [1, 16, 16, 4], strides = [1, 1, 1, 1]} : vector<1x18x16x4xf32> to vector<1x16x16x4xf32>
    %38 = vector.shape_cast %37 : vector<1x16x16x4xf32> to vector<256x4xf32>
    %c4 = arith.constant 4 : index
    %c0_47 = arith.constant 0 : index
    %c0_48 = arith.constant 0 : index
    %39 = vector.load %arg2[%c4, %c0_47, %c0_48] : memref<9x4x8xf32, #tpu.memory_space<vmem>>, vector<1x4x8xf32>
    %40 = vector.shape_cast %39 : vector<1x4x8xf32> to vector<4x8xf32>
    %cst_49 = arith.constant dense<0.000000e+00> : vector<256x8xf32>
    %41 = tpu.matmul %38, %40, %cst_49 {dimension_numbers = #tpu.dot_dimension_numbers<[1], [0], [0], [1], [0, 0, 1, 1], [], []>} : vector<256x4xf32>, vector<4x8xf32>, vector<256x8xf32> -> vector<256x8xf32>
    %42 = arith.addf %36, %41 : vector<256x8xf32>
    %43 = vector.extract_strided_slice %30 {offsets = [0, 2, 0, 0], sizes = [1, 16, 16, 4], strides = [1, 1, 1, 1]} : vector<1x18x16x4xf32> to vector<1x16x16x4xf32>
    %44 = vector.shape_cast %43 : vector<1x16x16x4xf32> to vector<256x4xf32>
    %c7 = arith.constant 7 : index
    %c0_50 = arith.constant 0 : index
    %c0_51 = arith.constant 0 : index
    %45 = vector.load %arg2[%c7, %c0_50, %c0_51] : memref<9x4x8xf32, #tpu.memory_space<vmem>>, vector<1x4x8xf32>
    %46 = vector.shape_cast %45 : vector<1x4x8xf32> to vector<4x8xf32>
    %cst_52 = arith.constant dense<0.000000e+00> : vector<256x8xf32>
    %47 = tpu.matmul %44, %46, %cst_52 {dimension_numbers = #tpu.dot_dimension_numbers<[1], [0], [0], [1], [0, 0, 1, 1], [], []>} : vector<256x4xf32>, vector<4x8xf32>, vector<256x8xf32> -> vector<256x8xf32>
    %48 = arith.addf %42, %47 : vector<256x8xf32>
    %c0_53 = arith.constant 0 : index
    %c0_54 = arith.constant 0 : index
    %c2 = arith.constant 2 : index
    %c0_55 = arith.constant 0 : index
    %49 = vector.load %arg23[%c0_53, %c0_54, %c2, %c0_55] : memref<1x18x18x4xf32, #tpu.memory_space<vmem>>, vector<1x18x16x4xf32>
    %50 = vector.extract_strided_slice %49 {offsets = [0, 0, 0, 0], sizes = [1, 16, 16, 4], strides = [1, 1, 1, 1]} : vector<1x18x16x4xf32> to vector<1x16x16x4xf32>
    %51 = vector.shape_cast %50 : vector<1x16x16x4xf32> to vector<256x4xf32>
    %c2_56 = arith.constant 2 : index
    %c0_57 = arith.constant 0 : index
    %c0_58 = arith.constant 0 : index
    %52 = vector.load %arg2[%c2_56, %c0_57, %c0_58] : memref<9x4x8xf32, #tpu.memory_space<vmem>>, vector<1x4x8xf32>
    %53 = vector.shape_cast %52 : vector<1x4x8xf32> to vector<4x8xf32>
    %cst_59 = arith.constant dense<0.000000e+00> : vector<256x8xf32>
    %54 = tpu.matmul %51, %53, %cst_59 {dimension_numbers = #tpu.dot_dimension_numbers<[1], [0], [0], [1], [0, 0, 1, 1], [], []>} : vector<256x4xf32>, vector<4x8xf32>, vector<256x8xf32> -> vector<256x8xf32>
    %55 = arith.addf %48, %54 : vector<256x8xf32>
    %56 = vector.extract_strided_slice %49 {offsets = [0, 1, 0, 0], sizes = [1, 16, 16, 4], strides = [1, 1, 1, 1]} : vector<1x18x16x4xf32> to vector<1x16x16x4xf32>
    %57 = vector.shape_cast %56 : vector<1x16x16x4xf32> to vector<256x4xf32>
    %c5 = arith.constant 5 : index
    %c0_60 = arith.constant 0 : index
    %c0_61 = arith.constant 0 : index
    %58 = vector.load %arg2[%c5, %c0_60, %c0_61] : memref<9x4x8xf32, #tpu.memory_space<vmem>>, vector<1x4x8xf32>
    %59 = vector.shape_cast %58 : vector<1x4x8xf32> to vector<4x8xf32>
    %cst_62 = arith.constant dense<0.000000e+00> : vector<256x8xf32>
    %60 = tpu.matmul %57, %59, %cst_62 {dimension_numbers = #tpu.dot_dimension_numbers<[1], [0], [0], [1], [0, 0, 1, 1], [], []>} : vector<256x4xf32>, vector<4x8xf32>, vector<256x8xf32> -> vector<256x8xf32>
    %61 = arith.addf %55, %60 : vector<256x8xf32>
    %62 = vector.extract_strided_slice %49 {offsets = [0, 2, 0, 0], sizes = [1, 16, 16, 4], strides = [1, 1, 1, 1]} : vector<1x18x16x4xf32> to vector<1x16x16x4xf32>
    %63 = vector.shape_cast %62 : vector<1x16x16x4xf32> to vector<256x4xf32>
    %c8 = arith.constant 8 : index
    %c0_63 = arith.constant 0 : index
    %c0_64 = arith.constant 0 : index
    %64 = vector.load %arg2[%c8, %c0_63, %c0_64] : memref<9x4x8xf32, #tpu.memory_space<vmem>>, vector<1x4x8xf32>
    %65 = vector.shape_cast %64 : vector<1x4x8xf32> to vector<4x8xf32>
    %cst_65 = arith.constant dense<0.000000e+00> : vector<256x8xf32>
    %66 = tpu.matmul %63, %65, %cst_65 {dimension_numbers = #tpu.dot_dimension_numbers<[1], [0], [0], [1], [0, 0, 1, 1], [], []>} : vector<256x4xf32>, vector<4x8xf32>, vector<256x8xf32> -> vector<256x8xf32>
    %67 = arith.addf %61, %66 : vector<256x8xf32>
    %c0_66 = arith.constant 0 : index
    %c0_67 = arith.constant 0 : index
    %68 = vector.load %arg3[%c0_66, %c0_67] : memref<1x8xf32, #tpu.memory_space<vmem>>, vector<1x8xf32>
    %69 = vector.broadcast %68 : vector<1x8xf32> to vector<256x8xf32>
    %70 = arith.addf %67, %69 : vector<256x8xf32>
    %cst_68 = arith.constant 0.000000e+00 : f32
    %71 = vector.broadcast %cst_68 : f32 to vector<256x8xf32>
    %72 = arith.maximumf %70, %71 : vector<256x8xf32>
    %73 = vector.shape_cast %72 : vector<256x8xf32> to vector<1x16x16x8xf32>
    %cst_69 = arith.constant 0.000000e+00 : f32
    %74 = vector.broadcast %cst_69 : f32 to vector<1x1x18x8xf32>
    %c0_70 = arith.constant 0 : index
    %c0_71 = arith.constant 0 : index
    %c0_72 = arith.constant 0 : index
    %c0_73 = arith.constant 0 : index
    %75 = vector.load %arg24[%c0_70, %c0_71, %c0_72, %c0_73] : memref<1x18x18x8xf32, #tpu.memory_space<vmem>>, vector<1x1x18x8xf32>
    tpu.vector_store %arg24[%c0_70, %c0_71, %c0_72, %c0_73], %74 {strides = array<i32>} : memref<1x18x18x8xf32, #tpu.memory_space<vmem>>, vector<1x1x18x8xf32>,
    %cst_74 = arith.constant 0.000000e+00 : f32
    %76 = vector.broadcast %cst_74 : f32 to vector<1x1x18x8xf32>
    %c0_75 = arith.constant 0 : index
    %c17_76 = arith.constant 17 : index
    %c0_77 = arith.constant 0 : index
    %c0_78 = arith.constant 0 : index
    %77 = vector.load %arg24[%c0_75, %c17_76, %c0_77, %c0_78] : memref<1x18x18x8xf32, #tpu.memory_space<vmem>>, vector<1x1x18x8xf32>
    tpu.vector_store %arg24[%c0_75, %c17_76, %c0_77, %c0_78], %76 {strides = array<i32>} : memref<1x18x18x8xf32, #tpu.memory_space<vmem>>, vector<1x1x18x8xf32>,
    %cst_79 = arith.constant 0.000000e+00 : f32
    %78 = vector.broadcast %cst_79 : f32 to vector<1x18x1x8xf32>
    %c0_80 = arith.constant 0 : index
    %c0_81 = arith.constant 0 : index
    %c0_82 = arith.constant 0 : index
    %c0_83 = arith.constant 0 : index
    %79 = vector.load %arg24[%c0_80, %c0_81, %c0_82, %c0_83] : memref<1x18x18x8xf32, #tpu.memory_space<vmem>>, vector<1x18x1x8xf32>
    tpu.vector_store %arg24[%c0_80, %c0_81, %c0_82, %c0_83], %78 {strides = array<i32>} : memref<1x18x18x8xf32, #tpu.memory_space<vmem>>, vector<1x18x1x8xf32>,
    %cst_84 = arith.constant 0.000000e+00 : f32
    %80 = vector.broadcast %cst_84 : f32 to vector<1x18x1x8xf32>
    %c0_85 = arith.constant 0 : index
    %c0_86 = arith.constant 0 : index
    %c17_87 = arith.constant 17 : index
    %c0_88 = arith.constant 0 : index
    %81 = vector.load %arg24[%c0_85, %c0_86, %c17_87, %c0_88] : memref<1x18x18x8xf32, #tpu.memory_space<vmem>>, vector<1x18x1x8xf32>
    tpu.vector_store %arg24[%c0_85, %c0_86, %c17_87, %c0_88], %80 {strides = array<i32>} : memref<1x18x18x8xf32, #tpu.memory_space<vmem>>, vector<1x18x1x8xf32>,
    %c0_89 = arith.constant 0 : index
    %c1_90 = arith.constant 1 : index
    %c1_91 = arith.constant 1 : index
    %c0_92 = arith.constant 0 : index
    %82 = vector.load %arg24[%c0_89, %c1_90, %c1_91, %c0_92] : memref<1x18x18x8xf32, #tpu.memory_space<vmem>>, vector<1x16x16x8xf32>
    tpu.vector_store %arg24[%c0_89, %c1_90, %c1_91, %c0_92], %73 {strides = array<i32>} : memref<1x18x18x8xf32, #tpu.memory_space<vmem>>, vector<1x16x16x8xf32>,
    %cst_93 = arith.constant 0.000000e+00 : f32
    %83 = vector.broadcast %cst_93 : f32 to vector<256x8xf32>
    %c0_94 = arith.constant 0 : index
    %c0_95 = arith.constant 0 : index
    %c0_96 = arith.constant 0 : index
    %c0_97 = arith.constant 0 : index
    %84 = vector.load %arg24[%c0_94, %c0_95, %c0_96, %c0_97] : memref<1x18x18x8xf32, #tpu.memory_space<vmem>>, vector<1x18x16x8xf32>
    %85 = vector.extract_strided_slice %84 {offsets = [0, 0, 0, 0], sizes = [1, 16, 16, 8], strides = [1, 1, 1, 1]} : vector<1x18x16x8xf32> to vector<1x16x16x8xf32>
    %86 = vector.shape_cast %85 : vector<1x16x16x8xf32> to vector<256x8xf32>
    %c0_98 = arith.constant 0 : index
    %c0_99 = arith.constant 0 : index
    %c0_100 = arith.constant 0 : index
    %87 = vector.load %arg4[%c0_98, %c0_99, %c0_100] : memref<9x8x8xf32, #tpu.memory_space<vmem>>, vector<1x8x8xf32>
    %88 = vector.shape_cast %87 : vector<1x8x8xf32> to vector<8x8xf32>
    %cst_101 = arith.constant dense<0.000000e+00> : vector<256x8xf32>
    %89 = tpu.matmul %86, %88, %cst_101 {dimension_numbers = #tpu.dot_dimension_numbers<[1], [0], [0], [1], [0, 0, 1, 1], [], []>} : vector<256x8xf32>, vector<8x8xf32>, vector<256x8xf32> -> vector<256x8xf32>
    %90 = arith.addf %83, %89 : vector<256x8xf32>
    %91 = vector.extract_strided_slice %84 {offsets = [0, 1, 0, 0], sizes = [1, 16, 16, 8], strides = [1, 1, 1, 1]} : vector<1x18x16x8xf32> to vector<1x16x16x8xf32>
    %92 = vector.shape_cast %91 : vector<1x16x16x8xf32> to vector<256x8xf32>
    %c3_102 = arith.constant 3 : index
    %c0_103 = arith.constant 0 : index
    %c0_104 = arith.constant 0 : index
    %93 = vector.load %arg4[%c3_102, %c0_103, %c0_104] : memref<9x8x8xf32, #tpu.memory_space<vmem>>, vector<1x8x8xf32>
    %94 = vector.shape_cast %93 : vector<1x8x8xf32> to vector<8x8xf32>
    %cst_105 = arith.constant dense<0.000000e+00> : vector<256x8xf32>
    %95 = tpu.matmul %92, %94, %cst_105 {dimension_numbers = #tpu.dot_dimension_numbers<[1], [0], [0], [1], [0, 0, 1, 1], [], []>} : vector<256x8xf32>, vector<8x8xf32>, vector<256x8xf32> -> vector<256x8xf32>
    %96 = arith.addf %90, %95 : vector<256x8xf32>
    %97 = vector.extract_strided_slice %84 {offsets = [0, 2, 0, 0], sizes = [1, 16, 16, 8], strides = [1, 1, 1, 1]} : vector<1x18x16x8xf32> to vector<1x16x16x8xf32>
    %98 = vector.shape_cast %97 : vector<1x16x16x8xf32> to vector<256x8xf32>
    %c6_106 = arith.constant 6 : index
    %c0_107 = arith.constant 0 : index
    %c0_108 = arith.constant 0 : index
    %99 = vector.load %arg4[%c6_106, %c0_107, %c0_108] : memref<9x8x8xf32, #tpu.memory_space<vmem>>, vector<1x8x8xf32>
    %100 = vector.shape_cast %99 : vector<1x8x8xf32> to vector<8x8xf32>
    %cst_109 = arith.constant dense<0.000000e+00> : vector<256x8xf32>
    %101 = tpu.matmul %98, %100, %cst_109 {dimension_numbers = #tpu.dot_dimension_numbers<[1], [0], [0], [1], [0, 0, 1, 1], [], []>} : vector<256x8xf32>, vector<8x8xf32>, vector<256x8xf32> -> vector<256x8xf32>
    %102 = arith.addf %96, %101 : vector<256x8xf32>
    %c0_110 = arith.constant 0 : index
    %c0_111 = arith.constant 0 : index
    %c1_112 = arith.constant 1 : index
    %c0_113 = arith.constant 0 : index
    %103 = vector.load %arg24[%c0_110, %c0_111, %c1_112, %c0_113] : memref<1x18x18x8xf32, #tpu.memory_space<vmem>>, vector<1x18x16x8xf32>
    %104 = vector.extract_strided_slice %103 {offsets = [0, 0, 0, 0], sizes = [1, 16, 16, 8], strides = [1, 1, 1, 1]} : vector<1x18x16x8xf32> to vector<1x16x16x8xf32>
    %105 = vector.shape_cast %104 : vector<1x16x16x8xf32> to vector<256x8xf32>
    %c1_114 = arith.constant 1 : index
    %c0_115 = arith.constant 0 : index
    %c0_116 = arith.constant 0 : index
    %106 = vector.load %arg4[%c1_114, %c0_115, %c0_116] : memref<9x8x8xf32, #tpu.memory_space<vmem>>, vector<1x8x8xf32>
    %107 = vector.shape_cast %106 : vector<1x8x8xf32> to vector<8x8xf32>
    %cst_117 = arith.constant dense<0.000000e+00> : vector<256x8xf32>
    %108 = tpu.matmul %105, %107, %cst_117 {dimension_numbers = #tpu.dot_dimension_numbers<[1], [0], [0], [1], [0, 0, 1, 1], [], []>} : vector<256x8xf32>, vector<8x8xf32>, vector<256x8xf32> -> vector<256x8xf32>
    %109 = arith.addf %102, %108 : vector<256x8xf32>
    %110 = vector.extract_strided_slice %103 {offsets = [0, 1, 0, 0], sizes = [1, 16, 16, 8], strides = [1, 1, 1, 1]} : vector<1x18x16x8xf32> to vector<1x16x16x8xf32>
    %111 = vector.shape_cast %110 : vector<1x16x16x8xf32> to vector<256x8xf32>
    %c4_118 = arith.constant 4 : index
    %c0_119 = arith.constant 0 : index
    %c0_120 = arith.constant 0 : index
    %112 = vector.load %arg4[%c4_118, %c0_119, %c0_120] : memref<9x8x8xf32, #tpu.memory_space<vmem>>, vector<1x8x8xf32>
    %113 = vector.shape_cast %112 : vector<1x8x8xf32> to vector<8x8xf32>
    %cst_121 = arith.constant dense<0.000000e+00> : vector<256x8xf32>
    %114 = tpu.matmul %111, %113, %cst_121 {dimension_numbers = #tpu.dot_dimension_numbers<[1], [0], [0], [1], [0, 0, 1, 1], [], []>} : vector<256x8xf32>, vector<8x8xf32>, vector<256x8xf32> -> vector<256x8xf32>
    %115 = arith.addf %109, %114 : vector<256x8xf32>
    %116 = vector.extract_strided_slice %103 {offsets = [0, 2, 0, 0], sizes = [1, 16, 16, 8], strides = [1, 1, 1, 1]} : vector<1x18x16x8xf32> to vector<1x16x16x8xf32>
    %117 = vector.shape_cast %116 : vector<1x16x16x8xf32> to vector<256x8xf32>
    %c7_122 = arith.constant 7 : index
    %c0_123 = arith.constant 0 : index
    %c0_124 = arith.constant 0 : index
    %118 = vector.load %arg4[%c7_122, %c0_123, %c0_124] : memref<9x8x8xf32, #tpu.memory_space<vmem>>, vector<1x8x8xf32>
    %119 = vector.shape_cast %118 : vector<1x8x8xf32> to vector<8x8xf32>
    %cst_125 = arith.constant dense<0.000000e+00> : vector<256x8xf32>
    %120 = tpu.matmul %117, %119, %cst_125 {dimension_numbers = #tpu.dot_dimension_numbers<[1], [0], [0], [1], [0, 0, 1, 1], [], []>} : vector<256x8xf32>, vector<8x8xf32>, vector<256x8xf32> -> vector<256x8xf32>
    %121 = arith.addf %115, %120 : vector<256x8xf32>
    %c0_126 = arith.constant 0 : index
    %c0_127 = arith.constant 0 : index
    %c2_128 = arith.constant 2 : index
    %c0_129 = arith.constant 0 : index
    %122 = vector.load %arg24[%c0_126, %c0_127, %c2_128, %c0_129] : memref<1x18x18x8xf32, #tpu.memory_space<vmem>>, vector<1x18x16x8xf32>
    %123 = vector.extract_strided_slice %122 {offsets = [0, 0, 0, 0], sizes = [1, 16, 16, 8], strides = [1, 1, 1, 1]} : vector<1x18x16x8xf32> to vector<1x16x16x8xf32>
    %124 = vector.shape_cast %123 : vector<1x16x16x8xf32> to vector<256x8xf32>
    %c2_130 = arith.constant 2 : index
    %c0_131 = arith.constant 0 : index
    %c0_132 = arith.constant 0 : index
    %125 = vector.load %arg4[%c2_130, %c0_131, %c0_132] : memref<9x8x8xf32, #tpu.memory_space<vmem>>, vector<1x8x8xf32>
    %126 = vector.shape_cast %125 : vector<1x8x8xf32> to vector<8x8xf32>
    %cst_133 = arith.constant dense<0.000000e+00> : vector<256x8xf32>
    %127 = tpu.matmul %124, %126, %cst_133 {dimension_numbers = #tpu.dot_dimension_numbers<[1], [0], [0], [1], [0, 0, 1, 1], [], []>} : vector<256x8xf32>, vector<8x8xf32>, vector<256x8xf32> -> vector<256x8xf32>
    %128 = arith.addf %121, %127 : vector<256x8xf32>
    %129 = vector.extract_strided_slice %122 {offsets = [0, 1, 0, 0], sizes = [1, 16, 16, 8], strides = [1, 1, 1, 1]} : vector<1x18x16x8xf32> to vector<1x16x16x8xf32>
    %130 = vector.shape_cast %129 : vector<1x16x16x8xf32> to vector<256x8xf32>
    %c5_134 = arith.constant 5 : index
    %c0_135 = arith.constant 0 : index
    %c0_136 = arith.constant 0 : index
    %131 = vector.load %arg4[%c5_134, %c0_135, %c0_136] : memref<9x8x8xf32, #tpu.memory_space<vmem>>, vector<1x8x8xf32>
    %132 = vector.shape_cast %131 : vector<1x8x8xf32> to vector<8x8xf32>
    %cst_137 = arith.constant dense<0.000000e+00> : vector<256x8xf32>
    %133 = tpu.matmul %130, %132, %cst_137 {dimension_numbers = #tpu.dot_dimension_numbers<[1], [0], [0], [1], [0, 0, 1, 1], [], []>} : vector<256x8xf32>, vector<8x8xf32>, vector<256x8xf32> -> vector<256x8xf32>
    %134 = arith.addf %128, %133 : vector<256x8xf32>
    %135 = vector.extract_strided_slice %122 {offsets = [0, 2, 0, 0], sizes = [1, 16, 16, 8], strides = [1, 1, 1, 1]} : vector<1x18x16x8xf32> to vector<1x16x16x8xf32>
    %136 = vector.shape_cast %135 : vector<1x16x16x8xf32> to vector<256x8xf32>
    %c8_138 = arith.constant 8 : index
    %c0_139 = arith.constant 0 : index
    %c0_140 = arith.constant 0 : index
    %137 = vector.load %arg4[%c8_138, %c0_139, %c0_140] : memref<9x8x8xf32, #tpu.memory_space<vmem>>, vector<1x8x8xf32>
    %138 = vector.shape_cast %137 : vector<1x8x8xf32> to vector<8x8xf32>
    %cst_141 = arith.constant dense<0.000000e+00> : vector<256x8xf32>
    %139 = tpu.matmul %136, %138, %cst_141 {dimension_numbers = #tpu.dot_dimension_numbers<[1], [0], [0], [1], [0, 0, 1, 1], [], []>} : vector<256x8xf32>, vector<8x8xf32>, vector<256x8xf32> -> vector<256x8xf32>
    %140 = arith.addf %134, %139 : vector<256x8xf32>
    %c0_142 = arith.constant 0 : index
    %c0_143 = arith.constant 0 : index
    %141 = vector.load %arg5[%c0_142, %c0_143] : memref<1x8xf32, #tpu.memory_space<vmem>>, vector<1x8xf32>
    %142 = vector.broadcast %141 : vector<1x8xf32> to vector<256x8xf32>
    %143 = arith.addf %140, %142 : vector<256x8xf32>
    %cst_144 = arith.constant 0.000000e+00 : f32
    %144 = vector.broadcast %cst_144 : f32 to vector<256x8xf32>
    %145 = arith.maximumf %143, %144 : vector<256x8xf32>
    %146 = vector.shape_cast %145 : vector<256x8xf32> to vector<1x16x16x8xf32>
    %147 = vector.shape_cast %146 : vector<1x16x16x8xf32> to vector<8x2x16x8xf32>
    %cst_145 = arith.constant dense<0xFF800000> : vector<8x16x8xf32>
    %148 = vector.multi_reduction <maximumf>, %147, %cst_145 [1] : vector<8x2x16x8xf32> to vector<8x16x8xf32>
    %c0_146 = arith.constant 0 : index
    %c0_147 = arith.constant 0 : index
    %c0_148 = arith.constant 0 : index
    %149 = vector.load %arg31[%c0_146, %c0_147, %c0_148] : memref<8x16x8xf32, #tpu.memory_space<vmem>>, vector<8x16x8xf32>
    tpu.vector_store %arg31[%c0_146, %c0_147, %c0_148], %148 {strides = array<i32>} : memref<8x16x8xf32, #tpu.memory_space<vmem>>, vector<8x16x8xf32>,
    %c0_149 = arith.constant 0 : index
    %c0_150 = arith.constant 0 : index
    %c0_151 = arith.constant 0 : index
    %150 = tpu.strided_load %arg31[%c0_149, %c0_150, %c0_151] {strides = array<i32: 1, 2, 1>} : memref<8x16x8xf32, #tpu.memory_space<vmem>>, vector<8x8x8xf32>
    %c0_152 = arith.constant 0 : index
    %c1_153 = arith.constant 1 : index
    %c0_154 = arith.constant 0 : index
    %151 = tpu.strided_load %arg31[%c0_152, %c1_153, %c0_154] {strides = array<i32: 1, 2, 1>} : memref<8x16x8xf32, #tpu.memory_space<vmem>>, vector<8x8x8xf32>
    %152 = arith.maximumf %150, %151 : vector<8x8x8xf32>
    %153 = vector.shape_cast %152 : vector<8x8x8xf32> to vector<1x8x8x8xf32>
    %cst_155 = arith.constant 0.000000e+00 : f32
    %154 = vector.broadcast %cst_155 : f32 to vector<1x1x10x8xf32>
    %c0_156 = arith.constant 0 : index
    %c0_157 = arith.constant 0 : index
    %c0_158 = arith.constant 0 : index
    %c0_159 = arith.constant 0 : index
    %155 = vector.load %arg25[%c0_156, %c0_157, %c0_158, %c0_159] : memref<1x10x10x8xf32, #tpu.memory_space<vmem>>, vector<1x1x10x8xf32>
    tpu.vector_store %arg25[%c0_156, %c0_157, %c0_158, %c0_159], %154 {strides = array<i32>} : memref<1x10x10x8xf32, #tpu.memory_space<vmem>>, vector<1x1x10x8xf32>,
    %cst_160 = arith.constant 0.000000e+00 : f32
    %156 = vector.broadcast %cst_160 : f32 to vector<1x1x10x8xf32>
    %c0_161 = arith.constant 0 : index
    %c9 = arith.constant 9 : index
    %c0_162 = arith.constant 0 : index
    %c0_163 = arith.constant 0 : index
    %157 = vector.load %arg25[%c0_161, %c9, %c0_162, %c0_163] : memref<1x10x10x8xf32, #tpu.memory_space<vmem>>, vector<1x1x10x8xf32>
    tpu.vector_store %arg25[%c0_161, %c9, %c0_162, %c0_163], %156 {strides = array<i32>} : memref<1x10x10x8xf32, #tpu.memory_space<vmem>>, vector<1x1x10x8xf32>,
    %cst_164 = arith.constant 0.000000e+00 : f32
    %158 = vector.broadcast %cst_164 : f32 to vector<1x10x1x8xf32>
    %c0_165 = arith.constant 0 : index
    %c0_166 = arith.constant 0 : index
    %c0_167 = arith.constant 0 : index
    %c0_168 = arith.constant 0 : index
    %159 = vector.load %arg25[%c0_165, %c0_166, %c0_167, %c0_168] : memref<1x10x10x8xf32, #tpu.memory_space<vmem>>, vector<1x10x1x8xf32>
    tpu.vector_store %arg25[%c0_165, %c0_166, %c0_167, %c0_168], %158 {strides = array<i32>} : memref<1x10x10x8xf32, #tpu.memory_space<vmem>>, vector<1x10x1x8xf32>,
    %cst_169 = arith.constant 0.000000e+00 : f32
    %160 = vector.broadcast %cst_169 : f32 to vector<1x10x1x8xf32>
    %c0_170 = arith.constant 0 : index
    %c0_171 = arith.constant 0 : index
    %c9_172 = arith.constant 9 : index
    %c0_173 = arith.constant 0 : index
    %161 = vector.load %arg25[%c0_170, %c0_171, %c9_172, %c0_173] : memref<1x10x10x8xf32, #tpu.memory_space<vmem>>, vector<1x10x1x8xf32>
    tpu.vector_store %arg25[%c0_170, %c0_171, %c9_172, %c0_173], %160 {strides = array<i32>} : memref<1x10x10x8xf32, #tpu.memory_space<vmem>>, vector<1x10x1x8xf32>,
    %c0_174 = arith.constant 0 : index
    %c1_175 = arith.constant 1 : index
    %c1_176 = arith.constant 1 : index
    %c0_177 = arith.constant 0 : index
    %162 = vector.load %arg25[%c0_174, %c1_175, %c1_176, %c0_177] : memref<1x10x10x8xf32, #tpu.memory_space<vmem>>, vector<1x8x8x8xf32>
    tpu.vector_store %arg25[%c0_174, %c1_175, %c1_176, %c0_177], %153 {strides = array<i32>} : memref<1x10x10x8xf32, #tpu.memory_space<vmem>>, vector<1x8x8x8xf32>,
    %cst_178 = arith.constant 0.000000e+00 : f32
    %163 = vector.broadcast %cst_178 : f32 to vector<64x16xf32>
    %c0_179 = arith.constant 0 : index
    %c0_180 = arith.constant 0 : index
    %c0_181 = arith.constant 0 : index
    %c0_182 = arith.constant 0 : index
    %164 = vector.load %arg25[%c0_179, %c0_180, %c0_181, %c0_182] : memref<1x10x10x8xf32, #tpu.memory_space<vmem>>, vector<1x10x8x8xf32>
    %165 = vector.extract_strided_slice %164 {offsets = [0, 0, 0, 0], sizes = [1, 8, 8, 8], strides = [1, 1, 1, 1]} : vector<1x10x8x8xf32> to vector<1x8x8x8xf32>
    %166 = vector.shape_cast %165 : vector<1x8x8x8xf32> to vector<64x8xf32>
    %c0_183 = arith.constant 0 : index
    %c0_184 = arith.constant 0 : index
    %c0_185 = arith.constant 0 : index
    %167 = vector.load %arg6[%c0_183, %c0_184, %c0_185] : memref<9x8x16xf32, #tpu.memory_space<vmem>>, vector<1x8x16xf32>
    %168 = vector.shape_cast %167 : vector<1x8x16xf32> to vector<8x16xf32>
    %cst_186 = arith.constant dense<0.000000e+00> : vector<64x16xf32>
    %169 = tpu.matmul %166, %168, %cst_186 {dimension_numbers = #tpu.dot_dimension_numbers<[1], [0], [0], [1], [0, 0, 1, 1], [], []>} : vector<64x8xf32>, vector<8x16xf32>, vector<64x16xf32> -> vector<64x16xf32>
    %170 = arith.addf %163, %169 : vector<64x16xf32>
    %171 = vector.extract_strided_slice %164 {offsets = [0, 1, 0, 0], sizes = [1, 8, 8, 8], strides = [1, 1, 1, 1]} : vector<1x10x8x8xf32> to vector<1x8x8x8xf32>
    %172 = vector.shape_cast %171 : vector<1x8x8x8xf32> to vector<64x8xf32>
    %c3_187 = arith.constant 3 : index
    %c0_188 = arith.constant 0 : index
    %c0_189 = arith.constant 0 : index
    %173 = vector.load %arg6[%c3_187, %c0_188, %c0_189] : memref<9x8x16xf32, #tpu.memory_space<vmem>>, vector<1x8x16xf32>
    %174 = vector.shape_cast %173 : vector<1x8x16xf32> to vector<8x16xf32>
    %cst_190 = arith.constant dense<0.000000e+00> : vector<64x16xf32>
    %175 = tpu.matmul %172, %174, %cst_190 {dimension_numbers = #tpu.dot_dimension_numbers<[1], [0], [0], [1], [0, 0, 1, 1], [], []>} : vector<64x8xf32>, vector<8x16xf32>, vector<64x16xf32> -> vector<64x16xf32>
    %176 = arith.addf %170, %175 : vector<64x16xf32>
    %177 = vector.extract_strided_slice %164 {offsets = [0, 2, 0, 0], sizes = [1, 8, 8, 8], strides = [1, 1, 1, 1]} : vector<1x10x8x8xf32> to vector<1x8x8x8xf32>
    %178 = vector.shape_cast %177 : vector<1x8x8x8xf32> to vector<64x8xf32>
    %c6_191 = arith.constant 6 : index
    %c0_192 = arith.constant 0 : index
    %c0_193 = arith.constant 0 : index
    %179 = vector.load %arg6[%c6_191, %c0_192, %c0_193] : memref<9x8x16xf32, #tpu.memory_space<vmem>>, vector<1x8x16xf32>
    %180 = vector.shape_cast %179 : vector<1x8x16xf32> to vector<8x16xf32>
    %cst_194 = arith.constant dense<0.000000e+00> : vector<64x16xf32>
    %181 = tpu.matmul %178, %180, %cst_194 {dimension_numbers = #tpu.dot_dimension_numbers<[1], [0], [0], [1], [0, 0, 1, 1], [], []>} : vector<64x8xf32>, vector<8x16xf32>, vector<64x16xf32> -> vector<64x16xf32>
    %182 = arith.addf %176, %181 : vector<64x16xf32>
    %c0_195 = arith.constant 0 : index
    %c0_196 = arith.constant 0 : index
    %c1_197 = arith.constant 1 : index
    %c0_198 = arith.constant 0 : index
    %183 = vector.load %arg25[%c0_195, %c0_196, %c1_197, %c0_198] : memref<1x10x10x8xf32, #tpu.memory_space<vmem>>, vector<1x10x8x8xf32>
    %184 = vector.extract_strided_slice %183 {offsets = [0, 0, 0, 0], sizes = [1, 8, 8, 8], strides = [1, 1, 1, 1]} : vector<1x10x8x8xf32> to vector<1x8x8x8xf32>
    %185 = vector.shape_cast %184 : vector<1x8x8x8xf32> to vector<64x8xf32>
    %c1_199 = arith.constant 1 : index
    %c0_200 = arith.constant 0 : index
    %c0_201 = arith.constant 0 : index
    %186 = vector.load %arg6[%c1_199, %c0_200, %c0_201] : memref<9x8x16xf32, #tpu.memory_space<vmem>>, vector<1x8x16xf32>
    %187 = vector.shape_cast %186 : vector<1x8x16xf32> to vector<8x16xf32>
    %cst_202 = arith.constant dense<0.000000e+00> : vector<64x16xf32>
    %188 = tpu.matmul %185, %187, %cst_202 {dimension_numbers = #tpu.dot_dimension_numbers<[1], [0], [0], [1], [0, 0, 1, 1], [], []>} : vector<64x8xf32>, vector<8x16xf32>, vector<64x16xf32> -> vector<64x16xf32>
    %189 = arith.addf %182, %188 : vector<64x16xf32>
    %190 = vector.extract_strided_slice %183 {offsets = [0, 1, 0, 0], sizes = [1, 8, 8, 8], strides = [1, 1, 1, 1]} : vector<1x10x8x8xf32> to vector<1x8x8x8xf32>
    %191 = vector.shape_cast %190 : vector<1x8x8x8xf32> to vector<64x8xf32>
    %c4_203 = arith.constant 4 : index
    %c0_204 = arith.constant 0 : index
    %c0_205 = arith.constant 0 : index
    %192 = vector.load %arg6[%c4_203, %c0_204, %c0_205] : memref<9x8x16xf32, #tpu.memory_space<vmem>>, vector<1x8x16xf32>
    %193 = vector.shape_cast %192 : vector<1x8x16xf32> to vector<8x16xf32>
    %cst_206 = arith.constant dense<0.000000e+00> : vector<64x16xf32>
    %194 = tpu.matmul %191, %193, %cst_206 {dimension_numbers = #tpu.dot_dimension_numbers<[1], [0], [0], [1], [0, 0, 1, 1], [], []>} : vector<64x8xf32>, vector<8x16xf32>, vector<64x16xf32> -> vector<64x16xf32>
    %195 = arith.addf %189, %194 : vector<64x16xf32>
    %196 = vector.extract_strided_slice %183 {offsets = [0, 2, 0, 0], sizes = [1, 8, 8, 8], strides = [1, 1, 1, 1]} : vector<1x10x8x8xf32> to vector<1x8x8x8xf32>
    %197 = vector.shape_cast %196 : vector<1x8x8x8xf32> to vector<64x8xf32>
    %c7_207 = arith.constant 7 : index
    %c0_208 = arith.constant 0 : index
    %c0_209 = arith.constant 0 : index
    %198 = vector.load %arg6[%c7_207, %c0_208, %c0_209] : memref<9x8x16xf32, #tpu.memory_space<vmem>>, vector<1x8x16xf32>
    %199 = vector.shape_cast %198 : vector<1x8x16xf32> to vector<8x16xf32>
    %cst_210 = arith.constant dense<0.000000e+00> : vector<64x16xf32>
    %200 = tpu.matmul %197, %199, %cst_210 {dimension_numbers = #tpu.dot_dimension_numbers<[1], [0], [0], [1], [0, 0, 1, 1], [], []>} : vector<64x8xf32>, vector<8x16xf32>, vector<64x16xf32> -> vector<64x16xf32>
    %201 = arith.addf %195, %200 : vector<64x16xf32>
    %c0_211 = arith.constant 0 : index
    %c0_212 = arith.constant 0 : index
    %c2_213 = arith.constant 2 : index
    %c0_214 = arith.constant 0 : index
    %202 = vector.load %arg25[%c0_211, %c0_212, %c2_213, %c0_214] : memref<1x10x10x8xf32, #tpu.memory_space<vmem>>, vector<1x10x8x8xf32>
    %203 = vector.extract_strided_slice %202 {offsets = [0, 0, 0, 0], sizes = [1, 8, 8, 8], strides = [1, 1, 1, 1]} : vector<1x10x8x8xf32> to vector<1x8x8x8xf32>
    %204 = vector.shape_cast %203 : vector<1x8x8x8xf32> to vector<64x8xf32>
    %c2_215 = arith.constant 2 : index
    %c0_216 = arith.constant 0 : index
    %c0_217 = arith.constant 0 : index
    %205 = vector.load %arg6[%c2_215, %c0_216, %c0_217] : memref<9x8x16xf32, #tpu.memory_space<vmem>>, vector<1x8x16xf32>
    %206 = vector.shape_cast %205 : vector<1x8x16xf32> to vector<8x16xf32>
    %cst_218 = arith.constant dense<0.000000e+00> : vector<64x16xf32>
    %207 = tpu.matmul %204, %206, %cst_218 {dimension_numbers = #tpu.dot_dimension_numbers<[1], [0], [0], [1], [0, 0, 1, 1], [], []>} : vector<64x8xf32>, vector<8x16xf32>, vector<64x16xf32> -> vector<64x16xf32>
    %208 = arith.addf %201, %207 : vector<64x16xf32>
    %209 = vector.extract_strided_slice %202 {offsets = [0, 1, 0, 0], sizes = [1, 8, 8, 8], strides = [1, 1, 1, 1]} : vector<1x10x8x8xf32> to vector<1x8x8x8xf32>
    %210 = vector.shape_cast %209 : vector<1x8x8x8xf32> to vector<64x8xf32>
    %c5_219 = arith.constant 5 : index
    %c0_220 = arith.constant 0 : index
    %c0_221 = arith.constant 0 : index
    %211 = vector.load %arg6[%c5_219, %c0_220, %c0_221] : memref<9x8x16xf32, #tpu.memory_space<vmem>>, vector<1x8x16xf32>
    %212 = vector.shape_cast %211 : vector<1x8x16xf32> to vector<8x16xf32>
    %cst_222 = arith.constant dense<0.000000e+00> : vector<64x16xf32>
    %213 = tpu.matmul %210, %212, %cst_222 {dimension_numbers = #tpu.dot_dimension_numbers<[1], [0], [0], [1], [0, 0, 1, 1], [], []>} : vector<64x8xf32>, vector<8x16xf32>, vector<64x16xf32> -> vector<64x16xf32>
    %214 = arith.addf %208, %213 : vector<64x16xf32>
    %215 = vector.extract_strided_slice %202 {offsets = [0, 2, 0, 0], sizes = [1, 8, 8, 8], strides = [1, 1, 1, 1]} : vector<1x10x8x8xf32> to vector<1x8x8x8xf32>
    %216 = vector.shape_cast %215 : vector<1x8x8x8xf32> to vector<64x8xf32>
    %c8_223 = arith.constant 8 : index
    %c0_224 = arith.constant 0 : index
    %c0_225 = arith.constant 0 : index
    %217 = vector.load %arg6[%c8_223, %c0_224, %c0_225] : memref<9x8x16xf32, #tpu.memory_space<vmem>>, vector<1x8x16xf32>
    %218 = vector.shape_cast %217 : vector<1x8x16xf32> to vector<8x16xf32>
    %cst_226 = arith.constant dense<0.000000e+00> : vector<64x16xf32>
    %219 = tpu.matmul %216, %218, %cst_226 {dimension_numbers = #tpu.dot_dimension_numbers<[1], [0], [0], [1], [0, 0, 1, 1], [], []>} : vector<64x8xf32>, vector<8x16xf32>, vector<64x16xf32> -> vector<64x16xf32>
    %220 = arith.addf %214, %219 : vector<64x16xf32>
    %c0_227 = arith.constant 0 : index
    %c0_228 = arith.constant 0 : index
    %221 = vector.load %arg7[%c0_227, %c0_228] : memref<1x16xf32, #tpu.memory_space<vmem>>, vector<1x16xf32>
    %222 = vector.broadcast %221 : vector<1x16xf32> to vector<64x16xf32>
    %223 = arith.addf %220, %222 : vector<64x16xf32>
    %cst_229 = arith.constant 0.000000e+00 : f32
    %224 = vector.broadcast %cst_229 : f32 to vector<64x16xf32>
    %225 = arith.maximumf %223, %224 : vector<64x16xf32>
    %226 = vector.shape_cast %225 : vector<64x16xf32> to vector<1x8x8x16xf32>
    %cst_230 = arith.constant 0.000000e+00 : f32
    %227 = vector.broadcast %cst_230 : f32 to vector<1x1x10x16xf32>
    %c0_231 = arith.constant 0 : index
    %c0_232 = arith.constant 0 : index
    %c0_233 = arith.constant 0 : index
    %c0_234 = arith.constant 0 : index
    %228 = vector.load %arg26[%c0_231, %c0_232, %c0_233, %c0_234] : memref<1x10x10x16xf32, #tpu.memory_space<vmem>>, vector<1x1x10x16xf32>
    tpu.vector_store %arg26[%c0_231, %c0_232, %c0_233, %c0_234], %227 {strides = array<i32>} : memref<1x10x10x16xf32, #tpu.memory_space<vmem>>, vector<1x1x10x16xf32>,
    %cst_235 = arith.constant 0.000000e+00 : f32
    %229 = vector.broadcast %cst_235 : f32 to vector<1x1x10x16xf32>
    %c0_236 = arith.constant 0 : index
    %c9_237 = arith.constant 9 : index
    %c0_238 = arith.constant 0 : index
    %c0_239 = arith.constant 0 : index
    %230 = vector.load %arg26[%c0_236, %c9_237, %c0_238, %c0_239] : memref<1x10x10x16xf32, #tpu.memory_space<vmem>>, vector<1x1x10x16xf32>
    tpu.vector_store %arg26[%c0_236, %c9_237, %c0_238, %c0_239], %229 {strides = array<i32>} : memref<1x10x10x16xf32, #tpu.memory_space<vmem>>, vector<1x1x10x16xf32>,
    %cst_240 = arith.constant 0.000000e+00 : f32
    %231 = vector.broadcast %cst_240 : f32 to vector<1x10x1x16xf32>
    %c0_241 = arith.constant 0 : index
    %c0_242 = arith.constant 0 : index
    %c0_243 = arith.constant 0 : index
    %c0_244 = arith.constant 0 : index
    %232 = vector.load %arg26[%c0_241, %c0_242, %c0_243, %c0_244] : memref<1x10x10x16xf32, #tpu.memory_space<vmem>>, vector<1x10x1x16xf32>
    tpu.vector_store %arg26[%c0_241, %c0_242, %c0_243, %c0_244], %231 {strides = array<i32>} : memref<1x10x10x16xf32, #tpu.memory_space<vmem>>, vector<1x10x1x16xf32>,
    %cst_245 = arith.constant 0.000000e+00 : f32
    %233 = vector.broadcast %cst_245 : f32 to vector<1x10x1x16xf32>
    %c0_246 = arith.constant 0 : index
    %c0_247 = arith.constant 0 : index
    %c9_248 = arith.constant 9 : index
    %c0_249 = arith.constant 0 : index
    %234 = vector.load %arg26[%c0_246, %c0_247, %c9_248, %c0_249] : memref<1x10x10x16xf32, #tpu.memory_space<vmem>>, vector<1x10x1x16xf32>
    tpu.vector_store %arg26[%c0_246, %c0_247, %c9_248, %c0_249], %233 {strides = array<i32>} : memref<1x10x10x16xf32, #tpu.memory_space<vmem>>, vector<1x10x1x16xf32>,
    %c0_250 = arith.constant 0 : index
    %c1_251 = arith.constant 1 : index
    %c1_252 = arith.constant 1 : index
    %c0_253 = arith.constant 0 : index
    %235 = vector.load %arg26[%c0_250, %c1_251, %c1_252, %c0_253] : memref<1x10x10x16xf32, #tpu.memory_space<vmem>>, vector<1x8x8x16xf32>
    tpu.vector_store %arg26[%c0_250, %c1_251, %c1_252, %c0_253], %226 {strides = array<i32>} : memref<1x10x10x16xf32, #tpu.memory_space<vmem>>, vector<1x8x8x16xf32>,
    %cst_254 = arith.constant 0.000000e+00 : f32
    %236 = vector.broadcast %cst_254 : f32 to vector<64x16xf32>
    %c0_255 = arith.constant 0 : index
    %c0_256 = arith.constant 0 : index
    %c0_257 = arith.constant 0 : index
    %c0_258 = arith.constant 0 : index
    %237 = vector.load %arg26[%c0_255, %c0_256, %c0_257, %c0_258] : memref<1x10x10x16xf32, #tpu.memory_space<vmem>>, vector<1x10x8x16xf32>
    %238 = vector.extract_strided_slice %237 {offsets = [0, 0, 0, 0], sizes = [1, 8, 8, 16], strides = [1, 1, 1, 1]} : vector<1x10x8x16xf32> to vector<1x8x8x16xf32>
    %239 = vector.shape_cast %238 : vector<1x8x8x16xf32> to vector<64x16xf32>
    %c0_259 = arith.constant 0 : index
    %c0_260 = arith.constant 0 : index
    %c0_261 = arith.constant 0 : index
    %240 = vector.load %arg8[%c0_259, %c0_260, %c0_261] : memref<9x16x16xf32, #tpu.memory_space<vmem>>, vector<1x16x16xf32>
    %241 = vector.shape_cast %240 : vector<1x16x16xf32> to vector<16x16xf32>
    %cst_262 = arith.constant dense<0.000000e+00> : vector<64x16xf32>
    %242 = tpu.matmul %239, %241, %cst_262 {dimension_numbers = #tpu.dot_dimension_numbers<[1], [0], [0], [1], [0, 0, 1, 1], [], []>} : vector<64x16xf32>, vector<16x16xf32>, vector<64x16xf32> -> vector<64x16xf32>
    %243 = arith.addf %236, %242 : vector<64x16xf32>
    %244 = vector.extract_strided_slice %237 {offsets = [0, 1, 0, 0], sizes = [1, 8, 8, 16], strides = [1, 1, 1, 1]} : vector<1x10x8x16xf32> to vector<1x8x8x16xf32>
    %245 = vector.shape_cast %244 : vector<1x8x8x16xf32> to vector<64x16xf32>
    %c3_263 = arith.constant 3 : index
    %c0_264 = arith.constant 0 : index
    %c0_265 = arith.constant 0 : index
    %246 = vector.load %arg8[%c3_263, %c0_264, %c0_265] : memref<9x16x16xf32, #tpu.memory_space<vmem>>, vector<1x16x16xf32>
    %247 = vector.shape_cast %246 : vector<1x16x16xf32> to vector<16x16xf32>
    %cst_266 = arith.constant dense<0.000000e+00> : vector<64x16xf32>
    %248 = tpu.matmul %245, %247, %cst_266 {dimension_numbers = #tpu.dot_dimension_numbers<[1], [0], [0], [1], [0, 0, 1, 1], [], []>} : vector<64x16xf32>, vector<16x16xf32>, vector<64x16xf32> -> vector<64x16xf32>
    %249 = arith.addf %243, %248 : vector<64x16xf32>
    %250 = vector.extract_strided_slice %237 {offsets = [0, 2, 0, 0], sizes = [1, 8, 8, 16], strides = [1, 1, 1, 1]} : vector<1x10x8x16xf32> to vector<1x8x8x16xf32>
    %251 = vector.shape_cast %250 : vector<1x8x8x16xf32> to vector<64x16xf32>
    %c6_267 = arith.constant 6 : index
    %c0_268 = arith.constant 0 : index
    %c0_269 = arith.constant 0 : index
    %252 = vector.load %arg8[%c6_267, %c0_268, %c0_269] : memref<9x16x16xf32, #tpu.memory_space<vmem>>, vector<1x16x16xf32>
    %253 = vector.shape_cast %252 : vector<1x16x16xf32> to vector<16x16xf32>
    %cst_270 = arith.constant dense<0.000000e+00> : vector<64x16xf32>
    %254 = tpu.matmul %251, %253, %cst_270 {dimension_numbers = #tpu.dot_dimension_numbers<[1], [0], [0], [1], [0, 0, 1, 1], [], []>} : vector<64x16xf32>, vector<16x16xf32>, vector<64x16xf32> -> vector<64x16xf32>
    %255 = arith.addf %249, %254 : vector<64x16xf32>
    %c0_271 = arith.constant 0 : index
    %c0_272 = arith.constant 0 : index
    %c1_273 = arith.constant 1 : index
    %c0_274 = arith.constant 0 : index
    %256 = vector.load %arg26[%c0_271, %c0_272, %c1_273, %c0_274] : memref<1x10x10x16xf32, #tpu.memory_space<vmem>>, vector<1x10x8x16xf32>
    %257 = vector.extract_strided_slice %256 {offsets = [0, 0, 0, 0], sizes = [1, 8, 8, 16], strides = [1, 1, 1, 1]} : vector<1x10x8x16xf32> to vector<1x8x8x16xf32>
    %258 = vector.shape_cast %257 : vector<1x8x8x16xf32> to vector<64x16xf32>
    %c1_275 = arith.constant 1 : index
    %c0_276 = arith.constant 0 : index
    %c0_277 = arith.constant 0 : index
    %259 = vector.load %arg8[%c1_275, %c0_276, %c0_277] : memref<9x16x16xf32, #tpu.memory_space<vmem>>, vector<1x16x16xf32>
    %260 = vector.shape_cast %259 : vector<1x16x16xf32> to vector<16x16xf32>
    %cst_278 = arith.constant dense<0.000000e+00> : vector<64x16xf32>
    %261 = tpu.matmul %258, %260, %cst_278 {dimension_numbers = #tpu.dot_dimension_numbers<[1], [0], [0], [1], [0, 0, 1, 1], [], []>} : vector<64x16xf32>, vector<16x16xf32>, vector<64x16xf32> -> vector<64x16xf32>
    %262 = arith.addf %255, %261 : vector<64x16xf32>
    %263 = vector.extract_strided_slice %256 {offsets = [0, 1, 0, 0], sizes = [1, 8, 8, 16], strides = [1, 1, 1, 1]} : vector<1x10x8x16xf32> to vector<1x8x8x16xf32>
    %264 = vector.shape_cast %263 : vector<1x8x8x16xf32> to vector<64x16xf32>
    %c4_279 = arith.constant 4 : index
    %c0_280 = arith.constant 0 : index
    %c0_281 = arith.constant 0 : index
    %265 = vector.load %arg8[%c4_279, %c0_280, %c0_281] : memref<9x16x16xf32, #tpu.memory_space<vmem>>, vector<1x16x16xf32>
    %266 = vector.shape_cast %265 : vector<1x16x16xf32> to vector<16x16xf32>
    %cst_282 = arith.constant dense<0.000000e+00> : vector<64x16xf32>
    %267 = tpu.matmul %264, %266, %cst_282 {dimension_numbers = #tpu.dot_dimension_numbers<[1], [0], [0], [1], [0, 0, 1, 1], [], []>} : vector<64x16xf32>, vector<16x16xf32>, vector<64x16xf32> -> vector<64x16xf32>
    %268 = arith.addf %262, %267 : vector<64x16xf32>
    %269 = vector.extract_strided_slice %256 {offsets = [0, 2, 0, 0], sizes = [1, 8, 8, 16], strides = [1, 1, 1, 1]} : vector<1x10x8x16xf32> to vector<1x8x8x16xf32>
    %270 = vector.shape_cast %269 : vector<1x8x8x16xf32> to vector<64x16xf32>
    %c7_283 = arith.constant 7 : index
    %c0_284 = arith.constant 0 : index
    %c0_285 = arith.constant 0 : index
    %271 = vector.load %arg8[%c7_283, %c0_284, %c0_285] : memref<9x16x16xf32, #tpu.memory_space<vmem>>, vector<1x16x16xf32>
    %272 = vector.shape_cast %271 : vector<1x16x16xf32> to vector<16x16xf32>
    %cst_286 = arith.constant dense<0.000000e+00> : vector<64x16xf32>
    %273 = tpu.matmul %270, %272, %cst_286 {dimension_numbers = #tpu.dot_dimension_numbers<[1], [0], [0], [1], [0, 0, 1, 1], [], []>} : vector<64x16xf32>, vector<16x16xf32>, vector<64x16xf32> -> vector<64x16xf32>
    %274 = arith.addf %268, %273 : vector<64x16xf32>
    %c0_287 = arith.constant 0 : index
    %c0_288 = arith.constant 0 : index
    %c2_289 = arith.constant 2 : index
    %c0_290 = arith.constant 0 : index
    %275 = vector.load %arg26[%c0_287, %c0_288, %c2_289, %c0_290] : memref<1x10x10x16xf32, #tpu.memory_space<vmem>>, vector<1x10x8x16xf32>
    %276 = vector.extract_strided_slice %275 {offsets = [0, 0, 0, 0], sizes = [1, 8, 8, 16], strides = [1, 1, 1, 1]} : vector<1x10x8x16xf32> to vector<1x8x8x16xf32>
    %277 = vector.shape_cast %276 : vector<1x8x8x16xf32> to vector<64x16xf32>
    %c2_291 = arith.constant 2 : index
    %c0_292 = arith.constant 0 : index
    %c0_293 = arith.constant 0 : index
    %278 = vector.load %arg8[%c2_291, %c0_292, %c0_293] : memref<9x16x16xf32, #tpu.memory_space<vmem>>, vector<1x16x16xf32>
    %279 = vector.shape_cast %278 : vector<1x16x16xf32> to vector<16x16xf32>
    %cst_294 = arith.constant dense<0.000000e+00> : vector<64x16xf32>
    %280 = tpu.matmul %277, %279, %cst_294 {dimension_numbers = #tpu.dot_dimension_numbers<[1], [0], [0], [1], [0, 0, 1, 1], [], []>} : vector<64x16xf32>, vector<16x16xf32>, vector<64x16xf32> -> vector<64x16xf32>
    %281 = arith.addf %274, %280 : vector<64x16xf32>
    %282 = vector.extract_strided_slice %275 {offsets = [0, 1, 0, 0], sizes = [1, 8, 8, 16], strides = [1, 1, 1, 1]} : vector<1x10x8x16xf32> to vector<1x8x8x16xf32>
    %283 = vector.shape_cast %282 : vector<1x8x8x16xf32> to vector<64x16xf32>
    %c5_295 = arith.constant 5 : index
    %c0_296 = arith.constant 0 : index
    %c0_297 = arith.constant 0 : index
    %284 = vector.load %arg8[%c5_295, %c0_296, %c0_297] : memref<9x16x16xf32, #tpu.memory_space<vmem>>, vector<1x16x16xf32>
    %285 = vector.shape_cast %284 : vector<1x16x16xf32> to vector<16x16xf32>
    %cst_298 = arith.constant dense<0.000000e+00> : vector<64x16xf32>
    %286 = tpu.matmul %283, %285, %cst_298 {dimension_numbers = #tpu.dot_dimension_numbers<[1], [0], [0], [1], [0, 0, 1, 1], [], []>} : vector<64x16xf32>, vector<16x16xf32>, vector<64x16xf32> -> vector<64x16xf32>
    %287 = arith.addf %281, %286 : vector<64x16xf32>
    %288 = vector.extract_strided_slice %275 {offsets = [0, 2, 0, 0], sizes = [1, 8, 8, 16], strides = [1, 1, 1, 1]} : vector<1x10x8x16xf32> to vector<1x8x8x16xf32>
    %289 = vector.shape_cast %288 : vector<1x8x8x16xf32> to vector<64x16xf32>
    %c8_299 = arith.constant 8 : index
    %c0_300 = arith.constant 0 : index
    %c0_301 = arith.constant 0 : index
    %290 = vector.load %arg8[%c8_299, %c0_300, %c0_301] : memref<9x16x16xf32, #tpu.memory_space<vmem>>, vector<1x16x16xf32>
    %291 = vector.shape_cast %290 : vector<1x16x16xf32> to vector<16x16xf32>
    %cst_302 = arith.constant dense<0.000000e+00> : vector<64x16xf32>
    %292 = tpu.matmul %289, %291, %cst_302 {dimension_numbers = #tpu.dot_dimension_numbers<[1], [0], [0], [1], [0, 0, 1, 1], [], []>} : vector<64x16xf32>, vector<16x16xf32>, vector<64x16xf32> -> vector<64x16xf32>
    %293 = arith.addf %287, %292 : vector<64x16xf32>
    %c0_303 = arith.constant 0 : index
    %c0_304 = arith.constant 0 : index
    %294 = vector.load %arg9[%c0_303, %c0_304] : memref<1x16xf32, #tpu.memory_space<vmem>>, vector<1x16xf32>
    %295 = vector.broadcast %294 : vector<1x16xf32> to vector<64x16xf32>
    %296 = arith.addf %293, %295 : vector<64x16xf32>
    %cst_305 = arith.constant 0.000000e+00 : f32
    %297 = vector.broadcast %cst_305 : f32 to vector<64x16xf32>
    %298 = arith.maximumf %296, %297 : vector<64x16xf32>
    %299 = vector.shape_cast %298 : vector<64x16xf32> to vector<1x8x8x16xf32>
    %300 = vector.shape_cast %299 : vector<1x8x8x16xf32> to vector<4x2x8x16xf32>
    %cst_306 = arith.constant dense<0xFF800000> : vector<4x8x16xf32>
    %301 = vector.multi_reduction <maximumf>, %300, %cst_306 [1] : vector<4x2x8x16xf32> to vector<4x8x16xf32>
    %c0_307 = arith.constant 0 : index
    %c0_308 = arith.constant 0 : index
    %c0_309 = arith.constant 0 : index
    %302 = vector.load %arg32[%c0_307, %c0_308, %c0_309] : memref<4x8x16xf32, #tpu.memory_space<vmem>>, vector<4x8x16xf32>
    tpu.vector_store %arg32[%c0_307, %c0_308, %c0_309], %301 {strides = array<i32>} : memref<4x8x16xf32, #tpu.memory_space<vmem>>, vector<4x8x16xf32>,
    %c0_310 = arith.constant 0 : index
    %c0_311 = arith.constant 0 : index
    %c0_312 = arith.constant 0 : index
    %303 = tpu.strided_load %arg32[%c0_310, %c0_311, %c0_312] {strides = array<i32: 1, 2, 1>} : memref<4x8x16xf32, #tpu.memory_space<vmem>>, vector<4x4x16xf32>
    %c0_313 = arith.constant 0 : index
    %c1_314 = arith.constant 1 : index
    %c0_315 = arith.constant 0 : index
    %304 = tpu.strided_load %arg32[%c0_313, %c1_314, %c0_315] {strides = array<i32: 1, 2, 1>} : memref<4x8x16xf32, #tpu.memory_space<vmem>>, vector<4x4x16xf32>
    %305 = arith.maximumf %303, %304 : vector<4x4x16xf32>
    %306 = vector.shape_cast %305 : vector<4x4x16xf32> to vector<1x4x4x16xf32>
    %cst_316 = arith.constant 0.000000e+00 : f32
    %307 = vector.broadcast %cst_316 : f32 to vector<1x1x6x16xf32>
    %c0_317 = arith.constant 0 : index
    %c0_318 = arith.constant 0 : index
    %c0_319 = arith.constant 0 : index
    %c0_320 = arith.constant 0 : index
    %308 = vector.load %arg27[%c0_317, %c0_318, %c0_319, %c0_320] : memref<1x6x6x16xf32, #tpu.memory_space<vmem>>, vector<1x1x6x16xf32>
    tpu.vector_store %arg27[%c0_317, %c0_318, %c0_319, %c0_320], %307 {strides = array<i32>} : memref<1x6x6x16xf32, #tpu.memory_space<vmem>>, vector<1x1x6x16xf32>,
    %cst_321 = arith.constant 0.000000e+00 : f32
    %309 = vector.broadcast %cst_321 : f32 to vector<1x1x6x16xf32>
    %c0_322 = arith.constant 0 : index
    %c5_323 = arith.constant 5 : index
    %c0_324 = arith.constant 0 : index
    %c0_325 = arith.constant 0 : index
    %310 = vector.load %arg27[%c0_322, %c5_323, %c0_324, %c0_325] : memref<1x6x6x16xf32, #tpu.memory_space<vmem>>, vector<1x1x6x16xf32>
    tpu.vector_store %arg27[%c0_322, %c5_323, %c0_324, %c0_325], %309 {strides = array<i32>} : memref<1x6x6x16xf32, #tpu.memory_space<vmem>>, vector<1x1x6x16xf32>,
    %cst_326 = arith.constant 0.000000e+00 : f32
    %311 = vector.broadcast %cst_326 : f32 to vector<1x6x1x16xf32>
    %c0_327 = arith.constant 0 : index
    %c0_328 = arith.constant 0 : index
    %c0_329 = arith.constant 0 : index
    %c0_330 = arith.constant 0 : index
    %312 = vector.load %arg27[%c0_327, %c0_328, %c0_329, %c0_330] : memref<1x6x6x16xf32, #tpu.memory_space<vmem>>, vector<1x6x1x16xf32>
    tpu.vector_store %arg27[%c0_327, %c0_328, %c0_329, %c0_330], %311 {strides = array<i32>} : memref<1x6x6x16xf32, #tpu.memory_space<vmem>>, vector<1x6x1x16xf32>,
    %cst_331 = arith.constant 0.000000e+00 : f32
    %313 = vector.broadcast %cst_331 : f32 to vector<1x6x1x16xf32>
    %c0_332 = arith.constant 0 : index
    %c0_333 = arith.constant 0 : index
    %c5_334 = arith.constant 5 : index
    %c0_335 = arith.constant 0 : index
    %314 = vector.load %arg27[%c0_332, %c0_333, %c5_334, %c0_335] : memref<1x6x6x16xf32, #tpu.memory_space<vmem>>, vector<1x6x1x16xf32>
    tpu.vector_store %arg27[%c0_332, %c0_333, %c5_334, %c0_335], %313 {strides = array<i32>} : memref<1x6x6x16xf32, #tpu.memory_space<vmem>>, vector<1x6x1x16xf32>,
    %c0_336 = arith.constant 0 : index
    %c1_337 = arith.constant 1 : index
    %c1_338 = arith.constant 1 : index
    %c0_339 = arith.constant 0 : index
    %315 = vector.load %arg27[%c0_336, %c1_337, %c1_338, %c0_339] : memref<1x6x6x16xf32, #tpu.memory_space<vmem>>, vector<1x4x4x16xf32>
    tpu.vector_store %arg27[%c0_336, %c1_337, %c1_338, %c0_339], %306 {strides = array<i32>} : memref<1x6x6x16xf32, #tpu.memory_space<vmem>>, vector<1x4x4x16xf32>,
    %cst_340 = arith.constant 0.000000e+00 : f32
    %316 = vector.broadcast %cst_340 : f32 to vector<16x32xf32>
    %c0_341 = arith.constant 0 : index
    %c0_342 = arith.constant 0 : index
    %c0_343 = arith.constant 0 : index
    %c0_344 = arith.constant 0 : index
    %317 = vector.load %arg27[%c0_341, %c0_342, %c0_343, %c0_344] : memref<1x6x6x16xf32, #tpu.memory_space<vmem>>, vector<1x6x4x16xf32>
    %318 = vector.extract_strided_slice %317 {offsets = [0, 0, 0, 0], sizes = [1, 4, 4, 16], strides = [1, 1, 1, 1]} : vector<1x6x4x16xf32> to vector<1x4x4x16xf32>
    %319 = vector.shape_cast %318 : vector<1x4x4x16xf32> to vector<16x16xf32>
    %c0_345 = arith.constant 0 : index
    %c0_346 = arith.constant 0 : index
    %c0_347 = arith.constant 0 : index
    %320 = vector.load %arg10[%c0_345, %c0_346, %c0_347] : memref<9x16x32xf32, #tpu.memory_space<vmem>>, vector<1x16x32xf32>
    %321 = vector.shape_cast %320 : vector<1x16x32xf32> to vector<16x32xf32>
    %cst_348 = arith.constant dense<0.000000e+00> : vector<16x32xf32>
    %322 = tpu.matmul %319, %321, %cst_348 {dimension_numbers = #tpu.dot_dimension_numbers<[1], [0], [0], [1], [0, 0, 1, 1], [], []>} : vector<16x16xf32>, vector<16x32xf32>, vector<16x32xf32> -> vector<16x32xf32>
    %323 = arith.addf %316, %322 : vector<16x32xf32>
    %324 = vector.extract_strided_slice %317 {offsets = [0, 1, 0, 0], sizes = [1, 4, 4, 16], strides = [1, 1, 1, 1]} : vector<1x6x4x16xf32> to vector<1x4x4x16xf32>
    %325 = vector.shape_cast %324 : vector<1x4x4x16xf32> to vector<16x16xf32>
    %c3_349 = arith.constant 3 : index
    %c0_350 = arith.constant 0 : index
    %c0_351 = arith.constant 0 : index
    %326 = vector.load %arg10[%c3_349, %c0_350, %c0_351] : memref<9x16x32xf32, #tpu.memory_space<vmem>>, vector<1x16x32xf32>
    %327 = vector.shape_cast %326 : vector<1x16x32xf32> to vector<16x32xf32>
    %cst_352 = arith.constant dense<0.000000e+00> : vector<16x32xf32>
    %328 = tpu.matmul %325, %327, %cst_352 {dimension_numbers = #tpu.dot_dimension_numbers<[1], [0], [0], [1], [0, 0, 1, 1], [], []>} : vector<16x16xf32>, vector<16x32xf32>, vector<16x32xf32> -> vector<16x32xf32>
    %329 = arith.addf %323, %328 : vector<16x32xf32>
    %330 = vector.extract_strided_slice %317 {offsets = [0, 2, 0, 0], sizes = [1, 4, 4, 16], strides = [1, 1, 1, 1]} : vector<1x6x4x16xf32> to vector<1x4x4x16xf32>
    %331 = vector.shape_cast %330 : vector<1x4x4x16xf32> to vector<16x16xf32>
    %c6_353 = arith.constant 6 : index
    %c0_354 = arith.constant 0 : index
    %c0_355 = arith.constant 0 : index
    %332 = vector.load %arg10[%c6_353, %c0_354, %c0_355] : memref<9x16x32xf32, #tpu.memory_space<vmem>>, vector<1x16x32xf32>
    %333 = vector.shape_cast %332 : vector<1x16x32xf32> to vector<16x32xf32>
    %cst_356 = arith.constant dense<0.000000e+00> : vector<16x32xf32>
    %334 = tpu.matmul %331, %333, %cst_356 {dimension_numbers = #tpu.dot_dimension_numbers<[1], [0], [0], [1], [0, 0, 1, 1], [], []>} : vector<16x16xf32>, vector<16x32xf32>, vector<16x32xf32> -> vector<16x32xf32>
    %335 = arith.addf %329, %334 : vector<16x32xf32>
    %c0_357 = arith.constant 0 : index
    %c0_358 = arith.constant 0 : index
    %c1_359 = arith.constant 1 : index
    %c0_360 = arith.constant 0 : index
    %336 = vector.load %arg27[%c0_357, %c0_358, %c1_359, %c0_360] : memref<1x6x6x16xf32, #tpu.memory_space<vmem>>, vector<1x6x4x16xf32>
    %337 = vector.extract_strided_slice %336 {offsets = [0, 0, 0, 0], sizes = [1, 4, 4, 16], strides = [1, 1, 1, 1]} : vector<1x6x4x16xf32> to vector<1x4x4x16xf32>
    %338 = vector.shape_cast %337 : vector<1x4x4x16xf32> to vector<16x16xf32>
    %c1_361 = arith.constant 1 : index
    %c0_362 = arith.constant 0 : index
    %c0_363 = arith.constant 0 : index
    %339 = vector.load %arg10[%c1_361, %c0_362, %c0_363] : memref<9x16x32xf32, #tpu.memory_space<vmem>>, vector<1x16x32xf32>
    %340 = vector.shape_cast %339 : vector<1x16x32xf32> to vector<16x32xf32>
    %cst_364 = arith.constant dense<0.000000e+00> : vector<16x32xf32>
    %341 = tpu.matmul %338, %340, %cst_364 {dimension_numbers = #tpu.dot_dimension_numbers<[1], [0], [0], [1], [0, 0, 1, 1], [], []>} : vector<16x16xf32>, vector<16x32xf32>, vector<16x32xf32> -> vector<16x32xf32>
    %342 = arith.addf %335, %341 : vector<16x32xf32>
    %343 = vector.extract_strided_slice %336 {offsets = [0, 1, 0, 0], sizes = [1, 4, 4, 16], strides = [1, 1, 1, 1]} : vector<1x6x4x16xf32> to vector<1x4x4x16xf32>
    %344 = vector.shape_cast %343 : vector<1x4x4x16xf32> to vector<16x16xf32>
    %c4_365 = arith.constant 4 : index
    %c0_366 = arith.constant 0 : index
    %c0_367 = arith.constant 0 : index
    %345 = vector.load %arg10[%c4_365, %c0_366, %c0_367] : memref<9x16x32xf32, #tpu.memory_space<vmem>>, vector<1x16x32xf32>
    %346 = vector.shape_cast %345 : vector<1x16x32xf32> to vector<16x32xf32>
    %cst_368 = arith.constant dense<0.000000e+00> : vector<16x32xf32>
    %347 = tpu.matmul %344, %346, %cst_368 {dimension_numbers = #tpu.dot_dimension_numbers<[1], [0], [0], [1], [0, 0, 1, 1], [], []>} : vector<16x16xf32>, vector<16x32xf32>, vector<16x32xf32> -> vector<16x32xf32>
    %348 = arith.addf %342, %347 : vector<16x32xf32>
    %349 = vector.extract_strided_slice %336 {offsets = [0, 2, 0, 0], sizes = [1, 4, 4, 16], strides = [1, 1, 1, 1]} : vector<1x6x4x16xf32> to vector<1x4x4x16xf32>
    %350 = vector.shape_cast %349 : vector<1x4x4x16xf32> to vector<16x16xf32>
    %c7_369 = arith.constant 7 : index
    %c0_370 = arith.constant 0 : index
    %c0_371 = arith.constant 0 : index
    %351 = vector.load %arg10[%c7_369, %c0_370, %c0_371] : memref<9x16x32xf32, #tpu.memory_space<vmem>>, vector<1x16x32xf32>
    %352 = vector.shape_cast %351 : vector<1x16x32xf32> to vector<16x32xf32>
    %cst_372 = arith.constant dense<0.000000e+00> : vector<16x32xf32>
    %353 = tpu.matmul %350, %352, %cst_372 {dimension_numbers = #tpu.dot_dimension_numbers<[1], [0], [0], [1], [0, 0, 1, 1], [], []>} : vector<16x16xf32>, vector<16x32xf32>, vector<16x32xf32> -> vector<16x32xf32>
    %354 = arith.addf %348, %353 : vector<16x32xf32>
    %c0_373 = arith.constant 0 : index
    %c0_374 = arith.constant 0 : index
    %c2_375 = arith.constant 2 : index
    %c0_376 = arith.constant 0 : index
    %355 = vector.load %arg27[%c0_373, %c0_374, %c2_375, %c0_376] : memref<1x6x6x16xf32, #tpu.memory_space<vmem>>, vector<1x6x4x16xf32>
    %356 = vector.extract_strided_slice %355 {offsets = [0, 0, 0, 0], sizes = [1, 4, 4, 16], strides = [1, 1, 1, 1]} : vector<1x6x4x16xf32> to vector<1x4x4x16xf32>
    %357 = vector.shape_cast %356 : vector<1x4x4x16xf32> to vector<16x16xf32>
    %c2_377 = arith.constant 2 : index
    %c0_378 = arith.constant 0 : index
    %c0_379 = arith.constant 0 : index
    %358 = vector.load %arg10[%c2_377, %c0_378, %c0_379] : memref<9x16x32xf32, #tpu.memory_space<vmem>>, vector<1x16x32xf32>
    %359 = vector.shape_cast %358 : vector<1x16x32xf32> to vector<16x32xf32>
    %cst_380 = arith.constant dense<0.000000e+00> : vector<16x32xf32>
    %360 = tpu.matmul %357, %359, %cst_380 {dimension_numbers = #tpu.dot_dimension_numbers<[1], [0], [0], [1], [0, 0, 1, 1], [], []>} : vector<16x16xf32>, vector<16x32xf32>, vector<16x32xf32> -> vector<16x32xf32>
    %361 = arith.addf %354, %360 : vector<16x32xf32>
    %362 = vector.extract_strided_slice %355 {offsets = [0, 1, 0, 0], sizes = [1, 4, 4, 16], strides = [1, 1, 1, 1]} : vector<1x6x4x16xf32> to vector<1x4x4x16xf32>
    %363 = vector.shape_cast %362 : vector<1x4x4x16xf32> to vector<16x16xf32>
    %c5_381 = arith.constant 5 : index
    %c0_382 = arith.constant 0 : index
    %c0_383 = arith.constant 0 : index
    %364 = vector.load %arg10[%c5_381, %c0_382, %c0_383] : memref<9x16x32xf32, #tpu.memory_space<vmem>>, vector<1x16x32xf32>
    %365 = vector.shape_cast %364 : vector<1x16x32xf32> to vector<16x32xf32>
    %cst_384 = arith.constant dense<0.000000e+00> : vector<16x32xf32>
    %366 = tpu.matmul %363, %365, %cst_384 {dimension_numbers = #tpu.dot_dimension_numbers<[1], [0], [0], [1], [0, 0, 1, 1], [], []>} : vector<16x16xf32>, vector<16x32xf32>, vector<16x32xf32> -> vector<16x32xf32>
    %367 = arith.addf %361, %366 : vector<16x32xf32>
    %368 = vector.extract_strided_slice %355 {offsets = [0, 2, 0, 0], sizes = [1, 4, 4, 16], strides = [1, 1, 1, 1]} : vector<1x6x4x16xf32> to vector<1x4x4x16xf32>
    %369 = vector.shape_cast %368 : vector<1x4x4x16xf32> to vector<16x16xf32>
    %c8_385 = arith.constant 8 : index
    %c0_386 = arith.constant 0 : index
    %c0_387 = arith.constant 0 : index
    %370 = vector.load %arg10[%c8_385, %c0_386, %c0_387] : memref<9x16x32xf32, #tpu.memory_space<vmem>>, vector<1x16x32xf32>
    %371 = vector.shape_cast %370 : vector<1x16x32xf32> to vector<16x32xf32>
    %cst_388 = arith.constant dense<0.000000e+00> : vector<16x32xf32>
    %372 = tpu.matmul %369, %371, %cst_388 {dimension_numbers = #tpu.dot_dimension_numbers<[1], [0], [0], [1], [0, 0, 1, 1], [], []>} : vector<16x16xf32>, vector<16x32xf32>, vector<16x32xf32> -> vector<16x32xf32>
    %373 = arith.addf %367, %372 : vector<16x32xf32>
    %c0_389 = arith.constant 0 : index
    %c0_390 = arith.constant 0 : index
    %374 = vector.load %arg11[%c0_389, %c0_390] : memref<1x32xf32, #tpu.memory_space<vmem>>, vector<1x32xf32>
    %375 = vector.broadcast %374 : vector<1x32xf32> to vector<16x32xf32>
    %376 = arith.addf %373, %375 : vector<16x32xf32>
    %cst_391 = arith.constant 0.000000e+00 : f32
    %377 = vector.broadcast %cst_391 : f32 to vector<16x32xf32>
    %378 = arith.maximumf %376, %377 : vector<16x32xf32>
    %379 = vector.shape_cast %378 : vector<16x32xf32> to vector<1x4x4x32xf32>
    %cst_392 = arith.constant 0.000000e+00 : f32
    %380 = vector.broadcast %cst_392 : f32 to vector<1x1x6x32xf32>
    %c0_393 = arith.constant 0 : index
    %c0_394 = arith.constant 0 : index
    %c0_395 = arith.constant 0 : index
    %c0_396 = arith.constant 0 : index
    %381 = vector.load %arg28[%c0_393, %c0_394, %c0_395, %c0_396] : memref<1x6x6x32xf32, #tpu.memory_space<vmem>>, vector<1x1x6x32xf32>
    tpu.vector_store %arg28[%c0_393, %c0_394, %c0_395, %c0_396], %380 {strides = array<i32>} : memref<1x6x6x32xf32, #tpu.memory_space<vmem>>, vector<1x1x6x32xf32>,
    %cst_397 = arith.constant 0.000000e+00 : f32
    %382 = vector.broadcast %cst_397 : f32 to vector<1x1x6x32xf32>
    %c0_398 = arith.constant 0 : index
    %c5_399 = arith.constant 5 : index
    %c0_400 = arith.constant 0 : index
    %c0_401 = arith.constant 0 : index
    %383 = vector.load %arg28[%c0_398, %c5_399, %c0_400, %c0_401] : memref<1x6x6x32xf32, #tpu.memory_space<vmem>>, vector<1x1x6x32xf32>
    tpu.vector_store %arg28[%c0_398, %c5_399, %c0_400, %c0_401], %382 {strides = array<i32>} : memref<1x6x6x32xf32, #tpu.memory_space<vmem>>, vector<1x1x6x32xf32>,
    %cst_402 = arith.constant 0.000000e+00 : f32
    %384 = vector.broadcast %cst_402 : f32 to vector<1x6x1x32xf32>
    %c0_403 = arith.constant 0 : index
    %c0_404 = arith.constant 0 : index
    %c0_405 = arith.constant 0 : index
    %c0_406 = arith.constant 0 : index
    %385 = vector.load %arg28[%c0_403, %c0_404, %c0_405, %c0_406] : memref<1x6x6x32xf32, #tpu.memory_space<vmem>>, vector<1x6x1x32xf32>
    tpu.vector_store %arg28[%c0_403, %c0_404, %c0_405, %c0_406], %384 {strides = array<i32>} : memref<1x6x6x32xf32, #tpu.memory_space<vmem>>, vector<1x6x1x32xf32>,
    %cst_407 = arith.constant 0.000000e+00 : f32
    %386 = vector.broadcast %cst_407 : f32 to vector<1x6x1x32xf32>
    %c0_408 = arith.constant 0 : index
    %c0_409 = arith.constant 0 : index
    %c5_410 = arith.constant 5 : index
    %c0_411 = arith.constant 0 : index
    %387 = vector.load %arg28[%c0_408, %c0_409, %c5_410, %c0_411] : memref<1x6x6x32xf32, #tpu.memory_space<vmem>>, vector<1x6x1x32xf32>
    tpu.vector_store %arg28[%c0_408, %c0_409, %c5_410, %c0_411], %386 {strides = array<i32>} : memref<1x6x6x32xf32, #tpu.memory_space<vmem>>, vector<1x6x1x32xf32>,
    %c0_412 = arith.constant 0 : index
    %c1_413 = arith.constant 1 : index
    %c1_414 = arith.constant 1 : index
    %c0_415 = arith.constant 0 : index
    %388 = vector.load %arg28[%c0_412, %c1_413, %c1_414, %c0_415] : memref<1x6x6x32xf32, #tpu.memory_space<vmem>>, vector<1x4x4x32xf32>
    tpu.vector_store %arg28[%c0_412, %c1_413, %c1_414, %c0_415], %379 {strides = array<i32>} : memref<1x6x6x32xf32, #tpu.memory_space<vmem>>, vector<1x4x4x32xf32>,
    %cst_416 = arith.constant 0.000000e+00 : f32
    %389 = vector.broadcast %cst_416 : f32 to vector<16x32xf32>
    %c0_417 = arith.constant 0 : index
    %c0_418 = arith.constant 0 : index
    %c0_419 = arith.constant 0 : index
    %c0_420 = arith.constant 0 : index
    %390 = vector.load %arg28[%c0_417, %c0_418, %c0_419, %c0_420] : memref<1x6x6x32xf32, #tpu.memory_space<vmem>>, vector<1x6x4x32xf32>
    %391 = vector.extract_strided_slice %390 {offsets = [0, 0, 0, 0], sizes = [1, 4, 4, 32], strides = [1, 1, 1, 1]} : vector<1x6x4x32xf32> to vector<1x4x4x32xf32>
    %392 = vector.shape_cast %391 : vector<1x4x4x32xf32> to vector<16x32xf32>
    %c0_421 = arith.constant 0 : index
    %c0_422 = arith.constant 0 : index
    %c0_423 = arith.constant 0 : index
    %393 = vector.load %arg12[%c0_421, %c0_422, %c0_423] : memref<9x32x32xf32, #tpu.memory_space<vmem>>, vector<1x32x32xf32>
    %394 = vector.shape_cast %393 : vector<1x32x32xf32> to vector<32x32xf32>
    %cst_424 = arith.constant dense<0.000000e+00> : vector<16x32xf32>
    %395 = tpu.matmul %392, %394, %cst_424 {dimension_numbers = #tpu.dot_dimension_numbers<[1], [0], [0], [1], [0, 0, 1, 1], [], []>} : vector<16x32xf32>, vector<32x32xf32>, vector<16x32xf32> -> vector<16x32xf32>
    %396 = arith.addf %389, %395 : vector<16x32xf32>
    %397 = vector.extract_strided_slice %390 {offsets = [0, 1, 0, 0], sizes = [1, 4, 4, 32], strides = [1, 1, 1, 1]} : vector<1x6x4x32xf32> to vector<1x4x4x32xf32>
    %398 = vector.shape_cast %397 : vector<1x4x4x32xf32> to vector<16x32xf32>
    %c3_425 = arith.constant 3 : index
    %c0_426 = arith.constant 0 : index
    %c0_427 = arith.constant 0 : index
    %399 = vector.load %arg12[%c3_425, %c0_426, %c0_427] : memref<9x32x32xf32, #tpu.memory_space<vmem>>, vector<1x32x32xf32>
    %400 = vector.shape_cast %399 : vector<1x32x32xf32> to vector<32x32xf32>
    %cst_428 = arith.constant dense<0.000000e+00> : vector<16x32xf32>
    %401 = tpu.matmul %398, %400, %cst_428 {dimension_numbers = #tpu.dot_dimension_numbers<[1], [0], [0], [1], [0, 0, 1, 1], [], []>} : vector<16x32xf32>, vector<32x32xf32>, vector<16x32xf32> -> vector<16x32xf32>
    %402 = arith.addf %396, %401 : vector<16x32xf32>
    %403 = vector.extract_strided_slice %390 {offsets = [0, 2, 0, 0], sizes = [1, 4, 4, 32], strides = [1, 1, 1, 1]} : vector<1x6x4x32xf32> to vector<1x4x4x32xf32>
    %404 = vector.shape_cast %403 : vector<1x4x4x32xf32> to vector<16x32xf32>
    %c6_429 = arith.constant 6 : index
    %c0_430 = arith.constant 0 : index
    %c0_431 = arith.constant 0 : index
    %405 = vector.load %arg12[%c6_429, %c0_430, %c0_431] : memref<9x32x32xf32, #tpu.memory_space<vmem>>, vector<1x32x32xf32>
    %406 = vector.shape_cast %405 : vector<1x32x32xf32> to vector<32x32xf32>
    %cst_432 = arith.constant dense<0.000000e+00> : vector<16x32xf32>
    %407 = tpu.matmul %404, %406, %cst_432 {dimension_numbers = #tpu.dot_dimension_numbers<[1], [0], [0], [1], [0, 0, 1, 1], [], []>} : vector<16x32xf32>, vector<32x32xf32>, vector<16x32xf32> -> vector<16x32xf32>
    %408 = arith.addf %402, %407 : vector<16x32xf32>
    %c0_433 = arith.constant 0 : index
    %c0_434 = arith.constant 0 : index
    %c1_435 = arith.constant 1 : index
    %c0_436 = arith.constant 0 : index
    %409 = vector.load %arg28[%c0_433, %c0_434, %c1_435, %c0_436] : memref<1x6x6x32xf32, #tpu.memory_space<vmem>>, vector<1x6x4x32xf32>
    %410 = vector.extract_strided_slice %409 {offsets = [0, 0, 0, 0], sizes = [1, 4, 4, 32], strides = [1, 1, 1, 1]} : vector<1x6x4x32xf32> to vector<1x4x4x32xf32>
    %411 = vector.shape_cast %410 : vector<1x4x4x32xf32> to vector<16x32xf32>
    %c1_437 = arith.constant 1 : index
    %c0_438 = arith.constant 0 : index
    %c0_439 = arith.constant 0 : index
    %412 = vector.load %arg12[%c1_437, %c0_438, %c0_439] : memref<9x32x32xf32, #tpu.memory_space<vmem>>, vector<1x32x32xf32>
    %413 = vector.shape_cast %412 : vector<1x32x32xf32> to vector<32x32xf32>
    %cst_440 = arith.constant dense<0.000000e+00> : vector<16x32xf32>
    %414 = tpu.matmul %411, %413, %cst_440 {dimension_numbers = #tpu.dot_dimension_numbers<[1], [0], [0], [1], [0, 0, 1, 1], [], []>} : vector<16x32xf32>, vector<32x32xf32>, vector<16x32xf32> -> vector<16x32xf32>
    %415 = arith.addf %408, %414 : vector<16x32xf32>
    %416 = vector.extract_strided_slice %409 {offsets = [0, 1, 0, 0], sizes = [1, 4, 4, 32], strides = [1, 1, 1, 1]} : vector<1x6x4x32xf32> to vector<1x4x4x32xf32>
    %417 = vector.shape_cast %416 : vector<1x4x4x32xf32> to vector<16x32xf32>
    %c4_441 = arith.constant 4 : index
    %c0_442 = arith.constant 0 : index
    %c0_443 = arith.constant 0 : index
    %418 = vector.load %arg12[%c4_441, %c0_442, %c0_443] : memref<9x32x32xf32, #tpu.memory_space<vmem>>, vector<1x32x32xf32>
    %419 = vector.shape_cast %418 : vector<1x32x32xf32> to vector<32x32xf32>
    %cst_444 = arith.constant dense<0.000000e+00> : vector<16x32xf32>
    %420 = tpu.matmul %417, %419, %cst_444 {dimension_numbers = #tpu.dot_dimension_numbers<[1], [0], [0], [1], [0, 0, 1, 1], [], []>} : vector<16x32xf32>, vector<32x32xf32>, vector<16x32xf32> -> vector<16x32xf32>
    %421 = arith.addf %415, %420 : vector<16x32xf32>
    %422 = vector.extract_strided_slice %409 {offsets = [0, 2, 0, 0], sizes = [1, 4, 4, 32], strides = [1, 1, 1, 1]} : vector<1x6x4x32xf32> to vector<1x4x4x32xf32>
    %423 = vector.shape_cast %422 : vector<1x4x4x32xf32> to vector<16x32xf32>
    %c7_445 = arith.constant 7 : index
    %c0_446 = arith.constant 0 : index
    %c0_447 = arith.constant 0 : index
    %424 = vector.load %arg12[%c7_445, %c0_446, %c0_447] : memref<9x32x32xf32, #tpu.memory_space<vmem>>, vector<1x32x32xf32>
    %425 = vector.shape_cast %424 : vector<1x32x32xf32> to vector<32x32xf32>
    %cst_448 = arith.constant dense<0.000000e+00> : vector<16x32xf32>
    %426 = tpu.matmul %423, %425, %cst_448 {dimension_numbers = #tpu.dot_dimension_numbers<[1], [0], [0], [1], [0, 0, 1, 1], [], []>} : vector<16x32xf32>, vector<32x32xf32>, vector<16x32xf32> -> vector<16x32xf32>
    %427 = arith.addf %421, %426 : vector<16x32xf32>
    %c0_449 = arith.constant 0 : index
    %c0_450 = arith.constant 0 : index
    %c2_451 = arith.constant 2 : index
    %c0_452 = arith.constant 0 : index
    %428 = vector.load %arg28[%c0_449, %c0_450, %c2_451, %c0_452] : memref<1x6x6x32xf32, #tpu.memory_space<vmem>>, vector<1x6x4x32xf32>
    %429 = vector.extract_strided_slice %428 {offsets = [0, 0, 0, 0], sizes = [1, 4, 4, 32], strides = [1, 1, 1, 1]} : vector<1x6x4x32xf32> to vector<1x4x4x32xf32>
    %430 = vector.shape_cast %429 : vector<1x4x4x32xf32> to vector<16x32xf32>
    %c2_453 = arith.constant 2 : index
    %c0_454 = arith.constant 0 : index
    %c0_455 = arith.constant 0 : index
    %431 = vector.load %arg12[%c2_453, %c0_454, %c0_455] : memref<9x32x32xf32, #tpu.memory_space<vmem>>, vector<1x32x32xf32>
    %432 = vector.shape_cast %431 : vector<1x32x32xf32> to vector<32x32xf32>
    %cst_456 = arith.constant dense<0.000000e+00> : vector<16x32xf32>
    %433 = tpu.matmul %430, %432, %cst_456 {dimension_numbers = #tpu.dot_dimension_numbers<[1], [0], [0], [1], [0, 0, 1, 1], [], []>} : vector<16x32xf32>, vector<32x32xf32>, vector<16x32xf32> -> vector<16x32xf32>
    %434 = arith.addf %427, %433 : vector<16x32xf32>
    %435 = vector.extract_strided_slice %428 {offsets = [0, 1, 0, 0], sizes = [1, 4, 4, 32], strides = [1, 1, 1, 1]} : vector<1x6x4x32xf32> to vector<1x4x4x32xf32>
    %436 = vector.shape_cast %435 : vector<1x4x4x32xf32> to vector<16x32xf32>
    %c5_457 = arith.constant 5 : index
    %c0_458 = arith.constant 0 : index
    %c0_459 = arith.constant 0 : index
    %437 = vector.load %arg12[%c5_457, %c0_458, %c0_459] : memref<9x32x32xf32, #tpu.memory_space<vmem>>, vector<1x32x32xf32>
    %438 = vector.shape_cast %437 : vector<1x32x32xf32> to vector<32x32xf32>
    %cst_460 = arith.constant dense<0.000000e+00> : vector<16x32xf32>
    %439 = tpu.matmul %436, %438, %cst_460 {dimension_numbers = #tpu.dot_dimension_numbers<[1], [0], [0], [1], [0, 0, 1, 1], [], []>} : vector<16x32xf32>, vector<32x32xf32>, vector<16x32xf32> -> vector<16x32xf32>
    %440 = arith.addf %434, %439 : vector<16x32xf32>
    %441 = vector.extract_strided_slice %428 {offsets = [0, 2, 0, 0], sizes = [1, 4, 4, 32], strides = [1, 1, 1, 1]} : vector<1x6x4x32xf32> to vector<1x4x4x32xf32>
    %442 = vector.shape_cast %441 : vector<1x4x4x32xf32> to vector<16x32xf32>
    %c8_461 = arith.constant 8 : index
    %c0_462 = arith.constant 0 : index
    %c0_463 = arith.constant 0 : index
    %443 = vector.load %arg12[%c8_461, %c0_462, %c0_463] : memref<9x32x32xf32, #tpu.memory_space<vmem>>, vector<1x32x32xf32>
    %444 = vector.shape_cast %443 : vector<1x32x32xf32> to vector<32x32xf32>
    %cst_464 = arith.constant dense<0.000000e+00> : vector<16x32xf32>
    %445 = tpu.matmul %442, %444, %cst_464 {dimension_numbers = #tpu.dot_dimension_numbers<[1], [0], [0], [1], [0, 0, 1, 1], [], []>} : vector<16x32xf32>, vector<32x32xf32>, vector<16x32xf32> -> vector<16x32xf32>
    %446 = arith.addf %440, %445 : vector<16x32xf32>
    %c0_465 = arith.constant 0 : index
    %c0_466 = arith.constant 0 : index
    %447 = vector.load %arg13[%c0_465, %c0_466] : memref<1x32xf32, #tpu.memory_space<vmem>>, vector<1x32xf32>
    %448 = vector.broadcast %447 : vector<1x32xf32> to vector<16x32xf32>
    %449 = arith.addf %446, %448 : vector<16x32xf32>
    %cst_467 = arith.constant 0.000000e+00 : f32
    %450 = vector.broadcast %cst_467 : f32 to vector<16x32xf32>
    %451 = arith.maximumf %449, %450 : vector<16x32xf32>
    %452 = vector.shape_cast %451 : vector<16x32xf32> to vector<1x4x4x32xf32>
    %453 = vector.shape_cast %452 : vector<1x4x4x32xf32> to vector<2x2x4x32xf32>
    %cst_468 = arith.constant dense<0xFF800000> : vector<2x4x32xf32>
    %454 = vector.multi_reduction <maximumf>, %453, %cst_468 [1] : vector<2x2x4x32xf32> to vector<2x4x32xf32>
    %c0_469 = arith.constant 0 : index
    %c0_470 = arith.constant 0 : index
    %c0_471 = arith.constant 0 : index
    %455 = vector.load %arg33[%c0_469, %c0_470, %c0_471] : memref<2x4x32xf32, #tpu.memory_space<vmem>>, vector<2x4x32xf32>
    tpu.vector_store %arg33[%c0_469, %c0_470, %c0_471], %454 {strides = array<i32>} : memref<2x4x32xf32, #tpu.memory_space<vmem>>, vector<2x4x32xf32>,
    %c0_472 = arith.constant 0 : index
    %c0_473 = arith.constant 0 : index
    %c0_474 = arith.constant 0 : index
    %456 = tpu.strided_load %arg33[%c0_472, %c0_473, %c0_474] {strides = array<i32: 1, 2, 1>} : memref<2x4x32xf32, #tpu.memory_space<vmem>>, vector<2x2x32xf32>
    %c0_475 = arith.constant 0 : index
    %c1_476 = arith.constant 1 : index
    %c0_477 = arith.constant 0 : index
    %457 = tpu.strided_load %arg33[%c0_475, %c1_476, %c0_477] {strides = array<i32: 1, 2, 1>} : memref<2x4x32xf32, #tpu.memory_space<vmem>>, vector<2x2x32xf32>
    %458 = arith.maximumf %456, %457 : vector<2x2x32xf32>
    %459 = vector.shape_cast %458 : vector<2x2x32xf32> to vector<1x2x2x32xf32>
    %cst_478 = arith.constant 0.000000e+00 : f32
    %460 = vector.broadcast %cst_478 : f32 to vector<1x1x4x32xf32>
    %c0_479 = arith.constant 0 : index
    %c0_480 = arith.constant 0 : index
    %c0_481 = arith.constant 0 : index
    %c0_482 = arith.constant 0 : index
    %461 = vector.load %arg29[%c0_479, %c0_480, %c0_481, %c0_482] : memref<1x4x4x32xf32, #tpu.memory_space<vmem>>, vector<1x1x4x32xf32>
    tpu.vector_store %arg29[%c0_479, %c0_480, %c0_481, %c0_482], %460 {strides = array<i32>} : memref<1x4x4x32xf32, #tpu.memory_space<vmem>>, vector<1x1x4x32xf32>,
    %cst_483 = arith.constant 0.000000e+00 : f32
    %462 = vector.broadcast %cst_483 : f32 to vector<1x1x4x32xf32>
    %c0_484 = arith.constant 0 : index
    %c3_485 = arith.constant 3 : index
    %c0_486 = arith.constant 0 : index
    %c0_487 = arith.constant 0 : index
    %463 = vector.load %arg29[%c0_484, %c3_485, %c0_486, %c0_487] : memref<1x4x4x32xf32, #tpu.memory_space<vmem>>, vector<1x1x4x32xf32>
    tpu.vector_store %arg29[%c0_484, %c3_485, %c0_486, %c0_487], %462 {strides = array<i32>} : memref<1x4x4x32xf32, #tpu.memory_space<vmem>>, vector<1x1x4x32xf32>,
    %cst_488 = arith.constant 0.000000e+00 : f32
    %464 = vector.broadcast %cst_488 : f32 to vector<1x4x1x32xf32>
    %c0_489 = arith.constant 0 : index
    %c0_490 = arith.constant 0 : index
    %c0_491 = arith.constant 0 : index
    %c0_492 = arith.constant 0 : index
    %465 = vector.load %arg29[%c0_489, %c0_490, %c0_491, %c0_492] : memref<1x4x4x32xf32, #tpu.memory_space<vmem>>, vector<1x4x1x32xf32>
    tpu.vector_store %arg29[%c0_489, %c0_490, %c0_491, %c0_492], %464 {strides = array<i32>} : memref<1x4x4x32xf32, #tpu.memory_space<vmem>>, vector<1x4x1x32xf32>,
    %cst_493 = arith.constant 0.000000e+00 : f32
    %466 = vector.broadcast %cst_493 : f32 to vector<1x4x1x32xf32>
    %c0_494 = arith.constant 0 : index
    %c0_495 = arith.constant 0 : index
    %c3_496 = arith.constant 3 : index
    %c0_497 = arith.constant 0 : index
    %467 = vector.load %arg29[%c0_494, %c0_495, %c3_496, %c0_497] : memref<1x4x4x32xf32, #tpu.memory_space<vmem>>, vector<1x4x1x32xf32>
    tpu.vector_store %arg29[%c0_494, %c0_495, %c3_496, %c0_497], %466 {strides = array<i32>} : memref<1x4x4x32xf32, #tpu.memory_space<vmem>>, vector<1x4x1x32xf32>,
    %c0_498 = arith.constant 0 : index
    %c1_499 = arith.constant 1 : index
    %c1_500 = arith.constant 1 : index
    %c0_501 = arith.constant 0 : index
    %468 = vector.load %arg29[%c0_498, %c1_499, %c1_500, %c0_501] : memref<1x4x4x32xf32, #tpu.memory_space<vmem>>, vector<1x2x2x32xf32>
    tpu.vector_store %arg29[%c0_498, %c1_499, %c1_500, %c0_501], %459 {strides = array<i32>} : memref<1x4x4x32xf32, #tpu.memory_space<vmem>>, vector<1x2x2x32xf32>,
    %cst_502 = arith.constant 0.000000e+00 : f32
    %469 = vector.broadcast %cst_502 : f32 to vector<4x64xf32>
    %c0_503 = arith.constant 0 : index
    %c0_504 = arith.constant 0 : index
    %c0_505 = arith.constant 0 : index
    %c0_506 = arith.constant 0 : index
    %470 = vector.load %arg29[%c0_503, %c0_504, %c0_505, %c0_506] : memref<1x4x4x32xf32, #tpu.memory_space<vmem>>, vector<1x4x2x32xf32>
    %471 = vector.extract_strided_slice %470 {offsets = [0, 0, 0, 0], sizes = [1, 2, 2, 32], strides = [1, 1, 1, 1]} : vector<1x4x2x32xf32> to vector<1x2x2x32xf32>
    %472 = vector.shape_cast %471 : vector<1x2x2x32xf32> to vector<4x32xf32>
    %c0_507 = arith.constant 0 : index
    %c0_508 = arith.constant 0 : index
    %c0_509 = arith.constant 0 : index
    %473 = vector.load %arg14[%c0_507, %c0_508, %c0_509] : memref<9x32x64xf32, #tpu.memory_space<vmem>>, vector<1x32x64xf32>
    %474 = vector.shape_cast %473 : vector<1x32x64xf32> to vector<32x64xf32>
    %cst_510 = arith.constant dense<0.000000e+00> : vector<4x64xf32>
    %475 = tpu.matmul %472, %474, %cst_510 {dimension_numbers = #tpu.dot_dimension_numbers<[1], [0], [0], [1], [0, 0, 1, 1], [], []>} : vector<4x32xf32>, vector<32x64xf32>, vector<4x64xf32> -> vector<4x64xf32>
    %476 = arith.addf %469, %475 : vector<4x64xf32>
    %477 = vector.extract_strided_slice %470 {offsets = [0, 1, 0, 0], sizes = [1, 2, 2, 32], strides = [1, 1, 1, 1]} : vector<1x4x2x32xf32> to vector<1x2x2x32xf32>
    %478 = vector.shape_cast %477 : vector<1x2x2x32xf32> to vector<4x32xf32>
    %c3_511 = arith.constant 3 : index
    %c0_512 = arith.constant 0 : index
    %c0_513 = arith.constant 0 : index
    %479 = vector.load %arg14[%c3_511, %c0_512, %c0_513] : memref<9x32x64xf32, #tpu.memory_space<vmem>>, vector<1x32x64xf32>
    %480 = vector.shape_cast %479 : vector<1x32x64xf32> to vector<32x64xf32>
    %cst_514 = arith.constant dense<0.000000e+00> : vector<4x64xf32>
    %481 = tpu.matmul %478, %480, %cst_514 {dimension_numbers = #tpu.dot_dimension_numbers<[1], [0], [0], [1], [0, 0, 1, 1], [], []>} : vector<4x32xf32>, vector<32x64xf32>, vector<4x64xf32> -> vector<4x64xf32>
    %482 = arith.addf %476, %481 : vector<4x64xf32>
    %483 = vector.extract_strided_slice %470 {offsets = [0, 2, 0, 0], sizes = [1, 2, 2, 32], strides = [1, 1, 1, 1]} : vector<1x4x2x32xf32> to vector<1x2x2x32xf32>
    %484 = vector.shape_cast %483 : vector<1x2x2x32xf32> to vector<4x32xf32>
    %c6_515 = arith.constant 6 : index
    %c0_516 = arith.constant 0 : index
    %c0_517 = arith.constant 0 : index
    %485 = vector.load %arg14[%c6_515, %c0_516, %c0_517] : memref<9x32x64xf32, #tpu.memory_space<vmem>>, vector<1x32x64xf32>
    %486 = vector.shape_cast %485 : vector<1x32x64xf32> to vector<32x64xf32>
    %cst_518 = arith.constant dense<0.000000e+00> : vector<4x64xf32>
    %487 = tpu.matmul %484, %486, %cst_518 {dimension_numbers = #tpu.dot_dimension_numbers<[1], [0], [0], [1], [0, 0, 1, 1], [], []>} : vector<4x32xf32>, vector<32x64xf32>, vector<4x64xf32> -> vector<4x64xf32>
    %488 = arith.addf %482, %487 : vector<4x64xf32>
    %c0_519 = arith.constant 0 : index
    %c0_520 = arith.constant 0 : index
    %c1_521 = arith.constant 1 : index
    %c0_522 = arith.constant 0 : index
    %489 = vector.load %arg29[%c0_519, %c0_520, %c1_521, %c0_522] : memref<1x4x4x32xf32, #tpu.memory_space<vmem>>, vector<1x4x2x32xf32>
    %490 = vector.extract_strided_slice %489 {offsets = [0, 0, 0, 0], sizes = [1, 2, 2, 32], strides = [1, 1, 1, 1]} : vector<1x4x2x32xf32> to vector<1x2x2x32xf32>
    %491 = vector.shape_cast %490 : vector<1x2x2x32xf32> to vector<4x32xf32>
    %c1_523 = arith.constant 1 : index
    %c0_524 = arith.constant 0 : index
    %c0_525 = arith.constant 0 : index
    %492 = vector.load %arg14[%c1_523, %c0_524, %c0_525] : memref<9x32x64xf32, #tpu.memory_space<vmem>>, vector<1x32x64xf32>
    %493 = vector.shape_cast %492 : vector<1x32x64xf32> to vector<32x64xf32>
    %cst_526 = arith.constant dense<0.000000e+00> : vector<4x64xf32>
    %494 = tpu.matmul %491, %493, %cst_526 {dimension_numbers = #tpu.dot_dimension_numbers<[1], [0], [0], [1], [0, 0, 1, 1], [], []>} : vector<4x32xf32>, vector<32x64xf32>, vector<4x64xf32> -> vector<4x64xf32>
    %495 = arith.addf %488, %494 : vector<4x64xf32>
    %496 = vector.extract_strided_slice %489 {offsets = [0, 1, 0, 0], sizes = [1, 2, 2, 32], strides = [1, 1, 1, 1]} : vector<1x4x2x32xf32> to vector<1x2x2x32xf32>
    %497 = vector.shape_cast %496 : vector<1x2x2x32xf32> to vector<4x32xf32>
    %c4_527 = arith.constant 4 : index
    %c0_528 = arith.constant 0 : index
    %c0_529 = arith.constant 0 : index
    %498 = vector.load %arg14[%c4_527, %c0_528, %c0_529] : memref<9x32x64xf32, #tpu.memory_space<vmem>>, vector<1x32x64xf32>
    %499 = vector.shape_cast %498 : vector<1x32x64xf32> to vector<32x64xf32>
    %cst_530 = arith.constant dense<0.000000e+00> : vector<4x64xf32>
    %500 = tpu.matmul %497, %499, %cst_530 {dimension_numbers = #tpu.dot_dimension_numbers<[1], [0], [0], [1], [0, 0, 1, 1], [], []>} : vector<4x32xf32>, vector<32x64xf32>, vector<4x64xf32> -> vector<4x64xf32>
    %501 = arith.addf %495, %500 : vector<4x64xf32>
    %502 = vector.extract_strided_slice %489 {offsets = [0, 2, 0, 0], sizes = [1, 2, 2, 32], strides = [1, 1, 1, 1]} : vector<1x4x2x32xf32> to vector<1x2x2x32xf32>
    %503 = vector.shape_cast %502 : vector<1x2x2x32xf32> to vector<4x32xf32>
    %c7_531 = arith.constant 7 : index
    %c0_532 = arith.constant 0 : index
    %c0_533 = arith.constant 0 : index
    %504 = vector.load %arg14[%c7_531, %c0_532, %c0_533] : memref<9x32x64xf32, #tpu.memory_space<vmem>>, vector<1x32x64xf32>
    %505 = vector.shape_cast %504 : vector<1x32x64xf32> to vector<32x64xf32>
    %cst_534 = arith.constant dense<0.000000e+00> : vector<4x64xf32>
    %506 = tpu.matmul %503, %505, %cst_534 {dimension_numbers = #tpu.dot_dimension_numbers<[1], [0], [0], [1], [0, 0, 1, 1], [], []>} : vector<4x32xf32>, vector<32x64xf32>, vector<4x64xf32> -> vector<4x64xf32>
    %507 = arith.addf %501, %506 : vector<4x64xf32>
    %c0_535 = arith.constant 0 : index
    %c0_536 = arith.constant 0 : index
    %c2_537 = arith.constant 2 : index
    %c0_538 = arith.constant 0 : index
    %508 = vector.load %arg29[%c0_535, %c0_536, %c2_537, %c0_538] : memref<1x4x4x32xf32, #tpu.memory_space<vmem>>, vector<1x4x2x32xf32>
    %509 = vector.extract_strided_slice %508 {offsets = [0, 0, 0, 0], sizes = [1, 2, 2, 32], strides = [1, 1, 1, 1]} : vector<1x4x2x32xf32> to vector<1x2x2x32xf32>
    %510 = vector.shape_cast %509 : vector<1x2x2x32xf32> to vector<4x32xf32>
    %c2_539 = arith.constant 2 : index
    %c0_540 = arith.constant 0 : index
    %c0_541 = arith.constant 0 : index
    %511 = vector.load %arg14[%c2_539, %c0_540, %c0_541] : memref<9x32x64xf32, #tpu.memory_space<vmem>>, vector<1x32x64xf32>
    %512 = vector.shape_cast %511 : vector<1x32x64xf32> to vector<32x64xf32>
    %cst_542 = arith.constant dense<0.000000e+00> : vector<4x64xf32>
    %513 = tpu.matmul %510, %512, %cst_542 {dimension_numbers = #tpu.dot_dimension_numbers<[1], [0], [0], [1], [0, 0, 1, 1], [], []>} : vector<4x32xf32>, vector<32x64xf32>, vector<4x64xf32> -> vector<4x64xf32>
    %514 = arith.addf %507, %513 : vector<4x64xf32>
    %515 = vector.extract_strided_slice %508 {offsets = [0, 1, 0, 0], sizes = [1, 2, 2, 32], strides = [1, 1, 1, 1]} : vector<1x4x2x32xf32> to vector<1x2x2x32xf32>
    %516 = vector.shape_cast %515 : vector<1x2x2x32xf32> to vector<4x32xf32>
    %c5_543 = arith.constant 5 : index
    %c0_544 = arith.constant 0 : index
    %c0_545 = arith.constant 0 : index
    %517 = vector.load %arg14[%c5_543, %c0_544, %c0_545] : memref<9x32x64xf32, #tpu.memory_space<vmem>>, vector<1x32x64xf32>
    %518 = vector.shape_cast %517 : vector<1x32x64xf32> to vector<32x64xf32>
    %cst_546 = arith.constant dense<0.000000e+00> : vector<4x64xf32>
    %519 = tpu.matmul %516, %518, %cst_546 {dimension_numbers = #tpu.dot_dimension_numbers<[1], [0], [0], [1], [0, 0, 1, 1], [], []>} : vector<4x32xf32>, vector<32x64xf32>, vector<4x64xf32> -> vector<4x64xf32>
    %520 = arith.addf %514, %519 : vector<4x64xf32>
    %521 = vector.extract_strided_slice %508 {offsets = [0, 2, 0, 0], sizes = [1, 2, 2, 32], strides = [1, 1, 1, 1]} : vector<1x4x2x32xf32> to vector<1x2x2x32xf32>
    %522 = vector.shape_cast %521 : vector<1x2x2x32xf32> to vector<4x32xf32>
    %c8_547 = arith.constant 8 : index
    %c0_548 = arith.constant 0 : index
    %c0_549 = arith.constant 0 : index
    %523 = vector.load %arg14[%c8_547, %c0_548, %c0_549] : memref<9x32x64xf32, #tpu.memory_space<vmem>>, vector<1x32x64xf32>
    %524 = vector.shape_cast %523 : vector<1x32x64xf32> to vector<32x64xf32>
    %cst_550 = arith.constant dense<0.000000e+00> : vector<4x64xf32>
    %525 = tpu.matmul %522, %524, %cst_550 {dimension_numbers = #tpu.dot_dimension_numbers<[1], [0], [0], [1], [0, 0, 1, 1], [], []>} : vector<4x32xf32>, vector<32x64xf32>, vector<4x64xf32> -> vector<4x64xf32>
    %526 = arith.addf %520, %525 : vector<4x64xf32>
    %c0_551 = arith.constant 0 : index
    %c0_552 = arith.constant 0 : index
    %527 = vector.load %arg15[%c0_551, %c0_552] : memref<1x64xf32, #tpu.memory_space<vmem>>, vector<1x64xf32>
    %528 = vector.broadcast %527 : vector<1x64xf32> to vector<4x64xf32>
    %529 = arith.addf %526, %528 : vector<4x64xf32>
    %cst_553 = arith.constant 0.000000e+00 : f32
    %530 = vector.broadcast %cst_553 : f32 to vector<4x64xf32>
    %531 = arith.maximumf %529, %530 : vector<4x64xf32>
    %532 = vector.shape_cast %531 : vector<4x64xf32> to vector<1x2x2x64xf32>
    %cst_554 = arith.constant 0.000000e+00 : f32
    %533 = vector.broadcast %cst_554 : f32 to vector<1x1x4x64xf32>
    %c0_555 = arith.constant 0 : index
    %c0_556 = arith.constant 0 : index
    %c0_557 = arith.constant 0 : index
    %c0_558 = arith.constant 0 : index
    %534 = vector.load %arg30[%c0_555, %c0_556, %c0_557, %c0_558] : memref<1x4x4x64xf32, #tpu.memory_space<vmem>>, vector<1x1x4x64xf32>
    tpu.vector_store %arg30[%c0_555, %c0_556, %c0_557, %c0_558], %533 {strides = array<i32>} : memref<1x4x4x64xf32, #tpu.memory_space<vmem>>, vector<1x1x4x64xf32>,
    %cst_559 = arith.constant 0.000000e+00 : f32
    %535 = vector.broadcast %cst_559 : f32 to vector<1x1x4x64xf32>
    %c0_560 = arith.constant 0 : index
    %c3_561 = arith.constant 3 : index
    %c0_562 = arith.constant 0 : index
    %c0_563 = arith.constant 0 : index
    %536 = vector.load %arg30[%c0_560, %c3_561, %c0_562, %c0_563] : memref<1x4x4x64xf32, #tpu.memory_space<vmem>>, vector<1x1x4x64xf32>
    tpu.vector_store %arg30[%c0_560, %c3_561, %c0_562, %c0_563], %535 {strides = array<i32>} : memref<1x4x4x64xf32, #tpu.memory_space<vmem>>, vector<1x1x4x64xf32>,
    %cst_564 = arith.constant 0.000000e+00 : f32
    %537 = vector.broadcast %cst_564 : f32 to vector<1x4x1x64xf32>
    %c0_565 = arith.constant 0 : index
    %c0_566 = arith.constant 0 : index
    %c0_567 = arith.constant 0 : index
    %c0_568 = arith.constant 0 : index
    %538 = vector.load %arg30[%c0_565, %c0_566, %c0_567, %c0_568] : memref<1x4x4x64xf32, #tpu.memory_space<vmem>>, vector<1x4x1x64xf32>
    tpu.vector_store %arg30[%c0_565, %c0_566, %c0_567, %c0_568], %537 {strides = array<i32>} : memref<1x4x4x64xf32, #tpu.memory_space<vmem>>, vector<1x4x1x64xf32>,
    %cst_569 = arith.constant 0.000000e+00 : f32
    %539 = vector.broadcast %cst_569 : f32 to vector<1x4x1x64xf32>
    %c0_570 = arith.constant 0 : index
    %c0_571 = arith.constant 0 : index
    %c3_572 = arith.constant 3 : index
    %c0_573 = arith.constant 0 : index
    %540 = vector.load %arg30[%c0_570, %c0_571, %c3_572, %c0_573] : memref<1x4x4x64xf32, #tpu.memory_space<vmem>>, vector<1x4x1x64xf32>
    tpu.vector_store %arg30[%c0_570, %c0_571, %c3_572, %c0_573], %539 {strides = array<i32>} : memref<1x4x4x64xf32, #tpu.memory_space<vmem>>, vector<1x4x1x64xf32>,
    %c0_574 = arith.constant 0 : index
    %c1_575 = arith.constant 1 : index
    %c1_576 = arith.constant 1 : index
    %c0_577 = arith.constant 0 : index
    %541 = vector.load %arg30[%c0_574, %c1_575, %c1_576, %c0_577] : memref<1x4x4x64xf32, #tpu.memory_space<vmem>>, vector<1x2x2x64xf32>
    tpu.vector_store %arg30[%c0_574, %c1_575, %c1_576, %c0_577], %532 {strides = array<i32>} : memref<1x4x4x64xf32, #tpu.memory_space<vmem>>, vector<1x2x2x64xf32>,
    %cst_578 = arith.constant 0.000000e+00 : f32
    %542 = vector.broadcast %cst_578 : f32 to vector<4x64xf32>
    %c0_579 = arith.constant 0 : index
    %c0_580 = arith.constant 0 : index
    %c0_581 = arith.constant 0 : index
    %c0_582 = arith.constant 0 : index
    %543 = vector.load %arg30[%c0_579, %c0_580, %c0_581, %c0_582] : memref<1x4x4x64xf32, #tpu.memory_space<vmem>>, vector<1x4x2x64xf32>
    %544 = vector.extract_strided_slice %543 {offsets = [0, 0, 0, 0], sizes = [1, 2, 2, 64], strides = [1, 1, 1, 1]} : vector<1x4x2x64xf32> to vector<1x2x2x64xf32>
    %545 = vector.shape_cast %544 : vector<1x2x2x64xf32> to vector<4x64xf32>
    %c0_583 = arith.constant 0 : index
    %c0_584 = arith.constant 0 : index
    %c0_585 = arith.constant 0 : index
    %546 = vector.load %arg16[%c0_583, %c0_584, %c0_585] : memref<9x64x64xf32, #tpu.memory_space<vmem>>, vector<1x64x64xf32>
    %547 = vector.shape_cast %546 : vector<1x64x64xf32> to vector<64x64xf32>
    %cst_586 = arith.constant dense<0.000000e+00> : vector<4x64xf32>
    %548 = tpu.matmul %545, %547, %cst_586 {dimension_numbers = #tpu.dot_dimension_numbers<[1], [0], [0], [1], [0, 0, 1, 1], [], []>} : vector<4x64xf32>, vector<64x64xf32>, vector<4x64xf32> -> vector<4x64xf32>
    %549 = arith.addf %542, %548 : vector<4x64xf32>
    %550 = vector.extract_strided_slice %543 {offsets = [0, 1, 0, 0], sizes = [1, 2, 2, 64], strides = [1, 1, 1, 1]} : vector<1x4x2x64xf32> to vector<1x2x2x64xf32>
    %551 = vector.shape_cast %550 : vector<1x2x2x64xf32> to vector<4x64xf32>
    %c3_587 = arith.constant 3 : index
    %c0_588 = arith.constant 0 : index
    %c0_589 = arith.constant 0 : index
    %552 = vector.load %arg16[%c3_587, %c0_588, %c0_589] : memref<9x64x64xf32, #tpu.memory_space<vmem>>, vector<1x64x64xf32>
    %553 = vector.shape_cast %552 : vector<1x64x64xf32> to vector<64x64xf32>
    %cst_590 = arith.constant dense<0.000000e+00> : vector<4x64xf32>
    %554 = tpu.matmul %551, %553, %cst_590 {dimension_numbers = #tpu.dot_dimension_numbers<[1], [0], [0], [1], [0, 0, 1, 1], [], []>} : vector<4x64xf32>, vector<64x64xf32>, vector<4x64xf32> -> vector<4x64xf32>
    %555 = arith.addf %549, %554 : vector<4x64xf32>
    %556 = vector.extract_strided_slice %543 {offsets = [0, 2, 0, 0], sizes = [1, 2, 2, 64], strides = [1, 1, 1, 1]} : vector<1x4x2x64xf32> to vector<1x2x2x64xf32>
    %557 = vector.shape_cast %556 : vector<1x2x2x64xf32> to vector<4x64xf32>
    %c6_591 = arith.constant 6 : index
    %c0_592 = arith.constant 0 : index
    %c0_593 = arith.constant 0 : index
    %558 = vector.load %arg16[%c6_591, %c0_592, %c0_593] : memref<9x64x64xf32, #tpu.memory_space<vmem>>, vector<1x64x64xf32>
    %559 = vector.shape_cast %558 : vector<1x64x64xf32> to vector<64x64xf32>
    %cst_594 = arith.constant dense<0.000000e+00> : vector<4x64xf32>
    %560 = tpu.matmul %557, %559, %cst_594 {dimension_numbers = #tpu.dot_dimension_numbers<[1], [0], [0], [1], [0, 0, 1, 1], [], []>} : vector<4x64xf32>, vector<64x64xf32>, vector<4x64xf32> -> vector<4x64xf32>
    %561 = arith.addf %555, %560 : vector<4x64xf32>
    %c0_595 = arith.constant 0 : index
    %c0_596 = arith.constant 0 : index
    %c1_597 = arith.constant 1 : index
    %c0_598 = arith.constant 0 : index
    %562 = vector.load %arg30[%c0_595, %c0_596, %c1_597, %c0_598] : memref<1x4x4x64xf32, #tpu.memory_space<vmem>>, vector<1x4x2x64xf32>
    %563 = vector.extract_strided_slice %562 {offsets = [0, 0, 0, 0], sizes = [1, 2, 2, 64], strides = [1, 1, 1, 1]} : vector<1x4x2x64xf32> to vector<1x2x2x64xf32>
    %564 = vector.shape_cast %563 : vector<1x2x2x64xf32> to vector<4x64xf32>
    %c1_599 = arith.constant 1 : index
    %c0_600 = arith.constant 0 : index
    %c0_601 = arith.constant 0 : index
    %565 = vector.load %arg16[%c1_599, %c0_600, %c0_601] : memref<9x64x64xf32, #tpu.memory_space<vmem>>, vector<1x64x64xf32>
    %566 = vector.shape_cast %565 : vector<1x64x64xf32> to vector<64x64xf32>
    %cst_602 = arith.constant dense<0.000000e+00> : vector<4x64xf32>
    %567 = tpu.matmul %564, %566, %cst_602 {dimension_numbers = #tpu.dot_dimension_numbers<[1], [0], [0], [1], [0, 0, 1, 1], [], []>} : vector<4x64xf32>, vector<64x64xf32>, vector<4x64xf32> -> vector<4x64xf32>
    %568 = arith.addf %561, %567 : vector<4x64xf32>
    %569 = vector.extract_strided_slice %562 {offsets = [0, 1, 0, 0], sizes = [1, 2, 2, 64], strides = [1, 1, 1, 1]} : vector<1x4x2x64xf32> to vector<1x2x2x64xf32>
    %570 = vector.shape_cast %569 : vector<1x2x2x64xf32> to vector<4x64xf32>
    %c4_603 = arith.constant 4 : index
    %c0_604 = arith.constant 0 : index
    %c0_605 = arith.constant 0 : index
    %571 = vector.load %arg16[%c4_603, %c0_604, %c0_605] : memref<9x64x64xf32, #tpu.memory_space<vmem>>, vector<1x64x64xf32>
    %572 = vector.shape_cast %571 : vector<1x64x64xf32> to vector<64x64xf32>
    %cst_606 = arith.constant dense<0.000000e+00> : vector<4x64xf32>
    %573 = tpu.matmul %570, %572, %cst_606 {dimension_numbers = #tpu.dot_dimension_numbers<[1], [0], [0], [1], [0, 0, 1, 1], [], []>} : vector<4x64xf32>, vector<64x64xf32>, vector<4x64xf32> -> vector<4x64xf32>
    %574 = arith.addf %568, %573 : vector<4x64xf32>
    %575 = vector.extract_strided_slice %562 {offsets = [0, 2, 0, 0], sizes = [1, 2, 2, 64], strides = [1, 1, 1, 1]} : vector<1x4x2x64xf32> to vector<1x2x2x64xf32>
    %576 = vector.shape_cast %575 : vector<1x2x2x64xf32> to vector<4x64xf32>
    %c7_607 = arith.constant 7 : index
    %c0_608 = arith.constant 0 : index
    %c0_609 = arith.constant 0 : index
    %577 = vector.load %arg16[%c7_607, %c0_608, %c0_609] : memref<9x64x64xf32, #tpu.memory_space<vmem>>, vector<1x64x64xf32>
    %578 = vector.shape_cast %577 : vector<1x64x64xf32> to vector<64x64xf32>
    %cst_610 = arith.constant dense<0.000000e+00> : vector<4x64xf32>
    %579 = tpu.matmul %576, %578, %cst_610 {dimension_numbers = #tpu.dot_dimension_numbers<[1], [0], [0], [1], [0, 0, 1, 1], [], []>} : vector<4x64xf32>, vector<64x64xf32>, vector<4x64xf32> -> vector<4x64xf32>
    %580 = arith.addf %574, %579 : vector<4x64xf32>
    %c0_611 = arith.constant 0 : index
    %c0_612 = arith.constant 0 : index
    %c2_613 = arith.constant 2 : index
    %c0_614 = arith.constant 0 : index
    %581 = vector.load %arg30[%c0_611, %c0_612, %c2_613, %c0_614] : memref<1x4x4x64xf32, #tpu.memory_space<vmem>>, vector<1x4x2x64xf32>
    %582 = vector.extract_strided_slice %581 {offsets = [0, 0, 0, 0], sizes = [1, 2, 2, 64], strides = [1, 1, 1, 1]} : vector<1x4x2x64xf32> to vector<1x2x2x64xf32>
    %583 = vector.shape_cast %582 : vector<1x2x2x64xf32> to vector<4x64xf32>
    %c2_615 = arith.constant 2 : index
    %c0_616 = arith.constant 0 : index
    %c0_617 = arith.constant 0 : index
    %584 = vector.load %arg16[%c2_615, %c0_616, %c0_617] : memref<9x64x64xf32, #tpu.memory_space<vmem>>, vector<1x64x64xf32>
    %585 = vector.shape_cast %584 : vector<1x64x64xf32> to vector<64x64xf32>
    %cst_618 = arith.constant dense<0.000000e+00> : vector<4x64xf32>
    %586 = tpu.matmul %583, %585, %cst_618 {dimension_numbers = #tpu.dot_dimension_numbers<[1], [0], [0], [1], [0, 0, 1, 1], [], []>} : vector<4x64xf32>, vector<64x64xf32>, vector<4x64xf32> -> vector<4x64xf32>
    %587 = arith.addf %580, %586 : vector<4x64xf32>
    %588 = vector.extract_strided_slice %581 {offsets = [0, 1, 0, 0], sizes = [1, 2, 2, 64], strides = [1, 1, 1, 1]} : vector<1x4x2x64xf32> to vector<1x2x2x64xf32>
    %589 = vector.shape_cast %588 : vector<1x2x2x64xf32> to vector<4x64xf32>
    %c5_619 = arith.constant 5 : index
    %c0_620 = arith.constant 0 : index
    %c0_621 = arith.constant 0 : index
    %590 = vector.load %arg16[%c5_619, %c0_620, %c0_621] : memref<9x64x64xf32, #tpu.memory_space<vmem>>, vector<1x64x64xf32>
    %591 = vector.shape_cast %590 : vector<1x64x64xf32> to vector<64x64xf32>
    %cst_622 = arith.constant dense<0.000000e+00> : vector<4x64xf32>
    %592 = tpu.matmul %589, %591, %cst_622 {dimension_numbers = #tpu.dot_dimension_numbers<[1], [0], [0], [1], [0, 0, 1, 1], [], []>} : vector<4x64xf32>, vector<64x64xf32>, vector<4x64xf32> -> vector<4x64xf32>
    %593 = arith.addf %587, %592 : vector<4x64xf32>
    %594 = vector.extract_strided_slice %581 {offsets = [0, 2, 0, 0], sizes = [1, 2, 2, 64], strides = [1, 1, 1, 1]} : vector<1x4x2x64xf32> to vector<1x2x2x64xf32>
    %595 = vector.shape_cast %594 : vector<1x2x2x64xf32> to vector<4x64xf32>
    %c8_623 = arith.constant 8 : index
    %c0_624 = arith.constant 0 : index
    %c0_625 = arith.constant 0 : index
    %596 = vector.load %arg16[%c8_623, %c0_624, %c0_625] : memref<9x64x64xf32, #tpu.memory_space<vmem>>, vector<1x64x64xf32>
    %597 = vector.shape_cast %596 : vector<1x64x64xf32> to vector<64x64xf32>
    %cst_626 = arith.constant dense<0.000000e+00> : vector<4x64xf32>
    %598 = tpu.matmul %595, %597, %cst_626 {dimension_numbers = #tpu.dot_dimension_numbers<[1], [0], [0], [1], [0, 0, 1, 1], [], []>} : vector<4x64xf32>, vector<64x64xf32>, vector<4x64xf32> -> vector<4x64xf32>
    %599 = arith.addf %593, %598 : vector<4x64xf32>
    %c0_627 = arith.constant 0 : index
    %c0_628 = arith.constant 0 : index
    %600 = vector.load %arg17[%c0_627, %c0_628] : memref<1x64xf32, #tpu.memory_space<vmem>>, vector<1x64xf32>
    %601 = vector.broadcast %600 : vector<1x64xf32> to vector<4x64xf32>
    %602 = arith.addf %599, %601 : vector<4x64xf32>
    %cst_629 = arith.constant 0.000000e+00 : f32
    %603 = vector.broadcast %cst_629 : f32 to vector<4x64xf32>
    %604 = arith.maximumf %602, %603 : vector<4x64xf32>
    %605 = vector.shape_cast %604 : vector<4x64xf32> to vector<1x2x2x64xf32>
    %cst_630 = arith.constant dense<0xFF800000> : vector<1x2x64xf32>
    %606 = vector.multi_reduction <maximumf>, %605, %cst_630 [1] : vector<1x2x2x64xf32> to vector<1x2x64xf32>
    %c0_631 = arith.constant 0 : index
    %c0_632 = arith.constant 0 : index
    %c0_633 = arith.constant 0 : index
    %607 = vector.load %arg34[%c0_631, %c0_632, %c0_633] : memref<1x2x64xf32, #tpu.memory_space<vmem>>, vector<1x2x64xf32>
    tpu.vector_store %arg34[%c0_631, %c0_632, %c0_633], %606 {strides = array<i32>} : memref<1x2x64xf32, #tpu.memory_space<vmem>>, vector<1x2x64xf32>,
    %c0_634 = arith.constant 0 : index
    %c0_635 = arith.constant 0 : index
    %c0_636 = arith.constant 0 : index
    %608 = tpu.strided_load %arg34[%c0_634, %c0_635, %c0_636] {strides = array<i32: 1, 2, 1>} : memref<1x2x64xf32, #tpu.memory_space<vmem>>, vector<1x1x64xf32>
    %c0_637 = arith.constant 0 : index
    %c1_638 = arith.constant 1 : index
    %c0_639 = arith.constant 0 : index
    %609 = tpu.strided_load %arg34[%c0_637, %c1_638, %c0_639] {strides = array<i32: 1, 2, 1>} : memref<1x2x64xf32, #tpu.memory_space<vmem>>, vector<1x1x64xf32>
    %610 = arith.maximumf %608, %609 : vector<1x1x64xf32>
    %611 = vector.shape_cast %610 : vector<1x1x64xf32> to vector<1x1x1x64xf32>
    %cst_640 = arith.constant dense<0.000000e+00> : vector<1x64xf32>
    %612 = vector.multi_reduction <add>, %611, %cst_640 [1, 2] : vector<1x1x1x64xf32> to vector<1x64xf32>
    %cst_641 = arith.constant 1.000000e+00 : f32
    %613 = vector.broadcast %cst_641 : f32 to vector<1x64xf32>
    %614 = arith.divf %612, %613 : vector<1x64xf32>
    %c0_642 = arith.constant 0 : index
    %c0_643 = arith.constant 0 : index
    %615 = vector.load %arg18[%c0_642, %c0_643] : memref<64x128xf32, #tpu.memory_space<vmem>>, vector<64x128xf32>
    %cst_644 = arith.constant dense<0.000000e+00> : vector<1x128xf32>
    %616 = tpu.matmul %614, %615, %cst_644 {dimension_numbers = #tpu.dot_dimension_numbers<[1], [0], [0], [1], [0, 0, 1, 1], [], []>} : vector<1x64xf32>, vector<64x128xf32>, vector<1x128xf32> -> vector<1x128xf32>
    %c0_645 = arith.constant 0 : index
    %c0_646 = arith.constant 0 : index
    %617 = vector.load %arg19[%c0_645, %c0_646] : memref<1x128xf32, #tpu.memory_space<vmem>>, vector<1x128xf32>
    %618 = arith.addf %616, %617 : vector<1x128xf32>
    %cst_647 = arith.constant 0.000000e+00 : f32
    %619 = vector.broadcast %cst_647 : f32 to vector<1x128xf32>
    %620 = arith.maximumf %618, %619 : vector<1x128xf32>
    %c0_648 = arith.constant 0 : index
    %c0_649 = arith.constant 0 : index
    %621 = vector.load %arg20[%c0_648, %c0_649] : memref<128x1xf32, #tpu.memory_space<vmem>>, vector<128x1xf32>
    %cst_650 = arith.constant dense<0.000000e+00> : vector<1x1xf32>
    %622 = tpu.matmul %620, %621, %cst_650 {dimension_numbers = #tpu.dot_dimension_numbers<[1], [0], [0], [1], [0, 0, 1, 1], [], []>} : vector<1x128xf32>, vector<128x1xf32>, vector<1x1xf32> -> vector<1x1xf32>
    %c0_651 = arith.constant 0 : index
    %c0_652 = arith.constant 0 : index
    %623 = vector.load %arg21[%c0_651, %c0_652] : memref<1x1xf32, #tpu.memory_space<vmem>>, vector<1x1xf32>
    %624 = arith.addf %622, %623 : vector<1x1xf32>
    %625 = vector.shape_cast %624 : vector<1x1xf32> to vector<1x1x1xf32>
    %c0_653 = arith.constant 0 : index
    %c0_654 = arith.constant 0 : index
    %c0_655 = arith.constant 0 : index
    %626 = vector.load %arg22[%c0_653, %c0_654, %c0_655] : memref<1x1x1xf32, #tpu.memory_space<vmem>>, vector<1x1x1xf32>
    tpu.vector_store %arg22[%c0_653, %c0_654, %c0_655], %625 {strides = array<i32>} : memref<1x1x1xf32, #tpu.memory_space<vmem>>, vector<1x1x1xf32>,
    return
  }
  func.func @transform_0(%arg0: i32) -> (i32, i32, i32, i32) {
    %c0_i32 = arith.constant 0 : i32
    %c0_i32_0 = arith.constant 0 : i32
    %c0_i32_1 = arith.constant 0 : i32
    %c0_i32_2 = arith.constant 0 : i32
    return %arg0, %c0_i32, %c0_i32_0, %c0_i32_1 : i32, i32, i32, i32
  }
  func.func @transform_1(%arg0: i32) -> (i32, i32, i32) {
    %c0_i32 = arith.constant 0 : i32
    %c0_i32_0 = arith.constant 0 : i32
    %c0_i32_1 = arith.constant 0 : i32
    %c0_i32_2 = arith.constant 0 : i32
    return %c0_i32, %c0_i32_0, %c0_i32_1 : i32, i32, i32
  }
  func.func @transform_2(%arg0: i32) -> (i32, i32) {
    %c0_i32 = arith.constant 0 : i32
    %c0_i32_0 = arith.constant 0 : i32
    %c0_i32_1 = arith.constant 0 : i32
    return %c0_i32, %c0_i32_0 : i32, i32
  }
  func.func @transform_3(%arg0: i32) -> (i32, i32, i32) {
    %c0_i32 = arith.constant 0 : i32
    %c0_i32_0 = arith.constant 0 : i32
    %c0_i32_1 = arith.constant 0 : i32
    %c0_i32_2 = arith.constant 0 : i32
    return %c0_i32, %c0_i32_0, %c0_i32_1 : i32, i32, i32
  }
  func.func @transform_4(%arg0: i32) -> (i32, i32) {
    %c0_i32 = arith.constant 0 : i32
    %c0_i32_0 = arith.constant 0 : i32
    %c0_i32_1 = arith.constant 0 : i32
    return %c0_i32, %c0_i32_0 : i32, i32
  }
  func.func @transform_5(%arg0: i32) -> (i32, i32, i32) {
    %c0_i32 = arith.constant 0 : i32
    %c0_i32_0 = arith.constant 0 : i32
    %c0_i32_1 = arith.constant 0 : i32
    %c0_i32_2 = arith.constant 0 : i32
    return %c0_i32, %c0_i32_0, %c0_i32_1 : i32, i32, i32
  }
  func.func @transform_6(%arg0: i32) -> (i32, i32) {
    %c0_i32 = arith.constant 0 : i32
    %c0_i32_0 = arith.constant 0 : i32
    %c0_i32_1 = arith.constant 0 : i32
    return %c0_i32, %c0_i32_0 : i32, i32
  }
  func.func @transform_7(%arg0: i32) -> (i32, i32, i32) {
    %c0_i32 = arith.constant 0 : i32
    %c0_i32_0 = arith.constant 0 : i32
    %c0_i32_1 = arith.constant 0 : i32
    %c0_i32_2 = arith.constant 0 : i32
    return %c0_i32, %c0_i32_0, %c0_i32_1 : i32, i32, i32
  }
  func.func @transform_8(%arg0: i32) -> (i32, i32) {
    %c0_i32 = arith.constant 0 : i32
    %c0_i32_0 = arith.constant 0 : i32
    %c0_i32_1 = arith.constant 0 : i32
    return %c0_i32, %c0_i32_0 : i32, i32
  }
  func.func @transform_9(%arg0: i32) -> (i32, i32, i32) {
    %c0_i32 = arith.constant 0 : i32
    %c0_i32_0 = arith.constant 0 : i32
    %c0_i32_1 = arith.constant 0 : i32
    %c0_i32_2 = arith.constant 0 : i32
    return %c0_i32, %c0_i32_0, %c0_i32_1 : i32, i32, i32
  }
  func.func @transform_10(%arg0: i32) -> (i32, i32) {
    %c0_i32 = arith.constant 0 : i32
    %c0_i32_0 = arith.constant 0 : i32
    %c0_i32_1 = arith.constant 0 : i32
    return %c0_i32, %c0_i32_0 : i32, i32
  }
  func.func @transform_11(%arg0: i32) -> (i32, i32, i32) {
    %c0_i32 = arith.constant 0 : i32
    %c0_i32_0 = arith.constant 0 : i32
    %c0_i32_1 = arith.constant 0 : i32
    %c0_i32_2 = arith.constant 0 : i32
    return %c0_i32, %c0_i32_0, %c0_i32_1 : i32, i32, i32
  }
  func.func @transform_12(%arg0: i32) -> (i32, i32) {
    %c0_i32 = arith.constant 0 : i32
    %c0_i32_0 = arith.constant 0 : i32
    %c0_i32_1 = arith.constant 0 : i32
    return %c0_i32, %c0_i32_0 : i32, i32
  }
  func.func @transform_13(%arg0: i32) -> (i32, i32, i32) {
    %c0_i32 = arith.constant 0 : i32
    %c0_i32_0 = arith.constant 0 : i32
    %c0_i32_1 = arith.constant 0 : i32
    %c0_i32_2 = arith.constant 0 : i32
    return %c0_i32, %c0_i32_0, %c0_i32_1 : i32, i32, i32
  }
  func.func @transform_14(%arg0: i32) -> (i32, i32) {
    %c0_i32 = arith.constant 0 : i32
    %c0_i32_0 = arith.constant 0 : i32
    %c0_i32_1 = arith.constant 0 : i32
    return %c0_i32, %c0_i32_0 : i32, i32
  }
  func.func @transform_15(%arg0: i32) -> (i32, i32, i32) {
    %c0_i32 = arith.constant 0 : i32
    %c0_i32_0 = arith.constant 0 : i32
    %c0_i32_1 = arith.constant 0 : i32
    %c0_i32_2 = arith.constant 0 : i32
    return %c0_i32, %c0_i32_0, %c0_i32_1 : i32, i32, i32
  }
  func.func @transform_16(%arg0: i32) -> (i32, i32) {
    %c0_i32 = arith.constant 0 : i32
    %c0_i32_0 = arith.constant 0 : i32
    %c0_i32_1 = arith.constant 0 : i32
    return %c0_i32, %c0_i32_0 : i32, i32
  }
  func.func @transform_17(%arg0: i32) -> (i32, i32) {
    %c0_i32 = arith.constant 0 : i32
    %c0_i32_0 = arith.constant 0 : i32
    %c0_i32_1 = arith.constant 0 : i32
    return %c0_i32, %c0_i32_0 : i32, i32
  }
  func.func @transform_18(%arg0: i32) -> (i32, i32) {
    %c0_i32 = arith.constant 0 : i32
    %c0_i32_0 = arith.constant 0 : i32
    %c0_i32_1 = arith.constant 0 : i32
    return %c0_i32, %c0_i32_0 : i32, i32
  }
  func.func @transform_19(%arg0: i32) -> (i32, i32) {
    %c0_i32 = arith.constant 0 : i32
    %c0_i32_0 = arith.constant 0 : i32
    %c0_i32_1 = arith.constant 0 : i32
    return %c0_i32, %c0_i32_0 : i32, i32
  }
  func.func @transform_20(%arg0: i32) -> (i32, i32) {
    %c0_i32 = arith.constant 0 : i32
    %c0_i32_0 = arith.constant 0 : i32
    %c0_i32_1 = arith.constant 0 : i32
    return %c0_i32, %c0_i32_0 : i32, i32
  }
  func.func @transform_21(%arg0: i32) -> (i32, i32, i32) {
    %c0_i32 = arith.constant 0 : i32
    %c0_i32_0 = arith.constant 0 : i32
    %c0_i32_1 = arith.constant 0 : i32
    return %arg0, %c0_i32, %c0_i32_0 : i32, i32, i32
  }
}

</mosaic_0001>

<bundles_post_ra>
// kernel: pneunet_forward.1
= control target key start
LH: loop header
LB: loop body
LE: loop exit
PB: predicated region body
PF: predicated region fallthrough
CT: control target
= control target key end

     0   :  { %s12618_s0 = inlined_call_operand.vmem [shape: f32[2,16,16,4], index: 0, kind: input, shape index: {}]   ;;  %s12619_s1 = inlined_call_operand.hbm [shape: f32[9,4,8], index: 1, kind: input, shape index: {}]   ;;  %s12620_s2 = inlined_call_operand.vmem [shape: f32[1,8], index: 2, kind: input, shape index: {}]   ;;  %s12621_s3 = inlined_call_operand.hbm [shape: f32[9,8,8], index: 3, kind: input, shape index: {}]   ;;  %s12622_s4 = inlined_call_operand.vmem [shape: f32[1,8], index: 4, kind: input, shape index: {}]   ;;  %s12623_s5 = inlined_call_operand.vmem [shape: f32[9,8,16], index: 5, kind: input, shape index: {}]   ;;  %s12624_s6 = inlined_call_operand.vmem [shape: f32[1,16], index: 6, kind: input, shape index: {}]   ;;  %s12625_s7 = inlined_call_operand.hbm [shape: f32[9,16,16], index: 7, kind: input, shape index: {}]   ;;  %s12626_s8 = inlined_call_operand.vmem [shape: f32[1,16], index: 8, kind: input, shape index: {}]   ;;  %s12627_s9 = inlined_call_operand.hbm [shape: f32[9,16,32], index: 9, kind: input, shape index: {}]   ;;  %s12628_s10 = inlined_call_operand.vmem [shape: f32[1,32], index: 10, kind: input, shape index: {}]   ;;  %s12629_s11 = inlined_call_operand.hbm [shape: f32[9,32,32], index: 11, kind: input, shape index: {}]   ;;  %s12630_s12 = inlined_call_operand.vmem [shape: f32[1,32], index: 12, kind: input, shape index: {}]   ;;  %s12631_s13 = inlined_call_operand.hbm [shape: f32[9,32,64], index: 13, kind: input, shape index: {}]   ;;  %s12632_s14 = inlined_call_operand.vmem [shape: f32[1,64], index: 14, kind: input, shape index: {}]   ;;  %s12633_s15 = inlined_call_operand.vmem [shape: f32[9,64,64], index: 15, kind: input, shape index: {}]   ;;  %s12634_s16 = inlined_call_operand.vmem [shape: f32[1,64], index: 16, kind: input, shape index: {}]   ;;  %s12635_s17 = inlined_call_operand.hbm [shape: f32[64,128], index: 17, kind: input, shape index: {}]   ;;  %s12636_s18 = inlined_call_operand.vmem [shape: f32[1,128], index: 18, kind: input, shape index: {}]   ;;  %s12637_s19 = inlined_call_operand.hbm [shape: f32[128,1], index: 19, kind: input, shape index: {}]   ;;  %s12638_s20 = inlined_call_operand.<no memory space> [shape: f32[1,1], index: 20, kind: input, shape index: {}]   ;;  %s12639_s21 = inlined_call_operand.vmem [shape: f32[2,1,1], index: 21, kind: output, shape index: {}]  }
   0x1   :  { %12647 = sst [smem:[#allocation85_spill]] %s12618_s0  ;;  %v26_v0 = vstv %s12638_s20 }
   0x2   :  { %12648 = sst [smem:[#allocation86_spill]] %s12619_s1  ;;  %27 = vst [vmem:[#allocation14] sm:$0x1] %v26_v0 }
   0x3   :  { %12649 = sst [smem:[#allocation87_spill]] %s12620_s2 }
   0x4   :  { %12650 = sst [smem:[#allocation88_spill]] %s12621_s3 }
   0x5   :  { %12651 = sst [smem:[#allocation89_spill]] %s12622_s4 }
   0x6   :  { %12652 = sst [smem:[#allocation90_spill]] %s12623_s5 }
   0x7   :  { %12653 = sst [smem:[#allocation91_spill]] %s12627_s9 }
   0x8   :  { %12654 = sst [smem:[#allocation92_spill]] %s12631_s13 }
   0x9   :  { %12655 = sst [smem:[#allocation93_spill]] %s12639_s21 }
   0xa   :  { %28 = vsyncpa [#allocation16], 0 }
   0xb   :  { %29 = vsyncpa [#allocation18], 0 }
   0xc   :  { %30 = vsyncpa [#allocation21], 0 }
   0xd   :  { %31 = vsyncpa [#allocation24], 0 }
   0xe   :  { %32 = vsyncpa [#allocation27], 0  ;;  %s9105_s26 = smov 0  }
   0xf LB: > { %12656 = sst [smem:[#allocation33_spill]] %s8977_s26  ;;  %s9114_s29 = sadd.s32 4294967295, %s8977_s26   ;;  %s8977_s26 = sphi %s9105_s26, %s38_s26  }
  0x10   : > { %s12657_s28 = sld [smem:[#allocation88_spill]]  ;;  %p7727_p0 = scmp.ge.s32.totalorder %s8977_s26, 1 }
  0x11   : > { %p515_p1 = scmp.lt.s32.totalorder %s8977_s26, 3  ;;  %p8665_p2 = scmp.eq.s32.totalorder %s9114_s29, 0 }
  0x12   : > { %s8979_s4 = smov [#allocation17]   ;;  %s12659_s9 = sld [smem:[#allocation91_spill]] }
  0x13   : > { %p9119_p3 = pnand %p7727_p0, %p515_p1  ;;  %s545_s30 = sshll.u32 %s8979_s4, 4  ;;  %s546_s30 = int_to_ptr.vmem [resolvable:$true] %s545_s30 }
  0x14   : > { %s8980_s24 = smov [#allocation20]   ;;  %s12661_s13 = sld [smem:[#allocation92_spill]] }
  0x15   : > { %p8640_p4 = pneg %p9119_p3  ;;  %s585_s2 = sshll.u32 %s8980_s24, 4  ;;  %s586_s2 = int_to_ptr.vmem [resolvable:$true] %s585_s2 }
  0x16   : > { %s543_s20 = sshll.u32 %s12657_s28, 4  ;;  %s8981_s28 = smov 128   ;;  %s544_s20 = int_to_ptr.hbm [resolvable:$true] %s543_s20 }
  0x17   : > { %p9130_p5 = pnand %p8665_p2, %p8640_p4  ;;  %s8982_s4 = smov 8  }
  0x18   : > { %s583_s23 = sshll.u32 %s12659_s9, 4  ;;  %s8983_s5 = smov [#allocation23]   ;;  %s584_s23 = int_to_ptr.hbm [resolvable:$true] %s583_s23 }
  0x19   : > { %8646 = dma.hbm_to_vmem [thread:$0]  (!%p9130_p5), %s544_s20, 1152, %s546_s30, [#allocation18], %s8981_s28, %s8981_s28, %s8982_s4  }
  0x1a   : > { %s617_s3 = sshll.u32 %s12661_s13, 4  ;;  %s619_s22 = sshll.u32 %s8983_s5, 4  ;;  %s618_s3 = int_to_ptr.hbm [resolvable:$true] %s617_s3  ;;  %s620_s22 = int_to_ptr.vmem [resolvable:$true] %s619_s22 }
  0x1b   : > { %8652 = dma.hbm_to_vmem [thread:$0]  (!%p9130_p5), %s584_s23, 2304, %s586_s2, [#allocation21], %s8981_s28, %s8981_s28, %s8982_s4  }
  0x1c   : > { %s12662_s27 = sld [smem:[#allocation86_spill]]  ;;  %s8984_s20 = smov [#allocation15]  }
  0x1d   : > { %8658 = dma.hbm_to_vmem [thread:$0]  (!%p9130_p5), %s618_s3, 4608, %s620_s22, [#allocation24], %s8981_s28, %s8981_s28, %s8982_s4  }
  0x1e   : > { %s528_s30 = sshll.u32 %s8984_s20, 4  ;;  %s566_s2 = sshll.u32 %s12625_s7, 4  ;;  %s529_s30 = int_to_ptr.vmem [resolvable:$true] %s528_s30  ;;  %s567_s2 = int_to_ptr.hbm [resolvable:$true] %s566_s2 }
  0x1f   : > { %s8985_s5 = smov 64   ;;  %s8986_s26 = smov 4  }
  0x20   : > { %s8987_s24 = smov [#allocation19]   ;;  %s600_s3 = sshll.u32 %s12629_s11, 4  ;;  %s601_s3 = int_to_ptr.hbm [resolvable:$true] %s600_s3 }
  0x21   : > { %s568_s25 = sshll.u32 %s8987_s24, 4  ;;  %s8989_s21 = smov [#allocation25]   ;;  %s569_s25 = int_to_ptr.vmem [resolvable:$true] %s568_s25 }
  0x22   : > { %s526_s9 = sshll.u32 %s12662_s27, 4  ;;  %s8990_s24 = smov [#allocation26]   ;;  %s527_s9 = int_to_ptr.hbm [resolvable:$true] %s526_s9 }
  0x23   : > { %8643 = dma.hbm_to_vmem [thread:$0]  (!%p9130_p5), %s527_s9, 576, %s529_s30, [#allocation16], %s8985_s5, %s8985_s5, %s8986_s26  }
  0x24   : > { %8649 = dma.hbm_to_vmem [thread:$0]  (!%p9130_p5), %s567_s2, 2304, %s569_s25, [#allocation18], %s8981_s28, %s8981_s28, %s8982_s4  }
  0x25   : > { %s640_s9 = sshll.u32 %s12635_s17, 4  ;;  %s8988_s26 = smov [#allocation22]   ;;  %s641_s9 = int_to_ptr.hbm [resolvable:$true] %s640_s9 }
  0x26   : > { %s602_s20 = sshll.u32 %s8988_s26, 4  ;;  %s642_s30 = sshll.u32 %s8989_s21, 4  ;;  %s603_s20 = int_to_ptr.vmem [resolvable:$true] %s602_s20  ;;  %s643_s30 = int_to_ptr.vmem [resolvable:$true] %s642_s30 }
  0x27   : > { %8655 = dma.hbm_to_vmem [thread:$0]  (!%p9130_p5), %s601_s3, 4608, %s603_s20, [#allocation21], %s8981_s28, %s8981_s28, %s8982_s4  }
  0x28   : > { %s657_s2 = sshll.u32 %s12637_s19, 4  ;;  %s659_s25 = sshll.u32 %s8990_s24, 4  ;;  %s658_s2 = int_to_ptr.hbm [resolvable:$true] %s657_s2  ;;  %s660_s25 = int_to_ptr.vmem [resolvable:$true] %s659_s25 }
  0x29   : > { %8661 = dma.hbm_to_vmem [thread:$0]  (!%p9130_p5), %s641_s9, 1024, %s643_s30, [#allocation24], %s8981_s28, %s8981_s28, %s8982_s4  }
  0x2a   : > { %8664 = dma.hbm_to_vmem [thread:$0]  (!%p9130_p5), %s658_s2, 2048, %s660_s25, [#allocation27], %s8981_s28, %s8981_s28, %s8982_s4  }
  0x2b   : > { %686 = sbr.rel (%p9119_p3) target bundleno = 3478 (0xd96), region = 104 }
  0x30   : > { %8956 = dma.done.wait (%p8665_p2), [#allocation16], 576  }
  0x31   : > { %8958 = vsyncadd (%p8665_p2), [#allocation16], 4294966720 }
  0x32   : > { %8960 = dma.done.wait (%p8665_p2), [#allocation18], 3456  }
  0x33   : > { %8962 = vsyncadd (%p8665_p2), [#allocation18], 4294963840 }
  0x34   : > { %8964 = dma.done.wait (%p8665_p2), [#allocation21], 6912  }
  0x35   : > { %8966 = vsyncadd (%p8665_p2), [#allocation21], 4294960384 }
  0x36   : > { %8968 = dma.done.wait (%p8665_p2), [#allocation24], 5632  }
  0x37   : > { %8970 = vsyncadd (%p8665_p2), [#allocation24], 4294961664 }
  0x38   : > { %8972 = dma.done.wait (%p8665_p2), [#allocation27], 2048  }
  0x39   : > { %8974 = vsyncadd (%p8665_p2), [#allocation27], 4294965248  ;;  %p780_p6 = scmp.lt.s32.totalorder %s9114_s29, 1  ;;  %vm820_vm0 = vcmask 31744   ;;  %vm829_vm1 = vcmask 24576   ;;  %v12643_v1 = vmov 0.0  }
  0x3a   : > { %821 = vst.msk [vmem:[#allocation2] sm:$0xff] %vm820_vm0, %v12643_v1  ;;  %vm1034_vm2 = vcmask 1043456   ;;  %s12663_s4 = sld [smem:[#allocation85_spill]]  ;;  %v937_v2 = vld [vmem:[#allocation15 + $0xc] sm:$0xf]  ;;  %vm823_vm3 = vcmask 25600  }
  0x3b   : > { %s12872_s29 = smov (!%p780_p6, %s9114_s29), 1  ;;  %831 = vst.msk [vmem:[#allocation2 + $0x18] sm:$0x1] %vm829_vm1, %v12643_v1  ;;  %v935_v3 = vld [vmem:[#allocation15] sm:$0xf]  ;;  %7748 = vmatpush.msk.msra.mxu0 %vm1034_vm2, %v937_v2  ;;  %vm2685_vm4 = vcmask 64512  }
  0x3c   : > { %822 = vst.msk [vmem:[#allocation2 + $0x8] sm:$0xff] %vm820_vm0, %v12643_v1  ;;  %s8606_s0 = sshll.u32 %s12872_s29, 8  ;;  %v1274_v4 = vld [vmem:[#allocation15 + $0x18] sm:$0xf]  ;;  %7781 = vmatpush.msk.msra.mxu1 %vm1034_vm2, %v935_v3  ;;  %v1466_v7 = vld [vmem:[#allocation15 + $0x4] sm:$0xf] }
  0x3d   : > { %826 = vst.msk [vmem:[#allocation2 + $0x198] sm:$0xff] %vm820_vm0, %v12643_v1  ;;  %7814 = vmatpush.msk.msra.mxu2 %vm1034_vm2, %v1274_v4  ;;  %7847 = vmatpush.msk.msrb.mxu0 %vm1034_vm2, %v1466_v7  ;;  %v1868_v63 = vld [vmem:[#allocation15 + $0x1c] sm:$0xf]  ;;  %vm2694_vm5 = vcmask 57344   ;;  %s12707_s22 = sld [smem:[#allocation87_spill]]  ;;  %vm2688_vm6 = vcmask 58368  }
  0x3e   : > { %827 = vst.msk [vmem:[#allocation2 + $0x1a0] sm:$0xff] %vm820_vm0, %v12643_v1  ;;  %8607 = vmatpush.msk.msra.mxu3 %vm1034_vm2, %v1466_v7  ;;  %7913 = vmatpush.msk.msrb.mxu1 %vm1034_vm2, %v1868_v63  ;;  %s12807_s30 = sld [smem:[#allocation90_spill]]  ;;  %vm5241_vm7 = vcmask 130048   ;;  %vm5248_vm8 = vcmask 122880   ;;  %vm5243_vm9 = vcmask 123904   ;;  %vm5904_vm10 = vcmask 128000  }
  0x3f   : > { %832 = vst.msk [vmem:[#allocation2 + $0x30] sm:$0x1] %vm829_vm1, %v12643_v1  ;;  %s12816_s25 = sld [smem:[#allocation89_spill]]  ;;  %vm5921_vm11 = vcmask 125952   ;;  %vm6340_vm12 = vcmask 259072   ;;  %vm6344_vm13 = vcmask 253952  }
  0x40   : > { %s9227_s27 = scalar_lea.vmem %s12663_s4, %s8606_s0  ;;  %833 = vst.msk [vmem:[#allocation2 + $0x48] sm:$0x1] %vm829_vm1, %v12643_v1  ;;  %vm6358_vm14 = vcmask 257024   ;;  %vm6391_vm15 = vcmask 261120   ;;  %s12869_s24 = sld [smem:[#allocation93_spill]] }
  0x41   : > { %v788_v5 = vld [vmem:[%s9227_s27] sm:$0xff]  ;;  %834 = vst.msk [vmem:[#allocation2 + $0x60] sm:$0x1] %vm829_vm1, %v12643_v1  ;;  %v790_v8 = vld [vmem:[%s9227_s27 + $0x10] sm:$0xff]  ;;  %v789_v9 = vld [vmem:[%s9227_s27 + $0x8] sm:$0xff] }
  0x42   : > { %867 = vst.msk [vmem:[#allocation2 + $0x19] sm:$0xff] %vm820_vm0, %v788_v5  ;;  %v791_v10 = vld [vmem:[%s9227_s27 + $0x18] sm:$0xff]  ;;  %v792_v11 = vld [vmem:[%s9227_s27 + $0x20] sm:$0xff]  ;;  %v793_v13 = vld [vmem:[%s9227_s27 + $0x28] sm:$0xff] }
  0x43   : > { %835 = vst.msk [vmem:[#allocation2 + $0x78] sm:$0x1] %vm829_vm1, %v12643_v1  ;;  %v794_v14 = vld [vmem:[%s9227_s27 + $0x30] sm:$0xff]  ;;  %v795_v16 = vld [vmem:[%s9227_s27 + $0x38] sm:$0xff]  ;;  %v796_v21 = vld [vmem:[%s9227_s27 + $0x40] sm:$0xff] }
  0x44   : > { %836 = vst.msk [vmem:[#allocation2 + $0x90] sm:$0x1] %vm829_vm1, %v12643_v1  ;;  %v900_v19 = vld [vmem:[#allocation2 + $0x8] sm:$0xff]  ;;  %v797_v24 = vld [vmem:[%s9227_s27 + $0x48] sm:$0xff]  ;;  %v799_v30 = vld [vmem:[%s9227_s27 + $0x58] sm:$0xff] }
  0x45   : > { %837 = vst.msk [vmem:[#allocation2 + $0xa8] sm:$0x1] %vm829_vm1, %v12643_v1  ;;  %v798_v27 = vld [vmem:[%s9227_s27 + $0x50] sm:$0xff]  ;;  %v800_v33 = vld [vmem:[%s9227_s27 + $0x60] sm:$0xff]  ;;  %v801_v36 = vld [vmem:[%s9227_s27 + $0x68] sm:$0xff] }
  0x46   : > { %838 = vst.msk [vmem:[#allocation2 + $0xc0] sm:$0x1] %vm829_vm1, %v12643_v1  ;;  %v802_v39 = vld [vmem:[%s9227_s27 + $0x70] sm:$0xff]  ;;  %v803_v42 = vld [vmem:[%s9227_s27 + $0x78] sm:$0xff]  ;;  %v804_v45 = vld [vmem:[%s9227_s27 + $0x80] sm:$0xff] }
  0x47   : > { %839 = vst.msk [vmem:[#allocation2 + $0xd8] sm:$0x1] %vm829_vm1, %v12643_v1  ;;  %v805_v48 = vld [vmem:[%s9227_s27 + $0x88] sm:$0xff]  ;;  %v806_v51 = vld [vmem:[%s9227_s27 + $0x90] sm:$0xff]  ;;  %v807_v54 = vld [vmem:[%s9227_s27 + $0x98] sm:$0xff] }
  0x48   : > { %840 = vst.msk [vmem:[#allocation2 + $0xf0] sm:$0x1] %vm829_vm1, %v12643_v1  ;;  %v808_v57 = vld [vmem:[%s9227_s27 + $0xa0] sm:$0xff]  ;;  %v809_v60 = vld [vmem:[%s9227_s27 + $0xa8] sm:$0xff]  ;;  %v810_v2 = vld [vmem:[%s9227_s27 + $0xb0] sm:$0xff] }
  0x49   : > { %v9252_v6 = vld [vmem:[#allocation2 + $0x18] sm:$0xff]  ;;  %841 = vst.msk [vmem:[#allocation2 + $0x108] sm:$0x1] %vm829_vm1, %v12643_v1  ;;  %v811_v7 = vld [vmem:[%s9227_s27 + $0xb8] sm:$0xff] }
  0x4a   : > { %7749 = vmatmul.msk.f32.vlgmr.msra.gmra.mxu0 %vm820_vm0, %v9252_v6  ;;  %842 = vst.msk [vmem:[#allocation2 + $0x120] sm:$0x1] %vm829_vm1, %v12643_v1  ;;  %v9335_v22 = vld [vmem:[#allocation2 + $0x19] sm:$0xff] }
  0x4b   : > { %843 = vst.msk [vmem:[#allocation2 + $0x138] sm:$0x1] %vm829_vm1, %v12643_v1 }
  0x4c   : > { %844 = vst.msk [vmem:[#allocation2 + $0x150] sm:$0x1] %vm829_vm1, %v12643_v1 }
  0x4d   : > { %845 = vst.msk [vmem:[#allocation2 + $0x168] sm:$0x1] %vm829_vm1, %v12643_v1 }
  0x4e   : > { %846 = vst.msk [vmem:[#allocation2 + $0x180] sm:$0x1] %vm829_vm1, %v12643_v1 }
  0x4f   : > { %849 = vst.msk [vmem:[#allocation2 + $0x29] sm:$0x1] %vm829_vm1, %v12643_v1 }
  0x50   : > { %850 = vst.msk [vmem:[#allocation2 + $0x41] sm:$0x1] %vm829_vm1, %v12643_v1 }
  0x51   : > { %851 = vst.msk [vmem:[#allocation2 + $0x59] sm:$0x1] %vm829_vm1, %v12643_v1 }
  0x52   : > { %852 = vst.msk [vmem:[#allocation2 + $0x71] sm:$0x1] %vm829_vm1, %v12643_v1 }
  0x53   : > { %853 = vst.msk [vmem:[#allocation2 + $0x89] sm:$0x1] %vm829_vm1, %v12643_v1 }
  0x54   : > { %854 = vst.msk [vmem:[#allocation2 + $0xa1] sm:$0x1] %vm829_vm1, %v12643_v1 }
  0x55   : > { %855 = vst.msk [vmem:[#allocation2 + $0xb9] sm:$0x1] %vm829_vm1, %v12643_v1 }
  0x56   : > { %856 = vst.msk [vmem:[#allocation2 + $0xd1] sm:$0x1] %vm829_vm1, %v12643_v1 }
  0x57   : > { %857 = vst.msk [vmem:[#allocation2 + $0xe9] sm:$0x1] %vm829_vm1, %v12643_v1 }
  0x58   : > { %858 = vst.msk [vmem:[#allocation2 + $0x101] sm:$0x1] %vm829_vm1, %v12643_v1 }
  0x59   : > { %859 = vst.msk [vmem:[#allocation2 + $0x119] sm:$0x1] %vm829_vm1, %v12643_v1 }
  0x5a   : > { %860 = vst.msk [vmem:[#allocation2 + $0x131] sm:$0x1] %vm829_vm1, %v12643_v1 }
  0x5b   : > { %861 = vst.msk [vmem:[#allocation2 + $0x149] sm:$0x1] %vm829_vm1, %v12643_v1 }
  0x5c   : > { %862 = vst.msk [vmem:[#allocation2 + $0x161] sm:$0x1] %vm829_vm1, %v12643_v1 }
  0x5d   : > { %863 = vst.msk [vmem:[#allocation2 + $0x179] sm:$0x1] %vm829_vm1, %v12643_v1 }
  0x5e   : > { %864 = vst.msk [vmem:[#allocation2 + $0x191] sm:$0x1] %vm829_vm1, %v12643_v1 }
  0x5f   : > { %830 = vst.msk [vmem:[#allocation2] sm:$0x1] %vm829_vm1, %v12643_v1 }
  0x60   : > { %847 = vst.msk [vmem:[#allocation2 + $0x198] sm:$0x1] %vm829_vm1, %v12643_v1 }
  0x61   : > { %869 = vst.msk [vmem:[#allocation2 + $0x31] sm:$0xff] %vm820_vm0, %v790_v8 }
  0x62   : > { %868 = vst.msk [vmem:[#allocation2 + $0x21] sm:$0xff] %vm820_vm0, %v789_v9 }
  0x63   : > { %870 = vst.msk [vmem:[#allocation2 + $0x39] sm:$0xff] %vm820_vm0, %v791_v10 }
  0x64   : > { %824 = vst.msk [vmem:[#allocation2 + $0x10] sm:$0x3] %vm823_vm3, %v12643_v1 }
  0x65   : > { %828 = vst.msk [vmem:[#allocation2 + $0x1a8] sm:$0x3] %vm823_vm3, %v12643_v1  ;;  %vm7160_vm3 = vcmask 517120  }
  0x66   : > { %v899_v12 = vld [vmem:[#allocation2] sm:$0xff]  ;;  %848 = vst.msk [vmem:[#allocation2 + $0x11] sm:$0x1] %vm829_vm1, %v12643_v1 }
  0x67   : > { %7782 = vmatmul.msk.f32.vlgmr.msra.gmra.mxu1 %vm820_vm0, %v899_v12  ;;  %865 = vst.msk [vmem:[#allocation2 + $0x1a9] sm:$0x1] %vm829_vm1, %v12643_v1  ;;  %vm7150_vm1 = vcmask 516096  }
  0x68   : > { %v903_v15 = vld [vmem:[#allocation2 + $0x30] sm:$0xff]  ;;  %871 = vst.msk [vmem:[#allocation2 + $0x49] sm:$0xff] %vm820_vm0, %v792_v11 }
  0x69   : > { %7815 = vmatmul.msk.f32.vlgmr.msra.gmra.mxu2 %vm820_vm0, %v903_v15  ;;  %v902_v17 = vld [vmem:[#allocation2 + $0x20] sm:$0xff]  ;;  %872 = vst.msk [vmem:[#allocation2 + $0x51] sm:$0xff] %vm820_vm0, %v793_v13  ;;  %v9354_v28 = vld [vmem:[#allocation2 + $0x31] sm:$0xff] }
  0x6a   : > { %7750 = vmatmul.msk.f32.gmra.mxu0 %vm820_vm0, %v902_v17  ;;  %873 = vst.msk [vmem:[#allocation2 + $0x61] sm:$0xff] %vm820_vm0, %v794_v14  ;;  %v904_v20 = vld [vmem:[#allocation2 + $0x38] sm:$0xff]  ;;  %v9345_v25 = vld [vmem:[#allocation2 + $0x21] sm:$0xff] }
  0x6b   : > { %v1430_v18 = vld [vmem:[#allocation2 + $0x9] sm:$0xff]  ;;  %874 = vst.msk [vmem:[#allocation2 + $0x69] sm:$0xff] %vm820_vm0, %v795_v16  ;;  %v9363_v31 = vld [vmem:[#allocation2 + $0x39] sm:$0xff] }
  0x6c   : > { %7849 = vmatmul.msk.f32.vlgmr.msra.gmra.mxu3 %vm820_vm0, %v1430_v18  ;;  %875 = vst.msk [vmem:[#allocation2 + $0x79] sm:$0xff] %vm820_vm0, %v796_v21  ;;  %v812_v16 = vld [vmem:[%s9227_s27 + $0xc0] sm:$0xff] }
  0x6d   : > { %876 = vst.msk [vmem:[#allocation2 + $0x81] sm:$0xff] %vm820_vm0, %v797_v24 }
  0x6e   : > { %877 = vst.msk [vmem:[#allocation2 + $0x91] sm:$0xff] %vm820_vm0, %v798_v27 }
  0x6f   : > { %7783 = vmatmul.msk.f32.gmra.mxu1 %vm820_vm0, %v900_v19  ;;  %v905_v23 = vld [vmem:[#allocation2 + $0x48] sm:$0xff]  ;;  %878 = vst.msk [vmem:[#allocation2 + $0x99] sm:$0xff] %vm820_vm0, %v799_v30 }
  0x70   : > { %v906_v26 = vld [vmem:[#allocation2 + $0x50] sm:$0xff]  ;;  %879 = vst.msk [vmem:[#allocation2 + $0xa9] sm:$0xff] %vm820_vm0, %v800_v33 }
  0x71   : > { %7816 = vmatmul.msk.f32.gmra.mxu2 %vm820_vm0, %v904_v20  ;;  %v907_v29 = vld [vmem:[#allocation2 + $0x60] sm:$0xff]  ;;  %v9372_v34 = vld [vmem:[#allocation2 + $0x49] sm:$0xff]  ;;  %v9381_v37 = vld [vmem:[#allocation2 + $0x51] sm:$0xff]  ;;  %880 = vst.msk [vmem:[#allocation2 + $0xb1] sm:$0xff] %vm820_vm0, %v801_v36 }
  0x72   : > { %7751 = vmatmul.msk.f32.gmra.mxu0 %vm820_vm0, %v903_v15  ;;  %v908_v32 = vld [vmem:[#allocation2 + $0x68] sm:$0xff]  ;;  %881 = vst.msk [vmem:[#allocation2 + $0xc1] sm:$0xff] %vm820_vm0, %v802_v39 }
  0x73   : > { %v909_v35 = vld [vmem:[#allocation2 + $0x78] sm:$0xff]  ;;  %v9390_v40 = vld [vmem:[#allocation2 + $0x61] sm:$0xff]  ;;  %v9399_v43 = vld [vmem:[#allocation2 + $0x69] sm:$0xff]  ;;  %882 = vst.msk [vmem:[#allocation2 + $0xc9] sm:$0xff] %vm820_vm0, %v803_v42 }
  0x74   : > { %7850 = vmatmul.msk.f32.gmra.mxu3 %vm820_vm0, %v9335_v22  ;;  %v910_v38 = vld [vmem:[#allocation2 + $0x80] sm:$0xff]  ;;  %883 = vst.msk [vmem:[#allocation2 + $0xd9] sm:$0xff] %vm820_vm0, %v804_v45 }
  0x75   : > { %v911_v41 = vld [vmem:[#allocation2 + $0x90] sm:$0xff]  ;;  %v9408_v46 = vld [vmem:[#allocation2 + $0x79] sm:$0xff]  ;;  %v9417_v49 = vld [vmem:[#allocation2 + $0x81] sm:$0xff]  ;;  %884 = vst.msk [vmem:[#allocation2 + $0xe1] sm:$0xff] %vm820_vm0, %v805_v48 }
  0x76   : > { %v912_v44 = vld [vmem:[#allocation2 + $0x98] sm:$0xff]  ;;  %885 = vst.msk [vmem:[#allocation2 + $0xf1] sm:$0xff] %vm820_vm0, %v806_v51 }
  0x77   : > { %7784 = vmatmul.msk.f32.gmra.mxu1 %vm820_vm0, %v9252_v6  ;;  %v913_v47 = vld [vmem:[#allocation2 + $0xa8] sm:$0xff]  ;;  %v9426_v52 = vld [vmem:[#allocation2 + $0x91] sm:$0xff]  ;;  %v9435_v55 = vld [vmem:[#allocation2 + $0x99] sm:$0xff]  ;;  %886 = vst.msk [vmem:[#allocation2 + $0xf9] sm:$0xff] %vm820_vm0, %v807_v54 }
  0x78   : > { %v914_v50 = vld [vmem:[#allocation2 + $0xb0] sm:$0xff]  ;;  %887 = vst.msk [vmem:[#allocation2 + $0x109] sm:$0xff] %vm820_vm0, %v808_v57  ;;  %v9713_v1 = vld [vmem:[#allocation2 + $0x7a] sm:$0xff] }
  0x79   : > { %7817 = vmatmul.msk.f32.gmra.mxu2 %vm820_vm0, %v905_v23  ;;  %v915_v53 = vld [vmem:[#allocation2 + $0xc0] sm:$0xff]  ;;  %v9444_v58 = vld [vmem:[#allocation2 + $0xa9] sm:$0xff]  ;;  %v9453_v61 = vld [vmem:[#allocation2 + $0xb1] sm:$0xff]  ;;  %888 = vst.msk [vmem:[#allocation2 + $0x111] sm:$0xff] %vm820_vm0, %v809_v60 }
  0x7a   : > { %7752 = vmatmul.msk.f32.gmra.mxu0 %vm820_vm0, %v904_v20  ;;  %v916_v56 = vld [vmem:[#allocation2 + $0xc8] sm:$0xff]  ;;  %889 = vst.msk [vmem:[#allocation2 + $0x121] sm:$0xff] %vm820_vm0, %v810_v2 }
  0x7b   : > { %v917_v59 = vld [vmem:[#allocation2 + $0xd8] sm:$0xff]  ;;  %v9463_v3 = vld [vmem:[#allocation2 + $0xc1] sm:$0xff]  ;;  %v9472_v8 = vld [vmem:[#allocation2 + $0xc9] sm:$0xff]  ;;  %890 = vst.msk [vmem:[#allocation2 + $0x129] sm:$0xff] %vm820_vm0, %v811_v7 }
  0x7c   : > { %7851 = vmatmul.msk.f32.gmra.mxu3 %vm820_vm0, %v9345_v25  ;;  %v918_v0 = vld [vmem:[#allocation2 + $0xe0] sm:$0xff]  ;;  %891 = vst.msk [vmem:[#allocation2 + $0x139] sm:$0xff] %vm820_vm0, %v812_v16 }
  0x7d   : > { %v919_v5 = vld [vmem:[#allocation2 + $0xf0] sm:$0xff]  ;;  %v9494_v30 = vld [vmem:[#allocation2 + $0xe1] sm:$0xff] }
  0x7e   : > { %v920_v13 = vld [vmem:[#allocation2 + $0xf8] sm:$0xff] }
  0x7f   : > { %7785 = vmatmul.msk.f32.gmra.mxu1 %vm820_vm0, %v902_v17  ;;  %v9483_v17 = vld [vmem:[#allocation2 + $0xd9] sm:$0xff]  ;;  %v9505_v45 = vld [vmem:[#allocation2 + $0xf1] sm:$0xff] }
  0x80   : > { %v9516_v60 = vld [vmem:[#allocation2 + $0xf9] sm:$0xff] }
  0x81   : > { %7818 = vmatmul.msk.f32.gmra.mxu2 %vm820_vm0, %v906_v26 }
  0x82   : > { %7753 = vmatmul.msk.f32.gmra.mxu0 %vm820_vm0, %v905_v23 }
  0x84   : > { %7852 = vmatmul.msk.f32.gmra.mxu3 %vm820_vm0, %v9354_v28 }
  0x87   : > { %7786 = vmatmul.msk.f32.gmra.mxu1 %vm820_vm0, %v903_v15 }
  0x89   : > { %7819 = vmatmul.msk.f32.gmra.mxu2 %vm820_vm0, %v907_v29 }
  0x8a   : > { %7754 = vmatmul.msk.f32.gmra.mxu0 %vm820_vm0, %v906_v26 }
  0x8c   : > { %7853 = vmatmul.msk.f32.gmra.mxu3 %vm820_vm0, %v9363_v31 }
  0x8f   : > { %7787 = vmatmul.msk.f32.gmra.mxu1 %vm820_vm0, %v904_v20 }
  0x91   : > { %7820 = vmatmul.msk.f32.gmra.mxu2 %vm820_vm0, %v908_v32 }
  0x92   : > { %7755 = vmatmul.msk.f32.gmra.mxu0 %vm820_vm0, %v907_v29 }
  0x94   : > { %7854 = vmatmul.msk.f32.gmra.mxu3 %vm820_vm0, %v9372_v34 }
  0x97   : > { %7788 = vmatmul.msk.f32.gmra.mxu1 %vm820_vm0, %v905_v23  ;;  %v921_v23 = vld [vmem:[#allocation2 + $0x108] sm:$0xff] }
  0x99   : > { %7821 = vmatmul.msk.f32.gmra.mxu2 %vm820_vm0, %v909_v35 }
  0x9a   : > { %7756 = vmatmul.msk.f32.gmra.mxu0 %vm820_vm0, %v908_v32 }
  0x9c   : > { %7855 = vmatmul.msk.f32.gmra.mxu3 %vm820_vm0, %v9381_v37 }
  0x9f   : > { %7789 = vmatmul.msk.f32.gmra.mxu1 %vm820_vm0, %v906_v26 }
  0xa1   : > { %7822 = vmatmul.msk.f32.gmra.mxu2 %vm820_vm0, %v910_v38 }
  0xa2   : > { %7757 = vmatmul.msk.f32.gmra.mxu0 %vm820_vm0, %v909_v35 }
  0xa4   : > { %7856 = vmatmul.msk.f32.gmra.mxu3 %vm820_vm0, %v9390_v40 }
  0xa7   : > { %7790 = vmatmul.msk.f32.gmra.mxu1 %vm820_vm0, %v907_v29  ;;  %v813_v29 = vld [vmem:[%s9227_s27 + $0xc8] sm:$0xff] }
  0xa8   : > { %892 = vst.msk [vmem:[#allocation2 + $0x141] sm:$0xff] %vm820_vm0, %v813_v29 }
  0xa9   : > { %7823 = vmatmul.msk.f32.gmra.mxu2 %vm820_vm0, %v911_v41 }
  0xaa   : > { %7758 = vmatmul.msk.f32.gmra.mxu0 %vm820_vm0, %v910_v38 }
  0xac   : > { %7857 = vmatmul.msk.f32.gmra.mxu3 %vm820_vm0, %v9399_v43 }
  0xaf   : > { %7791 = vmatmul.msk.f32.gmra.mxu1 %vm820_vm0, %v908_v32 }
  0xb1   : > { %7824 = vmatmul.msk.f32.gmra.mxu2 %vm820_vm0, %v912_v44 }
  0xb2   : > { %7759 = vmatmul.msk.f32.gmra.mxu0 %vm820_vm0, %v911_v41 }
  0xb4   : > { %7858 = vmatmul.msk.f32.gmra.mxu3 %vm820_vm0, %v9408_v46 }
  0xb7   : > { %7792 = vmatmul.msk.f32.gmra.mxu1 %vm820_vm0, %v909_v35 }
  0xb9   : > { %7825 = vmatmul.msk.f32.gmra.mxu2 %vm820_vm0, %v913_v47 }
  0xba   : > { %7760 = vmatmul.msk.f32.gmra.mxu0 %vm820_vm0, %v912_v44 }
  0xbc   : > { %7859 = vmatmul.msk.f32.gmra.mxu3 %vm820_vm0, %v9417_v49 }
  0xbf   : > { %7793 = vmatmul.msk.f32.gmra.mxu1 %vm820_vm0, %v910_v38  ;;  %v922_v38 = vld [vmem:[#allocation2 + $0x110] sm:$0xff] }
  0xc1   : > { %7826 = vmatmul.msk.f32.gmra.mxu2 %vm820_vm0, %v914_v50 }
  0xc2   : > { %7761 = vmatmul.msk.f32.gmra.mxu0 %vm820_vm0, %v913_v47 }
  0xc4   : > { %7860 = vmatmul.msk.f32.gmra.mxu3 %vm820_vm0, %v9426_v52 }
  0xc7   : > { %7794 = vmatmul.msk.f32.gmra.mxu1 %vm820_vm0, %v911_v41  ;;  %v1055_v62 = vpop.f32.mrf.mxu0 }
  0xc9   : > { %7827 = vmatmul.msk.f32.gmra.mxu2 %vm820_vm0, %v915_v53 }
  0xca   : > { %7762 = vmatmul.msk.f32.gmra.mxu0 %vm820_vm0, %v914_v50 }
  0xcc   : > { %7861 = vmatmul.msk.f32.gmra.mxu3 %vm820_vm0, %v9435_v55 }
  0xcf   : > { %7795 = vmatmul.msk.f32.gmra.mxu1 %vm820_vm0, %v912_v44  ;;  %v814_v44 = vld [vmem:[%s9227_s27 + $0xd0] sm:$0xff] }
  0xd0   : > { %893 = vst.msk [vmem:[#allocation2 + $0x151] sm:$0xff] %vm820_vm0, %v814_v44  ;;  %v9549_v44 = vld [vmem:[#allocation2 + $0x121] sm:$0xff] }
  0xd1   : > { %7828 = vmatmul.msk.f32.gmra.mxu2 %vm820_vm0, %v916_v56 }
  0xd2   : > { %7763 = vmatmul.msk.f32.gmra.mxu0 %vm820_vm0, %v915_v53 }
  0xd4   : > { %7862 = vmatmul.msk.f32.gmra.mxu3 %vm820_vm0, %v9444_v58 }
  0xd7   : > { %7796 = vmatmul.msk.f32.gmra.mxu1 %vm820_vm0, %v913_v47 }
  0xd9   : > { %7829 = vmatmul.msk.f32.gmra.mxu2 %vm820_vm0, %v917_v59 }
  0xda   : > { %7764 = vmatmul.msk.f32.gmra.mxu0 %vm820_vm0, %v916_v56 }
  0xdc   : > { %7863 = vmatmul.msk.f32.gmra.mxu3 %vm820_vm0, %v9453_v61 }
  0xdf   : > { %7797 = vmatmul.msk.f32.gmra.mxu1 %vm820_vm0, %v914_v50 }
  0xe1   : > { %7830 = vmatmul.msk.f32.gmra.mxu2 %vm820_vm0, %v918_v0 }
  0xe2   : > { %7765 = vmatmul.msk.f32.gmra.mxu0 %vm820_vm0, %v917_v59 }
  0xe4   : > { %v1177_v4 = vpop.f32.mrf.mxu1  ;;  %7864 = vmatmul.msk.f32.gmra.mxu3 %vm820_vm0, %v9463_v3 }
  0xe5   : > { %v1178_v9 = vadd.f32 %v1177_v4, %v1055_v62  ;;  %v924_v4 = vld [vmem:[#allocation2 + $0x128] sm:$0xff] }
  0xe7   : > { %7798 = vmatmul.msk.f32.gmra.mxu1 %vm820_vm0, %v915_v53  ;;  %v1058_v6 = vpop.f32.mrf.mxu0  ;;  %v923_v53 = vld [vmem:[#allocation2 + $0x120] sm:$0xff] }
  0xe9   : > { %7831 = vmatmul.msk.f32.gmra.mxu2 %vm820_vm0, %v919_v5 }
  0xea   : > { %7766 = vmatmul.msk.f32.gmra.mxu0 %vm820_vm0, %v918_v0 }
  0xec   : > { %v1301_v10 = vpop.f32.mrf.mxu2  ;;  %v1180_v11 = vpop.f32.mrf.mxu1  ;;  %7865 = vmatmul.msk.f32.gmra.mxu3 %vm820_vm0, %v9472_v8 }
  0xed   : > { %v9478_v12 = vadd.f32 %v1301_v10, %v1178_v9  ;;  %v1181_v18 = vadd.f32 %v1180_v11, %v1058_v6  ;;  %v816_v9 = vld [vmem:[%s9227_s27 + $0xe0] sm:$0xff]  ;;  %v9527_v10 = vld [vmem:[#allocation2 + $0x109] sm:$0xff] }
  0xee   : > { %895 = vst.msk [vmem:[#allocation2 + $0x169] sm:$0xff] %vm820_vm0, %v816_v9 }
  0xef   : > { %7799 = vmatmul.msk.f32.gmra.mxu1 %vm820_vm0, %v916_v56  ;;  %v1061_v14 = vpop.f32.mrf.mxu0  ;;  %v1586_v15 = vpop.f32.mrf.mxu3 }
  0xf1   : > { %7832 = vmatmul.msk.f32.gmra.mxu2 %vm820_vm0, %v920_v13 }
  0xf2   : > { %7767 = vmatmul.msk.f32.gmra.mxu0 %vm820_vm0, %v919_v5 }
  0xf4   : > { %v1304_v19 = vpop.f32.mrf.mxu2  ;;  %v1183_v20 = vpop.f32.mrf.mxu1  ;;  %7866 = vmatmul.msk.f32.gmra.mxu3 %vm820_vm0, %v9483_v17 }
  0xf5   : > { %v1398_v21 = vadd.f32 %v1304_v19, %v1181_v18  ;;  %v1184_v32 = vadd.f32 %v1183_v20, %v1061_v14 }
  0xf7   : > { %v9489_v24 = vadd.f32 %v1586_v15, %v1398_v21  ;;  %7800 = vmatmul.msk.f32.gmra.mxu1 %vm820_vm0, %v917_v59  ;;  %v1064_v26 = vpop.f32.mrf.mxu0  ;;  %v1589_v27 = vpop.f32.mrf.mxu3  ;;  %v815_v59 = vld [vmem:[%s9227_s27 + $0xd8] sm:$0xff]  ;;  %v817_v21 = vld [vmem:[%s9227_s27 + $0xe8] sm:$0xff] }
  0xf8   : > { %894 = vst.msk [vmem:[#allocation2 + $0x159] sm:$0xff] %vm820_vm0, %v815_v59 }
  0xf9   : > { %7833 = vmatmul.msk.f32.gmra.mxu2 %vm820_vm0, %v921_v23  ;;  %896 = vst.msk [vmem:[#allocation2 + $0x171] sm:$0xff] %vm820_vm0, %v817_v21 }
  0xfa   : > { %7768 = vmatmul.msk.f32.gmra.mxu0 %vm820_vm0, %v920_v13 }
  0xfc   : > { %v1307_v33 = vpop.f32.mrf.mxu2  ;;  %v1186_v35 = vpop.f32.mrf.mxu1  ;;  %7867 = vmatmul.msk.f32.gmra.mxu3 %vm820_vm0, %v9494_v30 }
  0xfd   : > { %v1399_v36 = vadd.f32 %v1307_v33, %v1184_v32  ;;  %v1187_v47 = vadd.f32 %v1186_v35, %v1064_v26  ;;  %v9538_v26 = vld [vmem:[#allocation2 + $0x111] sm:$0xff] }
  0xff   : > { %v9500_v39 = vadd.f32 %v1589_v27, %v1399_v36  ;;  %7801 = vmatmul.msk.f32.gmra.mxu1 %vm820_vm0, %v918_v0  ;;  %v1067_v41 = vpop.f32.mrf.mxu0  ;;  %v1592_v42 = vpop.f32.mrf.mxu3  ;;  %v928_v9 = vld [vmem:[#allocation2 + $0x158] sm:$0xff] }
 0x101   : > { %7834 = vmatmul.msk.f32.gmra.mxu2 %vm820_vm0, %v922_v38 }
 0x102   : > { %7769 = vmatmul.msk.f32.gmra.mxu0 %vm820_vm0, %v921_v23 }
 0x104   : > { %v1310_v48 = vpop.f32.mrf.mxu2  ;;  %v1189_v50 = vpop.f32.mrf.mxu1  ;;  %7868 = vmatmul.msk.f32.gmra.mxu3 %vm820_vm0, %v9505_v45 }
 0x105   : > { %v1400_v51 = vadd.f32 %v1310_v48, %v1187_v47  ;;  %v1190_v62 = vadd.f32 %v1189_v50, %v1067_v41 }
 0x107   : > { %v9511_v54 = vadd.f32 %v1592_v42, %v1400_v51  ;;  %7802 = vmatmul.msk.f32.gmra.mxu1 %vm820_vm0, %v919_v5  ;;  %v1070_v56 = vpop.f32.mrf.mxu0  ;;  %v1595_v57 = vpop.f32.mrf.mxu3  ;;  %v818_v42 = vld [vmem:[%s9227_s27 + $0xf0] sm:$0xff] }
 0x108   : > { %897 = vst.msk [vmem:[#allocation2 + $0x181] sm:$0xff] %vm820_vm0, %v818_v42 }
 0x109   : > { %7835 = vmatmul.msk.f32.gmra.mxu2 %vm820_vm0, %v923_v53 }
 0x10a   : > { %7770 = vmatmul.msk.f32.gmra.mxu0 %vm820_vm0, %v922_v38 }
 0x10c   : > { %v1313_v63 = vpop.f32.mrf.mxu2  ;;  %v1192_v0 = vpop.f32.mrf.mxu1  ;;  %7869 = vmatmul.msk.f32.gmra.mxu3 %vm820_vm0, %v9516_v60 }
 0x10d   : > { %v1401_v2 = vadd.f32 %v1313_v63, %v1190_v62  ;;  %v1193_v11 = vadd.f32 %v1192_v0, %v1070_v56  ;;  %v819_v62 = vld [vmem:[%s9227_s27 + $0xf8] sm:$0xff] }
 0x10e   : > { %v9560_v63 = vld [vmem:[#allocation2 + $0x129] sm:$0xff]  ;;  %898 = vst.msk [vmem:[#allocation2 + $0x189] sm:$0xff] %vm820_vm0, %v819_v62 }
 0x10f   : > { %v9522_v5 = vadd.f32 %v1595_v57, %v1401_v2  ;;  %7803 = vmatmul.msk.f32.gmra.mxu1 %vm820_vm0, %v920_v13  ;;  %v1073_v6 = vpop.f32.mrf.mxu0  ;;  %v1598_v7 = vpop.f32.mrf.mxu3  ;;  %v925_v13 = vld [vmem:[#allocation2 + $0x138] sm:$0xff] }
 0x111   : > { %7836 = vmatmul.msk.f32.gmra.mxu2 %vm820_vm0, %v924_v4 }
 0x112   : > { %7771 = vmatmul.msk.f32.gmra.mxu0 %vm820_vm0, %v923_v53 }
 0x114   : > { %v1316_v14 = vpop.f32.mrf.mxu2  ;;  %v1195_v15 = vpop.f32.mrf.mxu1  ;;  %7870 = vmatmul.msk.f32.gmra.mxu3 %vm820_vm0, %v9527_v10 }
 0x115   : > { %v1402_v16 = vadd.f32 %v1316_v14, %v1193_v11  ;;  %v1196_v27 = vadd.f32 %v1195_v15, %v1073_v6  ;;  %v9570_v15 = vld [vmem:[#allocation2 + $0x139] sm:$0xff] }
 0x117   : > { %v9533_v18 = vadd.f32 %v1598_v7, %v1402_v16  ;;  %7804 = vmatmul.msk.f32.gmra.mxu1 %vm820_vm0, %v921_v23  ;;  %v1076_v19 = vpop.f32.mrf.mxu0  ;;  %v1601_v20 = vpop.f32.mrf.mxu3  ;;  %v926_v23 = vld [vmem:[#allocation2 + $0x140] sm:$0xff] }
 0x119   : > { %7837 = vmatmul.msk.f32.gmra.mxu2 %vm820_vm0, %v925_v13 }
 0x11a   : > { %7772 = vmatmul.msk.f32.gmra.mxu0 %vm820_vm0, %v924_v4 }
 0x11c   : > { %v1319_v29 = vpop.f32.mrf.mxu2  ;;  %v1198_v32 = vpop.f32.mrf.mxu1  ;;  %7871 = vmatmul.msk.f32.gmra.mxu3 %vm820_vm0, %v9538_v26 }
 0x11d   : > { %v1403_v33 = vadd.f32 %v1319_v29, %v1196_v27  ;;  %v1199_v47 = vadd.f32 %v1198_v32, %v1076_v19  ;;  %v929_v27 = vld [vmem:[#allocation2 + $0x168] sm:$0xff] }
 0x11f   : > { %v9544_v35 = vadd.f32 %v1601_v20, %v1403_v33  ;;  %7805 = vmatmul.msk.f32.gmra.mxu1 %vm820_vm0, %v922_v38  ;;  %v1079_v36 = vpop.f32.mrf.mxu0  ;;  %v1604_v41 = vpop.f32.mrf.mxu3  ;;  %v927_v38 = vld [vmem:[#allocation2 + $0x150] sm:$0xff]  ;;  %v9579_v33 = vld [vmem:[#allocation2 + $0x141] sm:$0xff] }
 0x121   : > { %7838 = vmatmul.msk.f32.gmra.mxu2 %vm820_vm0, %v926_v23 }
 0x122   : > { %7773 = vmatmul.msk.f32.gmra.mxu0 %vm820_vm0, %v925_v13 }
 0x124   : > { %v1322_v48 = vpop.f32.mrf.mxu2  ;;  %v1201_v50 = vpop.f32.mrf.mxu1  ;;  %7872 = vmatmul.msk.f32.gmra.mxu3 %vm820_vm0, %v9549_v44 }
 0x125   : > { %v1404_v51 = vadd.f32 %v1322_v48, %v1199_v47  ;;  %v1202_v0 = vadd.f32 %v1201_v50, %v1079_v36  ;;  %v930_v48 = vld [vmem:[#allocation2 + $0x170] sm:$0xff] }
 0x127   : > { %v9555_v56 = vadd.f32 %v1604_v41, %v1404_v51  ;;  %7806 = vmatmul.msk.f32.gmra.mxu1 %vm820_vm0, %v923_v53  ;;  %v1082_v57 = vpop.f32.mrf.mxu0  ;;  %v1607_v59 = vpop.f32.mrf.mxu3 }
 0x129   : > { %7839 = vmatmul.msk.f32.gmra.mxu2 %vm820_vm0, %v927_v38 }
 0x12a   : > { %7774 = vmatmul.msk.f32.gmra.mxu0 %vm820_vm0, %v926_v23 }
 0x12c   : > { %v1325_v2 = vpop.f32.mrf.mxu2  ;;  %v1204_v6 = vpop.f32.mrf.mxu1  ;;  %7873 = vmatmul.msk.f32.gmra.mxu3 %vm820_vm0, %v9560_v63 }
 0x12d   : > { %v1405_v7 = vadd.f32 %v1325_v2, %v1202_v0  ;;  %v1205_v16 = vadd.f32 %v1204_v6, %v1082_v57  ;;  %v9588_v57 = vld [vmem:[#allocation2 + $0x151] sm:$0xff]  ;;  %v931_v6 = vld [vmem:[#allocation2 + $0x180] sm:$0xff] }
 0x12f   : > { %v9566_v53 = vadd.f32 %v1607_v59, %v1405_v7  ;;  %7807 = vmatmul.msk.f32.gmra.mxu1 %vm820_vm0, %v924_v4  ;;  %v1085_v11 = vpop.f32.mrf.mxu0  ;;  %v1610_v14 = vpop.f32.mrf.mxu3 }
 0x131   : > { %7840 = vmatmul.msk.f32.gmra.mxu2 %vm820_vm0, %v928_v9 }
 0x132   : > { %7775 = vmatmul.msk.f32.gmra.mxu0 %vm820_vm0, %v927_v38 }
 0x134   : > { %v1328_v19 = vpop.f32.mrf.mxu2  ;;  %v1207_v20 = vpop.f32.mrf.mxu1  ;;  %7874 = vmatmul.msk.f32.gmra.mxu3 %vm820_vm0, %v9570_v15 }
 0x135   : > { %v1406_v21 = vadd.f32 %v1328_v19, %v1205_v16  ;;  %v1208_v36 = vadd.f32 %v1207_v20, %v1085_v11  ;;  %v1712_v16 = vld [vmem:[#allocation15 + $0x10] sm:$0xf] }
 0x136   : > { %7880 = vmatpush.msk.msra.mxu0 %vm1034_vm2, %v1712_v16  ;;  %v9599_v19 = vld [vmem:[#allocation2 + $0x159] sm:$0xff]  ;;  %v9618_v16 = vld [vmem:[#allocation2 + $0x171] sm:$0xff] }
 0x137   : > { %v9575_v29 = vadd.f32 %v1610_v14, %v1406_v21  ;;  %7808 = vmatmul.msk.f32.gmra.mxu1 %vm820_vm0, %v925_v13  ;;  %v1088_v4 = vpop.f32.mrf.mxu0  ;;  %v1613_v32 = vpop.f32.mrf.mxu3  ;;  %v2060_v14 = vld [vmem:[#allocation15 + $0x8] sm:$0xf] }
 0x138   : > { %7946 = vmatpush.msk.msrb.mxu2 %vm1034_vm2, %v2060_v14 }
 0x139   : > { %7841 = vmatmul.msk.f32.gmra.mxu2 %vm820_vm0, %v929_v27 }
 0x13a   : > { %7776 = vmatmul.msk.f32.gmra.mxu0 %vm820_vm0, %v928_v9 }
 0x13c   : > { %v1331_v41 = vpop.f32.mrf.mxu2  ;;  %v1210_v42 = vpop.f32.mrf.mxu1  ;;  %7875 = vmatmul.msk.f32.gmra.mxu3 %vm820_vm0, %v9579_v33 }
 0x13d   : > { %v1407_v47 = vadd.f32 %v1331_v41, %v1208_v36  ;;  %v1211_v59 = vadd.f32 %v1210_v42, %v1088_v4 }
 0x13f   : > { %v9584_v50 = vadd.f32 %v1613_v32, %v1407_v47  ;;  %7809 = vmatmul.msk.f32.gmra.mxu1 %vm820_vm0, %v926_v23  ;;  %v1091_v13 = vpop.f32.mrf.mxu0  ;;  %v1616_v51 = vpop.f32.mrf.mxu3  ;;  %v932_v32 = vld [vmem:[#allocation2 + $0x188] sm:$0xff]  ;;  %v2306_v47 = vld [vmem:[#allocation15 + $0x14] sm:$0xf] }
 0x140   : > { %7979 = vmatpush.msk.msrb.mxu3 %vm1034_vm2, %v2306_v47  ;;  %v1429_v47 = vld [vmem:[#allocation2 + $0x1] sm:$0xff] }
 0x141   : > { %7842 = vmatmul.msk.f32.gmra.mxu2 %vm820_vm0, %v930_v48 }
 0x142   : > { %7777 = vmatmul.msk.f32.gmra.mxu0 %vm820_vm0, %v929_v27 }
 0x144   : > { %v1334_v62 = vpop.f32.mrf.mxu2  ;;  %v1213_v0 = vpop.f32.mrf.mxu1  ;;  %7876 = vmatmul.msk.f32.gmra.mxu3 %vm820_vm0, %v9588_v57 }
 0x145   : > { %v1408_v2 = vadd.f32 %v1334_v62, %v1211_v59  ;;  %v1214_v20 = vadd.f32 %v1213_v0, %v1091_v13 }
 0x147   : > { %v9593_v7 = vadd.f32 %v1616_v51, %v1408_v2  ;;  %7810 = vmatmul.msk.f32.gmra.mxu1 %vm820_vm0, %v927_v38  ;;  %v1094_v23 = vpop.f32.mrf.mxu0  ;;  %v1619_v11 = vpop.f32.mrf.mxu3  ;;  %v9609_v51 = vld [vmem:[#allocation2 + $0x169] sm:$0xff]  ;;  %v933_v2 = vld [vmem:[#allocation2 + $0x198] sm:$0xff] }
 0x149   : > { %7843 = vmatmul.msk.f32.gmra.mxu2 %vm820_vm0, %v931_v6 }
 0x14a   : > { %7778 = vmatmul.msk.f32.gmra.mxu0 %vm820_vm0, %v930_v48 }
 0x14c   : > { %v1337_v21 = vpop.f32.mrf.mxu2  ;;  %v1216_v4 = vpop.f32.mrf.mxu1  ;;  %7877 = vmatmul.msk.f32.gmra.mxu3 %vm820_vm0, %v9599_v19 }
 0x14d   : > { %v1409_v38 = vadd.f32 %v1337_v21, %v1214_v20  ;;  %v1217_v13 = vadd.f32 %v1216_v4, %v1094_v23  ;;  %v934_v4 = vld [vmem:[#allocation2 + $0x1a0] sm:$0xff] }
 0x14f   : > { %v9604_v36 = vadd.f32 %v1619_v11, %v1409_v38  ;;  %7811 = vmatmul.msk.f32.gmra.mxu1 %vm820_vm0, %v928_v9  ;;  %v1097_v41 = vpop.f32.mrf.mxu0  ;;  %v1622_v42 = vpop.f32.mrf.mxu3 }
 0x151   : > { %7844 = vmatmul.msk.f32.gmra.mxu2 %vm820_vm0, %v932_v32 }
 0x152   : > { %7779 = vmatmul.msk.f32.gmra.mxu0 %vm820_vm0, %v931_v6 }
 0x154   : > { %v1340_v59 = vpop.f32.mrf.mxu2  ;;  %v1219_v62 = vpop.f32.mrf.mxu1  ;;  %7878 = vmatmul.msk.f32.gmra.mxu3 %vm820_vm0, %v9609_v51 }
 0x155   : > { %v1410_v0 = vadd.f32 %v1340_v59, %v1217_v13  ;;  %v1220_v6 = vadd.f32 %v1219_v62, %v1097_v41  ;;  %v2462_v13 = vld [vmem:[#allocation15 + $0x20] sm:$0xf]  ;;  %v2025_v59 = vld [vmem:[#allocation2 + $0x1a] sm:$0xff] }
 0x157   : > { %v9614_v9 = vadd.f32 %v1622_v42, %v1410_v0  ;;  %7812 = vmatmul.msk.f32.gmra.mxu1 %vm820_vm0, %v929_v27  ;;  %v1100_v11 = vpop.f32.mrf.mxu0  ;;  %v1625_v14 = vpop.f32.mrf.mxu3 }
 0x159   : > { %7845 = vmatmul.msk.f32.gmra.mxu2 %vm820_vm0, %v933_v2  ;;  %v2023_v2 = vld [vmem:[#allocation2 + $0x2] sm:$0xff] }
 0x15a   : > { %7780 = vmatmul.msk.f32.gmra.mxu0 %vm820_vm0, %v932_v32 }
 0x15c   : > { %v1343_v23 = vpop.f32.mrf.mxu2  ;;  %v1222_v20 = vpop.f32.mrf.mxu1  ;;  %7879 = vmatmul.msk.f32.gmra.mxu3 %vm820_vm0, %v9618_v16 }
 0x15d   : > { %v1411_v21 = vadd.f32 %v1343_v23, %v1220_v6  ;;  %v1223_v32 = vadd.f32 %v1222_v20, %v1100_v11  ;;  %v2026_v23 = vld [vmem:[#allocation2 + $0x22] sm:$0xff] }
 0x15f   : > { %v9623_v38 = vadd.f32 %v1625_v14, %v1411_v21  ;;  %7813 = vmatmul.msk.f32.gmra.mxu1 %vm820_vm0, %v930_v48  ;;  %v1103_v27 = vpop.f32.mrf.mxu0  ;;  %v1628_v42 = vpop.f32.mrf.mxu3 }
 0x161   : > { %7846 = vmatmul.msk.f32.gmra.mxu2 %vm820_vm0, %v934_v4 }
 0x162   : > { %7848 = vmatmul.msk.f32.vlgmr.msrb.gmra.mxu0 %vm820_vm0, %v1429_v47  ;;  %v2024_v47 = vld [vmem:[#allocation2 + $0xa] sm:$0xff] }
 0x163   : > { %8012 = vmatpush.msk.msrb.mxu0 %vm1034_vm2, %v2462_v13  ;;  %vm7146_vm2 = vcmask 519168  }
 0x164   : > { %v1346_v41 = vpop.f32.mrf.mxu2  ;;  %v1225_v62 = vpop.f32.mrf.mxu1  ;;  %7980 = vmatmul.msk.f32.vlgmr.msrb.gmra.mxu3 %vm820_vm0, %v2025_v59 }
 0x165   : > { %v1412_v0 = vadd.f32 %v1346_v41, %v1223_v32  ;;  %v1226_v11 = vadd.f32 %v1225_v62, %v1103_v27  ;;  %v9643_v41 = vld [vmem:[#allocation2 + $0x32] sm:$0xff] }
 0x167   : > { %v9630_v14 = vadd.f32 %v1628_v42, %v1412_v0  ;;  %v1106_v48 = vpop.f32.mrf.mxu0  ;;  %v1631_v6 = vpop.f32.mrf.mxu3  ;;  %7914 = vmatmul.msk.f32.vlgmr.msrb.gmra.mxu1 %vm820_vm0, %v9354_v28 }
 0x169   : > { %7947 = vmatmul.msk.f32.vlgmr.msrb.gmra.mxu2 %vm820_vm0, %v2023_v2 }
 0x16a   : > { %7881 = vmatmul.msk.f32.vlgmr.msra.gmra.mxu0 %vm820_vm0, %v9335_v22 }
 0x16c   : > { %v1349_v20 = vpop.f32.mrf.mxu2  ;;  %v1228_v21 = vpop.f32.mrf.mxu1  ;;  %7981 = vmatmul.msk.f32.gmra.mxu3 %vm820_vm0, %v2026_v23 }
 0x16d   : > { %v1413_v4 = vadd.f32 %v1349_v20, %v1226_v11  ;;  %v1229_v22 = vadd.f32 %v1228_v21, %v1106_v48  ;;  %v9654_v20 = vld [vmem:[#allocation2 + $0x3a] sm:$0xff] }
 0x16f   : > { %v9638_v42 = vadd.f32 %v1631_v6, %v1413_v4  ;;  %v1109_v13 = vpop.f32.mrf.mxu0  ;;  %v1634_v32 = vpop.f32.mrf.mxu3  ;;  %7915 = vmatmul.msk.f32.gmra.mxu1 %vm820_vm0, %v9363_v31 }
 0x171   : > { %12664 = vst [vmem:[#allocation34_spill] sm:$0xff] %v9638_v42  ;;  %7948 = vmatmul.msk.f32.gmra.mxu2 %vm820_vm0, %v2024_v47  ;;  %v12693_v42 = vmov 0.0  }
 0x172   : > { %7882 = vmatmul.msk.f32.gmra.mxu0 %vm820_vm0, %v9345_v25  ;;  %2686 = vst.msk [vmem:[#allocation3] sm:$0xff] %vm2685_vm4, %v12693_v42 }
 0x173   : > { %2695 = vst.msk [vmem:[#allocation3] sm:$0x1] %vm2694_vm5, %v12693_v42 }
 0x174   : > { %v1352_v27 = vpop.f32.mrf.mxu2  ;;  %v1231_v62 = vpop.f32.mrf.mxu1  ;;  %7982 = vmatmul.msk.f32.gmra.mxu3 %vm820_vm0, %v9643_v41  ;;  %2687 = vst.msk [vmem:[#allocation3 + $0x8] sm:$0xff] %vm2685_vm4, %v12693_v42 }
 0x175   : > { %v1414_v0 = vadd.f32 %v1352_v27, %v1229_v22  ;;  %v1232_v25 = vadd.f32 %v1231_v62, %v1109_v13  ;;  %2691 = vst.msk [vmem:[#allocation3 + $0x198] sm:$0xff] %vm2685_vm4, %v12693_v42 }
 0x176   : > { %2692 = vst.msk [vmem:[#allocation3 + $0x1a0] sm:$0xff] %vm2685_vm4, %v12693_v42 }
 0x177   : > { %v9649_v2 = vadd.f32 %v1634_v32, %v1414_v0  ;;  %v1112_v6 = vpop.f32.mrf.mxu0  ;;  %v1637_v11 = vpop.f32.mrf.mxu3  ;;  %7916 = vmatmul.msk.f32.gmra.mxu1 %vm820_vm0, %v9372_v34  ;;  %2696 = vst.msk [vmem:[#allocation3 + $0x18] sm:$0x1] %vm2694_vm5, %v12693_v42 }
 0x178   : > { %2697 = vst.msk [vmem:[#allocation3 + $0x30] sm:$0x1] %vm2694_vm5, %v12693_v42 }
 0x179   : > { %12665 = vst [vmem:[#allocation35_spill] sm:$0xff] %v9649_v2  ;;  %7949 = vmatmul.msk.f32.gmra.mxu2 %vm820_vm0, %v2025_v59  ;;  %v9665_v59 = vld [vmem:[#allocation2 + $0x4a] sm:$0xff] }
 0x17a   : > { %7883 = vmatmul.msk.f32.gmra.mxu0 %vm820_vm0, %v9354_v28  ;;  %2698 = vst.msk [vmem:[#allocation3 + $0x48] sm:$0x1] %vm2694_vm5, %v12693_v42 }
 0x17b   : > { %2699 = vst.msk [vmem:[#allocation3 + $0x60] sm:$0x1] %vm2694_vm5, %v12693_v42 }
 0x17c   : > { %v1355_v48 = vpop.f32.mrf.mxu2  ;;  %v1234_v21 = vpop.f32.mrf.mxu1  ;;  %7983 = vmatmul.msk.f32.gmra.mxu3 %vm820_vm0, %v9654_v20  ;;  %2700 = vst.msk [vmem:[#allocation3 + $0x78] sm:$0x1] %vm2694_vm5, %v12693_v42 }
 0x17d   : > { %v1415_v4 = vadd.f32 %v1355_v48, %v1232_v25  ;;  %v1235_v28 = vadd.f32 %v1234_v21, %v1112_v6  ;;  %2701 = vst.msk [vmem:[#allocation3 + $0x90] sm:$0x1] %vm2694_vm5, %v12693_v42 }
 0x17e   : > { %2702 = vst.msk [vmem:[#allocation3 + $0xa8] sm:$0x1] %vm2694_vm5, %v12693_v42 }
 0x17f   : > { %v9660_v47 = vadd.f32 %v1637_v11, %v1415_v4  ;;  %v1115_v32 = vpop.f32.mrf.mxu0  ;;  %v1640_v22 = vpop.f32.mrf.mxu3  ;;  %7917 = vmatmul.msk.f32.gmra.mxu1 %vm820_vm0, %v9381_v37  ;;  %2703 = vst.msk [vmem:[#allocation3 + $0xc0] sm:$0x1] %vm2694_vm5, %v12693_v42 }
 0x180   : > { %2704 = vst.msk [vmem:[#allocation3 + $0xd8] sm:$0x1] %vm2694_vm5, %v12693_v42 }
 0x181   : > { %12666 = vst [vmem:[#allocation36_spill] sm:$0xff] %v9660_v47  ;;  %7950 = vmatmul.msk.f32.gmra.mxu2 %vm820_vm0, %v2026_v23  ;;  %v9677_v23 = vld [vmem:[#allocation2 + $0x52] sm:$0xff] }
 0x182   : > { %7884 = vmatmul.msk.f32.gmra.mxu0 %vm820_vm0, %v9363_v31  ;;  %2705 = vst.msk [vmem:[#allocation3 + $0xf0] sm:$0x1] %vm2694_vm5, %v12693_v42 }
 0x183   : > { %2706 = vst.msk [vmem:[#allocation3 + $0x108] sm:$0x1] %vm2694_vm5, %v12693_v42 }
 0x184   : > { %v1358_v13 = vpop.f32.mrf.mxu2  ;;  %v1237_v27 = vpop.f32.mrf.mxu1  ;;  %7984 = vmatmul.msk.f32.gmra.mxu3 %vm820_vm0, %v9665_v59  ;;  %2707 = vst.msk [vmem:[#allocation3 + $0x120] sm:$0x1] %vm2694_vm5, %v12693_v42 }
 0x185   : > { %v1416_v62 = vadd.f32 %v1358_v13, %v1235_v28  ;;  %v1238_v31 = vadd.f32 %v1237_v27, %v1115_v32  ;;  %v9689_v13 = vld [vmem:[#allocation2 + $0x62] sm:$0xff]  ;;  %2708 = vst.msk [vmem:[#allocation3 + $0x138] sm:$0x1] %vm2694_vm5, %v12693_v42 }
 0x186   : > { %2709 = vst.msk [vmem:[#allocation3 + $0x150] sm:$0x1] %vm2694_vm5, %v12693_v42 }
 0x187   : > { %v9671_v0 = vadd.f32 %v1640_v22, %v1416_v62  ;;  %v1118_v11 = vpop.f32.mrf.mxu0  ;;  %v1643_v25 = vpop.f32.mrf.mxu3  ;;  %7918 = vmatmul.msk.f32.gmra.mxu1 %vm820_vm0, %v9390_v40  ;;  %2710 = vst.msk [vmem:[#allocation3 + $0x168] sm:$0x1] %vm2694_vm5, %v12693_v42 }
 0x188   : > { %2711 = vst.msk [vmem:[#allocation3 + $0x180] sm:$0x1] %vm2694_vm5, %v12693_v42 }
 0x189   : > { %12667 = vst [vmem:[#allocation37_spill] sm:$0xff] %v9671_v0  ;;  %7951 = vmatmul.msk.f32.gmra.mxu2 %vm820_vm0, %v9643_v41 }
 0x18a   : > { %7885 = vmatmul.msk.f32.gmra.mxu0 %vm820_vm0, %v9372_v34  ;;  %2714 = vst.msk [vmem:[#allocation3 + $0x29] sm:$0x1] %vm2694_vm5, %v12693_v42 }
 0x18b   : > { %2715 = vst.msk [vmem:[#allocation3 + $0x41] sm:$0x1] %vm2694_vm5, %v12693_v42 }
 0x18c   : > { %v1361_v6 = vpop.f32.mrf.mxu2  ;;  %v1240_v48 = vpop.f32.mrf.mxu1  ;;  %7985 = vmatmul.msk.f32.gmra.mxu3 %vm820_vm0, %v9677_v23  ;;  %2716 = vst.msk [vmem:[#allocation3 + $0x59] sm:$0x1] %vm2694_vm5, %v12693_v42 }
 0x18d   : > { %v1417_v21 = vadd.f32 %v1361_v6, %v1238_v31  ;;  %v1241_v34 = vadd.f32 %v1240_v48, %v1118_v11  ;;  %2717 = vst.msk [vmem:[#allocation3 + $0x71] sm:$0x1] %vm2694_vm5, %v12693_v42 }
 0x18e   : > { %2718 = vst.msk [vmem:[#allocation3 + $0x89] sm:$0x1] %vm2694_vm5, %v12693_v42 }
 0x18f   : > { %v9683_v4 = vadd.f32 %v1643_v25, %v1417_v21  ;;  %v1121_v22 = vpop.f32.mrf.mxu0  ;;  %v1646_v28 = vpop.f32.mrf.mxu3  ;;  %7919 = vmatmul.msk.f32.gmra.mxu1 %vm820_vm0, %v9399_v43  ;;  %v9701_v21 = vld [vmem:[#allocation2 + $0x6a] sm:$0xff]  ;;  %2719 = vst.msk [vmem:[#allocation3 + $0xa1] sm:$0x1] %vm2694_vm5, %v12693_v42 }
 0x190   : > { %2720 = vst.msk [vmem:[#allocation3 + $0xb9] sm:$0x1] %vm2694_vm5, %v12693_v42 }
 0x191   : > { %12668 = vst [vmem:[#allocation38_spill] sm:$0xff] %v9683_v4  ;;  %7952 = vmatmul.msk.f32.gmra.mxu2 %vm820_vm0, %v9654_v20 }
 0x192   : > { %7886 = vmatmul.msk.f32.gmra.mxu0 %vm820_vm0, %v9381_v37  ;;  %2721 = vst.msk [vmem:[#allocation3 + $0xd1] sm:$0x1] %vm2694_vm5, %v12693_v42 }
 0x193   : > { %2722 = vst.msk [vmem:[#allocation3 + $0xe9] sm:$0x1] %vm2694_vm5, %v12693_v42 }
 0x194   : > { %v1364_v32 = vpop.f32.mrf.mxu2  ;;  %v1243_v27 = vpop.f32.mrf.mxu1  ;;  %7986 = vmatmul.msk.f32.gmra.mxu3 %vm820_vm0, %v9689_v13  ;;  %2723 = vst.msk [vmem:[#allocation3 + $0x101] sm:$0x1] %vm2694_vm5, %v12693_v42 }
 0x195   : > { %v1418_v62 = vadd.f32 %v1364_v32, %v1241_v34  ;;  %v1244_v37 = vadd.f32 %v1243_v27, %v1121_v22  ;;  %2724 = vst.msk [vmem:[#allocation3 + $0x119] sm:$0x1] %vm2694_vm5, %v12693_v42 }
 0x196   : > { %2725 = vst.msk [vmem:[#allocation3 + $0x131] sm:$0x1] %vm2694_vm5, %v12693_v42 }
 0x197   : > { %v9695_v25 = vadd.f32 %v1646_v28, %v1418_v62  ;;  %v1124_v31 = vpop.f32.mrf.mxu0  ;;  %v1649_v6 = vpop.f32.mrf.mxu3  ;;  %7920 = vmatmul.msk.f32.gmra.mxu1 %vm820_vm0, %v9408_v46  ;;  %2726 = vst.msk [vmem:[#allocation3 + $0x149] sm:$0x1] %vm2694_vm5, %v12693_v42 }
 0x198   : > { %2727 = vst.msk [vmem:[#allocation3 + $0x161] sm:$0x1] %vm2694_vm5, %v12693_v42 }
 0x199   : > { %12669 = vst [vmem:[#allocation39_spill] sm:$0xff] %v9695_v25  ;;  %7953 = vmatmul.msk.f32.gmra.mxu2 %vm820_vm0, %v9665_v59 }
 0x19a   : > { %7887 = vmatmul.msk.f32.gmra.mxu0 %vm820_vm0, %v9390_v40  ;;  %2728 = vst.msk [vmem:[#allocation3 + $0x179] sm:$0x1] %vm2694_vm5, %v12693_v42 }
 0x19b   : > { %2729 = vst.msk [vmem:[#allocation3 + $0x191] sm:$0x1] %vm2694_vm5, %v12693_v42 }
 0x19c   : > { %v1367_v11 = vpop.f32.mrf.mxu2  ;;  %v1246_v48 = vpop.f32.mrf.mxu1  ;;  %7987 = vmatmul.msk.f32.gmra.mxu3 %vm820_vm0, %v9701_v21  ;;  %4625 = vst.msk [vmem:[#allocation4] sm:$0xff] %vm2685_vm4, %v12693_v42 }
 0x19d   : > { %v1419_v28 = vadd.f32 %v1367_v11, %v1244_v37  ;;  %v1247_v40 = vadd.f32 %v1246_v48, %v1124_v31  ;;  %4628 = vst.msk [vmem:[#allocation4 + $0x90] sm:$0xff] %vm2685_vm4, %v12693_v42 }
 0x19e   : > { %4631 = vst.msk [vmem:[#allocation4 + $0x10] sm:$0x1] %vm2694_vm5, %v12693_v42 }
 0x19f   : > { %v9707_v34 = vadd.f32 %v1649_v6, %v1419_v28  ;;  %v1127_v32 = vpop.f32.mrf.mxu0  ;;  %v1652_v62 = vpop.f32.mrf.mxu3  ;;  %7921 = vmatmul.msk.f32.gmra.mxu1 %vm820_vm0, %v9417_v49  ;;  %4632 = vst.msk [vmem:[#allocation4 + $0x20] sm:$0x1] %vm2694_vm5, %v12693_v42 }
 0x1a0   : > { %4633 = vst.msk [vmem:[#allocation4 + $0x30] sm:$0x1] %vm2694_vm5, %v12693_v42 }
 0x1a1   : > { %12670 = vst [vmem:[#allocation40_spill] sm:$0xff] %v9707_v34  ;;  %7954 = vmatmul.msk.f32.gmra.mxu2 %vm820_vm0, %v9677_v23  ;;  %v9725_v34 = vld [vmem:[#allocation2 + $0x82] sm:$0xff] }
 0x1a2   : > { %7888 = vmatmul.msk.f32.gmra.mxu0 %vm820_vm0, %v9399_v43  ;;  %4634 = vst.msk [vmem:[#allocation4 + $0x40] sm:$0x1] %vm2694_vm5, %v12693_v42 }
 0x1a3   : > { %4635 = vst.msk [vmem:[#allocation4 + $0x50] sm:$0x1] %vm2694_vm5, %v12693_v42 }
 0x1a4   : > { %v1370_v22 = vpop.f32.mrf.mxu2  ;;  %v1249_v27 = vpop.f32.mrf.mxu1  ;;  %7988 = vmatmul.msk.f32.gmra.mxu3 %vm820_vm0, %v9713_v1  ;;  %4636 = vst.msk [vmem:[#allocation4 + $0x60] sm:$0x1] %vm2694_vm5, %v12693_v42 }
 0x1a5   : > { %v1420_v6 = vadd.f32 %v1370_v22, %v1247_v40  ;;  %v1250_v43 = vadd.f32 %v1249_v27, %v1127_v32  ;;  %4637 = vst.msk [vmem:[#allocation4 + $0x70] sm:$0x1] %vm2694_vm5, %v12693_v42 }
 0x1a6   : > { %4638 = vst.msk [vmem:[#allocation4 + $0x80] sm:$0x1] %vm2694_vm5, %v12693_v42 }
 0x1a7   : > { %v9719_v37 = vadd.f32 %v1652_v62, %v1420_v6  ;;  %v1130_v11 = vpop.f32.mrf.mxu0  ;;  %v1655_v28 = vpop.f32.mrf.mxu3  ;;  %7922 = vmatmul.msk.f32.gmra.mxu1 %vm820_vm0, %v9426_v52  ;;  %4641 = vst.msk [vmem:[#allocation4 + $0x19] sm:$0x1] %vm2694_vm5, %v12693_v42 }
 0x1a8   : > { %4642 = vst.msk [vmem:[#allocation4 + $0x29] sm:$0x1] %vm2694_vm5, %v12693_v42 }
 0x1a9   : > { %12671 = vst [vmem:[#allocation41_spill] sm:$0xff] %v9719_v37  ;;  %7955 = vmatmul.msk.f32.gmra.mxu2 %vm820_vm0, %v9689_v13  ;;  %v9737_v37 = vld [vmem:[#allocation2 + $0x92] sm:$0xff] }
 0x1aa   : > { %7889 = vmatmul.msk.f32.gmra.mxu0 %vm820_vm0, %v9408_v46  ;;  %4643 = vst.msk [vmem:[#allocation4 + $0x39] sm:$0x1] %vm2694_vm5, %v12693_v42 }
 0x1ab   : > { %4644 = vst.msk [vmem:[#allocation4 + $0x49] sm:$0x1] %vm2694_vm5, %v12693_v42 }
 0x1ac   : > { %v1373_v31 = vpop.f32.mrf.mxu2  ;;  %v1252_v48 = vpop.f32.mrf.mxu1  ;;  %7989 = vmatmul.msk.f32.gmra.mxu3 %vm820_vm0, %v9725_v34  ;;  %4645 = vst.msk [vmem:[#allocation4 + $0x59] sm:$0x1] %vm2694_vm5, %v12693_v42 }
 0x1ad   : > { %v1421_v62 = vadd.f32 %v1373_v31, %v1250_v43  ;;  %v1253_v46 = vadd.f32 %v1252_v48, %v1130_v11  ;;  %4646 = vst.msk [vmem:[#allocation4 + $0x69] sm:$0x1] %vm2694_vm5, %v12693_v42 }
 0x1ae   : > { %4647 = vst.msk [vmem:[#allocation4 + $0x79] sm:$0x1] %vm2694_vm5, %v12693_v42 }
 0x1af   : > { %v9731_v40 = vadd.f32 %v1655_v28, %v1421_v62  ;;  %v1133_v22 = vpop.f32.mrf.mxu0  ;;  %v1658_v6 = vpop.f32.mrf.mxu3  ;;  %7923 = vmatmul.msk.f32.gmra.mxu1 %vm820_vm0, %v9435_v55  ;;  %4648 = vst.msk [vmem:[#allocation4 + $0x89] sm:$0x1] %vm2694_vm5, %v12693_v42 }
 0x1b0   : > { %2712 = vst.msk [vmem:[#allocation3 + $0x198] sm:$0x1] %vm2694_vm5, %v12693_v42 }
 0x1b1   : > { %12672 = vst [vmem:[#allocation42_spill] sm:$0xff] %v9731_v40  ;;  %7956 = vmatmul.msk.f32.gmra.mxu2 %vm820_vm0, %v9701_v21  ;;  %v9749_v40 = vld [vmem:[#allocation2 + $0x9a] sm:$0xff] }
 0x1b2   : > { %7890 = vmatmul.msk.f32.gmra.mxu0 %vm820_vm0, %v9417_v49  ;;  %4630 = vst.msk [vmem:[#allocation4] sm:$0x1] %vm2694_vm5, %v12693_v42 }
 0x1b3   : > { %4639 = vst.msk [vmem:[#allocation4 + $0x90] sm:$0x1] %vm2694_vm5, %v12693_v42 }
 0x1b4   : > { %v1376_v32 = vpop.f32.mrf.mxu2  ;;  %v1255_v27 = vpop.f32.mrf.mxu1  ;;  %7990 = vmatmul.msk.f32.gmra.mxu3 %vm820_vm0, %v9737_v37  ;;  %2689 = vst.msk [vmem:[#allocation3 + $0x10] sm:$0x3] %vm2688_vm6, %v12693_v42 }
 0x1b5   : > { %v1422_v28 = vadd.f32 %v1376_v32, %v1253_v46  ;;  %v1256_v49 = vadd.f32 %v1255_v27, %v1133_v22  ;;  %2693 = vst.msk [vmem:[#allocation3 + $0x1a8] sm:$0x3] %vm2688_vm6, %v12693_v42 }
 0x1b6   : > { %2713 = vst.msk [vmem:[#allocation3 + $0x11] sm:$0x1] %vm2694_vm5, %v12693_v42 }
 0x1b7   : > { %v9743_v43 = vadd.f32 %v1658_v6, %v1422_v28  ;;  %v1136_v31 = vpop.f32.mrf.mxu0  ;;  %v1661_v62 = vpop.f32.mrf.mxu3  ;;  %7924 = vmatmul.msk.f32.gmra.mxu1 %vm820_vm0, %v9444_v58  ;;  %4626 = vst.msk [vmem:[#allocation4 + $0x8] sm:$0x3] %vm2688_vm6, %v12693_v42 }
 0x1b8   : > { %4629 = vst.msk [vmem:[#allocation4 + $0x98] sm:$0x3] %vm2688_vm6, %v12693_v42 }
 0x1b9   : > { %12673 = vst [vmem:[#allocation43_spill] sm:$0xff] %v9743_v43  ;;  %7957 = vmatmul.msk.f32.gmra.mxu2 %vm820_vm0, %v9713_v1  ;;  %v9761_v43 = vld [vmem:[#allocation2 + $0xaa] sm:$0xff] }
 0x1ba   : > { %7891 = vmatmul.msk.f32.gmra.mxu0 %vm820_vm0, %v9426_v52  ;;  %2730 = vst.msk [vmem:[#allocation3 + $0x1a9] sm:$0x1] %vm2694_vm5, %v12693_v42 }
 0x1bb   : > { %4640 = vst.msk [vmem:[#allocation4 + $0x9] sm:$0x1] %vm2694_vm5, %v12693_v42 }
 0x1bc   : > { %v1379_v11 = vpop.f32.mrf.mxu2  ;;  %v1258_v48 = vpop.f32.mrf.mxu1  ;;  %7991 = vmatmul.msk.f32.gmra.mxu3 %vm820_vm0, %v9749_v40  ;;  %4649 = vst.msk [vmem:[#allocation4 + $0x99] sm:$0x1] %vm2694_vm5, %v12693_v42  ;;  %vm7597_vm5 = vcmask 0  }
 0x1bd   : > { %v1423_v6 = vadd.f32 %v1379_v11, %v1256_v49  ;;  %v1259_v52 = vadd.f32 %v1258_v48, %v1136_v31 }
 0x1bf   : > { %v9755_v46 = vadd.f32 %v1661_v62, %v1423_v6  ;;  %v1139_v32 = vpop.f32.mrf.mxu0  ;;  %v1664_v28 = vpop.f32.mrf.mxu3  ;;  %7925 = vmatmul.msk.f32.gmra.mxu1 %vm820_vm0, %v9453_v61 }
 0x1c1   : > { %12674 = vst [vmem:[#allocation44_spill] sm:$0xff] %v9755_v46  ;;  %7958 = vmatmul.msk.f32.gmra.mxu2 %vm820_vm0, %v9725_v34  ;;  %v9773_v46 = vld [vmem:[#allocation2 + $0xb2] sm:$0xff] }
 0x1c2   : > { %7892 = vmatmul.msk.f32.gmra.mxu0 %vm820_vm0, %v9435_v55 }
 0x1c4   : > { %v1382_v22 = vpop.f32.mrf.mxu2  ;;  %v1261_v27 = vpop.f32.mrf.mxu1  ;;  %7992 = vmatmul.msk.f32.gmra.mxu3 %vm820_vm0, %v9761_v43 }
 0x1c5   : > { %v1424_v62 = vadd.f32 %v1382_v22, %v1259_v52  ;;  %v1262_v55 = vadd.f32 %v1261_v27, %v1139_v32 }
 0x1c7   : > { %v9767_v49 = vadd.f32 %v1664_v28, %v1424_v62  ;;  %v1142_v11 = vpop.f32.mrf.mxu0  ;;  %v1667_v6 = vpop.f32.mrf.mxu3  ;;  %7926 = vmatmul.msk.f32.gmra.mxu1 %vm820_vm0, %v9463_v3 }
 0x1c9   : > { %12675 = vst [vmem:[#allocation45_spill] sm:$0xff] %v9767_v49  ;;  %7959 = vmatmul.msk.f32.gmra.mxu2 %vm820_vm0, %v9737_v37  ;;  %v9785_v49 = vld [vmem:[#allocation2 + $0xc2] sm:$0xff] }
 0x1ca   : > { %7893 = vmatmul.msk.f32.gmra.mxu0 %vm820_vm0, %v9444_v58 }
 0x1cc   : > { %v1385_v31 = vpop.f32.mrf.mxu2  ;;  %v1264_v48 = vpop.f32.mrf.mxu1  ;;  %7993 = vmatmul.msk.f32.gmra.mxu3 %vm820_vm0, %v9773_v46 }
 0x1cd   : > { %v1425_v28 = vadd.f32 %v1385_v31, %v1262_v55  ;;  %v1265_v58 = vadd.f32 %v1264_v48, %v1142_v11 }
 0x1cf   : > { %v9779_v52 = vadd.f32 %v1667_v6, %v1425_v28  ;;  %v1145_v22 = vpop.f32.mrf.mxu0  ;;  %v1670_v62 = vpop.f32.mrf.mxu3  ;;  %7927 = vmatmul.msk.f32.gmra.mxu1 %vm820_vm0, %v9472_v8 }
 0x1d1   : > { %12676 = vst [vmem:[#allocation46_spill] sm:$0xff] %v9779_v52  ;;  %7960 = vmatmul.msk.f32.gmra.mxu2 %vm820_vm0, %v9749_v40  ;;  %v2802_v52 = vld [vmem:[#allocation17 + $0x18] sm:$0xff] }
 0x1d2   : > { %7894 = vmatmul.msk.f32.gmra.mxu0 %vm820_vm0, %v9453_v61  ;;  %2914 = vmatpush.msra.mxu1 %v2802_v52  ;;  %v9797_v61 = vld [vmem:[#allocation2 + $0xca] sm:$0xff]  ;;  %v9809_v52 = vld [vmem:[#allocation2 + $0xda] sm:$0xff] }
 0x1d4   : > { %v1388_v32 = vpop.f32.mrf.mxu2  ;;  %v1267_v27 = vpop.f32.mrf.mxu1  ;;  %7994 = vmatmul.msk.f32.gmra.mxu3 %vm820_vm0, %v9785_v49 }
 0x1d5   : > { %v1426_v6 = vadd.f32 %v1388_v32, %v1265_v58  ;;  %v1268_v11 = vadd.f32 %v1267_v27, %v1145_v22 }
 0x1d7   : > { %v9791_v55 = vadd.f32 %v1670_v62, %v1426_v6  ;;  %v1148_v31 = vpop.f32.mrf.mxu0  ;;  %v1673_v28 = vpop.f32.mrf.mxu3  ;;  %7928 = vmatmul.msk.f32.gmra.mxu1 %vm820_vm0, %v9483_v17 }
 0x1d9   : > { %12677 = vst [vmem:[#allocation47_spill] sm:$0xff] %v9791_v55  ;;  %7961 = vmatmul.msk.f32.gmra.mxu2 %vm820_vm0, %v9761_v43 }
 0x1da   : > { %7895 = vmatmul.msk.f32.gmra.mxu0 %vm820_vm0, %v9463_v3 }
 0x1dc   : > { %v1391_v48 = vpop.f32.mrf.mxu2  ;;  %v1270_v58 = vpop.f32.mrf.mxu1  ;;  %7995 = vmatmul.msk.f32.gmra.mxu3 %vm820_vm0, %v9797_v61 }
 0x1dd   : > { %v1427_v62 = vadd.f32 %v1391_v48, %v1268_v11  ;;  %v1271_v3 = vadd.f32 %v1270_v58, %v1148_v31 }
 0x1df   : > { %v9803_v32 = vadd.f32 %v1673_v28, %v1427_v62  ;;  %v1583_v6 = vpop.f32.mrf.mxu0  ;;  %v1676_v55 = vpop.f32.mrf.mxu3  ;;  %7929 = vmatmul.msk.f32.gmra.mxu1 %vm820_vm0, %v9494_v30 }
 0x1e0   : > { %v1679_v11 = vadd.f32 %v1583_v6, %v9478_v12 }
 0x1e1   : > { %12678 = vst [vmem:[#allocation48_spill] sm:$0xff] %v9803_v32  ;;  %7962 = vmatmul.msk.f32.gmra.mxu2 %vm820_vm0, %v9773_v46 }
 0x1e2   : > { %7896 = vmatmul.msk.f32.gmra.mxu0 %vm820_vm0, %v9472_v8  ;;  %v9822_v8 = vld [vmem:[#allocation2 + $0xe2] sm:$0xff] }
 0x1e4   : > { %v1394_v22 = vpop.f32.mrf.mxu2  ;;  %v1895_v27 = vpop.f32.mrf.mxu1  ;;  %7996 = vmatmul.msk.f32.gmra.mxu3 %vm820_vm0, %v9809_v52 }
 0x1e5   : > { %v1428_v28 = vadd.f32 %v1394_v22, %v1271_v3 }
 0x1e7   : > { %v9816_v48 = vadd.f32 %v1676_v55, %v1428_v28  ;;  %v1739_v62 = vpop.f32.mrf.mxu0  ;;  %7930 = vmatmul.msk.f32.gmra.mxu1 %vm820_vm0, %v9505_v45  ;;  %v2333_v32 = vpop.f32.mrf.mxu3 }
 0x1e8   : > { %v1835_v25 = vadd.f32 %v1739_v62, %v1679_v11 }
 0x1e9   : > { %12679 = vst [vmem:[#allocation49_spill] sm:$0xff] %v9816_v48  ;;  %7963 = vmatmul.msk.f32.gmra.mxu2 %vm820_vm0, %v9785_v49 }
 0x1ea   : > { %v1991_v31 = vadd.f32 %v1895_v27, %v1835_v25  ;;  %7897 = vmatmul.msk.f32.gmra.mxu0 %vm820_vm0, %v9483_v17  ;;  %v9835_v25 = vld [vmem:[#allocation2 + $0xf2] sm:$0xff] }
 0x1ec   : > { %v2177_v58 = vpop.f32.mrf.mxu2  ;;  %v1898_v3 = vpop.f32.mrf.mxu1  ;;  %7997 = vmatmul.msk.f32.gmra.mxu3 %vm820_vm0, %v9822_v8 }
 0x1ed   : > { %v2273_v12 = vadd.f32 %v2177_v58, %v1991_v31 }
 0x1ef   : > { %v9828_v55 = vadd.f32 %v2333_v32, %v2273_v12  ;;  %v1742_v6 = vpop.f32.mrf.mxu0  ;;  %7931 = vmatmul.msk.f32.gmra.mxu1 %vm820_vm0, %v9516_v60  ;;  %v2336_v22 = vpop.f32.mrf.mxu3 }
 0x1f0   : > { %v1836_v28 = vadd.f32 %v1742_v6, %v9489_v24 }
 0x1f1   : > { %7964 = vmatmul.msk.f32.gmra.mxu2 %vm820_vm0, %v9797_v61 }
 0x1f2   : > { %v1992_v17 = vadd.f32 %v1898_v3, %v1836_v28  ;;  %7898 = vmatmul.msk.f32.gmra.mxu0 %vm820_vm0, %v9494_v30  ;;  %v9848_v3 = vld [vmem:[#allocation2 + $0xfa] sm:$0xff] }
 0x1f4   : > { %v2180_v27 = vpop.f32.mrf.mxu2  ;;  %v1901_v11 = vpop.f32.mrf.mxu1  ;;  %7998 = vmatmul.msk.f32.gmra.mxu3 %vm820_vm0, %v9835_v25 }
 0x1f5   : > { %v2274_v32 = vadd.f32 %v2180_v27, %v1992_v17 }
 0x1f7   : > { %v9841_v62 = vadd.f32 %v2336_v22, %v2274_v32  ;;  %v1745_v31 = vpop.f32.mrf.mxu0  ;;  %7932 = vmatmul.msk.f32.gmra.mxu1 %vm820_vm0, %v9527_v10  ;;  %v2339_v24 = vpop.f32.mrf.mxu3 }
 0x1f8   : > { %v1837_v58 = vadd.f32 %v1745_v31, %v9500_v39 }
 0x1f9   : > { %7965 = vmatmul.msk.f32.gmra.mxu2 %vm820_vm0, %v9809_v52 }
 0x1fa   : > { %v1993_v30 = vadd.f32 %v1901_v11, %v1837_v58  ;;  %7899 = vmatmul.msk.f32.gmra.mxu0 %vm820_vm0, %v9505_v45  ;;  %v9861_v11 = vld [vmem:[#allocation2 + $0x10a] sm:$0xff] }
 0x1fc   : > { %v2183_v12 = vpop.f32.mrf.mxu2  ;;  %v1904_v6 = vpop.f32.mrf.mxu1  ;;  %7999 = vmatmul.msk.f32.gmra.mxu3 %vm820_vm0, %v9848_v3 }
 0x1fd   : > { %v2275_v22 = vadd.f32 %v2183_v12, %v1993_v30 }
 0x1ff   : > { %v9854_v28 = vadd.f32 %v2339_v24, %v2275_v22  ;;  %v1748_v17 = vpop.f32.mrf.mxu0  ;;  %7933 = vmatmul.msk.f32.gmra.mxu1 %vm820_vm0, %v9538_v26  ;;  %v2342_v39 = vpop.f32.mrf.mxu3 }
 0x200   : > { %v1838_v27 = vadd.f32 %v1748_v17, %v9511_v54 }
 0x201   : > { %7966 = vmatmul.msk.f32.gmra.mxu2 %vm820_vm0, %v9822_v8 }
 0x202   : > { %v1994_v45 = vadd.f32 %v1904_v6, %v1838_v27  ;;  %7900 = vmatmul.msk.f32.gmra.mxu0 %vm820_vm0, %v9516_v60  ;;  %v9874_v6 = vld [vmem:[#allocation2 + $0x112] sm:$0xff] }
 0x204   : > { %v2186_v32 = vpop.f32.mrf.mxu2  ;;  %v1907_v31 = vpop.f32.mrf.mxu1  ;;  %8000 = vmatmul.msk.f32.gmra.mxu3 %vm820_vm0, %v9861_v11 }
 0x205   : > { %v2276_v24 = vadd.f32 %v2186_v32, %v1994_v45 }
 0x207   : > { %v9867_v58 = vadd.f32 %v2342_v39, %v2276_v24  ;;  %v1751_v30 = vpop.f32.mrf.mxu0  ;;  %7934 = vmatmul.msk.f32.gmra.mxu1 %vm820_vm0, %v9549_v44  ;;  %v2345_v54 = vpop.f32.mrf.mxu3 }
 0x208   : > { %v1839_v12 = vadd.f32 %v1751_v30, %v9522_v5 }
 0x209   : > { %7967 = vmatmul.msk.f32.gmra.mxu2 %vm820_vm0, %v9835_v25 }
 0x20a   : > { %v1995_v60 = vadd.f32 %v1907_v31, %v1839_v12  ;;  %7901 = vmatmul.msk.f32.gmra.mxu0 %vm820_vm0, %v9527_v10  ;;  %v9887_v31 = vld [vmem:[#allocation2 + $0x122] sm:$0xff] }
 0x20c   : > { %v2189_v22 = vpop.f32.mrf.mxu2  ;;  %v1910_v17 = vpop.f32.mrf.mxu1  ;;  %8001 = vmatmul.msk.f32.gmra.mxu3 %vm820_vm0, %v9874_v6 }
 0x20d   : > { %v2277_v39 = vadd.f32 %v2189_v22, %v1995_v60  ;;  %v9900_v22 = vld [vmem:[#allocation2 + $0x12a] sm:$0xff] }
 0x20f   : > { %v9880_v27 = vadd.f32 %v2345_v54, %v2277_v39  ;;  %v1754_v45 = vpop.f32.mrf.mxu0  ;;  %7935 = vmatmul.msk.f32.gmra.mxu1 %vm820_vm0, %v9560_v63  ;;  %v2348_v32 = vpop.f32.mrf.mxu3 }
 0x210   : > { %v1840_v5 = vadd.f32 %v1754_v45, %v9533_v18 }
 0x211   : > { %7968 = vmatmul.msk.f32.gmra.mxu2 %vm820_vm0, %v9848_v3 }
 0x212   : > { %v1996_v10 = vadd.f32 %v1910_v17, %v1840_v5  ;;  %7902 = vmatmul.msk.f32.gmra.mxu0 %vm820_vm0, %v9538_v26 }
 0x214   : > { %v2192_v24 = vpop.f32.mrf.mxu2  ;;  %8002 = vmatmul.msk.f32.gmra.mxu3 %vm820_vm0, %v9887_v31  ;;  %v1913_v54 = vpop.f32.mrf.mxu1 }
 0x215   : > { %v2278_v30 = vadd.f32 %v2192_v24, %v1996_v10  ;;  %v9913_v24 = vld [vmem:[#allocation2 + $0x13a] sm:$0xff] }
 0x217   : > { %v9893_v12 = vadd.f32 %v2348_v32, %v2278_v30  ;;  %v1757_v60 = vpop.f32.mrf.mxu0  ;;  %7936 = vmatmul.msk.f32.gmra.mxu1 %vm820_vm0, %v9570_v15  ;;  %v2351_v17 = vpop.f32.mrf.mxu3 }
 0x218   : > { %v1841_v18 = vadd.f32 %v1757_v60, %v9544_v35 }
 0x219   : > { %7969 = vmatmul.msk.f32.gmra.mxu2 %vm820_vm0, %v9861_v11 }
 0x21a   : > { %v1997_v26 = vadd.f32 %v1913_v54, %v1841_v18  ;;  %7903 = vmatmul.msk.f32.gmra.mxu0 %vm820_vm0, %v9549_v44 }
 0x21c   : > { %v2195_v39 = vpop.f32.mrf.mxu2  ;;  %8003 = vmatmul.msk.f32.gmra.mxu3 %vm820_vm0, %v9900_v22  ;;  %v1916_v10 = vpop.f32.mrf.mxu1 }
 0x21d   : > { %v2279_v45 = vadd.f32 %v2195_v39, %v1997_v26  ;;  %v9951_v39 = vld [vmem:[#allocation2 + $0x15a] sm:$0xff] }
 0x21f   : > { %v9906_v5 = vadd.f32 %v2351_v17, %v2279_v45  ;;  %v1760_v32 = vpop.f32.mrf.mxu0  ;;  %7937 = vmatmul.msk.f32.gmra.mxu1 %vm820_vm0, %v9579_v33  ;;  %v2354_v54 = vpop.f32.mrf.mxu3  ;;  %v9939_v17 = vld [vmem:[#allocation2 + $0x152] sm:$0xff]  ;;  %v9963_v45 = vld [vmem:[#allocation2 + $0x16a] sm:$0xff] }
 0x220   : > { %v1842_v35 = vadd.f32 %v1760_v32, %v9555_v56  ;;  %v9927_v56 = vld [vmem:[#allocation2 + $0x142] sm:$0xff] }
 0x221   : > { %7970 = vmatmul.msk.f32.gmra.mxu2 %vm820_vm0, %v9874_v6 }
 0x222   : > { %v1998_v44 = vadd.f32 %v1916_v10, %v1842_v35  ;;  %7904 = vmatmul.msk.f32.gmra.mxu0 %vm820_vm0, %v9560_v63  ;;  %v9974_v10 = vld [vmem:[#allocation2 + $0x172] sm:$0xff] }
 0x224   : > { %v2198_v30 = vpop.f32.mrf.mxu2  ;;  %8004 = vmatmul.msk.f32.gmra.mxu3 %vm820_vm0, %v9913_v24  ;;  %v10033_v0 = vpop.f32.mrf.mxu1 }
 0x225   : > { %v2280_v60 = vadd.f32 %v2198_v30, %v1998_v44  ;;  %v9985_v44 = vld [vmem:[#allocation2 + $0x182] sm:$0xff] }
 0x227   : > { %v9919_v18 = vadd.f32 %v2354_v54, %v2280_v60  ;;  %v9921_v26 = vpop.f32.mrf.mxu0  ;;  %7938 = vmatmul.msk.f32.gmra.mxu1 %vm820_vm0, %v9588_v57  ;;  %v9996_v54 = vld [vmem:[#allocation2 + $0x18a] sm:$0xff]  ;;  %v1464_v60 = vld [vmem:[#allocation2 + $0x1a1] sm:$0xff] }
 0x228   : > { %12680 = vst [vmem:[#allocation50_spill] sm:$0xff] %v9996_v54 }
 0x229   : > { %7971 = vmatmul.msk.f32.gmra.mxu2 %vm820_vm0, %v9887_v31 }
 0x22a   : > { %7905 = vmatmul.msk.f32.gmra.mxu0 %vm820_vm0, %v9570_v15 }
 0x22c   : > { %8005 = vmatmul.msk.f32.gmra.mxu3 %vm820_vm0, %v9927_v56 }
 0x22f   : > { %v9933_v63 = vpop.f32.mrf.mxu0  ;;  %7939 = vmatmul.msk.f32.gmra.mxu1 %vm820_vm0, %v9599_v19 }
 0x231   : > { %7972 = vmatmul.msk.f32.gmra.mxu2 %vm820_vm0, %v9900_v22 }
 0x232   : > { %7906 = vmatmul.msk.f32.gmra.mxu0 %vm820_vm0, %v9579_v33 }
 0x234   : > { %8006 = vmatmul.msk.f32.gmra.mxu3 %vm820_vm0, %v9939_v17 }
 0x237   : > { %v9945_v15 = vpop.f32.mrf.mxu0  ;;  %7940 = vmatmul.msk.f32.gmra.mxu1 %vm820_vm0, %v9609_v51 }
 0x239   : > { %7973 = vmatmul.msk.f32.gmra.mxu2 %vm820_vm0, %v9913_v24 }
 0x23a   : > { %7907 = vmatmul.msk.f32.gmra.mxu0 %vm820_vm0, %v9588_v57  ;;  %v1461_v57 = vld [vmem:[#allocation2 + $0x181] sm:$0xff] }
 0x23c   : > { %8007 = vmatmul.msk.f32.gmra.mxu3 %vm820_vm0, %v9951_v39 }
 0x23f   : > { %v9957_v33 = vpop.f32.mrf.mxu0  ;;  %7941 = vmatmul.msk.f32.gmra.mxu1 %vm820_vm0, %v9618_v16 }
 0x241   : > { %7974 = vmatmul.msk.f32.gmra.mxu2 %vm820_vm0, %v9927_v56 }
 0x242   : > { %7908 = vmatmul.msk.f32.gmra.mxu0 %vm820_vm0, %v9599_v19  ;;  %v1462_v19 = vld [vmem:[#allocation2 + $0x189] sm:$0xff] }
 0x244   : > { %8008 = vmatmul.msk.f32.gmra.mxu3 %vm820_vm0, %v9963_v45 }
 0x247   : > { %v9969_v32 = vpop.f32.mrf.mxu0  ;;  %7942 = vmatmul.msk.f32.gmra.mxu1 %vm820_vm0, %v1461_v57 }
 0x249   : > { %7975 = vmatmul.msk.f32.gmra.mxu2 %vm820_vm0, %v9939_v17 }
 0x24a   : > { %7909 = vmatmul.msk.f32.gmra.mxu0 %vm820_vm0, %v9609_v51  ;;  %v1463_v51 = vld [vmem:[#allocation2 + $0x199] sm:$0xff] }
 0x24c   : > { %8009 = vmatmul.msk.f32.gmra.mxu3 %vm820_vm0, %v9974_v10 }
 0x24f   : > { %v9980_v35 = vpop.f32.mrf.mxu0  ;;  %7943 = vmatmul.msk.f32.gmra.mxu1 %vm820_vm0, %v1462_v19 }
 0x251   : > { %7976 = vmatmul.msk.f32.gmra.mxu2 %vm820_vm0, %v9951_v39 }
 0x252   : > { %7910 = vmatmul.msk.f32.gmra.mxu0 %vm820_vm0, %v9618_v16 }
 0x254   : > { %8010 = vmatmul.msk.f32.gmra.mxu3 %vm820_vm0, %v9985_v44 }
 0x257   : > { %v9991_v30 = vpop.f32.mrf.mxu0  ;;  %7944 = vmatmul.msk.f32.gmra.mxu1 %vm820_vm0, %v1463_v51 }
 0x259   : > { %7977 = vmatmul.msk.f32.gmra.mxu2 %vm820_vm0, %v9963_v45 }
 0x25a   : > { %7911 = vmatmul.msk.f32.gmra.mxu0 %vm820_vm0, %v1461_v57 }
 0x25c   : > { %8011 = vmatmul.msk.f32.gmra.mxu3 %vm820_vm0, %v9996_v54  ;;  %v3321_v54 = vld [vmem:[#allocation17 + $0x8] sm:$0xff] }
 0x25d   : > { %3433 = vmatpush.msra.mxu0 %v3321_v54 }
 0x25f   : > { %v10001_v16 = vpop.f32.mrf.mxu0  ;;  %7945 = vmatmul.msk.f32.gmra.mxu1 %vm820_vm0, %v1464_v60 }
 0x261   : > { %7978 = vmatmul.msk.f32.gmra.mxu2 %vm820_vm0, %v9974_v10 }
 0x262   : > { %7912 = vmatmul.msk.f32.gmra.mxu0 %vm820_vm0, %v1462_v19  ;;  %v10023_v19 = vpop.f32.mrf.mxu2 }
 0x267   : > { %v10007_v51 = vpop.f32.mrf.mxu0 }
 0x268   : > { %12681 = vst [vmem:[#allocation51_spill] sm:$0xff] %v10007_v51 }
 0x26a   : > { %8013 = vmatmul.msk.f32.vlgmr.msrb.gmra.mxu0 %vm820_vm0, %v9643_v41  ;;  %v10029_v41 = vpop.f32.mrf.mxu2 }
 0x26f   : > { %v10011_v48 = vpop.f32.mrf.mxu0 }
 0x270   : > { %12682 = vst [vmem:[#allocation52_spill] sm:$0xff] %v10011_v48 }
 0x272   : > { %8014 = vmatmul.msk.f32.gmra.mxu0 %vm820_vm0, %v9654_v20 }
 0x277   : > { %v10015_v57 = vpop.f32.mrf.mxu0 }
 0x278   : > { %12683 = vst [vmem:[#allocation53_spill] sm:$0xff] %v10015_v57 }
 0x27a   : > { %8015 = vmatmul.msk.f32.gmra.mxu0 %vm820_vm0, %v9665_v59 }
 0x27f   : > { %v10019_v60 = vpop.f32.mrf.mxu0 }
 0x280   : > { %12684 = vst [vmem:[#allocation54_spill] sm:$0xff] %v10019_v60  ;;  %v10039_v60 = vpop.f32.mrf.mxu2 }
 0x282   : > { %8016 = vmatmul.msk.f32.gmra.mxu0 %vm820_vm0, %v9677_v23  ;;  %v10043_v23 = vpop.f32.mrf.mxu1 }
 0x287   : > { %v10025_v4 = vpop.f32.mrf.mxu0 }
 0x288   : > { %12685 = vst [vmem:[#allocation55_spill] sm:$0xff] %v10025_v4  ;;  %v10045_v4 = vpop.f32.mrf.mxu3  ;;  %v10049_v57 = vpop.f32.mrf.mxu2 }
 0x28a   : > { %8017 = vmatmul.msk.f32.gmra.mxu0 %vm820_vm0, %v9689_v13 }
 0x28f   : > { %v10031_v20 = vpop.f32.mrf.mxu0 }
 0x290   : > { %12686 = vst [vmem:[#allocation56_spill] sm:$0xff] %v10031_v20  ;;  %v10053_v20 = vpop.f32.mrf.mxu1 }
 0x292   : > { %8018 = vmatmul.msk.f32.gmra.mxu0 %vm820_vm0, %v9701_v21  ;;  %v10055_v21 = vpop.f32.mrf.mxu3 }
 0x297   : > { %v10037_v59 = vpop.f32.mrf.mxu0 }
 0x298   : > { %12687 = vst [vmem:[#allocation57_spill] sm:$0xff] %v10037_v59  ;;  %v10065_v48 = vpop.f32.mrf.mxu1 }
 0x29a   : > { %8019 = vmatmul.msk.f32.gmra.mxu0 %vm820_vm0, %v9713_v1  ;;  %v10061_v1 = vpop.f32.mrf.mxu2 }
 0x29f   : > { %v10047_v13 = vpop.f32.mrf.mxu0 }
 0x2a0   : > { %12688 = vst [vmem:[#allocation58_spill] sm:$0xff] %v10047_v13  ;;  %v10067_v13 = vpop.f32.mrf.mxu3  ;;  %v10075_v51 = vpop.f32.mrf.mxu1 }
 0x2a2   : > { %8020 = vmatmul.msk.f32.gmra.mxu0 %vm820_vm0, %v9725_v34  ;;  %v10071_v34 = vpop.f32.mrf.mxu2 }
 0x2a7   : > { %v10057_v59 = vpop.f32.mrf.mxu0 }
 0x2a8   : > { %12689 = vst [vmem:[#allocation59_spill] sm:$0xff] %v10057_v59 }
 0x2aa   : > { %8021 = vmatmul.msk.f32.gmra.mxu0 %vm820_vm0, %v9737_v37  ;;  %v10079_v37 = vpop.f32.mrf.mxu3 }
 0x2af   : > { %v10063_v47 = vpop.f32.mrf.mxu0 }
 0x2b0   : > { %12690 = vst [vmem:[#allocation60_spill] sm:$0xff] %v10063_v47  ;;  %v10083_v47 = vpop.f32.mrf.mxu2 }
 0x2b2   : > { %8022 = vmatmul.msk.f32.gmra.mxu0 %vm820_vm0, %v9749_v40  ;;  %v10087_v40 = vpop.f32.mrf.mxu1 }
 0x2b7   : > { %v10073_v2 = vpop.f32.mrf.mxu0 }
 0x2b8   : > { %12691 = vst [vmem:[#allocation61_spill] sm:$0xff] %v10073_v2  ;;  %v10091_v2 = vpop.f32.mrf.mxu3 }
 0x2ba   : > { %8023 = vmatmul.msk.f32.gmra.mxu0 %vm820_vm0, %v9761_v43 }
 0x2bf   : > { %v10081_v59 = vpop.f32.mrf.mxu0 }
 0x2c0   : > { %12692 = vst [vmem:[#allocation62_spill] sm:$0xff] %v10081_v59  ;;  %v2800_v59 = vld [vmem:[#allocation17] sm:$0xff] }
 0x2c1   : > { %3033 = vmatpush.msra.mxu2 %v2800_v59  ;;  %v10118_v59 = vpop.f32.mrf.mxu1 }
 0x2c2   : > { %8024 = vmatmul.msk.f32.gmra.mxu0 %vm820_vm0, %v9773_v46  ;;  %v10105_v46 = vpop.f32.mrf.mxu2 }
 0x2c3   : > { %12695 = vst [vmem:[#allocation64_spill] sm:$0xff] %v10105_v46 }
 0x2c7   : > { %v10097_v43 = vpop.f32.mrf.mxu0 }
 0x2c8   : > { %12694 = vst [vmem:[#allocation63_spill] sm:$0xff] %v10097_v43  ;;  %v2764_v43 = vld [vmem:[#allocation3] sm:$0xff] }
 0x2c9   : > { %8077 = vmatmul.msk.f32.vlgmr.msra.gmra.mxu2 %vm2685_vm4, %v2764_v43 }
 0x2ca   : > { %8025 = vmatmul.msk.f32.gmra.mxu0 %vm820_vm0, %v9785_v49  ;;  %v10122_v49 = vpop.f32.mrf.mxu3  ;;  %v10138_v43 = vpop.f32.mrf.mxu2 }
 0x2cb   : > { %12697 = vst [vmem:[#allocation66_spill] sm:$0xff] %v10138_v43 }
 0x2cf   : > { %v10124_v46 = vpop.f32.mrf.mxu0 }
 0x2d0   : > { %12696 = vst [vmem:[#allocation65_spill] sm:$0xff] %v10124_v46 }
 0x2d2   : > { %8026 = vmatmul.msk.f32.gmra.mxu0 %vm820_vm0, %v9797_v61  ;;  %v10150_v61 = vpop.f32.mrf.mxu1  ;;  %v10154_v43 = vpop.f32.mrf.mxu3 }
 0x2d3   : > { %12699 = vst [vmem:[#allocation68_spill] sm:$0xff] %v10150_v61  ;;  %v10169_v61 = vpop.f32.mrf.mxu2 }
 0x2d4   : > { %12700 = vst [vmem:[#allocation69_spill] sm:$0xff] %v10154_v43 }
 0x2d5   : > { %12701 = vst [vmem:[#allocation70_spill] sm:$0xff] %v10169_v61  ;;  %v10227_v61 = vld [vmem:[%s12707_s22] ss:$0 sm:$0xff] }
 0x2d7   : > { %v10146_v46 = vpop.f32.mrf.mxu0 }
 0x2d8   : > { %12698 = vst [vmem:[#allocation67_spill] sm:$0xff] %v10146_v46  ;;  %v2765_v46 = vld [vmem:[#allocation3 + $0x8] sm:$0xff] }
 0x2d9   : > { %8078 = vmatmul.msk.f32.gmra.mxu2 %vm2685_vm4, %v2765_v46 }
 0x2da   : > { %8027 = vmatmul.msk.f32.gmra.mxu0 %vm820_vm0, %v9809_v52  ;;  %v3132_v52 = vld [vmem:[#allocation17 + $0x30] sm:$0xff]  ;;  %v10181_v46 = vpop.f32.mrf.mxu1 }
 0x2db   : > { %3154 = vmatpush.msra.mxu3 %v3132_v52  ;;  %12703 = vst [vmem:[#allocation72_spill] sm:$0xff] %v10181_v46  ;;  %v3564_v52 = vld [vmem:[#allocation17 + $0x20] sm:$0xff]  ;;  %v10199_v54 = vpop.f32.mrf.mxu2 }
 0x2dc   : > { %3586 = vmatpush.msrb.mxu1 %v3564_v52  ;;  %12704 = vst [vmem:[#allocation73_spill] sm:$0xff] %v10199_v54 }
 0x2df   : > { %v10173_v43 = vpop.f32.mrf.mxu0 }
 0x2e0   : > { %12702 = vst [vmem:[#allocation71_spill] sm:$0xff] %v10173_v43  ;;  %v10187_v43 = vpop.f32.mrf.mxu3 }
 0x2e2   : > { %8028 = vmatmul.msk.f32.gmra.mxu0 %vm820_vm0, %v9822_v8  ;;  %v10211_v52 = vpop.f32.mrf.mxu1 }
 0x2e3   : > { %12705 = vst [vmem:[#allocation74_spill] sm:$0xff] %v10211_v52 }
 0x2e7   : > { %v2489_v8 = vpop.f32.mrf.mxu0 }
 0x2e8   : > { %v10215_v54 = vpop.f32.mrf.mxu3 }
 0x2e9   : > { %12706 = vst [vmem:[#allocation75_spill] sm:$0xff] %v10215_v54  ;;  %v10233_v54 = vpop.f32.mrf.mxu2 }
 0x2ea   : > { %8029 = vmatmul.msk.f32.gmra.mxu0 %vm820_vm0, %v9835_v25  ;;  %v2585_v25 = vadd.f32 %v2489_v8, %v9828_v55  ;;  %12708 = vst [vmem:[#allocation76_spill] sm:$0xff] %v10233_v54  ;;  %v10247_v54 = vpop.f32.mrf.mxu1 }
 0x2eb   : > { %12709 = vst [vmem:[#allocation77_spill] sm:$0xff] %v10247_v54 }
 0x2ec   : > { %v2621_v55 = vadd.f32 %v10227_v61, %v2585_v25 }
 0x2ef   : > { %v2492_v52 = vpop.f32.mrf.mxu0 }
 0x2f0   : > { %v2586_v8 = vadd.f32 %v2492_v52, %v9841_v62  ;;  %v10251_v46 = vpop.f32.mrf.mxu3 }
 0x2f2   : > { %8030 = vmatmul.msk.f32.gmra.mxu0 %vm820_vm0, %v9848_v3  ;;  %v2653_v3 = vmax.f32 %v2621_v55, 0.0  ;;  %v2622_v25 = vadd.f32 %v10227_v61, %v2586_v8  ;;  %v10267_v8 = vpop.f32.mrf.mxu2 }
 0x2f3   : > { %12710 = vst [vmem:[#allocation78_spill] sm:$0xff] %v10267_v8 }
 0x2f4   : > { %2732 = vst.msk [vmem:[#allocation3 + $0x19] sm:$0xff] %vm2685_vm4, %v2653_v3  ;;  %v2654_v55 = vmax.f32 %v2622_v25, 0.0 }
 0x2f6   : > { %2733 = vst.msk [vmem:[#allocation3 + $0x21] sm:$0xff] %vm2685_vm4, %v2654_v55 }
 0x2f7   : > { %v2495_v62 = vpop.f32.mrf.mxu0 }
 0x2f8   : > { %v2587_v52 = vadd.f32 %v2495_v62, %v9854_v28  ;;  %v10280_v3 = vpop.f32.mrf.mxu3 }
 0x2f9   : > { %12712 = vst [vmem:[#allocation80_spill] sm:$0xff] %v10280_v3 }
 0x2fa   : > { %v2623_v54 = vadd.f32 %v10227_v61, %v2587_v52  ;;  %8031 = vmatmul.msk.f32.gmra.mxu0 %vm820_vm0, %v9861_v11  ;;  %v10276_v52 = vpop.f32.mrf.mxu1  ;;  %v10287_v8 = vpop.f32.mrf.mxu2 }
 0x2fb   : > { %12711 = vst [vmem:[#allocation79_spill] sm:$0xff] %v10276_v52  ;;  %v2766_v25 = vld [vmem:[#allocation3 + $0x18] sm:$0xff] }
 0x2fc   : > { %v2655_v28 = vmax.f32 %v2623_v54, 0.0  ;;  %8045 = vmatmul.msk.f32.vlgmr.msra.gmra.mxu1 %vm2685_vm4, %v2766_v25  ;;  %8079 = vmatmul.msk.f32.gmra.mxu2 %vm2685_vm4, %v2766_v25  ;;  %12713 = vst [vmem:[#allocation81_spill] sm:$0xff] %v10287_v8 }
 0x2fe   : > { %2734 = vst.msk [vmem:[#allocation3 + $0x31] sm:$0xff] %vm2685_vm4, %v2655_v28 }
 0x2ff   : > { %v2498_v62 = vpop.f32.mrf.mxu0 }
 0x300   : > { %v2588_v11 = vadd.f32 %v2498_v62, %v9867_v58  ;;  %v2767_v58 = vld [vmem:[#allocation3 + $0x20] sm:$0xff]  ;;  %v10297_v25 = vpop.f32.mrf.mxu3 }
 0x302   : > { %v2624_v54 = vadd.f32 %v10227_v61, %v2588_v11  ;;  %8032 = vmatmul.msk.f32.gmra.mxu0 %vm820_vm0, %v9874_v6  ;;  %v10292_v11 = vpop.f32.mrf.mxu1  ;;  %v10302_v3 = vpop.f32.mrf.mxu2 }
 0x303   : > { %12714 = vst [vmem:[#allocation82_spill] sm:$0xff] %v10302_v3 }
 0x304   : > { %v2656_v55 = vmax.f32 %v2624_v54, 0.0  ;;  %8046 = vmatmul.msk.f32.gmra.mxu1 %vm2685_vm4, %v2767_v58  ;;  %8080 = vmatmul.msk.f32.gmra.mxu2 %vm2685_vm4, %v2767_v58 }
 0x305   : > { %v2768_v28 = vld [vmem:[#allocation3 + $0x30] sm:$0xff] }
 0x306   : > { %2735 = vst.msk [vmem:[#allocation3 + $0x39] sm:$0xff] %vm2685_vm4, %v2656_v55  ;;  %8109 = vmatmul.msk.f32.vlgmr.msra.gmra.mxu3 %vm2685_vm4, %v2768_v28 }
 0x307   : > { %v2501_v52 = vpop.f32.mrf.mxu0 }
 0x308   : > { %v2589_v62 = vadd.f32 %v2501_v52, %v9880_v27 }
 0x30a   : > { %v2625_v6 = vadd.f32 %v10227_v61, %v2589_v62  ;;  %8033 = vmatmul.msk.f32.gmra.mxu0 %vm820_vm0, %v9887_v31  ;;  %v10311_v31 = vpop.f32.mrf.mxu1  ;;  %v10313_v62 = vpop.f32.mrf.mxu3 }
 0x30c   : > { %v2657_v54 = vmax.f32 %v2625_v6, 0.0  ;;  %8047 = vmatmul.msk.f32.gmra.mxu1 %vm2685_vm4, %v2768_v28  ;;  %8081 = vmatmul.msk.f32.gmra.mxu2 %vm2685_vm4, %v2768_v28 }
 0x30d   : > { %v2769_v55 = vld [vmem:[#allocation3 + $0x38] sm:$0xff] }
 0x30e   : > { %2736 = vst.msk [vmem:[#allocation3 + $0x49] sm:$0xff] %vm2685_vm4, %v2657_v54  ;;  %8110 = vmatmul.msk.f32.gmra.mxu3 %vm2685_vm4, %v2769_v55 }
 0x30f   : > { %v2504_v8 = vpop.f32.mrf.mxu0 }
 0x310   : > { %v2590_v27 = vadd.f32 %v2504_v8, %v9893_v12  ;;  %v10320_v8 = vpop.f32.mrf.mxu2 }
 0x312   : > { %v2626_v52 = vadd.f32 %v10227_v61, %v2590_v27  ;;  %8034 = vmatmul.msk.f32.gmra.mxu0 %vm820_vm0, %v9900_v22  ;;  %v1843_v22 = vadd.f32 %v9921_v26, %v9566_v53  ;;  %v10328_v3 = vpop.f32.mrf.mxu1  ;;  %v10331_v53 = vpop.f32.mrf.mxu3 }
 0x314   : > { %v2658_v58 = vmax.f32 %v2626_v52, 0.0  ;;  %8048 = vmatmul.msk.f32.gmra.mxu1 %vm2685_vm4, %v2769_v55  ;;  %8082 = vmatmul.msk.f32.gmra.mxu2 %vm2685_vm4, %v2769_v55  ;;  %v1844_v55 = vadd.f32 %v9933_v63, %v9575_v29 }
 0x315   : > { %v2770_v6 = vld [vmem:[#allocation3 + $0x48] sm:$0xff] }
 0x316   : > { %2737 = vst.msk [vmem:[#allocation3 + $0x51] sm:$0xff] %vm2685_vm4, %v2658_v58  ;;  %8111 = vmatmul.msk.f32.gmra.mxu3 %vm2685_vm4, %v2770_v6  ;;  %v1999_v58 = vadd.f32 %v10033_v0, %v1843_v22 }
 0x317   : > { %v2507_v54 = vpop.f32.mrf.mxu0 }
 0x318   : > { %v2591_v12 = vadd.f32 %v2507_v54, %v9906_v5  ;;  %v10343_v0 = vpop.f32.mrf.mxu2 }
 0x31a   : > { %v2627_v28 = vadd.f32 %v10227_v61, %v2591_v12  ;;  %8035 = vmatmul.msk.f32.gmra.mxu0 %vm820_vm0, %v9913_v24  ;;  %v2281_v24 = vadd.f32 %v10023_v19, %v1999_v58  ;;  %v2000_v19 = vadd.f32 %v10043_v23, %v1844_v55  ;;  %v10348_v63 = vpop.f32.mrf.mxu1 }
 0x31c   : > { %v2659_v27 = vmax.f32 %v2627_v28, 0.0  ;;  %8049 = vmatmul.msk.f32.gmra.mxu1 %vm2685_vm4, %v2770_v6  ;;  %8083 = vmatmul.msk.f32.gmra.mxu2 %vm2685_vm4, %v2770_v6  ;;  %v10351_v28 = vpop.f32.mrf.mxu3  ;;  %v2282_v6 = vadd.f32 %v10029_v41, %v2000_v19  ;;  %v1846_v41 = vadd.f32 %v9957_v33, %v9593_v7  ;;  %v1847_v19 = vadd.f32 %v9969_v32, %v9604_v36 }
 0x31d   : > { %v2771_v52 = vld [vmem:[#allocation3 + $0x50] sm:$0xff] }
 0x31e   : > { %2738 = vst.msk [vmem:[#allocation3 + $0x61] sm:$0xff] %vm2685_vm4, %v2659_v27  ;;  %8112 = vmatmul.msk.f32.gmra.mxu3 %vm2685_vm4, %v2771_v52  ;;  %v1845_v27 = vadd.f32 %v9945_v15, %v9584_v50 }
 0x31f   : > { %v2510_v5 = vpop.f32.mrf.mxu0 }
 0x320   : > { %v2592_v26 = vadd.f32 %v2510_v5, %v9919_v18  ;;  %v2437_v18 = vadd.f32 %v10045_v4, %v2281_v24  ;;  %v2438_v5 = vadd.f32 %v10055_v21, %v2282_v6  ;;  %v10363_v24 = vpop.f32.mrf.mxu2  ;;  %v2003_v6 = vadd.f32 %v10075_v51, %v1847_v19 }
 0x322   : > { %v2628_v54 = vadd.f32 %v10227_v61, %v2592_v26  ;;  %8036 = vmatmul.msk.f32.gmra.mxu0 %vm820_vm0, %v9927_v56  ;;  %v2001_v26 = vadd.f32 %v10053_v20, %v1845_v27  ;;  %v2285_v32 = vadd.f32 %v10061_v1, %v2003_v6  ;;  %v1848_v27 = vadd.f32 %v9980_v35, %v9614_v9  ;;  %v12720_v6 = vld [vmem:[#allocation51_spill] sm:$0xff] }
 0x324   : > { %v2660_v12 = vmax.f32 %v2628_v54, 0.0  ;;  %8050 = vmatmul.msk.f32.gmra.mxu1 %vm2685_vm4, %v2771_v52  ;;  %8084 = vmatmul.msk.f32.gmra.mxu2 %vm2685_vm4, %v2771_v52  ;;  %v10370_v52 = vpop.f32.mrf.mxu1  ;;  %v10375_v20 = vpop.f32.mrf.mxu3  ;;  %v2004_v1 = vadd.f32 %v10087_v40, %v1848_v27 }
 0x325   : > { %v2772_v22 = vld [vmem:[#allocation3 + $0x60] sm:$0xff] }
 0x326   : > { %2739 = vst.msk [vmem:[#allocation3 + $0x69] sm:$0xff] %vm2685_vm4, %v2660_v12  ;;  %8113 = vmatmul.msk.f32.gmra.mxu3 %vm2685_vm4, %v2772_v22  ;;  %v2002_v12 = vadd.f32 %v10065_v48, %v1846_v41 }
 0x327   : > { %v2513_v29 = vpop.f32.mrf.mxu0 }
 0x328   : > { %v2593_v56 = vadd.f32 %v2513_v29, %v2437_v18  ;;  %v10382_v33 = vpop.f32.mrf.mxu2  ;;  %v2284_v18 = vadd.f32 %v10049_v57, %v2002_v12 }
 0x32a   : > { %v2629_v58 = vadd.f32 %v10227_v61, %v2593_v56  ;;  %8037 = vmatmul.msk.f32.gmra.mxu0 %vm820_vm0, %v9939_v17  ;;  %v2283_v17 = vadd.f32 %v10039_v60, %v2001_v26  ;;  %v2440_v57 = vadd.f32 %v10079_v37, %v2284_v18  ;;  %v2286_v26 = vadd.f32 %v10071_v34, %v2004_v1  ;;  %v12717_v18 = vld [vmem:[#allocation68_spill] sm:$0xff] }
 0x32c   : > { %v2661_v4 = vmax.f32 %v2629_v58, 0.0  ;;  %8051 = vmatmul.msk.f32.gmra.mxu1 %vm2685_vm4, %v2772_v22  ;;  %8085 = vmatmul.msk.f32.gmra.mxu2 %vm2685_vm4, %v2772_v22  ;;  %v2439_v60 = vadd.f32 %v10067_v13, %v2283_v17  ;;  %v10393_v48 = vpop.f32.mrf.mxu1  ;;  %v10395_v29 = vpop.f32.mrf.mxu3  ;;  %v2442_v41 = vadd.f32 %v10122_v49, %v2286_v26  ;;  %v12715_v49 = vld [vmem:[#allocation50_spill] sm:$0xff] }
 0x32d   : > { %v2773_v23 = vld [vmem:[#allocation3 + $0x68] sm:$0xff] }
 0x32e   : > { %2740 = vst.msk [vmem:[#allocation3 + $0x79] sm:$0xff] %vm2685_vm4, %v2661_v4  ;;  %8114 = vmatmul.msk.f32.gmra.mxu3 %vm2685_vm4, %v2773_v23 }
 0x32f   : > { %v2516_v50 = vpop.f32.mrf.mxu0 }
 0x330   : > { %v2594_v15 = vadd.f32 %v2516_v50, %v2438_v5  ;;  %v10404_v58 = vpop.f32.mrf.mxu2  ;;  %v1849_v50 = vadd.f32 %v9991_v30, %v9623_v38 }
 0x332   : > { %v2630_v55 = vadd.f32 %v10227_v61, %v2594_v15  ;;  %8038 = vmatmul.msk.f32.gmra.mxu0 %vm820_vm0, %v9951_v39  ;;  %v2005_v34 = vadd.f32 %v10118_v59, %v1849_v50 }
 0x334   : > { %v2662_v21 = vmax.f32 %v2630_v55, 0.0  ;;  %8052 = vmatmul.msk.f32.gmra.mxu1 %vm2685_vm4, %v2773_v23  ;;  %8086 = vmatmul.msk.f32.gmra.mxu2 %vm2685_vm4, %v2773_v23  ;;  %v2441_v23 = vadd.f32 %v10091_v2, %v2285_v32  ;;  %v10413_v5 = vpop.f32.mrf.mxu1  ;;  %v10416_v9 = vpop.f32.mrf.mxu3 }
 0x335   : > { %v2774_v54 = vld [vmem:[#allocation3 + $0x78] sm:$0xff] }
 0x336   : > { %2741 = vst.msk [vmem:[#allocation3 + $0x81] sm:$0xff] %vm2685_vm4, %v2662_v21  ;;  %8115 = vmatmul.msk.f32.gmra.mxu3 %vm2685_vm4, %v2774_v54  ;;  %v2287_v21 = vadd.f32 %v10083_v47, %v2005_v34  ;;  %v2057_v47 = vld [vmem:[#allocation2 + $0x19a] sm:$0xff] }
 0x337   : > { %v2519_v7 = vpop.f32.mrf.mxu0 }
 0x338   : > { %v2595_v39 = vadd.f32 %v2519_v7, %v2439_v60  ;;  %v10427_v2 = vpop.f32.mrf.mxu2  ;;  %v12716_v7 = vld [vmem:[#allocation69_spill] sm:$0xff] }
 0x33a   : > { %v2631_v22 = vadd.f32 %v10227_v61, %v2595_v39  ;;  %8039 = vmatmul.msk.f32.gmra.mxu0 %vm820_vm0, %v9963_v45  ;;  %v2443_v39 = vadd.f32 %v12716_v7, %v2287_v21 }
 0x33c   : > { %v2663_v13 = vmax.f32 %v2631_v22, 0.0  ;;  %8053 = vmatmul.msk.f32.gmra.mxu1 %vm2685_vm4, %v2774_v54  ;;  %8087 = vmatmul.msk.f32.gmra.mxu2 %vm2685_vm4, %v2774_v54  ;;  %v10432_v30 = vpop.f32.mrf.mxu1  ;;  %v10435_v55 = vpop.f32.mrf.mxu3  ;;  %v1850_v54 = vadd.f32 %v10001_v16, %v9630_v14 }
 0x33d   : > { %v2775_v56 = vld [vmem:[#allocation3 + $0x80] sm:$0xff] }
 0x33e   : > { %2742 = vst.msk [vmem:[#allocation3 + $0x91] sm:$0xff] %vm2685_vm4, %v2663_v13  ;;  %8116 = vmatmul.msk.f32.gmra.mxu3 %vm2685_vm4, %v2775_v56  ;;  %v2006_v19 = vadd.f32 %v12717_v18, %v1850_v54  ;;  %v12718_v13 = vld [vmem:[#allocation64_spill] sm:$0xff]  ;;  %v3284_v18 = vld [vmem:[#allocation3 + $0x1] sm:$0xff] }
 0x33f   : > { %v2522_v36 = vpop.f32.mrf.mxu0 }
 0x340   : > { %v2596_v45 = vadd.f32 %v2522_v36, %v2440_v57  ;;  %v10447_v22 = vpop.f32.mrf.mxu2  ;;  %v12719_v57 = vld [vmem:[#allocation34_spill] sm:$0xff] }
 0x341   : > { %v1851_v36 = vadd.f32 %v12720_v6, %v12719_v57 }
 0x342   : > { %v2632_v4 = vadd.f32 %v10227_v61, %v2596_v45  ;;  %8040 = vmatmul.msk.f32.gmra.mxu0 %vm820_vm0, %v9974_v10 }
 0x344   : > { %v2664_v51 = vmax.f32 %v2632_v4, 0.0  ;;  %8054 = vmatmul.msk.f32.gmra.mxu1 %vm2685_vm4, %v2775_v56  ;;  %8088 = vmatmul.msk.f32.gmra.mxu2 %vm2685_vm4, %v2775_v56  ;;  %v2288_v56 = vadd.f32 %v12718_v13, %v2006_v19  ;;  %v10460_v45 = vpop.f32.mrf.mxu1  ;;  %v10466_v27 = vpop.f32.mrf.mxu3 }
 0x345   : > { %v2776_v37 = vld [vmem:[#allocation3 + $0x90] sm:$0xff] }
 0x346   : > { %2743 = vst.msk [vmem:[#allocation3 + $0x99] sm:$0xff] %vm2685_vm4, %v2664_v51  ;;  %8117 = vmatmul.msk.f32.gmra.mxu3 %vm2685_vm4, %v2776_v37 }
 0x347   : > { %v2525_v35 = vpop.f32.mrf.mxu0 }
 0x348   : > { %v2597_v10 = vadd.f32 %v2525_v35, %v2441_v23  ;;  %v12721_v23 = vld [vmem:[#allocation72_spill] sm:$0xff]  ;;  %v10481_v26 = vpop.f32.mrf.mxu2 }
 0x349   : > { %v2007_v1 = vadd.f32 %v12721_v23, %v1851_v36 }
 0x34a   : > { %v2633_v15 = vadd.f32 %v10227_v61, %v2597_v10  ;;  %8041 = vmatmul.msk.f32.gmra.mxu0 %vm820_vm0, %v9985_v44  ;;  %v2058_v10 = vld [vmem:[#allocation2 + $0x1a2] sm:$0xff] }
 0x34c   : > { %v2665_v40 = vmax.f32 %v2633_v15, 0.0  ;;  %8055 = vmatmul.msk.f32.gmra.mxu1 %vm2685_vm4, %v2776_v37  ;;  %8089 = vmatmul.msk.f32.gmra.mxu2 %vm2685_vm4, %v2776_v37  ;;  %v2444_v37 = vadd.f32 %v10187_v43, %v2288_v56  ;;  %v12722_v15 = vld [vmem:[#allocation66_spill] sm:$0xff]  ;;  %v10493_v21 = vpop.f32.mrf.mxu3 }
 0x34d   : > { %v2777_v17 = vld [vmem:[#allocation3 + $0x98] sm:$0xff] }
 0x34e   : > { %2744 = vst.msk [vmem:[#allocation3 + $0xa9] sm:$0xff] %vm2685_vm4, %v2665_v40  ;;  %8118 = vmatmul.msk.f32.gmra.mxu3 %vm2685_vm4, %v2777_v17  ;;  %v2289_v40 = vadd.f32 %v12722_v15, %v2007_v1  ;;  %v12731_v15 = vld [vmem:[#allocation73_spill] sm:$0xff] }
 0x34f   : > { %v2528_v38 = vpop.f32.mrf.mxu0 }
 0x350   : > { %v2598_v44 = vadd.f32 %v2528_v38, %v2442_v41  ;;  %v12724_v41 = vld [vmem:[#allocation52_spill] sm:$0xff]  ;;  %v10491_v38 = vpop.f32.mrf.mxu1  ;;  %v10502_v56 = vpop.f32.mrf.mxu2 }
 0x352   : > { %v2634_v60 = vadd.f32 %v10227_v61, %v2598_v44  ;;  %8042 = vmatmul.msk.f32.gmra.mxu0 %vm820_vm0, %v12715_v49 }
 0x354   : > { %v2666_v59 = vmax.f32 %v2634_v60, 0.0  ;;  %8056 = vmatmul.msk.f32.gmra.mxu1 %vm2685_vm4, %v2777_v17  ;;  %8090 = vmatmul.msk.f32.gmra.mxu2 %vm2685_vm4, %v2777_v17  ;;  %v12723_v17 = vld [vmem:[#allocation35_spill] sm:$0xff]  ;;  %v10513_v1 = vpop.f32.mrf.mxu3 }
 0x355   : > { %v2778_v12 = vld [vmem:[#allocation3 + $0xa8] sm:$0xff]  ;;  %v1852_v34 = vadd.f32 %v12724_v41, %v12723_v17 }
 0x356   : > { %2745 = vst.msk [vmem:[#allocation3 + $0xb1] sm:$0xff] %vm2685_vm4, %v2666_v59  ;;  %8119 = vmatmul.msk.f32.gmra.mxu3 %vm2685_vm4, %v2778_v12  ;;  %v12725_v60 = vld [vmem:[#allocation75_spill] sm:$0xff]  ;;  %v12726_v59 = vld [vmem:[#allocation74_spill] sm:$0xff] }
 0x357   : > { %v2531_v14 = vpop.f32.mrf.mxu0  ;;  %v2445_v49 = vadd.f32 %v12725_v60, %v2289_v40  ;;  %v2008_v7 = vadd.f32 %v12726_v59, %v1852_v34  ;;  %v12733_v17 = vld [vmem:[#allocation54_spill] sm:$0xff]  ;;  %v12734_v60 = vld [vmem:[#allocation80_spill] sm:$0xff]  ;;  %v12735_v59 = vld [vmem:[#allocation79_spill] sm:$0xff] }
 0x358   : > { %v2599_v16 = vadd.f32 %v2531_v14, %v2443_v39  ;;  %v12727_v14 = vld [vmem:[#allocation70_spill] sm:$0xff]  ;;  %v10510_v23 = vpop.f32.mrf.mxu1  ;;  %v10519_v34 = vpop.f32.mrf.mxu2 }
 0x35a   : > { %v2635_v32 = vadd.f32 %v10227_v61, %v2599_v16  ;;  %8043 = vmatmul.msk.f32.gmra.mxu0 %vm820_vm0, %v2057_v47  ;;  %v2290_v47 = vadd.f32 %v12727_v14, %v2008_v7  ;;  %v12729_v16 = vld [vmem:[#allocation53_spill] sm:$0xff] }
 0x35c   : > { %v2667_v4 = vmax.f32 %v2635_v32, 0.0  ;;  %8057 = vmatmul.msk.f32.gmra.mxu1 %vm2685_vm4, %v2778_v12  ;;  %8091 = vmatmul.msk.f32.gmra.mxu2 %vm2685_vm4, %v2778_v12  ;;  %v12728_v12 = vld [vmem:[#allocation36_spill] sm:$0xff]  ;;  %v2446_v32 = vadd.f32 %v10251_v46, %v2290_v47  ;;  %v10531_v14 = vpop.f32.mrf.mxu3 }
 0x35d   : > { %v2779_v51 = vld [vmem:[#allocation3 + $0xb0] sm:$0xff]  ;;  %v1853_v13 = vadd.f32 %v12729_v16, %v12728_v12  ;;  %v10533_v47 = vld [vmem:[#allocation3 + $0x19] sm:$0xff]  ;;  %v12737_v16 = vld [vmem:[#allocation38_spill] sm:$0xff] }
 0x35e   : > { %2746 = vst.msk [vmem:[#allocation3 + $0xc1] sm:$0xff] %vm2685_vm4, %v2667_v4  ;;  %8120 = vmatmul.msk.f32.gmra.mxu3 %vm2685_vm4, %v2779_v51  ;;  %v12730_v4 = vld [vmem:[#allocation77_spill] sm:$0xff]  ;;  %v12736_v12 = vld [vmem:[#allocation76_spill] sm:$0xff] }
 0x35f   : > { %v2534_v35 = vpop.f32.mrf.mxu0 }
 0x360   : > { %v2600_v50 = vadd.f32 %v2534_v35, %v2444_v37  ;;  %v2009_v37 = vadd.f32 %v12730_v4, %v1853_v13  ;;  %v12738_v13 = vld [vmem:[#allocation55_spill] sm:$0xff] }
 0x362   : > { %v2636_v43 = vadd.f32 %v10227_v61, %v2600_v50  ;;  %8044 = vmatmul.msk.f32.gmra.mxu0 %vm820_vm0, %v2058_v10  ;;  %v3285_v10 = vld [vmem:[#allocation3 + $0x9] sm:$0xff]  ;;  %v2291_v40 = vadd.f32 %v12731_v15, %v2009_v37  ;;  %vm6825_vm0 = vcmask 254976  }
 0x364   : > { %v2668_v44 = vmax.f32 %v2636_v43, 0.0  ;;  %8058 = vmatmul.msk.f32.gmra.mxu1 %vm2685_vm4, %v2779_v51  ;;  %8092 = vmatmul.msk.f32.gmra.mxu2 %vm2685_vm4, %v2779_v51  ;;  %v12732_v51 = vld [vmem:[#allocation37_spill] sm:$0xff] }
 0x365   : > { %v2780_v54 = vld [vmem:[#allocation3 + $0xc0] sm:$0xff]  ;;  %v1854_v41 = vadd.f32 %v12733_v17, %v12732_v51 }
 0x366   : > { %2747 = vst.msk [vmem:[#allocation3 + $0xc9] sm:$0xff] %vm2685_vm4, %v2668_v44  ;;  %8121 = vmatmul.msk.f32.gmra.mxu3 %vm2685_vm4, %v2780_v54  ;;  %v10549_v51 = vld [vmem:[#allocation3 + $0x21] sm:$0xff] }
 0x367   : > { %v2537_v39 = vpop.f32.mrf.mxu0  ;;  %v2010_v7 = vadd.f32 %v12735_v59, %v1854_v41  ;;  %v12739_v17 = vld [vmem:[#allocation78_spill] sm:$0xff] }
 0x368   : > { %v2601_v19 = vadd.f32 %v2537_v39, %v2445_v49  ;;  %v2447_v49 = vadd.f32 %v12734_v60, %v2291_v40 }
 0x36a   : > { %v2637_v57 = vadd.f32 %v10227_v61, %v2601_v19  ;;  %8141 = vmatmul.msk.f32.vlgmr.msra.gmra.mxu0 %vm2685_vm4, %v3284_v18  ;;  %v10528_v18 = vpop.f32.mrf.mxu1 }
 0x36c   : > { %v2669_v6 = vmax.f32 %v2637_v57, 0.0  ;;  %8059 = vmatmul.msk.f32.gmra.mxu1 %vm2685_vm4, %v2780_v54  ;;  %8093 = vmatmul.msk.f32.gmra.mxu2 %vm2685_vm4, %v2780_v54  ;;  %v2292_v54 = vadd.f32 %v12736_v12, %v2010_v7  ;;  %v1855_v57 = vadd.f32 %v12738_v13, %v12737_v16  ;;  %v10565_v16 = vld [vmem:[#allocation3 + $0x31] sm:$0xff]  ;;  %v12742_v13 = vld [vmem:[#allocation81_spill] sm:$0xff] }
 0x36d   : > { %v2781_v36 = vld [vmem:[#allocation3 + $0xc8] sm:$0xff] }
 0x36e   : > { %2748 = vst.msk [vmem:[#allocation3 + $0xd9] sm:$0xff] %vm2685_vm4, %v2669_v6  ;;  %8122 = vmatmul.msk.f32.gmra.mxu3 %vm2685_vm4, %v2781_v36 }
 0x36f   : > { %v2540_v35 = vpop.f32.mrf.mxu0 }
 0x370   : > { %v2602_v50 = vadd.f32 %v2540_v35, %v2446_v32  ;;  %v3038_v32 = vpop.f32.mrf.mxu2  ;;  %v2448_v35 = vadd.f32 %v10297_v25, %v2292_v54 }
 0x372   : > { %v2638_v46 = vadd.f32 %v10227_v61, %v2602_v50  ;;  %8142 = vmatmul.msk.f32.gmra.mxu0 %vm2685_vm4, %v3285_v10  ;;  %v2011_v10 = vadd.f32 %v10292_v11, %v1855_v57  ;;  %v10557_v11 = vpop.f32.mrf.mxu3 }
 0x374   : > { %v2670_v43 = vmax.f32 %v2638_v46, 0.0  ;;  %8060 = vmatmul.msk.f32.gmra.mxu1 %vm2685_vm4, %v2781_v36  ;;  %8094 = vmatmul.msk.f32.gmra.mxu2 %vm2685_vm4, %v2781_v36  ;;  %v2293_v41 = vadd.f32 %v12739_v17, %v2011_v10  ;;  %v12740_v36 = vld [vmem:[#allocation39_spill] sm:$0xff]  ;;  %v12741_v46 = vld [vmem:[#allocation56_spill] sm:$0xff] }
 0x375   : > { %v2782_v44 = vld [vmem:[#allocation3 + $0xd8] sm:$0xff] }
 0x376   : > { %2749 = vst.msk [vmem:[#allocation3 + $0xe1] sm:$0xff] %vm2685_vm4, %v2670_v43  ;;  %8123 = vmatmul.msk.f32.gmra.mxu3 %vm2685_vm4, %v2782_v44  ;;  %v1856_v43 = vadd.f32 %v12741_v46, %v12740_v36  ;;  %v2449_v59 = vadd.f32 %v10313_v62, %v2293_v41 }
 0x377   : > { %v2543_v39 = vpop.f32.mrf.mxu0 }
 0x378   : > { %v2603_v19 = vadd.f32 %v2543_v39, %v2447_v49  ;;  %v2012_v7 = vadd.f32 %v10311_v31, %v1856_v43  ;;  %v10581_v43 = vld [vmem:[#allocation3 + $0x39] sm:$0xff] }
 0x379   : > { %v10546_v15 = vpop.f32.mrf.mxu1 }
 0x37a   : > { %v2639_v6 = vadd.f32 %v10227_v61, %v2603_v19  ;;  %8143 = vmatmul.msk.f32.gmra.mxu0 %vm2685_vm4, %v10533_v47  ;;  %v2294_v57 = vadd.f32 %v12742_v13, %v2012_v7 }
 0x37c   : > { %v2671_v4 = vmax.f32 %v2639_v6, 0.0  ;;  %8061 = vmatmul.msk.f32.gmra.mxu1 %vm2685_vm4, %v2782_v44  ;;  %8095 = vmatmul.msk.f32.gmra.mxu2 %vm2685_vm4, %v2782_v44  ;;  %v12743_v6 = vld [vmem:[#allocation40_spill] sm:$0xff]  ;;  %v12744_v44 = vld [vmem:[#allocation57_spill] sm:$0xff] }
 0x37d   : > { %v2783_v37 = vld [vmem:[#allocation3 + $0xe0] sm:$0xff] }
 0x37e   : > { %2750 = vst.msk [vmem:[#allocation3 + $0xf1] sm:$0xff] %vm2685_vm4, %v2671_v4  ;;  %8124 = vmatmul.msk.f32.gmra.mxu3 %vm2685_vm4, %v2783_v37  ;;  %v1857_v4 = vadd.f32 %v12744_v44, %v12743_v6 }
 0x37f   : > { %v2546_v50 = vpop.f32.mrf.mxu0  ;;  %v3041_v39 = vpop.f32.mrf.mxu2 }
 0x380   : > { %v2604_v40 = vadd.f32 %v2546_v50, %v2448_v35  ;;  %v2450_v50 = vadd.f32 %v10331_v53, %v2294_v57 }
 0x381   : > { %v2919_v12 = vpop.f32.mrf.mxu1 }
 0x382   : > { %v2640_v60 = vadd.f32 %v10227_v61, %v2604_v40  ;;  %8144 = vmatmul.msk.f32.gmra.mxu0 %vm2685_vm4, %v10549_v51  ;;  %v2013_v40 = vadd.f32 %v10328_v3, %v1857_v4 }
 0x384   : > { %v2672_v25 = vmax.f32 %v2640_v60, 0.0  ;;  %8062 = vmatmul.msk.f32.gmra.mxu1 %vm2685_vm4, %v2783_v37  ;;  %8096 = vmatmul.msk.f32.gmra.mxu2 %vm2685_vm4, %v2783_v37  ;;  %v12745_v60 = vld [vmem:[#allocation82_spill] sm:$0xff] }
 0x385   : > { %v2784_v49 = vld [vmem:[#allocation3 + $0xf0] sm:$0xff]  ;;  %v2295_v37 = vadd.f32 %v12745_v60, %v2013_v40 }
 0x386   : > { %2751 = vst.msk [vmem:[#allocation3 + $0xf9] sm:$0xff] %vm2685_vm4, %v2672_v25  ;;  %8125 = vmatmul.msk.f32.gmra.mxu3 %vm2685_vm4, %v2784_v49  ;;  %v12746_v25 = vld [vmem:[#allocation41_spill] sm:$0xff]  ;;  %v12749_v40 = vld [vmem:[#allocation59_spill] sm:$0xff] }
 0x387   : > { %v2549_v19 = vpop.f32.mrf.mxu0  ;;  %v3044_v17 = vpop.f32.mrf.mxu2  ;;  %v2451_v6 = vadd.f32 %v10351_v28, %v2295_v37 }
 0x388   : > { %v2605_v54 = vadd.f32 %v2549_v19, %v2449_v59  ;;  %v12747_v59 = vld [vmem:[#allocation58_spill] sm:$0xff]  ;;  %v3039_v19 = vadd.f32 %v3038_v32, %v2919_v12 }
 0x389   : > { %v10575_v31 = vpop.f32.mrf.mxu3  ;;  %v2922_v36 = vpop.f32.mrf.mxu1  ;;  %v1858_v7 = vadd.f32 %v12747_v59, %v12746_v25 }
 0x38a   : > { %v2641_v35 = vadd.f32 %v10227_v61, %v2605_v54  ;;  %8145 = vmatmul.msk.f32.gmra.mxu0 %vm2685_vm4, %v10565_v16 }
 0x38b   : > { %v2014_v44 = vadd.f32 %v10348_v63, %v1858_v7 }
 0x38c   : > { %v2673_v62 = vmax.f32 %v2641_v35, 0.0  ;;  %8063 = vmatmul.msk.f32.gmra.mxu1 %vm2685_vm4, %v2784_v49  ;;  %8097 = vmatmul.msk.f32.gmra.mxu2 %vm2685_vm4, %v2784_v49 }
 0x38d   : > { %v2785_v10 = vld [vmem:[#allocation3 + $0xf8] sm:$0xff]  ;;  %v2296_v49 = vadd.f32 %v10320_v8, %v2014_v44 }
 0x38e   : > { %2752 = vst.msk [vmem:[#allocation3 + $0x109] sm:$0xff] %vm2685_vm4, %v2673_v62  ;;  %8126 = vmatmul.msk.f32.gmra.mxu3 %vm2685_vm4, %v2785_v10  ;;  %v10597_v62 = vld [vmem:[#allocation3 + $0x49] sm:$0xff] }
 0x38f   : > { %v2552_v41 = vpop.f32.mrf.mxu0  ;;  %v3047_v4 = vpop.f32.mrf.mxu2  ;;  %v2452_v8 = vadd.f32 %v10375_v20, %v2296_v49 }
 0x390   : > { %v2606_v46 = vadd.f32 %v2552_v41, %v2450_v50  ;;  %v12748_v50 = vld [vmem:[#allocation42_spill] sm:$0xff] }
 0x391   : > { %v3159_v3 = vpop.f32.mrf.mxu3  ;;  %v2925_v12 = vpop.f32.mrf.mxu1  ;;  %v1859_v41 = vadd.f32 %v12749_v40, %v12748_v50 }
 0x392   : > { %v2642_v53 = vadd.f32 %v10227_v61, %v2606_v46  ;;  %8146 = vmatmul.msk.f32.gmra.mxu0 %vm2685_vm4, %v10581_v43  ;;  %v10591_v13 = vadd.f32 %v3159_v3, %v3039_v19  ;;  %v3042_v46 = vadd.f32 %v3041_v39, %v2922_v36  ;;  %v12750_v3 = vld [vmem:[#allocation43_spill] sm:$0xff]  ;;  %v3045_v44 = vadd.f32 %v3044_v17, %v2925_v12 }
 0x393   : > { %v2015_v59 = vadd.f32 %v10370_v52, %v1859_v41 }
 0x394   : > { %v2674_v54 = vmax.f32 %v2642_v53, 0.0  ;;  %8064 = vmatmul.msk.f32.gmra.mxu1 %vm2685_vm4, %v2785_v10  ;;  %8098 = vmatmul.msk.f32.gmra.mxu2 %vm2685_vm4, %v2785_v10  ;;  %v10613_v53 = vld [vmem:[#allocation3 + $0x51] sm:$0xff] }
 0x395   : > { %v2786_v57 = vld [vmem:[#allocation3 + $0x108] sm:$0xff]  ;;  %v2297_v10 = vadd.f32 %v10343_v0, %v2015_v59 }
 0x396   : > { %2753 = vst.msk [vmem:[#allocation3 + $0x111] sm:$0xff] %vm2685_vm4, %v2674_v54  ;;  %8127 = vmatmul.msk.f32.gmra.mxu3 %vm2685_vm4, %v2786_v57  ;;  %v12751_v54 = vld [vmem:[#allocation60_spill] sm:$0xff] }
 0x397   : > { %v2555_v32 = vpop.f32.mrf.mxu0  ;;  %v3050_v7 = vpop.f32.mrf.mxu2  ;;  %v2453_v0 = vadd.f32 %v10395_v29, %v2297_v10 }
 0x398   : > { %v2607_v35 = vadd.f32 %v2555_v32, %v2451_v6  ;;  %v1860_v6 = vadd.f32 %v12751_v54, %v12750_v3 }
 0x399   : > { %v3162_v63 = vpop.f32.mrf.mxu3  ;;  %v2928_v36 = vpop.f32.mrf.mxu1 }
 0x39a   : > { %v2643_v28 = vadd.f32 %v10227_v61, %v2607_v35  ;;  %8147 = vmatmul.msk.f32.gmra.mxu0 %vm2685_vm4, %v10597_v62  ;;  %v10607_v37 = vadd.f32 %v3162_v63, %v3042_v46  ;;  %v2016_v50 = vadd.f32 %v10393_v48, %v1860_v6  ;;  %v10629_v46 = vld [vmem:[#allocation3 + $0x61] sm:$0xff]  ;;  %v10645_v6 = vld [vmem:[#allocation3 + $0x69] sm:$0xff] }
 0x39b   : > { %v12753_v63 = vld [vmem:[#allocation61_spill] sm:$0xff] }
 0x39c   : > { %v2675_v60 = vmax.f32 %v2643_v28, 0.0  ;;  %8065 = vmatmul.msk.f32.gmra.mxu1 %vm2685_vm4, %v2786_v57  ;;  %8099 = vmatmul.msk.f32.gmra.mxu2 %vm2685_vm4, %v2786_v57  ;;  %v2298_v57 = vadd.f32 %v10363_v24, %v2016_v50  ;;  %v12752_v28 = vld [vmem:[#allocation44_spill] sm:$0xff] }
 0x39d   : > { %v2787_v25 = vld [vmem:[#allocation3 + $0x110] sm:$0xff] }
 0x39e   : > { %2754 = vst.msk [vmem:[#allocation3 + $0x121] sm:$0xff] %vm2685_vm4, %v2675_v60  ;;  %8128 = vmatmul.msk.f32.gmra.mxu3 %vm2685_vm4, %v2787_v25  ;;  %v1861_v60 = vadd.f32 %v12753_v63, %v12752_v28  ;;  %v2454_v24 = vadd.f32 %v10416_v9, %v2298_v57  ;;  %v10661_v63 = vld [vmem:[#allocation3 + $0x79] sm:$0xff] }
 0x39f   : > { %v2558_v39 = vpop.f32.mrf.mxu0  ;;  %v3053_v40 = vpop.f32.mrf.mxu2 }
 0x3a0   : > { %v2608_v19 = vadd.f32 %v2558_v39, %v2452_v8  ;;  %v3048_v8 = vadd.f32 %v3047_v4, %v2928_v36  ;;  %v2017_v10 = vadd.f32 %v10413_v5, %v1861_v60  ;;  %v12756_v60 = vld [vmem:[#allocation46_spill] sm:$0xff] }
 0x3a1   : > { %v3165_v52 = vpop.f32.mrf.mxu3  ;;  %v2931_v12 = vpop.f32.mrf.mxu1 }
 0x3a2   : > { %v2644_v20 = vadd.f32 %v10227_v61, %v2608_v19  ;;  %8148 = vmatmul.msk.f32.gmra.mxu0 %vm2685_vm4, %v10613_v53  ;;  %v10623_v35 = vadd.f32 %v3165_v52, %v3045_v44  ;;  %v12754_v44 = vld [vmem:[#allocation45_spill] sm:$0xff] }
 0x3a4   : > { %v2676_v32 = vmax.f32 %v2644_v20, 0.0  ;;  %8066 = vmatmul.msk.f32.gmra.mxu1 %vm2685_vm4, %v2787_v25  ;;  %8100 = vmatmul.msk.f32.gmra.mxu2 %vm2685_vm4, %v2787_v25  ;;  %v2299_v25 = vadd.f32 %v10382_v33, %v2017_v10  ;;  %v12755_v20 = vld [vmem:[#allocation62_spill] sm:$0xff] }
 0x3a5   : > { %v2788_v49 = vld [vmem:[#allocation3 + $0x120] sm:$0xff]  ;;  %v1862_v52 = vadd.f32 %v12755_v20, %v12754_v44  ;;  %v12758_v20 = vld [vmem:[#allocation47_spill] sm:$0xff] }
 0x3a6   : > { %2755 = vst.msk [vmem:[#allocation3 + $0x129] sm:$0xff] %vm2685_vm4, %v2676_v32  ;;  %8129 = vmatmul.msk.f32.gmra.mxu3 %vm2685_vm4, %v2788_v49  ;;  %v3051_v32 = vadd.f32 %v3050_v7, %v2931_v12  ;;  %v2455_v33 = vadd.f32 %v10435_v55, %v2299_v25  ;;  %v10677_v44 = vld [vmem:[#allocation3 + $0x81] sm:$0xff] }
 0x3a7   : > { %v2561_v17 = vpop.f32.mrf.mxu0  ;;  %v3056_v3 = vpop.f32.mrf.mxu2 }
 0x3a8   : > { %v2609_v41 = vadd.f32 %v2561_v17, %v2453_v0 }
 0x3a9   : > { %v3168_v48 = vpop.f32.mrf.mxu3  ;;  %v2934_v36 = vpop.f32.mrf.mxu1 }
 0x3aa   : > { %v2645_v29 = vadd.f32 %v10227_v61, %v2609_v41  ;;  %8149 = vmatmul.msk.f32.gmra.mxu0 %vm2685_vm4, %v10629_v46  ;;  %v10639_v39 = vadd.f32 %v3168_v48, %v3048_v8  ;;  %v2018_v41 = vadd.f32 %v10432_v30, %v1862_v52  ;;  %v12757_v8 = vld [vmem:[#allocation63_spill] sm:$0xff]  ;;  %v3054_v48 = vadd.f32 %v3053_v40, %v2934_v36  ;;  %v12759_v52 = vld [vmem:[#allocation65_spill] sm:$0xff] }
 0x3ac   : > { %v2677_v59 = vmax.f32 %v2645_v29, 0.0  ;;  %8067 = vmatmul.msk.f32.gmra.mxu1 %vm2685_vm4, %v2788_v49  ;;  %8101 = vmatmul.msk.f32.gmra.mxu2 %vm2685_vm4, %v2788_v49  ;;  %v2300_v49 = vadd.f32 %v10404_v58, %v2018_v41  ;;  %v1863_v29 = vadd.f32 %v12757_v8, %v12756_v60  ;;  %v12761_v60 = vld [vmem:[#allocation67_spill] sm:$0xff] }
 0x3ad   : > { %v2789_v19 = vld [vmem:[#allocation3 + $0x128] sm:$0xff]  ;;  %v10695_v8 = vld [vmem:[#allocation3 + $0x91] sm:$0xff] }
 0x3ae   : > { %2756 = vst.msk [vmem:[#allocation3 + $0x139] sm:$0xff] %vm2685_vm4, %v2677_v59  ;;  %8130 = vmatmul.msk.f32.gmra.mxu3 %vm2685_vm4, %v2789_v19  ;;  %v2456_v58 = vadd.f32 %v10466_v27, %v2300_v49  ;;  %v12760_v49 = vld [vmem:[#allocation48_spill] sm:$0xff] }
 0x3af   : > { %v2564_v4 = vpop.f32.mrf.mxu0  ;;  %v3059_v57 = vpop.f32.mrf.mxu2 }
 0x3b0   : > { %v2610_v54 = vadd.f32 %v2564_v4, %v2454_v24  ;;  %v2019_v4 = vadd.f32 %v10460_v45, %v1863_v29 }
 0x3b1   : > { %v3171_v5 = vpop.f32.mrf.mxu3  ;;  %v2937_v12 = vpop.f32.mrf.mxu1 }
 0x3b2   : > { %v2646_v9 = vadd.f32 %v10227_v61, %v2610_v54  ;;  %8150 = vmatmul.msk.f32.gmra.mxu0 %vm2685_vm4, %v10645_v6  ;;  %v10655_v50 = vadd.f32 %v3171_v5, %v3051_v32  ;;  %v1864_v32 = vadd.f32 %v12759_v52, %v12758_v20  ;;  %v12762_v20 = vld [vmem:[#allocation49_spill] sm:$0xff]  ;;  %v12763_v52 = vld [vmem:[#allocation71_spill] sm:$0xff] }
 0x3b4   : > { %v2678_v0 = vmax.f32 %v2646_v9, 0.0  ;;  %8068 = vmatmul.msk.f32.gmra.mxu1 %vm2685_vm4, %v2789_v19  ;;  %8102 = vmatmul.msk.f32.gmra.mxu2 %vm2685_vm4, %v2789_v19  ;;  %v2301_v19 = vadd.f32 %v10427_v2, %v2019_v4  ;;  %v3057_v9 = vadd.f32 %v3056_v3, %v2937_v12  ;;  %v2020_v41 = vadd.f32 %v10491_v38, %v1864_v32 }
 0x3b5   : > { %v2790_v17 = vld [vmem:[#allocation3 + $0x138] sm:$0xff]  ;;  %v1866_v32 = vadd.f32 %v12763_v52, %v12762_v20 }
 0x3b6   : > { %2757 = vst.msk [vmem:[#allocation3 + $0x141] sm:$0xff] %vm2685_vm4, %v2678_v0  ;;  %8131 = vmatmul.msk.f32.gmra.mxu3 %vm2685_vm4, %v2790_v17  ;;  %v2457_v2 = vadd.f32 %v10493_v21, %v2301_v19  ;;  %v2302_v29 = vadd.f32 %v10447_v22, %v2020_v41  ;;  %v3717_v19 = vld [vmem:[#allocation17 + $0x38] sm:$0xff] }
 0x3b7   : > { %v2567_v7 = vpop.f32.mrf.mxu0  ;;  %v3062_v54 = vpop.f32.mrf.mxu2  ;;  %3739 = vmatpush.msrb.mxu2 %v3717_v19 }
 0x3b8   : > { %v2611_v28 = vadd.f32 %v2567_v7, %v2455_v33  ;;  %v2458_v4 = vadd.f32 %v10513_v1, %v2302_v29 }
 0x3b9   : > { %v3174_v30 = vpop.f32.mrf.mxu3  ;;  %v2940_v36 = vpop.f32.mrf.mxu1 }
 0x3ba   : > { %v2647_v55 = vadd.f32 %v10227_v61, %v2611_v28  ;;  %8151 = vmatmul.msk.f32.gmra.mxu0 %vm2685_vm4, %v10661_v63  ;;  %v10671_v24 = vadd.f32 %v3174_v30, %v3054_v48  ;;  %v3060_v48 = vadd.f32 %v3059_v57, %v2940_v36 }
 0x3bc   : > { %v2679_v59 = vmax.f32 %v2647_v55, 0.0  ;;  %8069 = vmatmul.msk.f32.gmra.mxu1 %vm2685_vm4, %v2790_v17  ;;  %8103 = vmatmul.msk.f32.gmra.mxu2 %vm2685_vm4, %v2790_v17  ;;  %v1865_v17 = vadd.f32 %v12761_v60, %v12760_v49 }
 0x3bd   : > { %v2791_v10 = vld [vmem:[#allocation3 + $0x140] sm:$0xff] }
 0x3be   : > { %2758 = vst.msk [vmem:[#allocation3 + $0x151] sm:$0xff] %vm2685_vm4, %v2679_v59  ;;  %8132 = vmatmul.msk.f32.gmra.mxu3 %vm2685_vm4, %v2791_v10  ;;  %v2021_v59 = vadd.f32 %v10510_v23, %v1865_v17 }
 0x3bf   : > { %v2570_v40 = vpop.f32.mrf.mxu0  ;;  %v3065_v7 = vpop.f32.mrf.mxu2 }
 0x3c0   : > { %v2612_v25 = vadd.f32 %v2570_v40, %v2456_v58 }
 0x3c1   : > { %v3177_v45 = vpop.f32.mrf.mxu3  ;;  %v2943_v12 = vpop.f32.mrf.mxu1 }
 0x3c2   : > { %v2648_v27 = vadd.f32 %v10227_v61, %v2612_v25  ;;  %8152 = vmatmul.msk.f32.gmra.mxu0 %vm2685_vm4, %v10677_v44  ;;  %v10687_v0 = vadd.f32 %v3177_v45, %v3057_v9  ;;  %v2303_v25 = vadd.f32 %v10481_v26, %v2021_v59  ;;  %v3063_v23 = vadd.f32 %v3062_v54, %v2943_v12  ;;  %v10725_v12 = vld [vmem:[#allocation3 + $0xa9] sm:$0xff]  ;;  %v10740_v59 = vld [vmem:[#allocation3 + $0xb1] sm:$0xff] }
 0x3c4   : > { %v2680_v5 = vmax.f32 %v2648_v27, 0.0  ;;  %8070 = vmatmul.msk.f32.gmra.mxu1 %vm2685_vm4, %v2791_v10  ;;  %8104 = vmatmul.msk.f32.gmra.mxu2 %vm2685_vm4, %v2791_v10  ;;  %v10710_v10 = vld [vmem:[#allocation3 + $0x99] sm:$0xff] }
 0x3c5   : > { %v2792_v33 = vld [vmem:[#allocation3 + $0x150] sm:$0xff] }
 0x3c6   : > { %2759 = vst.msk [vmem:[#allocation3 + $0x159] sm:$0xff] %vm2685_vm4, %v2680_v5  ;;  %8133 = vmatmul.msk.f32.gmra.mxu3 %vm2685_vm4, %v2792_v33  ;;  %v2459_v5 = vadd.f32 %v10531_v14, %v2303_v25  ;;  %v8710_v14 = vld [vmem:[%s12707_s22] ss:$0 sm:$0xff] }
 0x3c7   : > { %v2573_v3 = vpop.f32.mrf.mxu0  ;;  %v3068_v22 = vpop.f32.mrf.mxu2 }
 0x3c8   : > { %v2613_v28 = vadd.f32 %v2573_v3, %v2457_v2  ;;  %v2022_v2 = vadd.f32 %v10528_v18, %v1866_v32  ;;  %v10752_v32 = vld [vmem:[#allocation3 + $0xc1] sm:$0xff] }
 0x3c9   : > { %v3180_v38 = vpop.f32.mrf.mxu3  ;;  %v2946_v40 = vpop.f32.mrf.mxu1 }
 0x3ca   : > { %v2649_v21 = vadd.f32 %v10227_v61, %v2613_v28  ;;  %8153 = vmatmul.msk.f32.gmra.mxu0 %vm2685_vm4, %v10695_v8  ;;  %v10703_v30 = vadd.f32 %v3180_v38, %v3060_v48  ;;  %v2304_v28 = vadd.f32 %v10502_v56, %v2022_v2  ;;  %v3066_v49 = vadd.f32 %v3065_v7, %v2946_v40  ;;  %v4302_v40 = vld [vmem:[#allocation17 + $0x40] sm:$0xff] }
 0x3cb   : > { %4324 = vmatpush.msra.mxu1 %v4302_v40 }
 0x3cc   : > { %v2681_v55 = vmax.f32 %v2649_v21, 0.0  ;;  %8071 = vmatmul.msk.f32.gmra.mxu1 %vm2685_vm4, %v2792_v33  ;;  %8105 = vmatmul.msk.f32.gmra.mxu2 %vm2685_vm4, %v2792_v33  ;;  %v3906_v33 = vld [vmem:[#allocation17 + $0x10] sm:$0xff]  ;;  %v2460_v56 = vadd.f32 %v10557_v11, %v2304_v28 }
 0x3cd   : > { %v2793_v58 = vld [vmem:[#allocation3 + $0x158] sm:$0xff]  ;;  %4018 = vmatpush.msrb.mxu3 %v3906_v33 }
 0x3ce   : > { %2760 = vst.msk [vmem:[#allocation3 + $0x169] sm:$0xff] %vm2685_vm4, %v2681_v55  ;;  %8134 = vmatmul.msk.f32.gmra.mxu3 %vm2685_vm4, %v2793_v58  ;;  %v2798_v33 = vld [vmem:[#allocation3 + $0x198] sm:$0xff] }
 0x3cf   : > { %v2576_v57 = vpop.f32.mrf.mxu0  ;;  %v3071_v54 = vpop.f32.mrf.mxu2 }
 0x3d0   : > { %v2614_v36 = vadd.f32 %v2576_v57, %v2458_v4  ;;  %v4149_v4 = vld [vmem:[#allocation17 + $0x28] sm:$0xff] }
 0x3d1   : > { %v3183_v1 = vpop.f32.mrf.mxu3  ;;  %v2949_v41 = vpop.f32.mrf.mxu1  ;;  %4171 = vmatpush.msrb.mxu0 %v4149_v4 }
 0x3d2   : > { %v2650_v9 = vadd.f32 %v10227_v61, %v2614_v36  ;;  %8154 = vmatmul.msk.f32.gmra.mxu0 %vm2685_vm4, %v10710_v10  ;;  %v10719_v26 = vadd.f32 %v3183_v1, %v3063_v23  ;;  %v3069_v57 = vadd.f32 %v3068_v22, %v2949_v41 }
 0x3d4   : > { %v2682_v27 = vmax.f32 %v2650_v9, 0.0  ;;  %8072 = vmatmul.msk.f32.gmra.mxu1 %vm2685_vm4, %v2793_v58  ;;  %8106 = vmatmul.msk.f32.gmra.mxu2 %vm2685_vm4, %v2793_v58 }
 0x3d5   : > { %v2794_v45 = vld [vmem:[#allocation3 + $0x168] sm:$0xff] }
 0x3d6   : > { %2761 = vst.msk [vmem:[#allocation3 + $0x171] sm:$0xff] %vm2685_vm4, %v2682_v27  ;;  %8135 = vmatmul.msk.f32.gmra.mxu3 %vm2685_vm4, %v2794_v45 }
 0x3d7   : > { %v2579_v61 = vpop.f32.mrf.mxu0  ;;  %v3074_v7 = vpop.f32.mrf.mxu2 }
 0x3d8   : > { %v2615_v3 = vadd.f32 %v2579_v61, %v2459_v5  ;;  %v10763_v61 = vld [vmem:[#allocation3 + $0xc9] sm:$0xff] }
 0x3d9   : > { %v3186_v18 = vpop.f32.mrf.mxu3  ;;  %v2952_v38 = vpop.f32.mrf.mxu1 }
 0x3da   : > { %v2651_v60 = vadd.f32 %v8710_v14, %v2615_v3  ;;  %8155 = vmatmul.msk.f32.gmra.mxu0 %vm2685_vm4, %v10725_v12  ;;  %v10735_v29 = vadd.f32 %v3186_v18, %v3066_v49  ;;  %v3072_v23 = vadd.f32 %v3071_v54, %v2952_v38 }
 0x3dc   : > { %v2683_v17 = vmax.f32 %v2651_v60, 0.0  ;;  %8073 = vmatmul.msk.f32.gmra.mxu1 %vm2685_vm4, %v2794_v45  ;;  %8107 = vmatmul.msk.f32.gmra.mxu2 %vm2685_vm4, %v2794_v45  ;;  %v10775_v60 = vld [vmem:[#allocation3 + $0xd9] sm:$0xff] }
 0x3dd   : > { %v2795_v48 = vld [vmem:[#allocation3 + $0x170] sm:$0xff] }
 0x3de   : > { %2762 = vst.msk [vmem:[#allocation3 + $0x181] sm:$0xff] %vm2685_vm4, %v2683_v17  ;;  %8136 = vmatmul.msk.f32.gmra.mxu3 %vm2685_vm4, %v2795_v48 }
 0x3df   : > { %v2582_v21 = vpop.f32.mrf.mxu0  ;;  %v3077_v20 = vpop.f32.mrf.mxu2 }
 0x3e0   : > { %v2616_v55 = vadd.f32 %v2582_v21, %v2460_v56  ;;  %v2799_v56 = vld [vmem:[#allocation3 + $0x1a0] sm:$0xff] }
 0x3e1   : > { %v3189_v11 = vpop.f32.mrf.mxu3  ;;  %v2955_v52 = vpop.f32.mrf.mxu1 }
 0x3e2   : > { %v2652_v58 = vadd.f32 %v8710_v14, %v2616_v55  ;;  %8156 = vmatmul.msk.f32.gmra.mxu0 %vm2685_vm4, %v10740_v59  ;;  %v10746_v25 = vadd.f32 %v3189_v11, %v3069_v57  ;;  %v3075_v54 = vadd.f32 %v3074_v7, %v2955_v52  ;;  %v10787_v55 = vld [vmem:[#allocation3 + $0xe1] sm:$0xff] }
 0x3e3   : > { %v3869_v11 = vld [vmem:[#allocation3 + $0x2] sm:$0xff] }
 0x3e4   : > { %v2684_v36 = vmax.f32 %v2652_v58, 0.0  ;;  %12764 = vst [vmem:[#allocation50_spill] sm:$0xff] %v10746_v25  ;;  %8074 = vmatmul.msk.f32.gmra.mxu1 %vm2685_vm4, %v2795_v48  ;;  %8108 = vmatmul.msk.f32.gmra.mxu2 %vm2685_vm4, %v2795_v48 }
 0x3e5   : > { %v2796_v19 = vld [vmem:[#allocation3 + $0x180] sm:$0xff] }
 0x3e6   : > { %2763 = vst.msk [vmem:[#allocation3 + $0x189] sm:$0xff] %vm2685_vm4, %v2684_v36  ;;  %8137 = vmatmul.msk.f32.gmra.mxu3 %vm2685_vm4, %v2796_v19 }
 0x3e7   : > { %v10749_v22 = vpop.f32.mrf.mxu0  ;;  %v3080_v45 = vpop.f32.mrf.mxu2 }
 0x3e9   : > { %v3192_v9 = vpop.f32.mrf.mxu3  ;;  %v2958_v2 = vpop.f32.mrf.mxu1 }
 0x3ea   : > { %8157 = vmatmul.msk.f32.gmra.mxu0 %vm2685_vm4, %v10752_v32  ;;  %v10758_v1 = vadd.f32 %v3192_v9, %v3072_v23  ;;  %v3078_v18 = vadd.f32 %v3077_v20, %v2958_v2  ;;  %v10800_v20 = vld [vmem:[#allocation3 + $0xf1] sm:$0xff] }
 0x3eb   : > { %v3870_v9 = vld [vmem:[#allocation3 + $0xa] sm:$0xff] }
 0x3ec   : > { %12765 = vst [vmem:[#allocation69_spill] sm:$0xff] %v10758_v1  ;;  %8075 = vmatmul.msk.f32.gmra.mxu1 %vm2685_vm4, %v2796_v19  ;;  %8205 = vmatmul.msk.f32.vlgmr.msrb.gmra.mxu2 %vm2685_vm4, %v10565_v16 }
 0x3ed   : > { %v2797_v27 = vld [vmem:[#allocation3 + $0x188] sm:$0xff] }
 0x3ee   : > { %8138 = vmatmul.msk.f32.gmra.mxu3 %vm2685_vm4, %v2797_v27 }
 0x3ef   : > { %v10760_v5 = vpop.f32.mrf.mxu0  ;;  %v3083_v28 = vpop.f32.mrf.mxu2 }
 0x3f1   : > { %v3195_v41 = vpop.f32.mrf.mxu3  ;;  %v2961_v14 = vpop.f32.mrf.mxu1 }
 0x3f2   : > { %8158 = vmatmul.msk.f32.gmra.mxu0 %vm2685_vm4, %v10763_v61  ;;  %v10770_v3 = vadd.f32 %v3195_v41, %v3075_v54  ;;  %v3081_v4 = vadd.f32 %v3080_v45, %v2961_v14  ;;  %v10813_v54 = vld [vmem:[#allocation3 + $0xf9] sm:$0xff] }
 0x3f3   : > { %v10823_v14 = vld [vmem:[#allocation3 + $0x1a] sm:$0xff] }
 0x3f4   : > { %12766 = vst [vmem:[#allocation68_spill] sm:$0xff] %v10770_v3  ;;  %8076 = vmatmul.msk.f32.gmra.mxu1 %vm2685_vm4, %v2797_v27  ;;  %8206 = vmatmul.msk.f32.gmra.mxu2 %vm2685_vm4, %v10581_v43 }
 0x3f6   : > { %8139 = vmatmul.msk.f32.gmra.mxu3 %vm2685_vm4, %v2798_v33 }
 0x3f7   : > { %v10772_v49 = vpop.f32.mrf.mxu0  ;;  %v3086_v7 = vpop.f32.mrf.mxu2 }
 0x3f9   : > { %v3198_v17 = vpop.f32.mrf.mxu3  ;;  %v2964_v38 = vpop.f32.mrf.mxu1 }
 0x3fa   : > { %8159 = vmatmul.msk.f32.gmra.mxu0 %vm2685_vm4, %v10775_v60  ;;  %v10782_v48 = vadd.f32 %v3198_v17, %v3078_v18  ;;  %v3084_v52 = vadd.f32 %v3083_v28, %v2964_v38 }
 0x3fc   : > { %12767 = vst [vmem:[#allocation64_spill] sm:$0xff] %v10782_v48  ;;  %8173 = vmatmul.msk.f32.vlgmr.msrb.gmra.mxu1 %vm2685_vm4, %v10533_v47  ;;  %8207 = vmatmul.msk.f32.gmra.mxu2 %vm2685_vm4, %v10597_v62  ;;  %v10949_v48 = vld [vmem:[#allocation3 + $0x7a] sm:$0xff] }
 0x3fe   : > { %8140 = vmatmul.msk.f32.gmra.mxu3 %vm2685_vm4, %v2799_v56  ;;  %v10829_v56 = vld [vmem:[#allocation3 + $0x109] sm:$0xff] }
 0x3ff   : > { %v10784_v21 = vpop.f32.mrf.mxu0  ;;  %v3089_v40 = vpop.f32.mrf.mxu2 }
 0x401   : > { %v3201_v57 = vpop.f32.mrf.mxu3  ;;  %v2967_v19 = vpop.f32.mrf.mxu1 }
 0x402   : > { %8160 = vmatmul.msk.f32.gmra.mxu0 %vm2685_vm4, %v10787_v55  ;;  %v10795_v58 = vadd.f32 %v3201_v57, %v3081_v4  ;;  %v3087_v41 = vadd.f32 %v3086_v7, %v2967_v19  ;;  %v10839_v57 = vld [vmem:[#allocation3 + $0x22] sm:$0xff] }
 0x404   : > { %12768 = vst [vmem:[#allocation34_spill] sm:$0xff] %v10795_v58  ;;  %8174 = vmatmul.msk.f32.gmra.mxu1 %vm2685_vm4, %v10549_v51  ;;  %8208 = vmatmul.msk.f32.gmra.mxu2 %vm2685_vm4, %v10613_v53 }
 0x406   : > { %8237 = vmatmul.msk.f32.vlgmr.msrb.gmra.mxu3 %vm2685_vm4, %v3869_v11 }
 0x407   : > { %v10797_v36 = vpop.f32.mrf.mxu0  ;;  %v3092_v27 = vpop.f32.mrf.mxu2 }
 0x409   : > { %v3204_v47 = vpop.f32.mrf.mxu3  ;;  %v2970_v2 = vpop.f32.mrf.mxu1 }
 0x40a   : > { %8161 = vmatmul.msk.f32.gmra.mxu0 %vm2685_vm4, %v10800_v20  ;;  %v10808_v23 = vadd.f32 %v3204_v47, %v3084_v52  ;;  %v3090_v7 = vadd.f32 %v3089_v40, %v2970_v2  ;;  %v10843_v40 = vld [vmem:[#allocation3 + $0x111] sm:$0xff] }
 0x40b   : > { %v10855_v2 = vld [vmem:[#allocation3 + $0x32] sm:$0xff] }
 0x40c   : > { %12769 = vst [vmem:[#allocation51_spill] sm:$0xff] %v10808_v23  ;;  %8175 = vmatmul.msk.f32.gmra.mxu1 %vm2685_vm4, %v10565_v16  ;;  %8209 = vmatmul.msk.f32.gmra.mxu2 %vm2685_vm4, %v10629_v46 }
 0x40e   : > { %8238 = vmatmul.msk.f32.gmra.mxu3 %vm2685_vm4, %v3870_v9 }
 0x40f   : > { %v10810_v45 = vpop.f32.mrf.mxu0  ;;  %v3095_v28 = vpop.f32.mrf.mxu2 }
 0x411   : > { %v3207_v51 = vpop.f32.mrf.mxu3  ;;  %v2973_v18 = vpop.f32.mrf.mxu1 }
 0x412   : > { %8162 = vmatmul.msk.f32.gmra.mxu0 %vm2685_vm4, %v10813_v54  ;;  %v10821_v33 = vadd.f32 %v3207_v51, %v3087_v41  ;;  %v3093_v19 = vadd.f32 %v3092_v27, %v2973_v18  ;;  %v10859_v27 = vld [vmem:[#allocation3 + $0x121] sm:$0xff] }
 0x414   : > { %12770 = vst [vmem:[#allocation72_spill] sm:$0xff] %v10821_v33  ;;  %8176 = vmatmul.msk.f32.gmra.mxu1 %vm2685_vm4, %v10581_v43  ;;  %8210 = vmatmul.msk.f32.gmra.mxu2 %vm2685_vm4, %v10645_v6 }
 0x416   : > { %8239 = vmatmul.msk.f32.gmra.mxu3 %vm2685_vm4, %v10823_v14 }
 0x417   : > { %v10827_v17 = vpop.f32.mrf.mxu0  ;;  %v3098_v4 = vpop.f32.mrf.mxu2 }
 0x419   : > { %v3210_v16 = vpop.f32.mrf.mxu3  ;;  %v2976_v11 = vpop.f32.mrf.mxu1 }
 0x41a   : > { %8163 = vmatmul.msk.f32.gmra.mxu0 %vm2685_vm4, %v10829_v56  ;;  %v10837_v38 = vadd.f32 %v3210_v16, %v3090_v7  ;;  %v3096_v51 = vadd.f32 %v3095_v28, %v2976_v11  ;;  %v10875_v28 = vld [vmem:[#allocation3 + $0x129] sm:$0xff] }
 0x41c   : > { %12771 = vst [vmem:[#allocation66_spill] sm:$0xff] %v10837_v38  ;;  %8177 = vmatmul.msk.f32.gmra.mxu1 %vm2685_vm4, %v10597_v62  ;;  %8211 = vmatmul.msk.f32.gmra.mxu2 %vm2685_vm4, %v10661_v63 }
 0x41e   : > { %8240 = vmatmul.msk.f32.gmra.mxu3 %vm2685_vm4, %v10839_v57 }
 0x41f   : > { %v10845_v52 = vpop.f32.mrf.mxu0  ;;  %v3101_v9 = vpop.f32.mrf.mxu2 }
 0x421   : > { %v3213_v43 = vpop.f32.mrf.mxu3  ;;  %v2979_v41 = vpop.f32.mrf.mxu1 }
 0x422   : > { %8164 = vmatmul.msk.f32.gmra.mxu0 %vm2685_vm4, %v10843_v40  ;;  %v10853_v47 = vadd.f32 %v3213_v43, %v3093_v19  ;;  %v10871_v19 = vld [vmem:[#allocation3 + $0x3a] sm:$0xff]  ;;  %v3099_v11 = vadd.f32 %v3098_v4, %v2979_v41 }
 0x423   : > { %v10891_v4 = vld [vmem:[#allocation3 + $0x139] sm:$0xff] }
 0x424   : > { %12772 = vst [vmem:[#allocation35_spill] sm:$0xff] %v10853_v47  ;;  %8178 = vmatmul.msk.f32.gmra.mxu1 %vm2685_vm4, %v10613_v53  ;;  %8212 = vmatmul.msk.f32.gmra.mxu2 %vm2685_vm4, %v10677_v44 }
 0x426   : > { %8241 = vmatmul.msk.f32.gmra.mxu3 %vm2685_vm4, %v10855_v2 }
 0x427   : > { %v10867_v18 = vpop.f32.mrf.mxu0  ;;  %v3104_v16 = vpop.f32.mrf.mxu2 }
 0x429   : > { %v3216_v62 = vpop.f32.mrf.mxu3  ;;  %v2982_v43 = vpop.f32.mrf.mxu1 }
 0x42a   : > { %8165 = vmatmul.msk.f32.gmra.mxu0 %vm2685_vm4, %v10859_v27  ;;  %v10869_v7 = vadd.f32 %v3216_v62, %v3096_v51  ;;  %v3102_v41 = vadd.f32 %v3101_v9, %v2982_v43  ;;  %v10907_v9 = vld [vmem:[#allocation3 + $0x141] sm:$0xff] }
 0x42c   : > { %12773 = vst [vmem:[#allocation52_spill] sm:$0xff] %v10869_v7  ;;  %8179 = vmatmul.msk.f32.gmra.mxu1 %vm2685_vm4, %v10629_v46  ;;  %8213 = vmatmul.msk.f32.gmra.mxu2 %vm2685_vm4, %v10695_v8  ;;  %v10887_v7 = vld [vmem:[#allocation3 + $0x4a] sm:$0xff] }
 0x42e   : > { %8242 = vmatmul.msk.f32.gmra.mxu3 %vm2685_vm4, %v10871_v19 }
 0x42f   : > { %v3107_v62 = vpop.f32.mrf.mxu2  ;;  %v10885_v42 = vpop.f32.mrf.mxu0 }
 0x431   : > { %v3219_v53 = vpop.f32.mrf.mxu3  ;;  %v2985_v47 = vpop.f32.mrf.mxu1 }
 0x432   : > { %8166 = vmatmul.msk.f32.gmra.mxu0 %vm2685_vm4, %v10875_v28  ;;  %v10883_v51 = vadd.f32 %v3219_v53, %v3099_v11  ;;  %v3105_v43 = vadd.f32 %v3104_v16, %v2985_v47  ;;  %v10921_v47 = vld [vmem:[#allocation3 + $0x151] sm:$0xff] }
 0x434   : > { %12774 = vst [vmem:[#allocation75_spill] sm:$0xff] %v10883_v51  ;;  %8180 = vmatmul.msk.f32.gmra.mxu1 %vm2685_vm4, %v10645_v6  ;;  %8214 = vmatmul.msk.f32.gmra.mxu2 %vm2685_vm4, %v10710_v10  ;;  %v10901_v51 = vld [vmem:[#allocation3 + $0x52] sm:$0xff] }
 0x436   : > { %8243 = vmatmul.msk.f32.gmra.mxu3 %vm2685_vm4, %v10887_v7 }
 0x437   : > { %v3110_v53 = vpop.f32.mrf.mxu2  ;;  %v10903_v38 = vpop.f32.mrf.mxu0 }
 0x439   : > { %v3222_v46 = vpop.f32.mrf.mxu3  ;;  %v2988_v33 = vpop.f32.mrf.mxu1 }
 0x43a   : > { %8167 = vmatmul.msk.f32.gmra.mxu0 %vm2685_vm4, %v10891_v4  ;;  %v10899_v11 = vadd.f32 %v3222_v46, %v3102_v41  ;;  %v3108_v16 = vadd.f32 %v3107_v62, %v2988_v33  ;;  %v10937_v33 = vld [vmem:[#allocation3 + $0x159] sm:$0xff] }
 0x43c   : > { %12775 = vst [vmem:[#allocation74_spill] sm:$0xff] %v10899_v11  ;;  %8181 = vmatmul.msk.f32.gmra.mxu1 %vm2685_vm4, %v10661_v63  ;;  %8215 = vmatmul.msk.f32.gmra.mxu2 %vm2685_vm4, %v10725_v12  ;;  %v10917_v11 = vld [vmem:[#allocation3 + $0x62] sm:$0xff] }
 0x43e   : > { %8244 = vmatmul.msk.f32.gmra.mxu3 %vm2685_vm4, %v10901_v51 }
 0x43f   : > { %v3113_v46 = vpop.f32.mrf.mxu2  ;;  %v10923_v58 = vpop.f32.mrf.mxu0 }
 0x440   : > { %12777 = vst [vmem:[#allocation36_spill] sm:$0xff] %v10923_v58 }
 0x441   : > { %v3225_v6 = vpop.f32.mrf.mxu3  ;;  %v2991_v23 = vpop.f32.mrf.mxu1 }
 0x442   : > { %8168 = vmatmul.msk.f32.gmra.mxu0 %vm2685_vm4, %v10907_v9  ;;  %v10915_v41 = vadd.f32 %v3225_v6, %v3105_v43  ;;  %v3111_v62 = vadd.f32 %v3110_v53, %v2991_v23  ;;  %v10953_v23 = vld [vmem:[#allocation3 + $0x169] sm:$0xff] }
 0x444   : > { %12776 = vst [vmem:[#allocation70_spill] sm:$0xff] %v10915_v41  ;;  %8182 = vmatmul.msk.f32.gmra.mxu1 %vm2685_vm4, %v10677_v44  ;;  %8216 = vmatmul.msk.f32.gmra.mxu2 %vm2685_vm4, %v10740_v59  ;;  %v10933_v41 = vld [vmem:[#allocation3 + $0x6a] sm:$0xff] }
 0x446   : > { %8245 = vmatmul.msk.f32.gmra.mxu3 %vm2685_vm4, %v10917_v11 }
 0x447   : > { %v3116_v6 = vpop.f32.mrf.mxu2 }
 0x449   : > { %v3228_v63 = vpop.f32.mrf.mxu3  ;;  %v2994_v3 = vpop.f32.mrf.mxu1 }
 0x44a   : > { %8169 = vmatmul.msk.f32.gmra.mxu0 %vm2685_vm4, %v10921_v47  ;;  %v10931_v43 = vadd.f32 %v3228_v63, %v3108_v16  ;;  %v10945_v16 = vpop.f32.mrf.mxu0  ;;  %v3114_v53 = vadd.f32 %v3113_v46, %v2994_v3  ;;  %v10969_v3 = vld [vmem:[#allocation3 + $0x171] sm:$0xff] }
 0x44b   : > { %12779 = vst [vmem:[#allocation77_spill] sm:$0xff] %v10945_v16  ;;  %v10965_v16 = vld [vmem:[#allocation3 + $0x82] sm:$0xff] }
 0x44c   : > { %12778 = vst [vmem:[#allocation53_spill] sm:$0xff] %v10931_v43  ;;  %8183 = vmatmul.msk.f32.gmra.mxu1 %vm2685_vm4, %v10695_v8  ;;  %8217 = vmatmul.msk.f32.gmra.mxu2 %vm2685_vm4, %v10752_v32 }
 0x44e   : > { %8246 = vmatmul.msk.f32.gmra.mxu3 %vm2685_vm4, %v10933_v41 }
 0x44f   : > { %v3119_v43 = vpop.f32.mrf.mxu2 }
 0x451   : > { %v3231_v44 = vpop.f32.mrf.mxu3  ;;  %v2997_v1 = vpop.f32.mrf.mxu1 }
 0x452   : > { %8170 = vmatmul.msk.f32.gmra.mxu0 %vm2685_vm4, %v10937_v33  ;;  %v10947_v63 = vadd.f32 %v3231_v44, %v3111_v62  ;;  %v10963_v44 = vpop.f32.mrf.mxu0  ;;  %v3117_v46 = vadd.f32 %v3116_v6, %v2997_v1 }
 0x453   : > { %12782 = vst [vmem:[#allocation54_spill] sm:$0xff] %v10963_v44 }
 0x454   : > { %12780 = vst [vmem:[#allocation73_spill] sm:$0xff] %v10947_v63  ;;  %8184 = vmatmul.msk.f32.gmra.mxu1 %vm2685_vm4, %v10710_v10  ;;  %8218 = vmatmul.msk.f32.gmra.mxu2 %vm2685_vm4, %v10763_v61 }
 0x456   : > { %8247 = vmatmul.msk.f32.gmra.mxu3 %vm2685_vm4, %v10949_v48 }
 0x457   : > { %v3122_v63 = vpop.f32.mrf.mxu2 }
 0x459   : > { %v3234_v8 = vpop.f32.mrf.mxu3  ;;  %v3000_v58 = vpop.f32.mrf.mxu1 }
 0x45a   : > { %8171 = vmatmul.msk.f32.gmra.mxu0 %vm2685_vm4, %v10953_v23  ;;  %v10961_v62 = vadd.f32 %v3234_v8, %v3114_v53  ;;  %v10981_v44 = vpop.f32.mrf.mxu0  ;;  %v3120_v1 = vadd.f32 %v3119_v43, %v3000_v58 }
 0x45c   : > { %12781 = vst [vmem:[#allocation37_spill] sm:$0xff] %v10961_v62  ;;  %8185 = vmatmul.msk.f32.gmra.mxu1 %vm2685_vm4, %v10725_v12  ;;  %8219 = vmatmul.msk.f32.gmra.mxu2 %vm2685_vm4, %v10775_v60  ;;  %v10979_v62 = vld [vmem:[#allocation3 + $0x92] sm:$0xff] }
 0x45e   : > { %8248 = vmatmul.msk.f32.gmra.mxu3 %vm2685_vm4, %v10965_v16 }
 0x45f   : > { %v3125_v8 = vpop.f32.mrf.mxu2 }
 0x461   : > { %v3237_v10 = vpop.f32.mrf.mxu3  ;;  %v3003_v25 = vpop.f32.mrf.mxu1 }
 0x462   : > { %8172 = vmatmul.msk.f32.gmra.mxu0 %vm2685_vm4, %v10969_v3  ;;  %v10977_v53 = vadd.f32 %v3237_v10, %v3117_v46  ;;  %v10993_v10 = vld [vmem:[#allocation3 + $0x9a] sm:$0xff]  ;;  %v3123_v58 = vadd.f32 %v3122_v63, %v3003_v25  ;;  %v10997_v43 = vpop.f32.mrf.mxu0 }
 0x463   : > { %12785 = vst [vmem:[#allocation76_spill] sm:$0xff] %v10997_v43 }
 0x464   : > { %12783 = vst [vmem:[#allocation80_spill] sm:$0xff] %v10977_v53  ;;  %8186 = vmatmul.msk.f32.gmra.mxu1 %vm2685_vm4, %v10740_v59  ;;  %8220 = vmatmul.msk.f32.gmra.mxu2 %vm2685_vm4, %v10787_v55 }
 0x466   : > { %8249 = vmatmul.msk.f32.gmra.mxu3 %vm2685_vm4, %v10979_v62 }
 0x467   : > { %v3128_v46 = vpop.f32.mrf.mxu2 }
 0x469   : > { %v3240_v12 = vpop.f32.mrf.mxu3  ;;  %v3006_v53 = vpop.f32.mrf.mxu1 }
 0x46a   : > { %8269 = vmatmul.msk.f32.vlgmr.msrb.gmra.mxu0 %vm2685_vm4, %v10823_v14  ;;  %v10991_v6 = vadd.f32 %v3240_v12, %v3120_v1  ;;  %v11007_v12 = vld [vmem:[#allocation3 + $0xaa] sm:$0xff]  ;;  %v3126_v25 = vadd.f32 %v3125_v8, %v3006_v53  ;;  %v11019_v63 = vpop.f32.mrf.mxu0 }
 0x46c   : > { %12784 = vst [vmem:[#allocation79_spill] sm:$0xff] %v10991_v6  ;;  %8187 = vmatmul.msk.f32.gmra.mxu1 %vm2685_vm4, %v10752_v32  ;;  %8221 = vmatmul.msk.f32.gmra.mxu2 %vm2685_vm4, %v10800_v20  ;;  %v3036_v32 = vadd.f32 %v10519_v34, %v10546_v15 }
 0x46e   : > { %8250 = vmatmul.msk.f32.gmra.mxu3 %vm2685_vm4, %v10993_v10 }
 0x46f   : > { %v3741_v1 = vpop.f32.mrf.mxu2 }
 0x471   : > { %v3243_v59 = vpop.f32.mrf.mxu3  ;;  %v3009_v6 = vpop.f32.mrf.mxu1 }
 0x472   : > { %8270 = vmatmul.msk.f32.gmra.mxu0 %vm2685_vm4, %v10839_v57  ;;  %v11005_v14 = vadd.f32 %v3243_v59, %v3123_v58  ;;  %v3252_v59 = vadd.f32 %v10575_v31, %v3036_v32  ;;  %v3129_v15 = vadd.f32 %v3128_v46, %v3009_v6  ;;  %v3532_v32 = vadd.f32 %v10760_v5, %v10591_v13 }
 0x473   : > { %v3533_v5 = vadd.f32 %v10772_v49, %v10607_v37 }
 0x474   : > { %12786 = vst [vmem:[#allocation38_spill] sm:$0xff] %v11005_v14  ;;  %8188 = vmatmul.msk.f32.gmra.mxu1 %vm2685_vm4, %v10763_v61  ;;  %8222 = vmatmul.msk.f32.gmra.mxu2 %vm2685_vm4, %v10813_v54  ;;  %v3531_v8 = vadd.f32 %v10749_v22, %v3252_v59  ;;  %v11025_v14 = vld [vmem:[#allocation3 + $0xb2] sm:$0xff]  ;;  %v11055_v59 = vld [vmem:[#allocation3 + $0xca] sm:$0xff] }
 0x476   : > { %8251 = vmatmul.msk.f32.gmra.mxu3 %vm2685_vm4, %v11007_v12 }
 0x477   : > { %v3744_v53 = vpop.f32.mrf.mxu2 }
 0x479   : > { %v3246_v57 = vpop.f32.mrf.mxu3  ;;  %v3588_v43 = vpop.f32.mrf.mxu1 }
 0x47a   : > { %8271 = vmatmul.msk.f32.gmra.mxu0 %vm2685_vm4, %v10855_v2  ;;  %v11021_v58 = vadd.f32 %v3246_v57, %v3126_v25  ;;  %v3684_v34 = vadd.f32 %v3588_v43, %v3531_v8  ;;  %v11037_v25 = vpop.f32.mrf.mxu0  ;;  %v11041_v43 = vld [vmem:[#allocation3 + $0xc2] sm:$0xff] }
 0x47c   : > { %12787 = vst [vmem:[#allocation55_spill] sm:$0xff] %v11021_v58  ;;  %8189 = vmatmul.msk.f32.gmra.mxu1 %vm2685_vm4, %v10775_v60  ;;  %8223 = vmatmul.msk.f32.gmra.mxu2 %vm2685_vm4, %v10829_v56  ;;  %v3837_v61 = vadd.f32 %v3741_v1, %v3684_v34 }
 0x47e   : > { %8252 = vmatmul.msk.f32.gmra.mxu3 %vm2685_vm4, %v11025_v14 }
 0x47f   : > { %v3747_v6 = vpop.f32.mrf.mxu2 }
 0x481   : > { %v3249_v31 = vpop.f32.mrf.mxu3  ;;  %v3591_v46 = vpop.f32.mrf.mxu1 }
 0x482   : > { %8272 = vmatmul.msk.f32.gmra.mxu0 %vm2685_vm4, %v10871_v19  ;;  %v11035_v22 = vadd.f32 %v3249_v31, %v3129_v15  ;;  %v3685_v60 = vadd.f32 %v3591_v46, %v3532_v32  ;;  %v11057_v8 = vpop.f32.mrf.mxu0  ;;  %v3534_v31 = vadd.f32 %v10784_v21, %v10623_v35 }
 0x484   : > { %12788 = vst [vmem:[#allocation78_spill] sm:$0xff] %v11035_v22  ;;  %8190 = vmatmul.msk.f32.gmra.mxu1 %vm2685_vm4, %v10787_v55  ;;  %8224 = vmatmul.msk.f32.gmra.mxu2 %vm2685_vm4, %v10843_v40  ;;  %v3838_v57 = vadd.f32 %v3744_v53, %v3685_v60  ;;  %v3319_v22 = vld [vmem:[#allocation3 + $0x1a1] sm:$0xff] }
 0x486   : > { %8253 = vmatmul.msk.f32.gmra.mxu3 %vm2685_vm4, %v11041_v43 }
 0x487   : > { %v3750_v55 = vpop.f32.mrf.mxu2 }
 0x489   : > { %v4020_v1 = vpop.f32.mrf.mxu3  ;;  %v3594_v34 = vpop.f32.mrf.mxu1 }
 0x48a   : > { %8273 = vmatmul.msk.f32.gmra.mxu0 %vm2685_vm4, %v10887_v7  ;;  %v11051_v13 = vadd.f32 %v4020_v1, %v3837_v61  ;;  %v3686_v15 = vadd.f32 %v3594_v34, %v3533_v5  ;;  %v11071_v61 = vld [vmem:[#allocation3 + $0xda] sm:$0xff]  ;;  %v11075_v60 = vpop.f32.mrf.mxu0  ;;  %v3535_v1 = vadd.f32 %v10797_v36, %v10639_v39 }
 0x48b   : > { %12789 = vst [vmem:[#allocation39_spill] sm:$0xff] %v11075_v60 }
 0x48c   : > { %8191 = vmatmul.msk.f32.gmra.mxu1 %vm2685_vm4, %v10800_v20  ;;  %8225 = vmatmul.msk.f32.gmra.mxu2 %vm2685_vm4, %v10859_v27  ;;  %v3839_v49 = vadd.f32 %v3747_v6, %v3686_v15 }
 0x48e   : > { %8254 = vmatmul.msk.f32.gmra.mxu3 %vm2685_vm4, %v11055_v59 }
 0x48f   : > { %v3753_v21 = vpop.f32.mrf.mxu2 }
 0x491   : > { %v4023_v37 = vpop.f32.mrf.mxu3  ;;  %v3597_v32 = vpop.f32.mrf.mxu1 }
 0x492   : > { %8274 = vmatmul.msk.f32.gmra.mxu0 %vm2685_vm4, %v10901_v51  ;;  %v11067_v53 = vadd.f32 %v4023_v37, %v3838_v57  ;;  %v3687_v46 = vadd.f32 %v3597_v32, %v3534_v31  ;;  %v11087_v57 = vld [vmem:[#allocation3 + $0xe2] sm:$0xff]  ;;  %v3536_v37 = vadd.f32 %v10810_v45, %v10655_v50  ;;  %v3537_v45 = vadd.f32 %v10827_v17, %v10671_v24 }
 0x493   : > { %v3538_v17 = vadd.f32 %v10845_v52, %v10687_v0 }
 0x494   : > { %8192 = vmatmul.msk.f32.gmra.mxu1 %vm2685_vm4, %v10813_v54  ;;  %8226 = vmatmul.msk.f32.gmra.mxu2 %vm2685_vm4, %v10875_v28  ;;  %v3840_v35 = vadd.f32 %v3750_v55, %v3687_v46  ;;  %v11097_v55 = vpop.f32.mrf.mxu0 }
 0x495   : > { %12790 = vst [vmem:[#allocation56_spill] sm:$0xff] %v11097_v55 }
 0x496   : > { %8255 = vmatmul.msk.f32.gmra.mxu3 %vm2685_vm4, %v11071_v61 }
 0x497   : > { %v3756_v36 = vpop.f32.mrf.mxu2 }
 0x499   : > { %v4026_v20 = vpop.f32.mrf.mxu3  ;;  %v3600_v5 = vpop.f32.mrf.mxu1 }
 0x49a   : > { %8275 = vmatmul.msk.f32.gmra.mxu0 %vm2685_vm4, %v10917_v11  ;;  %v11083_v6 = vadd.f32 %v4026_v20, %v3839_v49  ;;  %v3688_v34 = vadd.f32 %v3600_v5, %v3535_v1  ;;  %v11103_v49 = vld [vmem:[#allocation3 + $0xf2] sm:$0xff] }
 0x49c   : > { %8193 = vmatmul.msk.f32.gmra.mxu1 %vm2685_vm4, %v10829_v56  ;;  %8227 = vmatmul.msk.f32.gmra.mxu2 %vm2685_vm4, %v10891_v4  ;;  %v3841_v15 = vadd.f32 %v3753_v21, %v3688_v34  ;;  %v11115_v50 = vpop.f32.mrf.mxu0 }
 0x49d   : > { %12791 = vst [vmem:[#allocation81_spill] sm:$0xff] %v11115_v50 }
 0x49e   : > { %8256 = vmatmul.msk.f32.gmra.mxu3 %vm2685_vm4, %v11087_v57 }
 0x49f   : > { %v3759_v21 = vpop.f32.mrf.mxu2 }
 0x4a1   : > { %v4029_v54 = vpop.f32.mrf.mxu3  ;;  %v3603_v31 = vpop.f32.mrf.mxu1 }
 0x4a2   : > { %8276 = vmatmul.msk.f32.gmra.mxu0 %vm2685_vm4, %v10933_v41  ;;  %v11099_v39 = vadd.f32 %v4029_v54, %v3840_v35  ;;  %v3689_v56 = vadd.f32 %v3603_v31, %v3536_v37  ;;  %v11119_v35 = vld [vmem:[#allocation3 + $0xfa] sm:$0xff]  ;;  %v11133_v54 = vld [vmem:[#allocation3 + $0x10a] sm:$0xff] }
 0x4a4   : > { %8194 = vmatmul.msk.f32.gmra.mxu1 %vm2685_vm4, %v10843_v40  ;;  %8228 = vmatmul.msk.f32.gmra.mxu2 %vm2685_vm4, %v10907_v9  ;;  %v3842_v46 = vadd.f32 %v3756_v36, %v3689_v56  ;;  %v11147_v56 = vld [vmem:[#allocation3 + $0x112] sm:$0xff] }
 0x4a6   : > { %8257 = vmatmul.msk.f32.gmra.mxu3 %vm2685_vm4, %v11103_v49 }
 0x4a9   : > { %v4032_v32 = vpop.f32.mrf.mxu3  ;;  %v3606_v1 = vpop.f32.mrf.mxu1 }
 0x4aa   : > { %8277 = vmatmul.msk.f32.gmra.mxu0 %vm2685_vm4, %v10949_v48  ;;  %v11113_v20 = vadd.f32 %v4032_v32, %v3841_v15  ;;  %v3690_v40 = vadd.f32 %v3606_v1, %v3537_v45  ;;  %v11135_v15 = vpop.f32.mrf.mxu0 }
 0x4ab   : > { %12792 = vst [vmem:[#allocation40_spill] sm:$0xff] %v11135_v15 }
 0x4ac   : > { %8195 = vmatmul.msk.f32.gmra.mxu1 %vm2685_vm4, %v10859_v27  ;;  %8229 = vmatmul.msk.f32.gmra.mxu2 %vm2685_vm4, %v10921_v47  ;;  %v3843_v34 = vadd.f32 %v3759_v21, %v3690_v40  ;;  %v3762_v27 = vpop.f32.mrf.mxu2  ;;  %v11163_v21 = vld [vmem:[#allocation3 + $0x122] sm:$0xff]  ;;  %v11177_v40 = vld [vmem:[#allocation3 + $0x12a] sm:$0xff] }
 0x4ae   : > { %8258 = vmatmul.msk.f32.gmra.mxu3 %vm2685_vm4, %v11119_v35 }
 0x4b1   : > { %v4035_v5 = vpop.f32.mrf.mxu3  ;;  %v3609_v36 = vpop.f32.mrf.mxu1 }
 0x4b2   : > { %8278 = vmatmul.msk.f32.gmra.mxu0 %vm2685_vm4, %v10965_v16  ;;  %v11129_v24 = vadd.f32 %v4035_v5, %v3842_v46  ;;  %v3691_v37 = vadd.f32 %v3609_v36, %v3538_v17  ;;  %v11153_v46 = vpop.f32.mrf.mxu0  ;;  %v11190_v17 = vld [vmem:[#allocation3 + $0x13a] sm:$0xff] }
 0x4b3   : > { %12793 = vst [vmem:[#allocation57_spill] sm:$0xff] %v11153_v46 }
 0x4b4   : > { %8196 = vmatmul.msk.f32.gmra.mxu1 %vm2685_vm4, %v10875_v28  ;;  %8230 = vmatmul.msk.f32.gmra.mxu2 %vm2685_vm4, %v10937_v33  ;;  %v3844_v52 = vadd.f32 %v3762_v27, %v3691_v37  ;;  %v3317_v37 = vld [vmem:[#allocation3 + $0x189] sm:$0xff]  ;;  %v11368_v15 = vpop.f32.mrf.mxu2 }
 0x4b6   : > { %8259 = vmatmul.msk.f32.gmra.mxu3 %vm2685_vm4, %v11133_v54 }
 0x4b9   : > { %v4038_v0 = vpop.f32.mrf.mxu3  ;;  %v11149_v32 = vpop.f32.mrf.mxu1 }
 0x4ba   : > { %8279 = vmatmul.msk.f32.gmra.mxu0 %vm2685_vm4, %v10979_v62  ;;  %v11145_v31 = vadd.f32 %v4038_v0, %v3843_v34  ;;  %v3316_v34 = vld [vmem:[#allocation3 + $0x181] sm:$0xff] }
 0x4bc   : > { %8197 = vmatmul.msk.f32.gmra.mxu1 %vm2685_vm4, %v10891_v4  ;;  %8231 = vmatmul.msk.f32.gmra.mxu2 %vm2685_vm4, %v10953_v23  ;;  %v11175_v4 = vpop.f32.mrf.mxu0 }
 0x4bd   : > { %12794 = vst [vmem:[#allocation82_spill] sm:$0xff] %v11175_v4 }
 0x4be   : > { %8260 = vmatmul.msk.f32.gmra.mxu3 %vm2685_vm4, %v11147_v56 }
 0x4c1   : > { %v4041_v28 = vpop.f32.mrf.mxu3  ;;  %v11165_v1 = vpop.f32.mrf.mxu1 }
 0x4c2   : > { %8280 = vmatmul.msk.f32.gmra.mxu0 %vm2685_vm4, %v10993_v10  ;;  %v11161_v45 = vadd.f32 %v4041_v28, %v3844_v52  ;;  %v3318_v52 = vld [vmem:[#allocation3 + $0x199] sm:$0xff] }
 0x4c4   : > { %8198 = vmatmul.msk.f32.gmra.mxu1 %vm2685_vm4, %v10907_v9  ;;  %8232 = vmatmul.msk.f32.gmra.mxu2 %vm2685_vm4, %v10969_v3  ;;  %v11188_v9 = vpop.f32.mrf.mxu0 }
 0x4c5   : > { %12795 = vst [vmem:[#allocation41_spill] sm:$0xff] %v11188_v9  ;;  %v11238_v9 = vld [vmem:[#allocation3 + $0x16a] sm:$0xff] }
 0x4c6   : > { %8261 = vmatmul.msk.f32.gmra.mxu3 %vm2685_vm4, %v11163_v21 }
 0x4c9   : > { %v11179_v5 = vpop.f32.mrf.mxu1 }
 0x4ca   : > { %8281 = vmatmul.msk.f32.gmra.mxu0 %vm2685_vm4, %v11007_v12 }
 0x4cc   : > { %8199 = vmatmul.msk.f32.gmra.mxu1 %vm2685_vm4, %v10921_v47  ;;  %8233 = vmatmul.msk.f32.gmra.mxu2 %vm2685_vm4, %v3316_v34  ;;  %v11201_v47 = vld [vmem:[#allocation3 + $0x142] sm:$0xff]  ;;  %v11203_v27 = vpop.f32.mrf.mxu0 }
 0x4cd   : > { %12796 = vst [vmem:[#allocation58_spill] sm:$0xff] %v11203_v27 }
 0x4ce   : > { %8262 = vmatmul.msk.f32.gmra.mxu3 %vm2685_vm4, %v11177_v40 }
 0x4d1   : > { %v11192_v36 = vpop.f32.mrf.mxu1 }
 0x4d2   : > { %8282 = vmatmul.msk.f32.gmra.mxu0 %vm2685_vm4, %v11025_v14 }
 0x4d4   : > { %8200 = vmatmul.msk.f32.gmra.mxu1 %vm2685_vm4, %v10937_v33  ;;  %8234 = vmatmul.msk.f32.gmra.mxu2 %vm2685_vm4, %v3317_v37  ;;  %v11214_v33 = vld [vmem:[#allocation3 + $0x152] sm:$0xff]  ;;  %v11220_v58 = vpop.f32.mrf.mxu0 }
 0x4d5   : > { %12797 = vst [vmem:[#allocation42_spill] sm:$0xff] %v11220_v58 }
 0x4d6   : > { %8263 = vmatmul.msk.f32.gmra.mxu3 %vm2685_vm4, %v11190_v17 }
 0x4d9   : > { %v11205_v0 = vpop.f32.mrf.mxu1 }
 0x4da   : > { %8283 = vmatmul.msk.f32.gmra.mxu0 %vm2685_vm4, %v11041_v43 }
 0x4dc   : > { %8201 = vmatmul.msk.f32.gmra.mxu1 %vm2685_vm4, %v10953_v23  ;;  %8235 = vmatmul.msk.f32.gmra.mxu2 %vm2685_vm4, %v3318_v52  ;;  %v11227_v23 = vld [vmem:[#allocation3 + $0x15a] sm:$0xff]  ;;  %v11236_v58 = vpop.f32.mrf.mxu0 }
 0x4dd   : > { %12798 = vst [vmem:[#allocation59_spill] sm:$0xff] %v11236_v58 }
 0x4de   : > { %8264 = vmatmul.msk.f32.gmra.mxu3 %vm2685_vm4, %v11201_v47 }
 0x4e1   : > { %v11216_v28 = vpop.f32.mrf.mxu1 }
 0x4e2   : > { %8284 = vmatmul.msk.f32.gmra.mxu0 %vm2685_vm4, %v11055_v59 }
 0x4e4   : > { %8202 = vmatmul.msk.f32.gmra.mxu1 %vm2685_vm4, %v10969_v3  ;;  %8236 = vmatmul.msk.f32.gmra.mxu2 %vm2685_vm4, %v3319_v22  ;;  %v11247_v3 = vpop.f32.mrf.mxu0  ;;  %v11249_v22 = vld [vmem:[#allocation3 + $0x172] sm:$0xff] }
 0x4e5   : > { %12799 = vst [vmem:[#allocation43_spill] sm:$0xff] %v11247_v3 }
 0x4e6   : > { %8265 = vmatmul.msk.f32.gmra.mxu3 %vm2685_vm4, %v11214_v33 }
 0x4e9   : > { %v11229_v52 = vpop.f32.mrf.mxu1 }
 0x4ea   : > { %8285 = vmatmul.msk.f32.gmra.mxu0 %vm2685_vm4, %v11071_v61 }
 0x4ec   : > { %8203 = vmatmul.msk.f32.gmra.mxu1 %vm2685_vm4, %v3316_v34  ;;  %v11259_v34 = vpop.f32.mrf.mxu0 }
 0x4ed   : > { %12800 = vst [vmem:[#allocation60_spill] sm:$0xff] %v11259_v34 }
 0x4ee   : > { %8266 = vmatmul.msk.f32.gmra.mxu3 %vm2685_vm4, %v11227_v23 }
 0x4f1   : > { %v11240_v27 = vpop.f32.mrf.mxu1 }
 0x4f2   : > { %8286 = vmatmul.msk.f32.gmra.mxu0 %vm2685_vm4, %v11087_v57 }
 0x4f4   : > { %8204 = vmatmul.msk.f32.gmra.mxu1 %vm2685_vm4, %v3317_v37  ;;  %v11269_v3 = vpop.f32.mrf.mxu0 }
 0x4f5   : > { %12801 = vst [vmem:[#allocation44_spill] sm:$0xff] %v11269_v3 }
 0x4f6   : > { %8267 = vmatmul.msk.f32.gmra.mxu3 %vm2685_vm4, %v11238_v9 }
 0x4f9   : > { %v11251_v4 = vpop.f32.mrf.mxu1 }
 0x4fa   : > { %8287 = vmatmul.msk.f32.gmra.mxu0 %vm2685_vm4, %v11103_v49 }
 0x4fc   : > { %8301 = vmatmul.msk.f32.vlgmr.msra.gmra.mxu1 %vm2685_vm4, %v10855_v2  ;;  %v4173_v34 = vpop.f32.mrf.mxu0 }
 0x4fe   : > { %8268 = vmatmul.msk.f32.gmra.mxu3 %vm2685_vm4, %v11249_v22 }
 0x501   : > { %v11261_v58 = vpop.f32.mrf.mxu1 }
 0x502   : > { %8288 = vmatmul.msk.f32.gmra.mxu0 %vm2685_vm4, %v11119_v35 }
 0x504   : > { %8302 = vmatmul.msk.f32.gmra.mxu1 %vm2685_vm4, %v10871_v19  ;;  %v4176_v3 = vpop.f32.mrf.mxu0 }
 0x509   : > { %v11267_v37 = vpop.f32.mrf.mxu1 }
 0x50a   : > { %8289 = vmatmul.msk.f32.gmra.mxu0 %vm2685_vm4, %v11133_v54 }
 0x50c   : > { %8303 = vmatmul.msk.f32.gmra.mxu1 %vm2685_vm4, %v10887_v7  ;;  %v4179_v7 = vpop.f32.mrf.mxu0 }
 0x511   : > { %v11275_v2 = vpop.f32.mrf.mxu1 }
 0x512   : > { %8290 = vmatmul.msk.f32.gmra.mxu0 %vm2685_vm4, %v11147_v56  ;;  %12802 = vst [vmem:[#allocation61_spill] sm:$0xff] %v11275_v2 }
 0x514   : > { %8304 = vmatmul.msk.f32.gmra.mxu1 %vm2685_vm4, %v10901_v51 }
 0x519   : > { %v11281_v19 = vpop.f32.mrf.mxu1 }
 0x51a   : > { %8291 = vmatmul.msk.f32.gmra.mxu0 %vm2685_vm4, %v11163_v21  ;;  %12803 = vst [vmem:[#allocation45_spill] sm:$0xff] %v11281_v19 }
 0x51c   : > { %8305 = vmatmul.msk.f32.gmra.mxu1 %vm2685_vm4, %v10917_v11  ;;  %v4182_v11 = vpop.f32.mrf.mxu0 }
 0x521   : > { %v11287_v46 = vpop.f32.mrf.mxu1 }
 0x522   : > { %8292 = vmatmul.msk.f32.gmra.mxu0 %vm2685_vm4, %v11177_v40  ;;  %12804 = vst [vmem:[#allocation62_spill] sm:$0xff] %v11287_v46  ;;  %v4669_v46 = vld [vmem:[%s12807_s30] sm:$0xff] }
 0x523   : > { %4755 = vmatpush.msra.mxu3 %v4669_v46 }
 0x524   : > { %8306 = vmatmul.msk.f32.gmra.mxu1 %vm2685_vm4, %v10933_v41  ;;  %v8333_v41 = vld [vmem:[%s12807_s30 + $0x18] sm:$0xff] }
 0x525   : > { %4711 = vmatpush.msra.mxu2 %v8333_v41 }
 0x529   : > { %v11293_v51 = vpop.f32.mrf.mxu1 }
 0x52a   : > { %8293 = vmatmul.msk.f32.gmra.mxu0 %vm2685_vm4, %v11190_v17  ;;  %12805 = vst [vmem:[#allocation46_spill] sm:$0xff] %v11293_v51 }
 0x52c   : > { %8307 = vmatmul.msk.f32.gmra.mxu1 %vm2685_vm4, %v10949_v48 }
 0x531   : > { %v11299_v50 = vpop.f32.mrf.mxu1 }
 0x532   : > { %8294 = vmatmul.msk.f32.gmra.mxu0 %vm2685_vm4, %v11201_v47  ;;  %12806 = vst [vmem:[#allocation63_spill] sm:$0xff] %v11299_v50  ;;  %v11317_v50 = vpop.f32.mrf.mxu0 }
 0x534   : > { %8308 = vmatmul.msk.f32.gmra.mxu1 %vm2685_vm4, %v10965_v16 }
 0x539   : > { %v11311_v48 = vpop.f32.mrf.mxu1 }
 0x53a   : > { %8295 = vmatmul.msk.f32.gmra.mxu0 %vm2685_vm4, %v11214_v33  ;;  %12808 = vst [vmem:[#allocation47_spill] sm:$0xff] %v11311_v48  ;;  %v11325_v41 = vpop.f32.mrf.mxu0 }
 0x53c   : > { %8309 = vmatmul.msk.f32.gmra.mxu1 %vm2685_vm4, %v10979_v62 }
 0x541   : > { %v11319_v16 = vpop.f32.mrf.mxu1 }
 0x542   : > { %8296 = vmatmul.msk.f32.gmra.mxu0 %vm2685_vm4, %v11227_v23  ;;  %12809 = vst [vmem:[#allocation65_spill] sm:$0xff] %v11319_v16  ;;  %v11333_v62 = vpop.f32.mrf.mxu0  ;;  %v11337_v16 = vld [vmem:[#allocation3 + $0x182] sm:$0xff] }
 0x544   : > { %8310 = vmatmul.msk.f32.gmra.mxu1 %vm2685_vm4, %v10993_v10 }
 0x549   : > { %v11327_v46 = vpop.f32.mrf.mxu1 }
 0x54a   : > { %8297 = vmatmul.msk.f32.gmra.mxu0 %vm2685_vm4, %v11238_v9  ;;  %12810 = vst [vmem:[#allocation48_spill] sm:$0xff] %v11327_v46  ;;  %v11345_v46 = vld [vmem:[#allocation3 + $0x18a] sm:$0xff]  ;;  %v11347_v51 = vpop.f32.mrf.mxu0 }
 0x54c   : > { %8311 = vmatmul.msk.f32.gmra.mxu1 %vm2685_vm4, %v11007_v12 }
 0x551   : > { %v11335_v48 = vpop.f32.mrf.mxu1 }
 0x552   : > { %8298 = vmatmul.msk.f32.gmra.mxu0 %vm2685_vm4, %v11249_v22  ;;  %12811 = vst [vmem:[#allocation67_spill] sm:$0xff] %v11335_v48 }
 0x554   : > { %8312 = vmatmul.msk.f32.gmra.mxu1 %vm2685_vm4, %v11025_v14 }
 0x559   : > { %v11343_v10 = vpop.f32.mrf.mxu1 }
 0x55a   : > { %8299 = vmatmul.msk.f32.gmra.mxu0 %vm2685_vm4, %v11337_v16  ;;  %12812 = vst [vmem:[#allocation49_spill] sm:$0xff] %v11343_v10 }
 0x55c   : > { %8313 = vmatmul.msk.f32.gmra.mxu1 %vm2685_vm4, %v11041_v43 }
 0x561   : > { %v11353_v12 = vpop.f32.mrf.mxu1 }
 0x562   : > { %8300 = vmatmul.msk.f32.gmra.mxu0 %vm2685_vm4, %v11345_v46  ;;  %12813 = vst [vmem:[#allocation71_spill] sm:$0xff] %v11353_v12  ;;  %v4269_v12 = vadd.f32 %v4173_v34, %v11051_v13  ;;  %v4271_v13 = vadd.f32 %v4179_v7, %v11083_v6  ;;  %v4272_v6 = vadd.f32 %v4182_v11, %v11099_v39 }
 0x564   : > { %8314 = vmatmul.msk.f32.gmra.mxu1 %vm2685_vm4, %v11055_v59 }
 0x569   : > { %v11357_v48 = vpop.f32.mrf.mxu1 }
 0x56a   : > { %12814 = vst [vmem:[#allocation83_spill] sm:$0xff] %v11357_v48  ;;  %v11373_v48 = vld [vmem:[%s12816_s25] ss:$0 sm:$0xff]  ;;  %s787_s25 = scalar_lea.vmem %s12869_s24, %s12872_s29 }
 0x56c   : > { %8315 = vmatmul.msk.f32.gmra.mxu1 %vm2685_vm4, %v11071_v61  ;;  %v4659_v61 = vld [vmem:[#allocation4] sm:$0xff] }
 0x571   : > { %v11361_v14 = vpop.f32.mrf.mxu1 }
 0x572   : > { %12815 = vst [vmem:[#allocation84_spill] sm:$0xff] %v11361_v14 }
 0x574   : > { %8316 = vmatmul.msk.f32.gmra.mxu1 %vm2685_vm4, %v11087_v57  ;;  %v11377_v57 = vpop.f32.mrf.mxu3  ;;  %8342 = vmatmul.msk.f32.vlgmr.msra.gmra.mxu3 %vm2685_vm4, %v4659_v61 }
 0x579   : > { %v4326_v10 = vpop.f32.mrf.mxu1 }
 0x57a   : > { %v4422_v59 = vadd.f32 %v4326_v10, %v4269_v12  ;;  %v4270_v12 = vadd.f32 %v4176_v3, %v11067_v53 }
 0x57c   : > { %8317 = vmatmul.msk.f32.gmra.mxu1 %vm2685_vm4, %v11103_v49  ;;  %v11380_v49 = vpop.f32.mrf.mxu0  ;;  %v4458_v34 = vadd.f32 %v11373_v48, %v4422_v59  ;;  %v11390_v60 = vpop.f32.mrf.mxu3 }
 0x57e   : > { %v4490_v19 = vmax.f32 %v4458_v34, 0.0 }
 0x580   : > { %v4522_v7 = vsel %vm2685_vm4, %v4490_v19, -inf }
 0x581   : > { %v4329_v43 = vpop.f32.mrf.mxu1 }
 0x582   : > { %v4423_v55 = vadd.f32 %v4329_v43, %v4270_v12 }
 0x584   : > { %8318 = vmatmul.msk.f32.gmra.mxu1 %vm2685_vm4, %v11119_v35  ;;  %v11388_v35 = vpop.f32.mrf.mxu2  ;;  %v4459_v59 = vadd.f32 %v11373_v48, %v4423_v55  ;;  %v11396_v3 = vpop.f32.mrf.mxu0 }
 0x585   : > { %v11406_v34 = vpop.f32.mrf.mxu3 }
 0x589   : > { %v4332_v10 = vpop.f32.mrf.mxu1 }
 0x58a   : > { %v4424_v14 = vadd.f32 %v4332_v10, %v4271_v13 }
 0x58c   : > { %v4460_v2 = vadd.f32 %v11373_v48, %v4424_v14  ;;  %8319 = vmatmul.msk.f32.gmra.mxu1 %vm2685_vm4, %v11133_v54  ;;  %v4491_v54 = vmax.f32 %v4459_v59, 0.0  ;;  %v11402_v11 = vpop.f32.mrf.mxu2 }
 0x58e   : > { %v4492_v61 = vmax.f32 %v4460_v2, 0.0  ;;  %v4525_v55 = vsel %vm2685_vm4, %v4491_v54, -inf }
 0x590   : > { %v4523_v53 = vsel %vm2685_vm4, %v4492_v61, -inf  ;;  %v11408_v61 = vpop.f32.mrf.mxu0 }
 0x591   : > { %v4524_v43 = vmax.f32 %v4522_v7, %v4523_v53  ;;  %v4335_v14 = vpop.f32.mrf.mxu1  ;;  %v4273_v7 = vadd.f32 %v11317_v50, %v11113_v20  ;;  %v4274_v20 = vadd.f32 %v11325_v41, %v11129_v24 }
 0x592   : > { %v4425_v13 = vadd.f32 %v4335_v14, %v4272_v6 }
 0x593   : > { %4570 = vst.msk [vmem:[#allocation10] sm:$0xff] %vm2685_vm4, %v4524_v43  ;;  %v11417_v43 = vpop.f32.mrf.mxu3 }
 0x594   : > { %v4461_v2 = vadd.f32 %v11373_v48, %v4425_v13  ;;  %8320 = vmatmul.msk.f32.gmra.mxu1 %vm2685_vm4, %v11147_v56  ;;  %v11413_v56 = vpop.f32.mrf.mxu2 }
 0x596   : > { %v4493_v39 = vmax.f32 %v4461_v2, 0.0 }
 0x598   : > { %v4526_v19 = vsel %vm2685_vm4, %v4493_v39, -inf  ;;  %v11421_v54 = vpop.f32.mrf.mxu0 }
 0x599   : > { %v4527_v10 = vmax.f32 %v4525_v55, %v4526_v19  ;;  %v4338_v12 = vpop.f32.mrf.mxu1  ;;  %v8404_v55 = vld [vmem:[%s12807_s30 + $0x40] sm:$0xff] }
 0x59a   : > { %v4426_v13 = vadd.f32 %v4338_v12, %v4273_v7  ;;  %5187 = vmatpush.msra.mxu0 %v8404_v55  ;;  %v4276_v7 = vadd.f32 %v11347_v51, %v11161_v45 }
 0x59b   : > { %4571 = vst.msk [vmem:[#allocation10 + $0x8] sm:$0xff] %vm2685_vm4, %v4527_v10 }
 0x59c   : > { %8321 = vmatmul.msk.f32.gmra.mxu1 %vm2685_vm4, %v11163_v21  ;;  %v4275_v21 = vadd.f32 %v11333_v62, %v11145_v31  ;;  %v4462_v2 = vadd.f32 %v11373_v48, %v4426_v13  ;;  %v11432_v19 = vpop.f32.mrf.mxu2  ;;  %v11437_v62 = vpop.f32.mrf.mxu3 }
 0x5a0   : > { %v11441_v41 = vpop.f32.mrf.mxu0 }
 0x5a1   : > { %v4341_v6 = vpop.f32.mrf.mxu1 }
 0x5a2   : > { %v4586_v59 = vld [vmem:[#allocation10] ss:$2 sm:$0xff]  ;;  %v4602_v53 = vld [vmem:[#allocation10 + $0x1] ss:$2 sm:$0xff]  ;;  %v4427_v10 = vadd.f32 %v4341_v6, %v4274_v20  ;;  %v3539_v20 = vadd.f32 %v10867_v18, %v10703_v30  ;;  %v3540_v18 = vadd.f32 %v10885_v42, %v10719_v26 }
 0x5a3   : > { %v4617_v14 = vmax.f32 %v4586_v59, %v4602_v53 }
 0x5a4   : > { %8322 = vmatmul.msk.f32.gmra.mxu1 %vm2685_vm4, %v11177_v40  ;;  %v4494_v40 = vmax.f32 %v4462_v2, 0.0  ;;  %v4463_v59 = vadd.f32 %v11373_v48, %v4427_v10  ;;  %v11454_v51 = vpop.f32.mrf.mxu3 }
 0x5a5   : > { %4651 = vst.msk [vmem:[#allocation4 + $0x11] sm:$0xff] %vm2685_vm4, %v4617_v14 }
 0x5a6   : > { %v4528_v6 = vsel %vm2685_vm4, %v4494_v40, -inf }
 0x5a8   : > { %v11460_v40 = vpop.f32.mrf.mxu0 }
 0x5a9   : > { %v4344_v39 = vpop.f32.mrf.mxu1 }
 0x5aa   : > { %v4428_v50 = vadd.f32 %v4344_v39, %v4275_v21  ;;  %v4495_v21 = vmax.f32 %v4463_v59, 0.0  ;;  %v11452_v39 = vpop.f32.mrf.mxu2 }
 0x5ac   : > { %v4464_v12 = vadd.f32 %v11373_v48, %v4428_v50  ;;  %8323 = vmatmul.msk.f32.gmra.mxu1 %vm2685_vm4, %v11190_v17  ;;  %v4660_v31 = vld [vmem:[#allocation4 + $0x10] sm:$0xff]  ;;  %v4531_v50 = vsel %vm2685_vm4, %v4495_v21, -inf }
 0x5ad   : > { %8334 = vmatmul.msk.f32.vlgmr.msra.gmra.mxu2 %vm2685_vm4, %v4660_v31  ;;  %8343 = vmatmul.msk.f32.gmra.mxu3 %vm2685_vm4, %v4660_v31  ;;  %v3692_v31 = vadd.f32 %v11149_v32, %v3539_v20  ;;  %v11475_v32 = vpop.f32.mrf.mxu3 }
 0x5ae   : > { %v4496_v24 = vmax.f32 %v4464_v12, 0.0 }
 0x5af   : > { %v3845_v30 = vadd.f32 %v11368_v15, %v3692_v31 }
 0x5b0   : > { %v4529_v17 = vsel %vm2685_vm4, %v4496_v24, -inf }
 0x5b1   : > { %v4530_v53 = vmax.f32 %v4528_v6, %v4529_v17  ;;  %v4347_v14 = vpop.f32.mrf.mxu1  ;;  %v3693_v17 = vadd.f32 %v11165_v1, %v3540_v18 }
 0x5b2   : > { %v4429_v13 = vadd.f32 %v4347_v14, %v4276_v7  ;;  %v4124_v7 = vadd.f32 %v11377_v57, %v3845_v30  ;;  %v11473_v6 = vpop.f32.mrf.mxu2  ;;  %v12818_v57 = vld [vmem:[#allocation36_spill] sm:$0xff] }
 0x5b3   : > { %4572 = vst.msk [vmem:[#allocation10 + $0x10] sm:$0xff] %vm2685_vm4, %v4530_v53  ;;  %v3846_v1 = vadd.f32 %v11388_v35, %v3693_v17 }
 0x5b4   : > { %v4465_v2 = vadd.f32 %v11373_v48, %v4429_v13  ;;  %8324 = vmatmul.msk.f32.gmra.mxu1 %vm2685_vm4, %v11201_v47  ;;  %v3541_v47 = vadd.f32 %v10903_v38, %v10735_v29  ;;  %v11479_v38 = vpop.f32.mrf.mxu0 }
 0x5b5   : > { %v4125_v21 = vadd.f32 %v11390_v60, %v3846_v1 }
 0x5b6   : > { %v4497_v45 = vmax.f32 %v4465_v2, 0.0  ;;  %v3694_v24 = vadd.f32 %v11179_v5, %v3541_v47  ;;  %v12817_v5 = vld [vmem:[#allocation50_spill] sm:$0xff] }
 0x5b7   : > { %v3542_v14 = vadd.f32 %v12818_v57, %v12817_v5 }
 0x5b8   : > { %v4532_v55 = vsel %vm2685_vm4, %v4497_v45, -inf  ;;  %v3847_v42 = vadd.f32 %v11402_v11, %v3694_v24 }
 0x5b9   : > { %v4533_v10 = vmax.f32 %v4531_v50, %v4532_v55  ;;  %v4350_v12 = vpop.f32.mrf.mxu1  ;;  %v3695_v13 = vadd.f32 %v11192_v36, %v3542_v14  ;;  %v11496_v55 = vpop.f32.mrf.mxu3 }
 0x5ba   : > { %v11493_v20 = vpop.f32.mrf.mxu2 }
 0x5bb   : > { %4573 = vst.msk [vmem:[#allocation10 + $0x18] sm:$0xff] %vm2685_vm4, %v4533_v10  ;;  %v3848_v35 = vadd.f32 %v11413_v56, %v3695_v13 }
 0x5bc   : > { %8325 = vmatmul.msk.f32.gmra.mxu1 %vm2685_vm4, %v11214_v33  ;;  %v4277_v33 = vadd.f32 %v11380_v49, %v4124_v7  ;;  %v4126_v49 = vadd.f32 %v11406_v34, %v3847_v42 }
 0x5be   : > { %v4430_v26 = vadd.f32 %v4350_v12, %v4277_v33  ;;  %v4279_v2 = vadd.f32 %v11408_v61, %v4126_v49  ;;  %v11506_v12 = vpop.f32.mrf.mxu0 }
 0x5c0   : > { %v4466_v11 = vadd.f32 %v11373_v48, %v4430_v26 }
 0x5c1   : > { %v4353_v59 = vpop.f32.mrf.mxu1 }
 0x5c2   : > { %v4588_v53 = vld [vmem:[#allocation10 + $0x10] ss:$2 sm:$0xff]  ;;  %v4604_v29 = vld [vmem:[#allocation10 + $0x11] ss:$2 sm:$0xff]  ;;  %v4498_v10 = vmax.f32 %v4466_v11, 0.0  ;;  %v12822_v11 = vld [vmem:[#allocation68_spill] sm:$0xff] }
 0x5c3   : > { %v4618_v15 = vmax.f32 %v4588_v53, %v4604_v29  ;;  %v12819_v29 = vld [vmem:[#allocation69_spill] sm:$0xff] }
 0x5c4   : > { %8326 = vmatmul.msk.f32.gmra.mxu1 %vm2685_vm4, %v11227_v23  ;;  %v4278_v23 = vadd.f32 %v11396_v3, %v4125_v21  ;;  %v4127_v3 = vadd.f32 %v11417_v43, %v3848_v35  ;;  %v4534_v31 = vsel %vm2685_vm4, %v4498_v10, -inf }
 0x5c5   : > { %4652 = vst.msk [vmem:[#allocation4 + $0x21] sm:$0xff] %vm2685_vm4, %v4618_v15  ;;  %v12820_v15 = vld [vmem:[#allocation77_spill] sm:$0xff] }
 0x5c6   : > { %v4431_v34 = vadd.f32 %v4353_v59, %v4278_v23  ;;  %v11520_v59 = vpop.f32.mrf.mxu2  ;;  %v11527_v53 = vpop.f32.mrf.mxu0  ;;  %v3543_v42 = vadd.f32 %v12820_v15, %v12819_v29 }
 0x5c8   : > { %v4467_v47 = vadd.f32 %v11373_v48, %v4431_v34  ;;  %v3696_v1 = vadd.f32 %v11205_v0, %v3543_v42 }
 0x5c9   : > { %v4356_v45 = vpop.f32.mrf.mxu1 }
 0x5ca   : > { %v4432_v50 = vadd.f32 %v4356_v45, %v4279_v2  ;;  %v4499_v43 = vmax.f32 %v4467_v47, 0.0  ;;  %v3849_v13 = vadd.f32 %v11432_v19, %v3696_v1  ;;  %v12823_v45 = vld [vmem:[#allocation54_spill] sm:$0xff] }
 0x5cb   : > { %v3544_v23 = vadd.f32 %v12823_v45, %v12822_v11  ;;  %v3904_v1 = vld [vmem:[#allocation3 + $0x1a2] sm:$0xff] }
 0x5cc   : > { %v4468_v36 = vadd.f32 %v11373_v48, %v4432_v50  ;;  %8327 = vmatmul.msk.f32.gmra.mxu1 %vm2685_vm4, %v11238_v9  ;;  %v11502_v60 = vld [vmem:[#allocation4 + $0x20] sm:$0xff]  ;;  %v4280_v9 = vadd.f32 %v11421_v54, %v4127_v3  ;;  %v11525_v54 = vpop.f32.mrf.mxu3  ;;  %v4537_v26 = vsel %vm2685_vm4, %v4499_v43, -inf  ;;  %v4128_v0 = vadd.f32 %v11437_v62, %v3849_v13 }
 0x5cd   : > { %v11504_v61 = vld [vmem:[#allocation4 + $0x22] sm:$0xff]  ;;  %8335 = vmatmul.msk.f32.gmra.mxu2 %vm2685_vm4, %v11502_v60  ;;  %8344 = vmatmul.msk.f32.gmra.mxu3 %vm2685_vm4, %v11502_v60 }
 0x5ce   : > { %v4500_v56 = vmax.f32 %v4468_v36, 0.0  ;;  %8405 = vmatmul.msk.f32.vlgmr.msra.gmra.mxu0 %vm2685_vm4, %v11504_v61  ;;  %v11540_v21 = vpop.f32.mrf.mxu2  ;;  %v11548_v35 = vpop.f32.mrf.mxu0  ;;  %v12825_v62 = vld [vmem:[#allocation76_spill] sm:$0xff] }
 0x5d0   : > { %v4535_v30 = vsel %vm2685_vm4, %v4500_v56, -inf }
 0x5d1   : > { %v4536_v18 = vmax.f32 %v4534_v31, %v4535_v30  ;;  %v4359_v24 = vpop.f32.mrf.mxu1 }
 0x5d2   : > { %v4433_v7 = vadd.f32 %v4359_v24, %v4280_v9 }
 0x5d3   : > { %4574 = vst.msk [vmem:[#allocation10 + $0x20] sm:$0xff] %vm2685_vm4, %v4536_v18 }
 0x5d4   : > { %v4469_v17 = vadd.f32 %v11373_v48, %v4433_v7  ;;  %8328 = vmatmul.msk.f32.gmra.mxu1 %vm2685_vm4, %v11249_v22  ;;  %v12821_v22 = vld [vmem:[#allocation64_spill] sm:$0xff]  ;;  %v11542_v2 = vpop.f32.mrf.mxu3 }
 0x5d5   : > { %v3545_v49 = vadd.f32 %v10981_v44, %v12821_v22  ;;  %v4281_v44 = vadd.f32 %v11441_v41, %v4128_v0  ;;  %v3903_v7 = vld [vmem:[#allocation3 + $0x19a] sm:$0xff] }
 0x5d6   : > { %v4501_v33 = vmax.f32 %v4469_v17, 0.0  ;;  %v3795_v30 = vpop.f32.mrf.mxu2 }
 0x5d7   : > { %v3698_v50 = vadd.f32 %v11229_v52, %v3545_v49  ;;  %v12824_v52 = vld [vmem:[#allocation34_spill] sm:$0xff] }
 0x5d8   : > { %v4538_v5 = vsel %vm2685_vm4, %v4501_v33, -inf  ;;  %v3546_v9 = vadd.f32 %v12825_v62, %v12824_v52  ;;  %v4227_v33 = vpop.f32.mrf.mxu0  ;;  %v12828_v62 = vld [vmem:[#allocation72_spill] sm:$0xff] }
 0x5d9   : > { %v4539_v57 = vmax.f32 %v4537_v26, %v4538_v5  ;;  %v4362_v14 = vpop.f32.mrf.mxu1  ;;  %v3851_v3 = vadd.f32 %v11473_v6, %v3698_v50 }
 0x5da   : > { %v4434_v56 = vadd.f32 %v4362_v14, %v4281_v44  ;;  %v3699_v41 = vadd.f32 %v11240_v27, %v3546_v9  ;;  %v3548_v9 = vadd.f32 %v11037_v25, %v12828_v62  ;;  %v12834_v62 = vld [vmem:[#allocation45_spill] sm:$0xff] }
 0x5db   : > { %4575 = vst.msk [vmem:[#allocation10 + $0x28] sm:$0xff] %vm2685_vm4, %v4539_v57 }
 0x5dc   : > { %8329 = vmatmul.msk.f32.gmra.mxu1 %vm2685_vm4, %v11337_v16  ;;  %v3697_v16 = vadd.f32 %v11216_v28, %v3544_v23  ;;  %v4130_v28 = vadd.f32 %v11475_v32, %v3851_v3  ;;  %v4470_v18 = vadd.f32 %v11373_v48, %v4434_v56  ;;  %v4074_v24 = vpop.f32.mrf.mxu3  ;;  %v12826_v23 = vld [vmem:[#allocation51_spill] sm:$0xff]  ;;  %v12827_v3 = vld [vmem:[#allocation66_spill] sm:$0xff] }
 0x5dd   : > { %v3547_v50 = vadd.f32 %v11019_v63, %v12826_v23  ;;  %v3549_v56 = vadd.f32 %v11057_v8, %v12827_v3 }
 0x5de   : > { %v3850_v31 = vadd.f32 %v11452_v39, %v3697_v16  ;;  %v4283_v6 = vadd.f32 %v11479_v38, %v4130_v28  ;;  %v3852_v39 = vadd.f32 %v11493_v20, %v3699_v41  ;;  %v4502_v29 = vmax.f32 %v4470_v18, 0.0  ;;  %v3798_v22 = vpop.f32.mrf.mxu2 }
 0x5df   : > { %v3701_v41 = vadd.f32 %v11261_v58, %v3548_v9  ;;  %v12831_v58 = vld [vmem:[#allocation61_spill] sm:$0xff] }
 0x5e0   : > { %v4129_v47 = vadd.f32 %v11454_v51, %v3850_v31  ;;  %v4540_v42 = vsel %vm2685_vm4, %v4502_v29, -inf  ;;  %v3702_v31 = vadd.f32 %v11267_v37, %v3549_v56 }
 0x5e1   : > { %v4365_v10 = vpop.f32.mrf.mxu1  ;;  %v3854_v37 = vadd.f32 %v11540_v21, %v3701_v41  ;;  %v12835_v41 = vld [vmem:[#allocation74_spill] sm:$0xff] }
 0x5e2   : > { %v4590_v34 = vld [vmem:[#allocation10 + $0x20] ss:$2 sm:$0xff]  ;;  %v4606_v19 = vld [vmem:[#allocation10 + $0x21] ss:$2 sm:$0xff]  ;;  %v4282_v43 = vadd.f32 %v11460_v40, %v4129_v47  ;;  %v4131_v40 = vadd.f32 %v11496_v55, %v3852_v39  ;;  %v3855_v8 = vadd.f32 %v3795_v30, %v3702_v31 }
 0x5e3   : > { %v4619_v36 = vmax.f32 %v4590_v34, %v4606_v19  ;;  %v3700_v34 = vadd.f32 %v11251_v4, %v3547_v50 }
 0x5e4   : > { %8330 = vmatmul.msk.f32.gmra.mxu1 %vm2685_vm4, %v11345_v46  ;;  %v4435_v32 = vadd.f32 %v4365_v10, %v4282_v43  ;;  %v4284_v20 = vadd.f32 %v11506_v12, %v4131_v40  ;;  %v4077_v13 = vpop.f32.mrf.mxu3  ;;  %v4230_v12 = vpop.f32.mrf.mxu0  ;;  %v12830_v43 = vld [vmem:[#allocation39_spill] sm:$0xff] }
 0x5e5   : > { %4653 = vst.msk [vmem:[#allocation4 + $0x31] sm:$0xff] %vm2685_vm4, %v4619_v36  ;;  %v3853_v52 = vadd.f32 %v11520_v59, %v3700_v34  ;;  %v12829_v59 = vld [vmem:[#allocation35_spill] sm:$0xff] }
 0x5e6   : > { %v4471_v26 = vadd.f32 %v11373_v48, %v4435_v32  ;;  %v11592_v19 = vpop.f32.mrf.mxu2 }
 0x5e7   : > { %v4132_v4 = vadd.f32 %v11525_v54, %v3853_v52  ;;  %v4134_v54 = vadd.f32 %v4074_v24, %v3855_v8  ;;  %v12838_v8 = vld [vmem:[#allocation81_spill] sm:$0xff] }
 0x5e8   : > { %v4503_v55 = vmax.f32 %v4471_v26, 0.0 }
 0x5e9   : > { %v4368_v46 = vpop.f32.mrf.mxu1  ;;  %v4285_v47 = vadd.f32 %v11527_v53, %v4132_v4  ;;  %v4133_v53 = vadd.f32 %v11542_v2, %v3854_v37  ;;  %v4287_v32 = vadd.f32 %v4227_v33, %v4134_v54  ;;  %v12840_v54 = vld [vmem:[#allocation62_spill] sm:$0xff] }
 0x5ea   : > { %v4436_v17 = vadd.f32 %v4368_v46, %v4283_v6  ;;  %v4543_v0 = vsel %vm2685_vm4, %v4503_v55, -inf }
 0x5ec   : > { %v4472_v27 = vadd.f32 %v11373_v48, %v4436_v17  ;;  %8331 = vmatmul.msk.f32.gmra.mxu1 %vm2685_vm4, %v3903_v7  ;;  %v11568_v51 = vld [vmem:[#allocation4 + $0x30] sm:$0xff]  ;;  %v11594_v36 = vpop.f32.mrf.mxu3  ;;  %v11599_v63 = vpop.f32.mrf.mxu0  ;;  %v3550_v17 = vadd.f32 %v12830_v43, %v12829_v59 }
 0x5ed   : > { %v11570_v38 = vld [vmem:[#allocation4 + $0x32] sm:$0xff]  ;;  %8336 = vmatmul.msk.f32.gmra.mxu2 %vm2685_vm4, %v11568_v51  ;;  %8345 = vmatmul.msk.f32.gmra.mxu3 %vm2685_vm4, %v11568_v51 }
 0x5ee   : > { %v4504_v15 = vmax.f32 %v4472_v27, 0.0  ;;  %8406 = vmatmul.msk.f32.gmra.mxu0 %vm2685_vm4, %v11570_v38  ;;  %v11610_v25 = vpop.f32.mrf.mxu2  ;;  %v3703_v29 = vadd.f32 %v12831_v58, %v3550_v17  ;;  %v12839_v59 = vld [vmem:[#allocation46_spill] sm:$0xff] }
 0x5f0   : > { %v4541_v5 = vsel %vm2685_vm4, %v4504_v15, -inf  ;;  %v4286_v15 = vadd.f32 %v11548_v35, %v4133_v53 }
 0x5f1   : > { %v4542_v57 = vmax.f32 %v4540_v42, %v4541_v5  ;;  %v4371_v14 = vpop.f32.mrf.mxu1  ;;  %v3856_v42 = vadd.f32 %v3798_v22, %v3703_v29 }
 0x5f2   : > { %v4437_v49 = vadd.f32 %v4371_v14, %v4284_v20 }
 0x5f3   : > { %4576 = vst.msk [vmem:[#allocation10 + $0x30] sm:$0xff] %vm2685_vm4, %v4542_v57  ;;  %v4135_v2 = vadd.f32 %v4077_v13, %v3856_v42 }
 0x5f4   : > { %v4473_v11 = vadd.f32 %v11373_v48, %v4437_v49  ;;  %8332 = vmatmul.msk.f32.gmra.mxu1 %vm2685_vm4, %v3904_v1  ;;  %v11613_v39 = vpop.f32.mrf.mxu3  ;;  %v11618_v27 = vpop.f32.mrf.mxu0 }
 0x5f5   : > { %v4288_v14 = vadd.f32 %v4230_v12, %v4135_v2 }
 0x5f6   : > { %v4505_v45 = vmax.f32 %v4473_v11, 0.0  ;;  %v3807_v35 = vpop.f32.mrf.mxu2 }
 0x5f8   : > { %v4544_v10 = vsel %vm2685_vm4, %v4505_v45, -inf }
 0x5f9   : > { %v4545_v16 = vmax.f32 %v4543_v0, %v4544_v10  ;;  %v4374_v44 = vpop.f32.mrf.mxu1 }
 0x5fa   : > { %v4438_v7 = vadd.f32 %v4374_v44, %v4285_v47  ;;  %v12833_v44 = vld [vmem:[#allocation56_spill] sm:$0xff] }
 0x5fb   : > { %4577 = vst.msk [vmem:[#allocation10 + $0x38] sm:$0xff] %vm2685_vm4, %v4545_v16  ;;  %v12832_v16 = vld [vmem:[#allocation52_spill] sm:$0xff] }
 0x5fc   : > { %v4474_v30 = vadd.f32 %v11373_v48, %v4438_v7  ;;  %v4086_v55 = vpop.f32.mrf.mxu3  ;;  %v4239_v50 = vpop.f32.mrf.mxu0  ;;  %v3551_v12 = vadd.f32 %v12833_v44, %v12832_v16  ;;  %v12836_v47 = vld [vmem:[#allocation40_spill] sm:$0xff] }
 0x5fe   : > { %v4506_v26 = vmax.f32 %v4474_v30, 0.0  ;;  %v3704_v9 = vadd.f32 %v12834_v62, %v3551_v12  ;;  %v3810_v31 = vpop.f32.mrf.mxu2 }
 0x600   : > { %v4546_v1 = vsel %vm2685_vm4, %v4506_v26, -inf  ;;  %v12842_v26 = vld [vmem:[#allocation57_spill] sm:$0xff] }
 0x601   : > { %v4377_v28 = vpop.f32.mrf.mxu1 }
 0x602   : > { %v4592_v6 = vld [vmem:[#allocation10 + $0x30] ss:$2 sm:$0xff]  ;;  %v4608_v18 = vld [vmem:[#allocation10 + $0x31] ss:$2 sm:$0xff]  ;;  %v4439_v5 = vadd.f32 %v4377_v28, %v4286_v15 }
 0x603   : > { %v4620_v46 = vmax.f32 %v4592_v6, %v4608_v18  ;;  %v3553_v6 = vadd.f32 %v12836_v47, %v12835_v41  ;;  %v3857_v18 = vadd.f32 %v11592_v19, %v3704_v9  ;;  %v12841_v19 = vld [vmem:[#allocation70_spill] sm:$0xff]  ;;  %v12844_v41 = vld [vmem:[#allocation53_spill] sm:$0xff] }
 0x604   : > { %v4475_v22 = vadd.f32 %v11373_v48, %v4439_v5  ;;  %v4089_v4 = vpop.f32.mrf.mxu3  ;;  %v4242_v28 = vpop.f32.mrf.mxu0  ;;  %v3554_v5 = vadd.f32 %v12842_v26, %v12841_v19  ;;  %v12845_v47 = vld [vmem:[#allocation82_spill] sm:$0xff]  ;;  %v12851_v26 = vld [vmem:[#allocation48_spill] sm:$0xff] }
 0x605   : > { %4654 = vst.msk [vmem:[#allocation4 + $0x41] sm:$0xff] %vm2685_vm4, %v4620_v46  ;;  %v12837_v46 = vld [vmem:[#allocation75_spill] sm:$0xff]  ;;  %v3706_v43 = vadd.f32 %v12839_v59, %v3553_v6  ;;  %v4136_v17 = vadd.f32 %v11594_v36, %v3857_v18  ;;  %v3555_v6 = vadd.f32 %v12845_v47, %v12844_v41 }
 0x606   : > { %v4507_v13 = vmax.f32 %v4475_v22, 0.0  ;;  %v3552_v7 = vadd.f32 %v12838_v8, %v12837_v46 }
 0x607   : > { %v4289_v29 = vadd.f32 %v11599_v63, %v4136_v17  ;;  %v3859_v15 = vadd.f32 %v3807_v35, %v3706_v43  ;;  %v12846_v43 = vld [vmem:[#allocation47_spill] sm:$0xff] }
 0x608   : > { %v4549_v34 = vsel %vm2685_vm4, %v4507_v13, -inf  ;;  %v3705_v58 = vadd.f32 %v12840_v54, %v3552_v7  ;;  %v3708_v17 = vadd.f32 %v12846_v43, %v3555_v6  ;;  %v8350_v54 = vld [vmem:[%s12807_s30 + $0x30] sm:$0xff] }
 0x609   : > { %v4380_v40 = vpop.f32.mrf.mxu1  ;;  %v4138_v36 = vadd.f32 %v4086_v55, %v3859_v15  ;;  %4801 = vmatpush.msrb.mxu2 %v8350_v54  ;;  %v12849_v15 = vld [vmem:[#allocation73_spill] sm:$0xff] }
 0x60a   : > { %v4440_v20 = vadd.f32 %v4380_v40, %v4287_v32  ;;  %v3813_v40 = vpop.f32.mrf.mxu2 }
 0x60c   : > { %v4476_v21 = vadd.f32 %v11373_v48, %v4440_v20  ;;  %v11622_v24 = vld [vmem:[#allocation4 + $0x40] sm:$0xff]  ;;  %v4092_v42 = vpop.f32.mrf.mxu3  ;;  %v4245_v2 = vpop.f32.mrf.mxu0 }
 0x60d   : > { %v11624_v57 = vld [vmem:[#allocation4 + $0x42] sm:$0xff]  ;;  %8337 = vmatmul.msk.f32.gmra.mxu2 %vm2685_vm4, %v11622_v24  ;;  %8346 = vmatmul.msk.f32.gmra.mxu3 %vm2685_vm4, %v11622_v24 }
 0x60e   : > { %v4508_v33 = vmax.f32 %v4476_v21, 0.0  ;;  %8407 = vmatmul.msk.f32.gmra.mxu0 %vm2685_vm4, %v11624_v57  ;;  %v3858_v21 = vadd.f32 %v11610_v25, %v3705_v58  ;;  %v8359_v58 = vld [vmem:[%s12807_s30 + $0x8] sm:$0xff] }
 0x60f   : > { %4886 = vmatpush.msrb.mxu3 %v8359_v58 }
 0x610   : > { %v4547_v49 = vsel %vm2685_vm4, %v4508_v33, -inf  ;;  %v12843_v33 = vld [vmem:[#allocation63_spill] sm:$0xff]  ;;  %v4137_v63 = vadd.f32 %v11613_v39, %v3858_v21 }
 0x611   : > { %v4548_v11 = vmax.f32 %v4546_v1, %v4547_v49  ;;  %v4383_v45 = vpop.f32.mrf.mxu1  ;;  %v4291_v1 = vadd.f32 %v4239_v50, %v4138_v36 }
 0x612   : > { %v4441_v23 = vadd.f32 %v4383_v45, %v4288_v14  ;;  %v3707_v14 = vadd.f32 %v12843_v33, %v3554_v5  ;;  %v4290_v35 = vadd.f32 %v11618_v27, %v4137_v63  ;;  %v3816_v39 = vpop.f32.mrf.mxu2  ;;  %v12852_v33 = vld [vmem:[#allocation65_spill] sm:$0xff] }
 0x613   : > { %4578 = vst.msk [vmem:[#allocation10 + $0x40] sm:$0xff] %vm2685_vm4, %v4548_v11 }
 0x614   : > { %v4477_v0 = vadd.f32 %v11373_v48, %v4441_v23  ;;  %v3860_v45 = vadd.f32 %v3810_v31, %v3707_v14  ;;  %v4095_v27 = vpop.f32.mrf.mxu3 }
 0x616   : > { %v4509_v10 = vmax.f32 %v4477_v0, 0.0  ;;  %v4139_v55 = vadd.f32 %v4089_v4, %v3860_v45 }
 0x618   : > { %v4550_v3 = vsel %vm2685_vm4, %v4509_v10, -inf  ;;  %v4292_v16 = vadd.f32 %v4242_v28, %v4139_v55 }
 0x619   : > { %v4551_v56 = vmax.f32 %v4549_v34, %v4550_v3  ;;  %v4386_v52 = vpop.f32.mrf.mxu1  ;;  %v4248_v3 = vpop.f32.mrf.mxu0 }
 0x61a   : > { %v4442_v20 = vadd.f32 %v4386_v52, %v4289_v29  ;;  %v3819_v28 = vpop.f32.mrf.mxu2  ;;  %v12847_v29 = vld [vmem:[#allocation37_spill] sm:$0xff] }
 0x61b   : > { %4579 = vst.msk [vmem:[#allocation10 + $0x48] sm:$0xff] %vm2685_vm4, %v4551_v56 }
 0x61c   : > { %v4478_v22 = vadd.f32 %v11373_v48, %v4442_v20  ;;  %v4098_v8 = vpop.f32.mrf.mxu3  ;;  %v12850_v20 = vld [vmem:[#allocation41_spill] sm:$0xff] }
 0x61d   : > { %v3556_v19 = vadd.f32 %v12850_v20, %v12849_v15  ;;  %v12857_v15 = vld [vmem:[#allocation59_spill] sm:$0xff] }
 0x61e   : > { %v4510_v23 = vmax.f32 %v4478_v22, 0.0 }
 0x61f   : > { %v3709_v14 = vadd.f32 %v12852_v33, %v3556_v19  ;;  %v12858_v33 = vld [vmem:[#allocation49_spill] sm:$0xff] }
 0x620   : > { %v4552_v44 = vsel %vm2685_vm4, %v4510_v23, -inf }
 0x621   : > { %v4389_v37 = vpop.f32.mrf.mxu1 }
 0x622   : > { %v4594_v53 = vld [vmem:[#allocation10 + $0x40] ss:$2 sm:$0xff]  ;;  %v4610_v32 = vld [vmem:[#allocation10 + $0x41] ss:$2 sm:$0xff]  ;;  %v4443_v13 = vadd.f32 %v4389_v37, %v4290_v35  ;;  %v4251_v37 = vpop.f32.mrf.mxu0 }
 0x623   : > { %v4621_v30 = vmax.f32 %v4594_v53, %v4610_v32  ;;  %v12848_v53 = vld [vmem:[#allocation58_spill] sm:$0xff] }
 0x624   : > { %v4479_v12 = vadd.f32 %v11373_v48, %v4443_v13  ;;  %v3557_v32 = vadd.f32 %v12848_v53, %v12847_v29  ;;  %v4101_v35 = vpop.f32.mrf.mxu3 }
 0x625   : > { %4655 = vst.msk [vmem:[#allocation4 + $0x51] sm:$0xff] %vm2685_vm4, %v4621_v30  ;;  %v3861_v30 = vadd.f32 %v3813_v40, %v3708_v17  ;;  %v12853_v40 = vld [vmem:[#allocation80_spill] sm:$0xff] }
 0x626   : > { %v4511_v9 = vmax.f32 %v4479_v12, 0.0  ;;  %v3710_v5 = vadd.f32 %v12851_v26, %v3557_v32 }
 0x627   : > { %v4140_v21 = vadd.f32 %v4092_v42, %v3861_v30  ;;  %v12855_v42 = vld [vmem:[#allocation67_spill] sm:$0xff] }
 0x628   : > { %v4555_v18 = vsel %vm2685_vm4, %v4511_v9, -inf  ;;  %v3863_v45 = vadd.f32 %v3819_v28, %v3710_v5  ;;  %v12856_v30 = vld [vmem:[#allocation79_spill] sm:$0xff] }
 0x629   : > { %v4392_v49 = vpop.f32.mrf.mxu1  ;;  %v4293_v63 = vadd.f32 %v4245_v2, %v4140_v21  ;;  %v3559_v20 = vadd.f32 %v12857_v15, %v12856_v30 }
 0x62a   : > { %v4444_v11 = vadd.f32 %v4392_v49, %v4291_v1  ;;  %v3822_v49 = vpop.f32.mrf.mxu2  ;;  %v4254_v13 = vpop.f32.mrf.mxu0 }
 0x62c   : > { %v4480_v0 = vadd.f32 %v11373_v48, %v4444_v11  ;;  %v11661_v10 = vld [vmem:[#allocation4 + $0x50] sm:$0xff]  ;;  %v4104_v28 = vpop.f32.mrf.mxu3 }
 0x62d   : > { %v11663_v25 = vld [vmem:[#allocation4 + $0x52] sm:$0xff]  ;;  %8338 = vmatmul.msk.f32.gmra.mxu2 %vm2685_vm4, %v11661_v10  ;;  %8347 = vmatmul.msk.f32.gmra.mxu3 %vm2685_vm4, %v11661_v10 }
 0x62e   : > { %v4512_v50 = vmax.f32 %v4480_v0, 0.0  ;;  %8408 = vmatmul.msk.f32.gmra.mxu0 %vm2685_vm4, %v11663_v25  ;;  %v12854_v0 = vld [vmem:[#allocation42_spill] sm:$0xff] }
 0x62f   : > { %v3558_v55 = vadd.f32 %v12854_v0, %v12853_v40 }
 0x630   : > { %v4553_v34 = vsel %vm2685_vm4, %v4512_v50, -inf  ;;  %v3862_v50 = vadd.f32 %v3816_v39, %v3709_v14  ;;  %v3712_v14 = vadd.f32 %v12858_v33, %v3559_v20 }
 0x631   : > { %v4554_v56 = vmax.f32 %v4552_v44, %v4553_v34  ;;  %v4395_v52 = vpop.f32.mrf.mxu1  ;;  %v3711_v44 = vadd.f32 %v12855_v42, %v3558_v55 }
 0x632   : > { %v4445_v62 = vadd.f32 %v4395_v52, %v4292_v16  ;;  %v4142_v16 = vadd.f32 %v4098_v8, %v3863_v45  ;;  %v4141_v12 = vadd.f32 %v4095_v27, %v3862_v50  ;;  %v3825_v39 = vpop.f32.mrf.mxu2  ;;  %v12862_v45 = vld [vmem:[#allocation43_spill] sm:$0xff] }
 0x633   : > { %4580 = vst.msk [vmem:[#allocation10 + $0x50] sm:$0xff] %vm2685_vm4, %v4554_v56  ;;  %v3864_v9 = vadd.f32 %v3822_v49, %v3711_v44  ;;  %v3865_v49 = vadd.f32 %v3825_v39, %v3712_v14 }
 0x634   : > { %v4481_v31 = vadd.f32 %v11373_v48, %v4445_v62  ;;  %v4295_v34 = vadd.f32 %v4251_v37, %v4142_v16  ;;  %v4294_v52 = vadd.f32 %v4248_v3, %v4141_v12  ;;  %v4107_v32 = vpop.f32.mrf.mxu3  ;;  %v12864_v16 = vld [vmem:[#allocation71_spill] sm:$0xff] }
 0x635   : > { %v4143_v27 = vadd.f32 %v4101_v35, %v3864_v9  ;;  %v4144_v0 = vadd.f32 %v4104_v28, %v3865_v49  ;;  %v12865_v9 = vld [vmem:[#allocation78_spill] sm:$0xff] }
 0x636   : > { %v4513_v4 = vmax.f32 %v4481_v31, 0.0  ;;  %v8368_v49 = vld [vmem:[%s12807_s30 + $0x20] sm:$0xff] }
 0x637   : > { %4940 = vmatpush.msra.mxu2 %v8368_v49 }
 0x638   : > { %v4556_v46 = vsel %vm2685_vm4, %v4513_v4, -inf }
 0x639   : > { %v4557_v7 = vmax.f32 %v4555_v18, %v4556_v46  ;;  %v4398_v59 = vpop.f32.mrf.mxu1  ;;  %v4257_v18 = vpop.f32.mrf.mxu0  ;;  %v4296_v46 = vadd.f32 %v4254_v13, %v4143_v27  ;;  %v12863_v13 = vld [vmem:[#allocation83_spill] sm:$0xff]  ;;  %v12867_v27 = vld [vmem:[#allocation84_spill] sm:$0xff] }
 0x63a   : > { %v4446_v23 = vadd.f32 %v4398_v59, %v4293_v63  ;;  %v3828_v53 = vpop.f32.mrf.mxu2  ;;  %v12859_v63 = vld [vmem:[#allocation55_spill] sm:$0xff]  ;;  %v4297_v44 = vadd.f32 %v4257_v18, %v4144_v0 }
 0x63b   : > { %4581 = vst.msk [vmem:[#allocation10 + $0x58] sm:$0xff] %vm2685_vm4, %v4557_v7 }
 0x63c   : > { %v4482_v2 = vadd.f32 %v11373_v48, %v4446_v23  ;;  %v4110_v55 = vpop.f32.mrf.mxu3 }
 0x63e   : > { %v4514_v31 = vmax.f32 %v4482_v2, 0.0 }
 0x640   : > { %v4558_v8 = vsel %vm2685_vm4, %v4514_v31, -inf  ;;  %v12866_v31 = vld [vmem:[#allocation44_spill] sm:$0xff] }
 0x641   : > { %v4401_v36 = vpop.f32.mrf.mxu1  ;;  %v4260_v5 = vpop.f32.mrf.mxu0 }
 0x642   : > { %v4596_v1 = vld [vmem:[#allocation10 + $0x50] ss:$2 sm:$0xff]  ;;  %v4612_v22 = vld [vmem:[#allocation10 + $0x51] ss:$2 sm:$0xff]  ;;  %v4447_v4 = vadd.f32 %v4401_v36, %v4294_v52  ;;  %v3831_v35 = vpop.f32.mrf.mxu2 }
 0x643   : > { %v4622_v11 = vmax.f32 %v4596_v1, %v4612_v22  ;;  %v12860_v1 = vld [vmem:[#allocation60_spill] sm:$0xff] }
 0x644   : > { %v4483_v7 = vadd.f32 %v11373_v48, %v4447_v4  ;;  %v3561_v22 = vadd.f32 %v12860_v1, %v12859_v63  ;;  %v3562_v4 = vadd.f32 %v12866_v31, %v12865_v9  ;;  %v4835_v63 = vld [vmem:[#allocation4 + $0x1] sm:$0xff] }
 0x645   : > { %4656 = vst.msk [vmem:[#allocation4 + $0x61] sm:$0xff] %vm2685_vm4, %v4622_v11  ;;  %v12861_v11 = vld [vmem:[#allocation38_spill] sm:$0xff] }
 0x646   : > { %v4515_v54 = vmax.f32 %v4483_v7, 0.0  ;;  %v3560_v23 = vadd.f32 %v12862_v45, %v12861_v11  ;;  %v3714_v40 = vadd.f32 %v12863_v13, %v3561_v22  ;;  %v3715_v28 = vadd.f32 %v12867_v27, %v3562_v4 }
 0x648   : > { %v4561_v19 = vsel %vm2685_vm4, %v4515_v54, -inf  ;;  %v3713_v42 = vadd.f32 %v12864_v16, %v3560_v23  ;;  %v3867_v52 = vadd.f32 %v3831_v35, %v3714_v40  ;;  %v8377_v35 = vld [vmem:[%s12807_s30 + $0x38] sm:$0xff] }
 0x649   : > { %v4404_v56 = vpop.f32.mrf.mxu1  ;;  %v4263_v2 = vpop.f32.mrf.mxu0  ;;  %4994 = vmatpush.msra.mxu3 %v8377_v35  ;;  %v5292_v16 = vld [vmem:[#allocation19 + $0x38] sm:$0xff] }
 0x64a   : > { %v4448_v62 = vadd.f32 %v4404_v56, %v4295_v34  ;;  %v4146_v39 = vadd.f32 %v4110_v55, %v3867_v52  ;;  %v3834_v18 = vpop.f32.mrf.mxu2  ;;  %5331 = vmatpush.msrb.mxu1 %v5292_v16  ;;  %v5289_v16 = vld [vmem:[#allocation19 + $0x8] sm:$0xff] }
 0x64c   : > { %v4484_v41 = vadd.f32 %v11373_v48, %v4448_v62  ;;  %v11700_v47 = vld [vmem:[#allocation4 + $0x60] sm:$0xff] }
 0x64d   : > { %v11702_v6 = vld [vmem:[#allocation4 + $0x62] sm:$0xff]  ;;  %8339 = vmatmul.msk.f32.gmra.mxu2 %vm2685_vm4, %v11700_v47  ;;  %8348 = vmatmul.msk.f32.gmra.mxu3 %vm2685_vm4, %v11700_v47 }
 0x64e   : > { %v4516_v3 = vmax.f32 %v4484_v41, 0.0  ;;  %8409 = vmatmul.msk.f32.gmra.mxu0 %vm2685_vm4, %v11702_v6  ;;  %v3866_v41 = vadd.f32 %v3828_v53, %v3713_v42 }
 0x650   : > { %v4559_v59 = vsel %vm2685_vm4, %v4516_v3, -inf  ;;  %v4145_v3 = vadd.f32 %v4107_v32, %v3866_v41 }
 0x651   : > { %v4560_v43 = vmax.f32 %v4558_v8, %v4559_v59  ;;  %v4407_v17 = vpop.f32.mrf.mxu1  ;;  %v4266_v15 = vpop.f32.mrf.mxu0 }
 0x652   : > { %v4449_v37 = vadd.f32 %v4407_v17, %v4296_v46  ;;  %v4299_v46 = vadd.f32 %v4263_v2, %v4146_v39  ;;  %v4298_v59 = vadd.f32 %v4260_v5, %v4145_v3  ;;  %v4113_v17 = vpop.f32.mrf.mxu3  ;;  %v4840_v2 = vld [vmem:[#allocation4 + $0x51] sm:$0xff]  ;;  %v11805_v31 = vpop.f32.mrf.mxu2 }
 0x653   : > { %4582 = vst.msk [vmem:[#allocation10 + $0x60] sm:$0xff] %vm2685_vm4, %v4560_v43 }
 0x654   : > { %v4485_v58 = vadd.f32 %v11373_v48, %v4449_v37  ;;  %v3868_v37 = vadd.f32 %v3834_v18, %v3715_v28 }
 0x656   : > { %v4517_v29 = vmax.f32 %v4485_v58, 0.0  ;;  %v4147_v32 = vadd.f32 %v4113_v17, %v3868_v37 }
 0x658   : > { %v4562_v26 = vsel %vm2685_vm4, %v4517_v29, -inf }
 0x659   : > { %v4563_v21 = vmax.f32 %v4561_v19, %v4562_v26  ;;  %v4410_v36 = vpop.f32.mrf.mxu1  ;;  %v4300_v19 = vadd.f32 %v4266_v15, %v4147_v32 }
 0x65a   : > { %v4450_v62 = vadd.f32 %v4410_v36, %v4297_v44  ;;  %v4838_v44 = vld [vmem:[#allocation4 + $0x31] sm:$0xff]  ;;  %v11811_v41 = vpop.f32.mrf.mxu2 }
 0x65b   : > { %4583 = vst.msk [vmem:[#allocation10 + $0x68] sm:$0xff] %vm2685_vm4, %v4563_v21 }
 0x65c   : > { %v4486_v8 = vadd.f32 %v11373_v48, %v4450_v62  ;;  %v4668_v62 = vld [vmem:[#allocation4 + $0x90] sm:$0xff] }
 0x65e   : > { %v4518_v54 = vmax.f32 %v4486_v8, 0.0 }
 0x660   : > { %v4564_v26 = vsel %vm2685_vm4, %v4518_v54, -inf }
 0x661   : > { %v4413_v50 = vpop.f32.mrf.mxu1 }
 0x662   : > { %v4598_v12 = vld [vmem:[#allocation10 + $0x60] ss:$2 sm:$0xff]  ;;  %v4614_v34 = vld [vmem:[#allocation10 + $0x61] ss:$2 sm:$0xff]  ;;  %v4451_v58 = vadd.f32 %v4413_v50, %v4298_v59 }
 0x663   : > { %v4623_v56 = vmax.f32 %v4598_v12, %v4614_v34  ;;  %v4837_v50 = vld [vmem:[#allocation4 + $0x21] sm:$0xff] }
 0x664   : > { %v4487_v5 = vadd.f32 %v11373_v48, %v4451_v58  ;;  %v4839_v34 = vld [vmem:[#allocation4 + $0x41] sm:$0xff] }
 0x665   : > { %4657 = vst.msk [vmem:[#allocation4 + $0x71] sm:$0xff] %vm2685_vm4, %v4623_v56  ;;  %v4841_v56 = vld [vmem:[#allocation4 + $0x61] sm:$0xff] }
 0x666   : > { %v4519_v1 = vmax.f32 %v4487_v5, 0.0 }
 0x668   : > { %v4567_v45 = vsel %vm2685_vm4, %v4519_v1, -inf }
 0x669   : > { %v4416_v7 = vpop.f32.mrf.mxu1 }
 0x66a   : > { %v4452_v43 = vadd.f32 %v4416_v7, %v4299_v46  ;;  %v4844_v46 = vld [vmem:[#allocation4 + $0x91] sm:$0xff] }
 0x66b   : > { %v5029_v7 = vld [vmem:[#allocation4 + $0x12] sm:$0xff] }
 0x66c   : > { %v4488_v29 = vadd.f32 %v11373_v48, %v4452_v43  ;;  %v11733_v30 = vld [vmem:[#allocation4 + $0x70] sm:$0xff] }
 0x66d   : > { %v11735_v53 = vld [vmem:[#allocation4 + $0x72] sm:$0xff]  ;;  %8340 = vmatmul.msk.f32.gmra.mxu2 %vm2685_vm4, %v11733_v30  ;;  %8349 = vmatmul.msk.f32.gmra.mxu3 %vm2685_vm4, %v11733_v30 }
 0x66e   : > { %v4520_v20 = vmax.f32 %v4488_v29, 0.0  ;;  %8410 = vmatmul.msk.f32.gmra.mxu0 %vm2685_vm4, %v11735_v53  ;;  %v4842_v52 = vld [vmem:[#allocation4 + $0x71] sm:$0xff]  ;;  %v5291_v29 = vld [vmem:[#allocation19 + $0x30] sm:$0xff] }
 0x66f   : > { %5332 = vmatpush.msrb.mxu1 %v5291_v29 }
 0x670   : > { %v4565_v21 = vsel %vm2685_vm4, %v4520_v20, -inf  ;;  %v11817_v28 = vpop.f32.mrf.mxu2  ;;  %v5028_v20 = vld [vmem:[#allocation4 + $0x2] sm:$0xff] }
 0x671   : > { %v4566_v36 = vmax.f32 %v4564_v26, %v4565_v21  ;;  %v4419_v33 = vpop.f32.mrf.mxu1 }
 0x672   : > { %v4453_v14 = vadd.f32 %v4419_v33, %v4300_v19 }
 0x673   : > { %4584 = vst.msk [vmem:[#allocation10 + $0x70] sm:$0xff] %vm2685_vm4, %v4566_v36 }
 0x674   : > { %v4489_v22 = vadd.f32 %v11373_v48, %v4453_v14  ;;  %v4836_v48 = vld [vmem:[#allocation4 + $0x11] sm:$0xff] }
 0x675   : > { %8360 = vmatmul.msk.f32.vlgmr.msrb.gmra.mxu3 %vm2685_vm4, %v4835_v63  ;;  %v5037_v63 = vld [vmem:[#allocation4 + $0x92] sm:$0xff] }
 0x676   : > { %v4521_v11 = vmax.f32 %v4489_v22, 0.0 }
 0x678   : > { %v4568_v23 = vsel %vm2685_vm4, %v4521_v11, -inf }
 0x679   : > { %v4569_v13 = vmax.f32 %v4567_v45, %v4568_v23 }
 0x67b   : > { %4585 = vst.msk [vmem:[#allocation10 + $0x78] sm:$0xff] %vm2685_vm4, %v4569_v13 }
 0x67d   : > { %8361 = vmatmul.msk.f32.gmra.mxu3 %vm2685_vm4, %v4836_v48 }
 0x682   : > { %v4600_v40 = vld [vmem:[#allocation10 + $0x70] ss:$2 sm:$0xff]  ;;  %v4616_v0 = vld [vmem:[#allocation10 + $0x71] ss:$2 sm:$0xff] }
 0x683   : > { %v4624_v55 = vmax.f32 %v4600_v40, %v4616_v0 }
 0x685   : > { %8362 = vmatmul.msk.f32.gmra.mxu3 %vm2685_vm4, %v4837_v50  ;;  %4658 = vst.msk [vmem:[#allocation4 + $0x81] sm:$0xff] %vm2685_vm4, %v4624_v55  ;;  %v12868_v55 = vmov 0.0  }
 0x686   : > { %5242 = vst.msk [vmem:[#allocation5] sm:$0xff] %vm5241_vm7, %v12868_v55 }
 0x687   : > { %5246 = vst.msk [vmem:[#allocation5 + $0x90] sm:$0xff] %vm5241_vm7, %v12868_v55 }
 0x688   : > { %5249 = vst.msk [vmem:[#allocation5] sm:$0x1] %vm5248_vm8, %v12868_v55 }
 0x689   : > { %5250 = vst.msk [vmem:[#allocation5 + $0x10] sm:$0x1] %vm5248_vm8, %v12868_v55 }
 0x68a   : > { %5251 = vst.msk [vmem:[#allocation5 + $0x20] sm:$0x1] %vm5248_vm8, %v12868_v55 }
 0x68b   : > { %5252 = vst.msk [vmem:[#allocation5 + $0x30] sm:$0x1] %vm5248_vm8, %v12868_v55 }
 0x68c   : > { %v4667_v42 = vld [vmem:[#allocation4 + $0x80] sm:$0xff]  ;;  %5253 = vst.msk [vmem:[#allocation5 + $0x40] sm:$0x1] %vm5248_vm8, %v12868_v55 }
 0x68d   : > { %v11761_v12 = vld [vmem:[#allocation4 + $0x82] sm:$0xff]  ;;  %8341 = vmatmul.msk.f32.gmra.mxu2 %vm2685_vm4, %v4667_v42  ;;  %8363 = vmatmul.msk.f32.gmra.mxu3 %vm2685_vm4, %v4838_v44  ;;  %5254 = vst.msk [vmem:[#allocation5 + $0x50] sm:$0x1] %vm5248_vm8, %v12868_v55 }
 0x68e   : > { %8411 = vmatmul.msk.f32.gmra.mxu0 %vm2685_vm4, %v11761_v12  ;;  %v4843_v27 = vld [vmem:[#allocation4 + $0x81] sm:$0xff]  ;;  %5255 = vst.msk [vmem:[#allocation5 + $0x60] sm:$0x1] %vm5248_vm8, %v12868_v55 }
 0x68f   : > { %5256 = vst.msk [vmem:[#allocation5 + $0x70] sm:$0x1] %vm5248_vm8, %v12868_v55 }
 0x690   : > { %v11823_v8 = vpop.f32.mrf.mxu2  ;;  %5257 = vst.msk [vmem:[#allocation5 + $0x80] sm:$0x1] %vm5248_vm8, %v12868_v55 }
 0x691   : > { %5258 = vst.msk [vmem:[#allocation5 + $0x90] sm:$0x1] %vm5248_vm8, %v12868_v55 }
 0x692   : > { %5260 = vst.msk [vmem:[#allocation5 + $0x19] sm:$0x1] %vm5248_vm8, %v12868_v55 }
 0x693   : > { %5261 = vst.msk [vmem:[#allocation5 + $0x29] sm:$0x1] %vm5248_vm8, %v12868_v55 }
 0x694   : > { %5262 = vst.msk [vmem:[#allocation5 + $0x39] sm:$0x1] %vm5248_vm8, %v12868_v55 }
 0x695   : > { %8351 = vmatmul.msk.f32.vlgmr.msrb.gmra.mxu2 %vm2685_vm4, %v11502_v60  ;;  %8364 = vmatmul.msk.f32.gmra.mxu3 %vm2685_vm4, %v4839_v34  ;;  %v8386_v60 = vld [vmem:[%s12807_s30 + $0x10] sm:$0xff]  ;;  %5263 = vst.msk [vmem:[#allocation5 + $0x49] sm:$0x1] %vm5248_vm8, %v12868_v55 }
 0x696   : > { %5079 = vmatpush.msrb.mxu2 %v8386_v60  ;;  %8412 = vmatmul.msk.f32.gmra.mxu0 %vm2685_vm4, %v5037_v63  ;;  %v5404_v60 = vld [vmem:[#allocation19 + $0x68] sm:$0xff]  ;;  %5264 = vst.msk [vmem:[#allocation5 + $0x59] sm:$0x1] %vm5248_vm8, %v12868_v55 }
 0x697   : > { %5265 = vst.msk [vmem:[#allocation5 + $0x69] sm:$0x1] %vm5248_vm8, %v12868_v55 }
 0x698   : > { %5266 = vst.msk [vmem:[#allocation5 + $0x79] sm:$0x1] %vm5248_vm8, %v12868_v55 }
 0x699   : > { %5267 = vst.msk [vmem:[#allocation5 + $0x89] sm:$0x1] %vm5248_vm8, %v12868_v55 }
 0x69a   : > { %5909 = vst.msk [vmem:[#allocation6 + $0x8] sm:$0x1] %vm5248_vm8, %v12868_v55 }
 0x69b   : > { %5910 = vst.msk [vmem:[#allocation6 + $0x10] sm:$0x1] %vm5248_vm8, %v12868_v55 }
 0x69c   : > { %5911 = vst.msk [vmem:[#allocation6 + $0x18] sm:$0x1] %vm5248_vm8, %v12868_v55 }
 0x69d   : > { %8352 = vmatmul.msk.f32.gmra.mxu2 %vm2685_vm4, %v11568_v51  ;;  %8365 = vmatmul.msk.f32.gmra.mxu3 %vm2685_vm4, %v4840_v2  ;;  %v8395_v51 = vld [vmem:[%s12807_s30 + $0x28] sm:$0xff]  ;;  %5912 = vst.msk [vmem:[#allocation6 + $0x20] sm:$0x1] %vm5248_vm8, %v12868_v55 }
 0x69e   : > { %5133 = vmatpush.msrb.mxu3 %v8395_v51  ;;  %5915 = vst.msk [vmem:[#allocation6 + $0xd] sm:$0x1] %vm5248_vm8, %v12868_v55 }
 0x69f   : > { %5916 = vst.msk [vmem:[#allocation6 + $0x15] sm:$0x1] %vm5248_vm8, %v12868_v55 }
 0x6a0   : > { %5917 = vst.msk [vmem:[#allocation6 + $0x1d] sm:$0x1] %vm5248_vm8, %v12868_v55 }
 0x6a1   : > { %5918 = vst.msk [vmem:[#allocation6 + $0x25] sm:$0x1] %vm5248_vm8, %v12868_v55 }
 0x6a2   : > { %5244 = vst.msk [vmem:[#allocation5 + $0x8] sm:$0x3] %vm5243_vm9, %v12868_v55 }
 0x6a3   : > { %5247 = vst.msk [vmem:[#allocation5 + $0x98] sm:$0x3] %vm5243_vm9, %v12868_v55 }
 0x6a4   : > { %5259 = vst.msk [vmem:[#allocation5 + $0x9] sm:$0x1] %vm5248_vm8, %v12868_v55 }
 0x6a5   : > { %8353 = vmatmul.msk.f32.gmra.mxu2 %vm2685_vm4, %v11622_v24  ;;  %8366 = vmatmul.msk.f32.gmra.mxu3 %vm2685_vm4, %v4841_v56  ;;  %v11788_v24 = vpop.f32.mrf.mxu3  ;;  %5268 = vst.msk [vmem:[#allocation5 + $0x99] sm:$0x1] %vm5248_vm8, %v12868_v55 }
 0x6a6   : > { %5905 = vst.msk [vmem:[#allocation6] sm:$0x3f] %vm5904_vm10, %v12868_v55 }
 0x6a7   : > { %5907 = vst.msk [vmem:[#allocation6 + $0x28] sm:$0x3f] %vm5904_vm10, %v12868_v55 }
 0x6a8   : > { %5908 = vst.msk [vmem:[#allocation6] sm:$0x1] %vm5248_vm8, %v12868_v55 }
 0x6a9   : > { %5914 = vst.msk [vmem:[#allocation6 + $0x5] sm:$0x1] %vm5248_vm8, %v12868_v55 }
 0x6aa   : > { %5919 = vst.msk [vmem:[#allocation6 + $0x2d] sm:$0x1] %vm5248_vm8, %v12868_v55 }
 0x6ab   : > { %5913 = vst.msk [vmem:[#allocation6 + $0x28] sm:$0x1] %vm5248_vm8, %v12868_v55 }
 0x6ac   : > { %6341 = vst.msk [vmem:[#allocation7] sm:$0x3f] %vm6340_vm12, %v12868_v55 }
 0x6ad   : > { %8354 = vmatmul.msk.f32.gmra.mxu2 %vm2685_vm4, %v11661_v10  ;;  %8367 = vmatmul.msk.f32.gmra.mxu3 %vm2685_vm4, %v4842_v52  ;;  %v11793_v10 = vpop.f32.mrf.mxu3  ;;  %6343 = vst.msk [vmem:[#allocation7 + $0x28] sm:$0x3f] %vm6340_vm12, %v12868_v55 }
 0x6ae   : > { %6345 = vst.msk [vmem:[#allocation7] sm:$0x1] %vm6344_vm13, %v12868_v55 }
 0x6af   : > { %6346 = vst.msk [vmem:[#allocation7 + $0x8] sm:$0x1] %vm6344_vm13, %v12868_v55 }
 0x6b0   : > { %v11827_v59 = vpop.f32.mrf.mxu2  ;;  %6347 = vst.msk [vmem:[#allocation7 + $0x10] sm:$0x1] %vm6344_vm13, %v12868_v55 }
 0x6b1   : > { %6350 = vst.msk [vmem:[#allocation7 + $0x28] sm:$0x1] %vm6344_vm13, %v12868_v55 }
 0x6b2   : > { %6351 = vst.msk [vmem:[#allocation7 + $0x5] sm:$0x1] %vm6344_vm13, %v12868_v55 }
 0x6b3   : > { %6352 = vst.msk [vmem:[#allocation7 + $0xd] sm:$0x1] %vm6344_vm13, %v12868_v55 }
 0x6b4   : > { %6353 = vst.msk [vmem:[#allocation7 + $0x15] sm:$0x1] %vm6344_vm13, %v12868_v55 }
 0x6b5   : > { %8355 = vmatmul.msk.f32.gmra.mxu2 %vm2685_vm4, %v11700_v47  ;;  %8378 = vmatmul.msk.f32.vlgmr.msra.gmra.mxu3 %vm2685_vm4, %v4837_v50  ;;  %v11797_v47 = vpop.f32.mrf.mxu3  ;;  %6356 = vst.msk [vmem:[#allocation7 + $0x2d] sm:$0x1] %vm6344_vm13, %v12868_v55 }
 0x6b6   : > { %5422 = vmatpush.msra.mxu3 %v5404_v60  ;;  %6813 = vst.msk [vmem:[#allocation8] sm:$0xf] %vm6358_vm14, %v12868_v55 }
 0x6b7   : > { %6815 = vst.msk [vmem:[#allocation8 + $0xc] sm:$0xf] %vm6358_vm14, %v12868_v55 }
 0x6b8   : > { %6816 = vst.msk [vmem:[#allocation8] sm:$0x1] %vm6344_vm13, %v12868_v55 }
 0x6b9   : > { %6819 = vst.msk [vmem:[#allocation8 + $0xc] sm:$0x1] %vm6344_vm13, %v12868_v55 }
 0x6ba   : > { %6820 = vst.msk [vmem:[#allocation8 + $0x3] sm:$0x1] %vm6344_vm13, %v12868_v55 }
 0x6bb   : > { %6823 = vst.msk [vmem:[#allocation8 + $0xf] sm:$0x1] %vm6344_vm13, %v12868_v55 }
 0x6bc   : > { %6348 = vst.msk [vmem:[#allocation7 + $0x18] sm:$0x1] %vm6344_vm13, %v12868_v55 }
 0x6bd   : > { %8356 = vmatmul.msk.f32.gmra.mxu2 %vm2685_vm4, %v11733_v30  ;;  %8379 = vmatmul.msk.f32.gmra.mxu3 %vm2685_vm4, %v4838_v44  ;;  %v11801_v9 = vpop.f32.mrf.mxu3  ;;  %6349 = vst.msk [vmem:[#allocation7 + $0x20] sm:$0x1] %vm6344_vm13, %v12868_v55 }
 0x6be   : > { %6354 = vst.msk [vmem:[#allocation7 + $0x1d] sm:$0x1] %vm6344_vm13, %v12868_v55 }
 0x6bf   : > { %6355 = vst.msk [vmem:[#allocation7 + $0x25] sm:$0x1] %vm6344_vm13, %v12868_v55 }
 0x6c0   : > { %6817 = vst.msk [vmem:[#allocation8 + $0x4] sm:$0x1] %vm6344_vm13, %v12868_v55 }
 0x6c1   : > { %6818 = vst.msk [vmem:[#allocation8 + $0x8] sm:$0x1] %vm6344_vm13, %v12868_v55 }
 0x6c2   : > { %6821 = vst.msk [vmem:[#allocation8 + $0x7] sm:$0x1] %vm6344_vm13, %v12868_v55 }
 0x6c3   : > { %6822 = vst.msk [vmem:[#allocation8 + $0xb] sm:$0x1] %vm6344_vm13, %v12868_v55 }
 0x6c4   : > { %7152 = vst.msk [vmem:[#allocation9 + $0x4] sm:$0x1] %vm7150_vm1, %v12868_v55 }
 0x6c5   : > { %8357 = vmatmul.msk.f32.gmra.mxu2 %vm2685_vm4, %v4667_v42  ;;  %8380 = vmatmul.msk.f32.gmra.mxu3 %vm2685_vm4, %v4839_v34  ;;  %v11807_v4 = vpop.f32.mrf.mxu3  ;;  %v5469_v42 = vld [vmem:[#allocation19 + $0x18] sm:$0xff]  ;;  %7147 = vst.msk [vmem:[#allocation9] sm:$0xf] %vm7146_vm2, %v12868_v55 }
 0x6c6   : > { %5508 = vmatpush.msrb.mxu0 %v5469_v42  ;;  %v5457_v42 = vld [vmem:[#allocation5 + $0x1] sm:$0xff]  ;;  %7149 = vst.msk [vmem:[#allocation9 + $0xc] sm:$0xf] %vm7146_vm2, %v12868_v55 }
 0x6c7   : > { %7151 = vst.msk [vmem:[#allocation9] sm:$0x1] %vm7150_vm1, %v12868_v55 }
 0x6c8   : > { %7153 = vst.msk [vmem:[#allocation9 + $0x8] sm:$0x1] %vm7150_vm1, %v12868_v55 }
 0x6c9   : > { %7154 = vst.msk [vmem:[#allocation9 + $0xc] sm:$0x1] %vm7150_vm1, %v12868_v55 }
 0x6ca   : > { %7155 = vst.msk [vmem:[#allocation9 + $0x3] sm:$0x1] %vm7150_vm1, %v12868_v55 }
 0x6cb   : > { %7156 = vst.msk [vmem:[#allocation9 + $0x7] sm:$0x1] %vm7150_vm1, %v12868_v55 }
 0x6cc   : > { %7157 = vst.msk [vmem:[#allocation9 + $0xb] sm:$0x1] %vm7150_vm1, %v12868_v55 }
 0x6cd   : > { %8358 = vmatmul.msk.f32.gmra.mxu2 %vm2685_vm4, %v4668_v62  ;;  %8381 = vmatmul.msk.f32.gmra.mxu3 %vm2685_vm4, %v4840_v2  ;;  %v11813_v39 = vpop.f32.mrf.mxu3  ;;  %7158 = vst.msk [vmem:[#allocation9 + $0xf] sm:$0x1] %vm7150_vm1, %v12868_v55  ;;  %v7173_v55 = vld [vmem:[%s12633_s15 + $0x30] sm:$0xff] }
 0x6d0   : > { %v11834_v17 = vpop.f32.mrf.mxu2 }
 0x6d5   : > { %8369 = vmatmul.msk.f32.vlgmr.msra.gmra.mxu2 %vm2685_vm4, %v4836_v48  ;;  %8382 = vmatmul.msk.f32.gmra.mxu3 %vm2685_vm4, %v4841_v56  ;;  %v11819_v3 = vpop.f32.mrf.mxu3 }
 0x6d6   : > { %5375 = vmatpush.msra.mxu2 %v5289_v16 }
 0x6dd   : > { %8370 = vmatmul.msk.f32.gmra.mxu2 %vm2685_vm4, %v4837_v50  ;;  %8383 = vmatmul.msk.f32.gmra.mxu3 %vm2685_vm4, %v4842_v52 }
 0x6e5   : > { %8371 = vmatmul.msk.f32.gmra.mxu2 %vm2685_vm4, %v4838_v44  ;;  %8384 = vmatmul.msk.f32.gmra.mxu3 %vm2685_vm4, %v4843_v27 }
 0x6ed   : > { %8372 = vmatmul.msk.f32.gmra.mxu2 %vm2685_vm4, %v4839_v34  ;;  %8385 = vmatmul.msk.f32.gmra.mxu3 %vm2685_vm4, %v4844_v46  ;;  %v5468_v34 = vld [vmem:[#allocation19 + $0x10] sm:$0xff]  ;;  %v4761_v46 = vadd.f32 %v11793_v10, %v11811_v41 }
 0x6ee   : > { %5509 = vmatpush.msrb.mxu0 %v5468_v34 }
 0x6ef   : > { %8437 = vmatmul.msk.f32.vlgmr.msrb.gmra.mxu0 %vm5241_vm7, %v5457_v42 }
 0x6f0   : > { %v4778_v18 = vpop.f32.mrf.mxu3  ;;  %v11841_v54 = vpop.f32.mrf.mxu2 }
 0x6f5   : > { %8373 = vmatmul.msk.f32.gmra.mxu2 %vm2685_vm4, %v4840_v2  ;;  %8396 = vmatmul.msk.f32.vlgmr.msrb.gmra.mxu3 %vm2685_vm4, %v5029_v7  ;;  %v5278_v2 = vld [vmem:[#allocation5] sm:$0xff] }
 0x6f8   : > { %v11829_v43 = vpop.f32.mrf.mxu3 }
 0x6fd   : > { %8374 = vmatmul.msk.f32.gmra.mxu2 %vm2685_vm4, %v4841_v56  ;;  %8397 = vmatmul.msk.f32.gmra.mxu3 %vm2685_vm4, %v11504_v61 }
 0x700   : > { %v11836_v37 = vpop.f32.mrf.mxu3 }
 0x705   : > { %8375 = vmatmul.msk.f32.gmra.mxu2 %vm2685_vm4, %v4842_v52  ;;  %8398 = vmatmul.msk.f32.gmra.mxu3 %vm2685_vm4, %v11570_v38  ;;  %v4758_v52 = vadd.f32 %v11788_v24, %v11805_v31 }
 0x708   : > { %v11843_v58 = vpop.f32.mrf.mxu3 }
 0x70d   : > { %8376 = vmatmul.msk.f32.gmra.mxu2 %vm2685_vm4, %v4843_v27  ;;  %8399 = vmatmul.msk.f32.gmra.mxu3 %vm2685_vm4, %v11624_v57  ;;  %v5403_v27 = vld [vmem:[#allocation19 + $0x60] sm:$0xff] }
 0x70e   : > { %5423 = vmatpush.msra.mxu3 %v5403_v27 }
 0x710   : > { %v4734_v30 = vpop.f32.mrf.mxu2  ;;  %v11848_v15 = vpop.f32.mrf.mxu3 }
 0x711   : > { %v11850_v32 = vadd.f32 %v4778_v18, %v4734_v30 }
 0x715   : > { %8387 = vmatmul.msk.f32.vlgmr.msrb.gmra.mxu2 %vm2685_vm4, %v5028_v20  ;;  %8400 = vmatmul.msk.f32.gmra.mxu3 %vm2685_vm4, %v11663_v25 }
 0x718   : > { %v11855_v19 = vpop.f32.mrf.mxu2  ;;  %v11857_v26 = vpop.f32.mrf.mxu3 }
 0x719   : > { %v4827_v62 = vadd.f32 %v11855_v19, %v4758_v52  ;;  %v5189_v19 = vpop.f32.mrf.mxu0 }
 0x71b   : > { %v4912_v31 = vadd.f32 %v11829_v43, %v4827_v62 }
 0x71d   : > { %8388 = vmatmul.msk.f32.gmra.mxu2 %vm2685_vm4, %v5029_v7  ;;  %8401 = vmatmul.msk.f32.gmra.mxu3 %vm2685_vm4, %v11702_v6  ;;  %v5545_v7 = vld [vmem:[#allocation19 + $0x48] sm:$0xff] }
 0x71e   : > { %5563 = vmatpush.msra.mxu1 %v5545_v7 }
 0x720   : > { %v11862_v5 = vpop.f32.mrf.mxu2  ;;  %v11864_v21 = vpop.f32.mrf.mxu3 }
 0x721   : > { %v4828_v43 = vadd.f32 %v11862_v5, %v4761_v46  ;;  %v4764_v5 = vadd.f32 %v11797_v47, %v11817_v28  ;;  %v5192_v60 = vpop.f32.mrf.mxu0 }
 0x723   : > { %v4913_v30 = vadd.f32 %v11836_v37, %v4828_v43 }
 0x725   : > { %8389 = vmatmul.msk.f32.gmra.mxu2 %vm2685_vm4, %v11504_v61  ;;  %8402 = vmatmul.msk.f32.gmra.mxu3 %vm2685_vm4, %v11735_v53 }
 0x728   : > { %v11870_v36 = vpop.f32.mrf.mxu2  ;;  %v11872_v33 = vpop.f32.mrf.mxu3 }
 0x729   : > { %v4829_v37 = vadd.f32 %v11870_v36, %v4764_v5 }
 0x72b   : > { %v4914_v28 = vadd.f32 %v11843_v58, %v4829_v37  ;;  %v4773_v37 = vadd.f32 %v11813_v39, %v11834_v17 }
 0x72d   : > { %8390 = vmatmul.msk.f32.gmra.mxu2 %vm2685_vm4, %v11570_v38  ;;  %8403 = vmatmul.msk.f32.gmra.mxu3 %vm2685_vm4, %v11761_v12  ;;  %v5288_v12 = vld [vmem:[#allocation19] sm:$0xff] }
 0x72e   : > { %5376 = vmatpush.msra.mxu2 %v5288_v12 }
 0x730   : > { %v11878_v14 = vpop.f32.mrf.mxu2  ;;  %v11880_v1 = vpop.f32.mrf.mxu3 }
 0x735   : > { %8391 = vmatmul.msk.f32.gmra.mxu2 %vm2685_vm4, %v11624_v57 }
 0x738   : > { %v11885_v61 = vpop.f32.mrf.mxu2  ;;  %v11887_v22 = vpop.f32.mrf.mxu3 }
 0x73d   : > { %8392 = vmatmul.msk.f32.gmra.mxu2 %vm2685_vm4, %v11663_v25 }
 0x740   : > { %v11891_v38 = vpop.f32.mrf.mxu2  ;;  %v11895_v49 = vpop.f32.mrf.mxu3 }
 0x741   : > { %v4832_v42 = vadd.f32 %v11891_v38, %v4773_v37 }
 0x745   : > { %8393 = vmatmul.msk.f32.gmra.mxu2 %vm2685_vm4, %v11702_v6 }
 0x748   : > { %v11897_v35 = vpop.f32.mrf.mxu2  ;;  %v11901_v57 = vpop.f32.mrf.mxu3 }
 0x74d   : > { %8394 = vmatmul.msk.f32.gmra.mxu2 %vm2685_vm4, %v11735_v53  ;;  %vm7190_vm4 = vcmask 523264  }
 0x750   : > { %v11903_v11 = vpop.f32.mrf.mxu2  ;;  %v11905_v23 = vpop.f32.mrf.mxu3 }
 0x755   : > { %8421 = vmatmul.msk.f32.vlgmr.msra.gmra.mxu2 %vm5241_vm7, %v5278_v2 }
 0x758   : > { %v4942_v45 = vpop.f32.mrf.mxu2  ;;  %v11909_v13 = vpop.f32.mrf.mxu3 }
 0x759   : > { %v4966_v18 = vadd.f32 %v4942_v45, %v4912_v31  ;;  %v12007_v45 = vld [vmem:[%s12624_s6] ss:$0 sm:$0xff] }
 0x75b   : > { %v5020_v10 = vadd.f32 %v11887_v22, %v4966_v18 }
 0x760   : > { %v11907_v25 = vpop.f32.mrf.mxu2  ;;  %v11913_v6 = vpop.f32.mrf.mxu3 }
 0x761   : > { %v4967_v63 = vadd.f32 %v11907_v25, %v4913_v30 }
 0x763   : > { %v5021_v34 = vadd.f32 %v11895_v49, %v4967_v63 }
 0x768   : > { %v11911_v48 = vpop.f32.mrf.mxu2  ;;  %v11917_v0 = vpop.f32.mrf.mxu3 }
 0x769   : > { %v4968_v36 = vadd.f32 %v11911_v48, %v4914_v28  ;;  %v4770_v48 = vadd.f32 %v11807_v4, %v11827_v59 }
 0x76b   : > { %v5022_v46 = vadd.f32 %v11901_v57, %v4968_v36  ;;  %v5665_v36 = vld [vmem:[#allocation19 + $0x28] sm:$0xff] }
 0x76c   : > { %5704 = vmatpush.msrb.mxu3 %v5665_v36 }
 0x770   : > { %v11915_v40 = vpop.f32.mrf.mxu2  ;;  %v11937_v44 = vpop.f32.mrf.mxu3 }
 0x778   : > { %v11919_v53 = vpop.f32.mrf.mxu2  ;;  %v5135_v51 = vpop.f32.mrf.mxu3 }
 0x780   : > { %v11931_v50 = vpop.f32.mrf.mxu2  ;;  %v5138_v29 = vpop.f32.mrf.mxu3 }
 0x788   : > { %v11952_v56 = vpop.f32.mrf.mxu2  ;;  %v5141_v2 = vpop.f32.mrf.mxu3 }
 0x790   : > { %v11973_v24 = vpop.f32.mrf.mxu2 }
 0x798   : > { %v5081_v41 = vpop.f32.mrf.mxu2 }
 0x799   : > { %v5105_v20 = vadd.f32 %v5081_v41, %v5020_v10  ;;  %v5195_v10 = vpop.f32.mrf.mxu0  ;;  %v5144_v41 = vpop.f32.mrf.mxu3 }
 0x79b   : > { %v5159_v22 = vadd.f32 %v5135_v51, %v5105_v20  ;;  %v4767_v51 = vadd.f32 %v11801_v9, %v11823_v8 }
 0x79d   : > { %v5213_v16 = vadd.f32 %v5189_v19, %v5159_v22  ;;  %v4830_v31 = vadd.f32 %v11878_v14, %v4767_v51 }
 0x79f   : > { %v5225_v12 = vadd.f32 %v12007_v45, %v5213_v16  ;;  %v4915_v58 = vadd.f32 %v11848_v15, %v4830_v31  ;;  %v4831_v15 = vadd.f32 %v11885_v61, %v4770_v48 }
 0x7a0   : > { %v5084_v47 = vpop.f32.mrf.mxu2 }
 0x7a1   : > { %v5233_v25 = vmax.f32 %v5225_v12, 0.0  ;;  %v5106_v52 = vadd.f32 %v5084_v47, %v5021_v34  ;;  %v4969_v14 = vadd.f32 %v11915_v40, %v4915_v58  ;;  %v4916_v59 = vadd.f32 %v11857_v26, %v4831_v15  ;;  %v5198_v5 = vpop.f32.mrf.mxu0  ;;  %v5147_v26 = vpop.f32.mrf.mxu3 }
 0x7a2   : > { %v4917_v34 = vadd.f32 %v11864_v21, %v4832_v42  ;;  %v5600_v21 = vld [vmem:[#allocation19 + $0x78] sm:$0xff] }
 0x7a3   : > { %5270 = vst.msk [vmem:[#allocation5 + $0x11] sm:$0xff] %vm5241_vm7, %v5233_v25  ;;  %v5160_v62 = vadd.f32 %v5138_v29, %v5106_v52  ;;  %v5023_v20 = vadd.f32 %v11905_v23, %v4969_v14  ;;  %v4970_v16 = vadd.f32 %v11919_v53, %v4916_v59  ;;  %v5544_v23 = vld [vmem:[#allocation19 + $0x40] sm:$0xff]  ;;  %5618 = vmatpush.msrb.mxu2 %v5600_v21 }
 0x7a4   : > { %5564 = vmatpush.msra.mxu1 %v5544_v23  ;;  %v4971_v38 = vadd.f32 %v11931_v50, %v4917_v34  ;;  %v5740_v50 = vld [vmem:[#allocation19 + $0x50] sm:$0xff]  ;;  %v5466_v21 = vld [vmem:[#allocation5 + $0x91] sm:$0xff] }
 0x7a5   : > { %v5214_v49 = vadd.f32 %v5192_v60, %v5160_v62  ;;  %v5024_v17 = vadd.f32 %v11909_v13, %v4970_v16  ;;  %v4776_v60 = vadd.f32 %v11819_v3, %v11841_v54  ;;  %v5741_v13 = vld [vmem:[#allocation19 + $0x58] sm:$0xff]  ;;  %v5599_v54 = vld [vmem:[#allocation19 + $0x70] sm:$0xff] }
 0x7a6   : > { %5759 = vmatpush.msra.mxu0 %v5741_v13  ;;  %5619 = vmatpush.msrb.mxu2 %v5599_v54 }
 0x7a7   : > { %v5226_v27 = vadd.f32 %v12007_v45, %v5214_v49  ;;  %v4833_v62 = vadd.f32 %v11897_v35, %v4776_v60 }
 0x7a8   : > { %v5087_v18 = vpop.f32.mrf.mxu2  ;;  %5760 = vmatpush.msra.mxu0 %v5740_v50 }
 0x7a9   : > { %v5234_v7 = vmax.f32 %v5226_v27, 0.0  ;;  %v5107_v43 = vadd.f32 %v5087_v18, %v5022_v46  ;;  %v5201_v28 = vpop.f32.mrf.mxu0  ;;  %v5150_v31 = vpop.f32.mrf.mxu3  ;;  %v5025_v27 = vadd.f32 %v11913_v6, %v4971_v38  ;;  %v4918_v18 = vadd.f32 %v11872_v33, %v4833_v62 }
 0x7aa   : > { %v5279_v9 = vld [vmem:[#allocation5 + $0x10] sm:$0xff]  ;;  %v4834_v33 = vadd.f32 %v11903_v11, %v11850_v32 }
 0x7ab   : > { %v12022_v8 = vld [vmem:[#allocation5 + $0x11] sm:$0xff]  ;;  %5271 = vst.msk [vmem:[#allocation5 + $0x21] sm:$0xff] %vm5241_vm7, %v5234_v7  ;;  %v5161_v29 = vadd.f32 %v5141_v2, %v5107_v43  ;;  %8413 = vmatmul.msk.f32.vlgmr.msrb.gmra.mxu1 %vm5241_vm7, %v5279_v9  ;;  %8422 = vmatmul.msk.f32.gmra.mxu2 %vm5241_vm7, %v5279_v9 }
 0x7ac   : > { %8438 = vmatmul.msk.f32.gmra.mxu0 %vm5241_vm7, %v12022_v8  ;;  %v4919_v15 = vadd.f32 %v11880_v1, %v4834_v33  ;;  %v5796_v1 = vld [vmem:[#allocation19 + $0x88] sm:$0xff]  ;;  %v5664_v11 = vld [vmem:[#allocation19 + $0x20] sm:$0xff] }
 0x7ad   : > { %v5215_v57 = vadd.f32 %v5195_v10, %v5161_v29  ;;  %5814 = vmatpush.msrb.mxu1 %v5796_v1  ;;  %5705 = vmatpush.msrb.mxu3 %v5664_v11 }
 0x7af   : > { %v5227_v30 = vadd.f32 %v12007_v45, %v5215_v57 }
 0x7b0   : > { %v5090_v4 = vpop.f32.mrf.mxu2 }
 0x7b1   : > { %v5235_v40 = vmax.f32 %v5227_v30, 0.0  ;;  %v5108_v19 = vadd.f32 %v5090_v4, %v5023_v20  ;;  %v5204_v43 = vpop.f32.mrf.mxu0  ;;  %v5153_v14 = vpop.f32.mrf.mxu3 }
 0x7b2   : > { %v5280_v63 = vld [vmem:[#allocation5 + $0x20] sm:$0xff] }
 0x7b3   : > { %v12036_v22 = vld [vmem:[#allocation5 + $0x21] sm:$0xff]  ;;  %5272 = vst.msk [vmem:[#allocation5 + $0x31] sm:$0xff] %vm5241_vm7, %v5235_v40  ;;  %v5162_v61 = vadd.f32 %v5144_v41, %v5108_v19  ;;  %8414 = vmatmul.msk.f32.gmra.mxu1 %vm5241_vm7, %v5280_v63  ;;  %8423 = vmatmul.msk.f32.gmra.mxu2 %vm5241_vm7, %v5280_v63  ;;  %v4972_v41 = vadd.f32 %v11952_v56, %v4918_v18 }
 0x7b4   : > { %8429 = vmatmul.msk.f32.vlgmr.msra.gmra.mxu3 %vm5241_vm7, %v5280_v63  ;;  %8439 = vmatmul.msk.f32.gmra.mxu0 %vm5241_vm7, %v12036_v22  ;;  %v4973_v40 = vadd.f32 %v11973_v24, %v4919_v15 }
 0x7b5   : > { %v5216_v12 = vadd.f32 %v5198_v5, %v5162_v61  ;;  %v5026_v56 = vadd.f32 %v11917_v0, %v4972_v41 }
 0x7b6   : > { %v5027_v24 = vadd.f32 %v11937_v44, %v4973_v40 }
 0x7b7   : > { %v5228_v39 = vadd.f32 %v12007_v45, %v5216_v12 }
 0x7b8   : > { %v5093_v53 = vpop.f32.mrf.mxu2 }
 0x7b9   : > { %v5236_v2 = vmax.f32 %v5228_v39, 0.0  ;;  %v5109_v47 = vadd.f32 %v5093_v53, %v5024_v17  ;;  %v5207_v20 = vpop.f32.mrf.mxu0  ;;  %v5156_v16 = vpop.f32.mrf.mxu3 }
 0x7ba   : > { %v5281_v25 = vld [vmem:[#allocation5 + $0x30] sm:$0xff] }
 0x7bb   : > { %v12051_v52 = vld [vmem:[#allocation5 + $0x31] sm:$0xff]  ;;  %5273 = vst.msk [vmem:[#allocation5 + $0x41] sm:$0xff] %vm5241_vm7, %v5236_v2  ;;  %v5163_v51 = vadd.f32 %v5147_v26, %v5109_v47  ;;  %8415 = vmatmul.msk.f32.gmra.mxu1 %vm5241_vm7, %v5281_v25  ;;  %8424 = vmatmul.msk.f32.gmra.mxu2 %vm5241_vm7, %v5281_v25  ;;  %v5655_v47 = vld [vmem:[#allocation5 + $0x22] sm:$0xff] }
 0x7bc   : > { %8430 = vmatmul.msk.f32.gmra.mxu3 %vm5241_vm7, %v5281_v25  ;;  %8440 = vmatmul.msk.f32.gmra.mxu0 %vm5241_vm7, %v12051_v52  ;;  %v5287_v2 = vld [vmem:[#allocation5 + $0x90] sm:$0xff]  ;;  %v5653_v25 = vld [vmem:[#allocation5 + $0x2] sm:$0xff] }
 0x7bd   : > { %v5217_v3 = vadd.f32 %v5201_v28, %v5163_v51  ;;  %v5795_v28 = vld [vmem:[#allocation19 + $0x80] sm:$0xff] }
 0x7be   : > { %5815 = vmatpush.msrb.mxu1 %v5795_v28  ;;  %v5656_v60 = vld [vmem:[#allocation5 + $0x32] sm:$0xff] }
 0x7bf   : > { %v5229_v49 = vadd.f32 %v12007_v45, %v5217_v3 }
 0x7c0   : > { %v5096_v46 = vpop.f32.mrf.mxu2 }
 0x7c1   : > { %v5237_v58 = vmax.f32 %v5229_v49, 0.0  ;;  %v5110_v7 = vadd.f32 %v5096_v46, %v5025_v27  ;;  %v5210_v26 = vpop.f32.mrf.mxu0 }
 0x7c2   : > { %v5282_v35 = vld [vmem:[#allocation5 + $0x40] sm:$0xff] }
 0x7c3   : > { %v12066_v10 = vld [vmem:[#allocation5 + $0x41] sm:$0xff]  ;;  %5274 = vst.msk [vmem:[#allocation5 + $0x51] sm:$0xff] %vm5241_vm7, %v5237_v58  ;;  %v5164_v9 = vadd.f32 %v5150_v31, %v5110_v7  ;;  %8416 = vmatmul.msk.f32.gmra.mxu1 %vm5241_vm7, %v5282_v35  ;;  %8425 = vmatmul.msk.f32.gmra.mxu2 %vm5241_vm7, %v5282_v35 }
 0x7c4   : > { %8431 = vmatmul.msk.f32.gmra.mxu3 %vm5241_vm7, %v5282_v35  ;;  %8441 = vmatmul.msk.f32.gmra.mxu0 %vm5241_vm7, %v12066_v10 }
 0x7c5   : > { %v5218_v6 = vadd.f32 %v5204_v43, %v5164_v9 }
 0x7c7   : > { %v5230_v48 = vadd.f32 %v12007_v45, %v5218_v6 }
 0x7c8   : > { %v5099_v29 = vpop.f32.mrf.mxu2 }
 0x7c9   : > { %v5238_v57 = vmax.f32 %v5230_v48, 0.0  ;;  %v5111_v30 = vadd.f32 %v5099_v29, %v5026_v56  ;;  %v5511_v49 = vpop.f32.mrf.mxu0  ;;  %v5662_v48 = vld [vmem:[#allocation5 + $0x92] sm:$0xff] }
 0x7ca   : > { %v5283_v4 = vld [vmem:[#allocation5 + $0x50] sm:$0xff] }
 0x7cb   : > { %v12080_v59 = vld [vmem:[#allocation5 + $0x51] sm:$0xff]  ;;  %5275 = vst.msk [vmem:[#allocation5 + $0x61] sm:$0xff] %vm5241_vm7, %v5238_v57  ;;  %v5165_v32 = vadd.f32 %v5153_v14, %v5111_v30  ;;  %8417 = vmatmul.msk.f32.gmra.mxu1 %vm5241_vm7, %v5283_v4  ;;  %8426 = vmatmul.msk.f32.gmra.mxu2 %vm5241_vm7, %v5283_v4 }
 0x7cc   : > { %8432 = vmatmul.msk.f32.gmra.mxu3 %vm5241_vm7, %v5283_v4  ;;  %8442 = vmatmul.msk.f32.gmra.mxu0 %vm5241_vm7, %v12080_v59 }
 0x7cd   : > { %v5219_v0 = vadd.f32 %v5207_v20, %v5165_v32 }
 0x7cf   : > { %v5231_v19 = vadd.f32 %v12007_v45, %v5219_v0 }
 0x7d0   : > { %v5102_v5 = vpop.f32.mrf.mxu2 }
 0x7d1   : > { %v5239_v63 = vmax.f32 %v5231_v19, 0.0  ;;  %v5112_v37 = vadd.f32 %v5102_v5, %v5027_v24 }
 0x7d2   : > { %v5284_v61 = vld [vmem:[#allocation5 + $0x60] sm:$0xff] }
 0x7d3   : > { %v5463_v23 = vld [vmem:[#allocation5 + $0x61] sm:$0xff]  ;;  %5276 = vst.msk [vmem:[#allocation5 + $0x71] sm:$0xff] %vm5241_vm7, %v5239_v63  ;;  %8418 = vmatmul.msk.f32.gmra.mxu1 %vm5241_vm7, %v5284_v61  ;;  %8427 = vmatmul.msk.f32.gmra.mxu2 %vm5241_vm7, %v5284_v61  ;;  %v5166_v42 = vadd.f32 %v5156_v16, %v5112_v37 }
 0x7d4   : > { %8433 = vmatmul.msk.f32.gmra.mxu3 %vm5241_vm7, %v5284_v61  ;;  %8443 = vmatmul.msk.f32.gmra.mxu0 %vm5241_vm7, %v5463_v23 }
 0x7d5   : > { %v5220_v12 = vadd.f32 %v5210_v26, %v5166_v42 }
 0x7d7   : > { %v5232_v44 = vadd.f32 %v12007_v45, %v5220_v12  ;;  %v5654_v45 = vld [vmem:[#allocation5 + $0x12] sm:$0xff] }
 0x7d8   : > { %v5378_v50 = vpop.f32.mrf.mxu2 }
 0x7d9   : > { %v5240_v39 = vmax.f32 %v5232_v44, 0.0 }
 0x7da   : > { %v5285_v17 = vld [vmem:[#allocation5 + $0x70] sm:$0xff] }
 0x7db   : > { %v5464_v53 = vld [vmem:[#allocation5 + $0x71] sm:$0xff]  ;;  %5277 = vst.msk [vmem:[#allocation5 + $0x81] sm:$0xff] %vm5241_vm7, %v5240_v39  ;;  %8419 = vmatmul.msk.f32.gmra.mxu1 %vm5241_vm7, %v5285_v17  ;;  %8428 = vmatmul.msk.f32.gmra.mxu2 %vm5241_vm7, %v5285_v17 }
 0x7dc   : > { %8434 = vmatmul.msk.f32.gmra.mxu3 %vm5241_vm7, %v5285_v17  ;;  %8444 = vmatmul.msk.f32.gmra.mxu0 %vm5241_vm7, %v5464_v53  ;;  %v5660_v51 = vld [vmem:[#allocation5 + $0x72] sm:$0xff] }
 0x7e2   : > { %v5286_v34 = vld [vmem:[#allocation5 + $0x80] sm:$0xff] }
 0x7e3   : > { %8420 = vmatmul.msk.f32.gmra.mxu1 %vm5241_vm7, %v5286_v34  ;;  %8453 = vmatmul.msk.f32.vlgmr.msrb.gmra.mxu2 %vm5241_vm7, %v12036_v22  ;;  %v5465_v38 = vld [vmem:[#allocation5 + $0x81] sm:$0xff] }
 0x7e4   : > { %8435 = vmatmul.msk.f32.gmra.mxu3 %vm5241_vm7, %v5286_v34  ;;  %8469 = vmatmul.msk.f32.vlgmr.msra.gmra.mxu0 %vm5241_vm7, %v5654_v45  ;;  %v5661_v13 = vld [vmem:[#allocation5 + $0x82] sm:$0xff] }
 0x7eb   : > { %8445 = vmatmul.msk.f32.vlgmr.msra.gmra.mxu1 %vm5241_vm7, %v12022_v8  ;;  %8454 = vmatmul.msk.f32.gmra.mxu2 %vm5241_vm7, %v12051_v52  ;;  %v5657_v8 = vld [vmem:[#allocation5 + $0x42] sm:$0xff] }
 0x7ec   : > { %8436 = vmatmul.msk.f32.gmra.mxu3 %vm5241_vm7, %v5287_v2  ;;  %8470 = vmatmul.msk.f32.gmra.mxu0 %vm5241_vm7, %v5655_v47 }
 0x7f3   : > { %8446 = vmatmul.msk.f32.gmra.mxu1 %vm5241_vm7, %v12036_v22  ;;  %8455 = vmatmul.msk.f32.gmra.mxu2 %vm5241_vm7, %v12066_v10  ;;  %v5658_v22 = vld [vmem:[#allocation5 + $0x52] sm:$0xff] }
 0x7f4   : > { %8461 = vmatmul.msk.f32.vlgmr.msrb.gmra.mxu3 %vm5241_vm7, %v5653_v25  ;;  %8471 = vmatmul.msk.f32.gmra.mxu0 %vm5241_vm7, %v5656_v60 }
 0x7fb   : > { %8447 = vmatmul.msk.f32.gmra.mxu1 %vm5241_vm7, %v12051_v52  ;;  %8456 = vmatmul.msk.f32.gmra.mxu2 %vm5241_vm7, %v12080_v59  ;;  %v5659_v52 = vld [vmem:[#allocation5 + $0x62] sm:$0xff] }
 0x7fc   : > { %8462 = vmatmul.msk.f32.gmra.mxu3 %vm5241_vm7, %v5654_v45  ;;  %8472 = vmatmul.msk.f32.gmra.mxu0 %vm5241_vm7, %v5657_v8 }
 0x803   : > { %8448 = vmatmul.msk.f32.gmra.mxu1 %vm5241_vm7, %v12066_v10  ;;  %8457 = vmatmul.msk.f32.gmra.mxu2 %vm5241_vm7, %v5463_v23 }
 0x804   : > { %8463 = vmatmul.msk.f32.gmra.mxu3 %vm5241_vm7, %v5655_v47  ;;  %8473 = vmatmul.msk.f32.gmra.mxu0 %vm5241_vm7, %v5658_v22 }
 0x80b   : > { %8449 = vmatmul.msk.f32.gmra.mxu1 %vm5241_vm7, %v12080_v59  ;;  %8458 = vmatmul.msk.f32.gmra.mxu2 %vm5241_vm7, %v5464_v53 }
 0x80c   : > { %8464 = vmatmul.msk.f32.gmra.mxu3 %vm5241_vm7, %v5656_v60  ;;  %8474 = vmatmul.msk.f32.gmra.mxu0 %vm5241_vm7, %v5659_v52 }
 0x813   : > { %8450 = vmatmul.msk.f32.gmra.mxu1 %vm5241_vm7, %v5463_v23  ;;  %8459 = vmatmul.msk.f32.gmra.mxu2 %vm5241_vm7, %v5465_v38 }
 0x814   : > { %8465 = vmatmul.msk.f32.gmra.mxu3 %vm5241_vm7, %v5657_v8  ;;  %8475 = vmatmul.msk.f32.gmra.mxu0 %vm5241_vm7, %v5660_v51 }
 0x81b   : > { %8451 = vmatmul.msk.f32.gmra.mxu1 %vm5241_vm7, %v5464_v53  ;;  %8460 = vmatmul.msk.f32.gmra.mxu2 %vm5241_vm7, %v5466_v21 }
 0x81c   : > { %8466 = vmatmul.msk.f32.gmra.mxu3 %vm5241_vm7, %v5658_v22  ;;  %8476 = vmatmul.msk.f32.gmra.mxu0 %vm5241_vm7, %v5661_v13 }
 0x823   : > { %8452 = vmatmul.msk.f32.gmra.mxu1 %vm5241_vm7, %v5465_v38 }
 0x824   : > { %8467 = vmatmul.msk.f32.gmra.mxu3 %vm5241_vm7, %v5659_v52 }
 0x828   : > { %v5334_v36 = vpop.f32.mrf.mxu1 }
 0x829   : > { %v5514_v7 = vpop.f32.mrf.mxu0  ;;  %v5379_v2 = vadd.f32 %v5378_v50, %v5334_v36 }
 0x82b   : > { %8477 = vmatmul.msk.f32.vlgmr.msrb.gmra.mxu1 %vm5241_vm7, %v5655_v47 }
 0x82c   : > { %8468 = vmatmul.msk.f32.gmra.mxu3 %vm5241_vm7, %v5660_v51 }
 0x82e   : > { %v5381_v46 = vpop.f32.mrf.mxu2 }
 0x830   : > { %v12147_v62 = vpop.f32.mrf.mxu1 }
 0x831   : > { %v5517_v41 = vpop.f32.mrf.mxu0  ;;  %v5382_v38 = vadd.f32 %v5381_v46, %v12147_v62 }
 0x833   : > { %8478 = vmatmul.msk.f32.gmra.mxu1 %vm5241_vm7, %v5656_v60 }
 0x836   : > { %v5384_v43 = vpop.f32.mrf.mxu2 }
 0x837   : > { %v5425_v31 = vpop.f32.mrf.mxu3 }
 0x838   : > { %v5340_v3 = vpop.f32.mrf.mxu1  ;;  %v5449_v60 = vadd.f32 %v5425_v31, %v5379_v2 }
 0x839   : > { %v12166_v56 = vpop.f32.mrf.mxu0  ;;  %v5385_v20 = vadd.f32 %v5384_v43, %v5340_v3 }
 0x83b   : > { %8479 = vmatmul.msk.f32.gmra.mxu1 %vm5241_vm7, %v5657_v8 }
 0x83e   : > { %v12159_v9 = vpop.f32.mrf.mxu2 }
 0x83f   : > { %v5428_v18 = vpop.f32.mrf.mxu3 }
 0x840   : > { %v12151_v54 = vpop.f32.mrf.mxu1  ;;  %v5450_v21 = vadd.f32 %v5428_v18, %v5382_v38 }
 0x841   : > { %v5523_v57 = vpop.f32.mrf.mxu0 }
 0x842   : > { %v5536_v43 = vadd.f32 %v5514_v7, %v5450_v21 }
 0x843   : > { %8480 = vmatmul.msk.f32.gmra.mxu1 %vm5241_vm7, %v5658_v22 }
 0x846   : > { %v5390_v29 = vpop.f32.mrf.mxu2 }
 0x847   : > { %v5431_v35 = vpop.f32.mrf.mxu3 }
 0x848   : > { %v5346_v27 = vpop.f32.mrf.mxu1  ;;  %v5451_v4 = vadd.f32 %v5431_v35, %v5385_v20 }
 0x849   : > { %v12172_v0 = vpop.f32.mrf.mxu0  ;;  %v5391_v63 = vadd.f32 %v5390_v29, %v5346_v27 }
 0x84a   : > { %v5537_v32 = vadd.f32 %v5517_v41, %v5451_v4  ;;  %v12202_v41 = vld [vmem:[%s12626_s8] ss:$0 sm:$0xff] }
 0x84b   : > { %8481 = vmatmul.msk.f32.gmra.mxu1 %vm5241_vm7, %v5659_v52 }
 0x84e   : > { %v12168_v59 = vpop.f32.mrf.mxu2 }
 0x84f   : > { %v12161_v33 = vpop.f32.mrf.mxu3 }
 0x850   : > { %v12155_v58 = vpop.f32.mrf.mxu1 }
 0x851   : > { %v5529_v16 = vpop.f32.mrf.mxu0 }
 0x853   : > { %8482 = vmatmul.msk.f32.gmra.mxu1 %vm5241_vm7, %v5660_v51  ;;  %v5535_v51 = vadd.f32 %v5511_v49, %v5449_v60 }
 0x856   : > { %v5396_v19 = vpop.f32.mrf.mxu2 }
 0x857   : > { %v5437_v15 = vpop.f32.mrf.mxu3 }
 0x858   : > { %v5352_v10 = vpop.f32.mrf.mxu1  ;;  %v5453_v37 = vadd.f32 %v5437_v15, %v5391_v63 }
 0x859   : > { %v12180_v44 = vpop.f32.mrf.mxu0  ;;  %v5397_v17 = vadd.f32 %v5396_v19, %v5352_v10 }
 0x85a   : > { %v5539_v23 = vadd.f32 %v5523_v57, %v5453_v37 }
 0x85b   : > { %8483 = vmatmul.msk.f32.gmra.mxu1 %vm5241_vm7, %v5661_v13 }
 0x85e   : > { %v12174_v61 = vpop.f32.mrf.mxu2 }
 0x85f   : > { %v12170_v40 = vpop.f32.mrf.mxu3 }
 0x860   : > { %v12163_v6 = vpop.f32.mrf.mxu1 }
 0x861   : > { %v5762_v28 = vpop.f32.mrf.mxu0 }
 0x863   : > { %8484 = vmatmul.msk.f32.gmra.mxu1 %vm5241_vm7, %v5662_v48 }
 0x866   : > { %v5621_v53 = vpop.f32.mrf.mxu2 }
 0x867   : > { %v5443_v24 = vpop.f32.mrf.mxu3 }
 0x868   : > { %v5566_v14 = vpop.f32.mrf.mxu1  ;;  %v5455_v45 = vadd.f32 %v5443_v24, %v5397_v17 }
 0x869   : > { %v5590_v13 = vadd.f32 %v5566_v14, %v5535_v51  ;;  %v5765_v27 = vpop.f32.mrf.mxu0  ;;  %v5388_v14 = vadd.f32 %v12159_v9, %v12151_v54 }
 0x86a   : > { %v5541_v47 = vadd.f32 %v5529_v16, %v5455_v45 }
 0x86b   : > { %v5645_v35 = vadd.f32 %v5621_v53, %v5590_v13  ;;  %v5452_v29 = vadd.f32 %v12161_v33, %v5388_v14  ;;  %v5936_v13 = vld [vmem:[#allocation20 + $0x38] sm:$0xff] }
 0x86c   : > { %5968 = vmatpush.msra.mxu2 %v5936_v13 }
 0x86e   : > { %v5624_v22 = vpop.f32.mrf.mxu2 }
 0x86f   : > { %v12176_v26 = vpop.f32.mrf.mxu3 }
 0x870   : > { %v5569_v30 = vpop.f32.mrf.mxu1 }
 0x871   : > { %v5591_v36 = vadd.f32 %v5569_v30, %v5536_v43  ;;  %v5768_v48 = vpop.f32.mrf.mxu0 }
 0x873   : > { %v5646_v46 = vadd.f32 %v5624_v22, %v5591_v36 }
 0x876   : > { %v5627_v50 = vpop.f32.mrf.mxu2 }
 0x877   : > { %v5707_v34 = vpop.f32.mrf.mxu3 }
 0x878   : > { %v5572_v1 = vpop.f32.mrf.mxu1  ;;  %v5731_v31 = vadd.f32 %v5707_v34, %v5645_v35 }
 0x879   : > { %v5592_v11 = vadd.f32 %v5572_v1, %v5537_v32  ;;  %v5538_v1 = vadd.f32 %v12166_v56, %v5452_v29 }
 0x87a   : > { %v5786_v18 = vadd.f32 %v5762_v28, %v5731_v31 }
 0x87b   : > { %v5647_v19 = vadd.f32 %v5627_v50, %v5592_v11 }
 0x87e   : > { %v5630_v15 = vpop.f32.mrf.mxu2 }
 0x87f   : > { %v5710_v52 = vpop.f32.mrf.mxu3 }
 0x880   : > { %v5575_v5 = vpop.f32.mrf.mxu1  ;;  %v5732_v7 = vadd.f32 %v5710_v52, %v5646_v46 }
 0x881   : > { %v5593_v37 = vadd.f32 %v5575_v5, %v5538_v1  ;;  %v5394_v5 = vadd.f32 %v12168_v59, %v12155_v58 }
 0x882   : > { %v5787_v30 = vadd.f32 %v5765_v27, %v5732_v7 }
 0x883   : > { %v5648_v53 = vadd.f32 %v5630_v15, %v5593_v37  ;;  %v5400_v15 = vadd.f32 %v12174_v61, %v12163_v6  ;;  %v5932_v61 = vld [vmem:[#allocation20] sm:$0xff] }
 0x886   : > { %v5633_v45 = vpop.f32.mrf.mxu2 }
 0x887   : > { %v5713_v62 = vpop.f32.mrf.mxu3 }
 0x888   : > { %v5578_v42 = vpop.f32.mrf.mxu1  ;;  %v5733_v16 = vadd.f32 %v5713_v62, %v5647_v19 }
 0x889   : > { %v12178_v12 = vadd.f32 %v5578_v42, %v5539_v23  ;;  %v5771_v42 = vpop.f32.mrf.mxu0 }
 0x88a   : > { %v5788_v34 = vadd.f32 %v5768_v48, %v5733_v16 }
 0x88b   : > { %v5649_v43 = vadd.f32 %v5633_v45, %v12178_v12  ;;  %v5933_v12 = vld [vmem:[#allocation20 + $0x8] sm:$0xff] }
 0x88c   : > { %6005 = vmatpush.msra.mxu3 %v5933_v12 }
 0x88e   : > { %v5636_v59 = vpop.f32.mrf.mxu2  ;;  %6006 = vmatpush.msra.mxu3 %v5932_v61 }
 0x88f   : > { %v5716_v20 = vpop.f32.mrf.mxu3 }
 0x890   : > { %v12182_v39 = vpop.f32.mrf.mxu1  ;;  %v5734_v56 = vadd.f32 %v5716_v20, %v5648_v53  ;;  %v5456_v20 = vadd.f32 %v12176_v26, %v5400_v15 }
 0x891   : > { %v5774_v60 = vpop.f32.mrf.mxu0 }
 0x892   : > { %v5542_v16 = vadd.f32 %v12180_v44, %v5456_v20 }
 0x897   : > { %v5719_v2 = vpop.f32.mrf.mxu3 }
 0x898   : > { %v5584_v25 = vpop.f32.mrf.mxu1  ;;  %v5735_v50 = vadd.f32 %v5719_v2, %v5649_v43 }
 0x899   : > { %v12184_v8 = vadd.f32 %v5584_v25, %v5541_v47  ;;  %v5454_v47 = vadd.f32 %v12170_v40, %v5394_v5  ;;  %v5789_v25 = vadd.f32 %v5771_v42, %v5734_v56 }
 0x89a   : > { %v5790_v7 = vadd.f32 %v5774_v60, %v5735_v50  ;;  %v5926_v60 = vld [vmem:[#allocation6] sm:$0xf] }
 0x89b   : > { %v5540_v27 = vadd.f32 %v12172_v0, %v5454_v47 }
 0x89d   : > { %v5595_v36 = vadd.f32 %v12182_v39, %v5540_v27  ;;  %v5935_v39 = vld [vmem:[#allocation20 + $0x30] sm:$0xff] }
 0x89e   : > { %5969 = vmatpush.msra.mxu2 %v5935_v39  ;;  %v6109_v39 = vld [vmem:[#allocation20 + $0x48] sm:$0xff] }
 0x89f   : > { %v5722_v40 = vpop.f32.mrf.mxu3 }
 0x8a0   : > { %v12187_v3 = vpop.f32.mrf.mxu1 }
 0x8a1   : > { %v5597_v26 = vadd.f32 %v12187_v3, %v5542_v16 }
 0x8a8   : > { %v5817_v49 = vpop.f32.mrf.mxu1 }
 0x8a9   : > { %v5841_v10 = vadd.f32 %v5817_v49, %v5786_v18  ;;  %v5650_v18 = vadd.f32 %v5636_v59, %v5595_v36 }
 0x8ab   : > { %v5853_v57 = vadd.f32 %v12202_v41, %v5841_v10  ;;  %v5777_v10 = vpop.f32.mrf.mxu0  ;;  %v5736_v48 = vadd.f32 %v5722_v40, %v5650_v18 }
 0x8ad   : > { %v5861_v24 = vmax.f32 %v5853_v57, 0.0  ;;  %v5639_v57 = vpop.f32.mrf.mxu2 }
 0x8af   : > { %v5869_v54 = vsel %vm5241_vm7, %v5861_v24, -inf }
 0x8b0   : > { %v5820_v4 = vpop.f32.mrf.mxu1 }
 0x8b1   : > { %v5842_v32 = vadd.f32 %v5820_v4, %v5787_v30  ;;  %v5725_v30 = vpop.f32.mrf.mxu3 }
 0x8b3   : > { %v5854_v63 = vadd.f32 %v12202_v41, %v5842_v32  ;;  %v5791_v32 = vadd.f32 %v5777_v10, %v5736_v48  ;;  %v6063_v48 = vld [vmem:[#allocation20 + $0x10] sm:$0xff] }
 0x8b5   : > { %v5862_v23 = vmax.f32 %v5854_v63, 0.0 }
 0x8b7   : > { %v5870_v9 = vsel %vm5241_vm7, %v5862_v23, -inf  ;;  %v5651_v23 = vadd.f32 %v5639_v57, %v12184_v8  ;;  %v6108_v57 = vld [vmem:[#allocation20 + $0x40] sm:$0xff] }
 0x8b8   : > { %v5871_v33 = vmax.f32 %v5869_v54, %v5870_v9  ;;  %v5823_v17 = vpop.f32.mrf.mxu1  ;;  %v5780_v54 = vpop.f32.mrf.mxu0 }
 0x8b9   : > { %v5843_v11 = vadd.f32 %v5823_v17, %v5788_v34  ;;  %v5737_v9 = vadd.f32 %v5725_v30, %v5651_v23  ;;  %v5642_v17 = vpop.f32.mrf.mxu2  ;;  %v5728_v44 = vpop.f32.mrf.mxu3  ;;  %v6199_v23 = vld [vmem:[#allocation20 + $0x28] sm:$0xff] }
 0x8ba   : > { %5881 = vst.msk [vmem:[#allocation11] sm:$0xff] %vm5241_vm7, %v5871_v33  ;;  %v5652_v2 = vadd.f32 %v5642_v17, %v5597_v26 }
 0x8bb   : > { %v5855_v28 = vadd.f32 %v12202_v41, %v5843_v11  ;;  %v5792_v56 = vadd.f32 %v5780_v54, %v5737_v9  ;;  %v6244_v54 = vld [vmem:[#allocation20 + $0x58] sm:$0xff] }
 0x8bc   : > { %v5738_v11 = vadd.f32 %v5728_v44, %v5652_v2 }
 0x8bd   : > { %v5863_v35 = vmax.f32 %v5855_v28, 0.0 }
 0x8bf   : > { %v5872_v62 = vsel %vm5241_vm7, %v5863_v35, -inf }
 0x8c0   : > { %v5826_v22 = vpop.f32.mrf.mxu1  ;;  %v5783_v28 = vpop.f32.mrf.mxu0 }
 0x8c1   : > { %v5885_v52 = vld [vmem:[#allocation11] ss:$2 sm:$0xf]  ;;  %v5893_v38 = vld [vmem:[#allocation11 + $0x1] ss:$2 sm:$0xf]  ;;  %v5844_v51 = vadd.f32 %v5826_v22, %v5789_v25  ;;  %v5793_v25 = vadd.f32 %v5783_v28, %v5738_v11 }
 0x8c2   : > { %v5900_v21 = vmax.f32 %v5885_v52, %v5893_v38 }
 0x8c3   : > { %v5856_v58 = vadd.f32 %v12202_v41, %v5844_v51 }
 0x8c4   : > { %5922 = vst.msk [vmem:[#allocation6 + $0x9] sm:$0xf] %vm5921_vm11, %v5900_v21 }
 0x8c5   : > { %v5864_v31 = vmax.f32 %v5856_v58, 0.0 }
 0x8c7   : > { %v5873_v49 = vsel %vm5241_vm7, %v5864_v31, -inf }
 0x8c8   : > { %v5874_v46 = vmax.f32 %v5872_v62, %v5873_v49  ;;  %v5829_v0 = vpop.f32.mrf.mxu1  ;;  %v6016_v49 = vld [vmem:[#allocation20 + $0x68] sm:$0xff] }
 0x8c9   : > { %v5845_v29 = vadd.f32 %v5829_v0, %v5790_v7  ;;  %6045 = vmatpush.msrb.mxu2 %v6016_v49  ;;  %v6056_v0 = vld [vmem:[#allocation6 + $0x1] sm:$0xf] }
 0x8ca   : > { %5882 = vst.msk [vmem:[#allocation11 + $0x8] sm:$0xff] %vm5241_vm7, %v5874_v46  ;;  %v6015_v46 = vld [vmem:[#allocation20 + $0x60] sm:$0xff]  ;;  %v6064_v7 = vld [vmem:[#allocation20 + $0x18] sm:$0xff] }
 0x8cb   : > { %v5927_v14 = vld [vmem:[#allocation6 + $0x8] sm:$0xf]  ;;  %v5857_v4 = vadd.f32 %v12202_v41, %v5845_v29  ;;  %6046 = vmatpush.msrb.mxu2 %v6015_v46  ;;  %6096 = vmatpush.msrb.mxu3 %v6064_v7  ;;  %v8706_v7 = vld [vmem:[%s12628_s10] ss:$0 sm:$0xff] }
 0x8cc   : > { %5941 = vst [vmem:[#allocation1] ss:$2 sm:$0xff] %v5927_v14  ;;  %v6057_v12 = vld [vmem:[#allocation6 + $0x9] sm:$0xf] }
 0x8cd   : > { %v5865_v42 = vmax.f32 %v5857_v4, 0.0  ;;  %6097 = vmatpush.msrb.mxu3 %v6063_v48  ;;  %v6286_v4 = vld [vmem:[#allocation20 + $0x88] sm:$0xff] }
 0x8ce   : > { %6315 = vmatpush.msrb.mxu0 %v6286_v4 }
 0x8cf   : > { %v5875_v53 = vsel %vm5241_vm7, %v5865_v42, -inf  ;;  %v6192_v42 = vld [vmem:[#allocation6 + $0xa] sm:$0xf] }
 0x8d0   : > { %v5832_v1 = vpop.f32.mrf.mxu1 }
 0x8d1   : > { %v5887_v19 = vld [vmem:[#allocation11 + $0x8] ss:$2 sm:$0xf]  ;;  %v5895_v24 = vld [vmem:[#allocation11 + $0x9] ss:$2 sm:$0xf]  ;;  %v5846_v63 = vadd.f32 %v5832_v1, %v5791_v32 }
 0x8d2   : > { %v5901_v37 = vmax.f32 %v5887_v19, %v5895_v24  ;;  %v6151_v32 = vld [vmem:[#allocation20 + $0x78] sm:$0xff]  ;;  %v5931_v1 = vld [vmem:[#allocation6 + $0x28] sm:$0xf]  ;;  %v6150_v19 = vld [vmem:[#allocation20 + $0x70] sm:$0xff] }
 0x8d3   : > { %v5858_v6 = vadd.f32 %v12202_v41, %v5846_v63  ;;  %v6285_v24 = vld [vmem:[#allocation20 + $0x80] sm:$0xff] }
 0x8d4   : > { %5923 = vst.msk [vmem:[#allocation6 + $0x11] sm:$0xf] %vm5921_vm11, %v5901_v37  ;;  %6316 = vmatpush.msrb.mxu0 %v6285_v24  ;;  %v6191_v37 = vld [vmem:[#allocation6 + $0x2] sm:$0xf] }
 0x8d5   : > { %v5866_v33 = vmax.f32 %v5858_v6, 0.0  ;;  %v6198_v6 = vld [vmem:[#allocation20 + $0x20] sm:$0xff] }
 0x8d7   : > { %v5876_v34 = vsel %vm5241_vm7, %v5866_v33, -inf  ;;  %v6243_v33 = vld [vmem:[#allocation20 + $0x50] sm:$0xff] }
 0x8d8   : > { %v5877_v45 = vmax.f32 %v5875_v53, %v5876_v34  ;;  %v5835_v8 = vpop.f32.mrf.mxu1 }
 0x8d9   : > { %v5847_v47 = vadd.f32 %v5835_v8, %v5792_v56 }
 0x8da   : > { %5883 = vst.msk [vmem:[#allocation11 + $0x10] sm:$0xff] %vm5241_vm7, %v5877_v45  ;;  %v6061_v45 = vld [vmem:[#allocation6 + $0x29] sm:$0xf] }
 0x8db   : > { %v5928_v5 = vld [vmem:[#allocation6 + $0x10] sm:$0xf]  ;;  %v5859_v3 = vadd.f32 %v12202_v41, %v5847_v47  ;;  %v6196_v47 = vld [vmem:[#allocation6 + $0x2a] sm:$0xf] }
 0x8dc   : > { %5943 = vst [vmem:[#allocation1 + $0x1] ss:$2 sm:$0xff] %v5928_v5  ;;  %v6058_v29 = vld [vmem:[#allocation6 + $0x11] sm:$0xf] }
 0x8dd   : > { %v5867_v27 = vmax.f32 %v5859_v3, 0.0  ;;  %v6193_v9 = vld [vmem:[#allocation6 + $0x12] sm:$0xf] }
 0x8df   : > { %v5878_v58 = vsel %vm5241_vm7, %v5867_v27, -inf }
 0x8e0   : > { %v5838_v22 = vpop.f32.mrf.mxu1 }
 0x8e1   : > { %v5889_v52 = vld [vmem:[#allocation11 + $0x10] ss:$2 sm:$0xf]  ;;  %v5897_v38 = vld [vmem:[#allocation11 + $0x11] ss:$2 sm:$0xf]  ;;  %v5848_v51 = vadd.f32 %v5838_v22, %v5793_v25 }
 0x8e2   : > { %v5902_v21 = vmax.f32 %v5889_v52, %v5897_v38 }
 0x8e3   : > { %v5948_v13 = vld.sshfl [vmem:[#allocation1] sm:$0xff pattern:$0x75316420]  ;;  %v5860_v43 = vadd.f32 %v12202_v41, %v5848_v51  ;;  %v6377_v51 = vld [vmem:[#allocation22 + $0x78] sm:$0xff] }
 0x8e4   : > { %5978 = vst [vmem:[#allocation1] ss:$2 sm:$0xff] %v5926_v60  ;;  %8485 = vmatmul.msk.f32.vlgmr.msra.gmra.mxu2 %vm5241_vm7, %v5948_v13  ;;  %6408 = vmatpush.msra.mxu1 %v6377_v51 }
 0x8e5   : > { %5980 = vst [vmem:[#allocation1 + $0x1] ss:$2 sm:$0xff] %v5927_v14  ;;  %v5868_v35 = vmax.f32 %v5860_v43, 0.0  ;;  %6138 = vmatpush.msra.mxu2 %v6109_v39  ;;  %v6375_v39 = vld [vmem:[#allocation22 + $0x68] sm:$0xff] }
 0x8e6   : > { %5924 = vst.msk [vmem:[#allocation6 + $0x19] sm:$0xf] %vm5921_vm11, %v5902_v21 }
 0x8e7   : > { %v5879_v59 = vsel %vm5241_vm7, %v5868_v35, -inf  ;;  %6139 = vmatpush.msra.mxu2 %v6108_v57 }
 0x8e8   : > { %v5880_v40 = vmax.f32 %v5878_v58, %v5879_v59 }
 0x8ea   : > { %5884 = vst.msk [vmem:[#allocation11 + $0x18] sm:$0xff] %vm5241_vm7, %v5880_v40 }
 0x8ec   : > { %v5985_v36 = vld.sshfl [vmem:[#allocation1] sm:$0xff pattern:$0x75316420] }
 0x8ed   : > { %6018 = vst [vmem:[#allocation1] ss:$2 sm:$0xff] %v5928_v5  ;;  %v5929_v50 = vld [vmem:[#allocation6 + $0x18] sm:$0xf]  ;;  %8487 = vmatmul.msk.f32.vlgmr.msra.gmra.mxu3 %vm5241_vm7, %v5985_v36 }
 0x8ee   : > { %5945 = vst [vmem:[#allocation1 + $0x10] ss:$2 sm:$0xff] %v5929_v50  ;;  %v6059_v20 = vld [vmem:[#allocation6 + $0x19] sm:$0xf]  ;;  %6180 = vmatpush.msra.mxu3 %v6151_v32 }
 0x8ef   : > { %6020 = vst [vmem:[#allocation1 + $0x1] ss:$2 sm:$0xff] %v5929_v50  ;;  %v6194_v44 = vld [vmem:[#allocation6 + $0x1a] sm:$0xf] }
 0x8f0   : > { %6181 = vmatpush.msra.mxu3 %v6150_v19  ;;  %v6374_v32 = vld [vmem:[#allocation22 + $0x60] sm:$0xff] }
 0x8f1   : > { %v5891_v41 = vld [vmem:[#allocation11 + $0x18] ss:$2 sm:$0xf]  ;;  %v5899_v31 = vld [vmem:[#allocation11 + $0x19] ss:$2 sm:$0xf] }
 0x8f2   : > { %v5903_v62 = vmax.f32 %v5891_v41, %v5899_v31 }
 0x8f4   : > { %5925 = vst.msk [vmem:[#allocation6 + $0x21] sm:$0xf] %vm5921_vm11, %v5903_v62 }
 0x8f6   : > { %v6025_v18 = vld.sshfl [vmem:[#allocation1] sm:$0xff pattern:$0x75316420] }
 0x8f7   : > { %6069 = vst [vmem:[#allocation1] ss:$2 sm:$0xff] %v6056_v0 }
 0x8f8   : > { %6071 = vst [vmem:[#allocation1 + $0x1] ss:$2 sm:$0xff] %v6057_v12 }
 0x8fb   : > { %v5930_v10 = vld [vmem:[#allocation6 + $0x20] sm:$0xf] }
 0x8fc   : > { %5947 = vst [vmem:[#allocation1 + $0x11] ss:$2 sm:$0xff] %v5930_v10  ;;  %v6060_v53 = vld [vmem:[#allocation6 + $0x21] sm:$0xf] }
 0x8ff   : > { %v6076_v14 = vld.sshfl [vmem:[#allocation1] sm:$0xff pattern:$0x75316420] }
 0x900   : > { %6111 = vst [vmem:[#allocation1] ss:$2 sm:$0xff] %v6057_v12 }
 0x901   : > { %6113 = vst [vmem:[#allocation1 + $0x1] ss:$2 sm:$0xff] %v6058_v29 }
 0x903   : > { %v5949_v15 = vld.sshfl [vmem:[#allocation1 + $0x10] sm:$0xff pattern:$0x75316420] }
 0x904   : > { %5982 = vst [vmem:[#allocation1 + $0x10] ss:$2 sm:$0xff] %v5928_v5  ;;  %8486 = vmatmul.msk.f32.gmra.mxu2 %vm5241_vm7, %v5949_v15  ;;  %v6195_v5 = vld [vmem:[#allocation6 + $0x22] sm:$0xf] }
 0x905   : > { %5984 = vst [vmem:[#allocation1 + $0x11] ss:$2 sm:$0xff] %v5929_v50 }
 0x908   : > { %v6118_v30 = vld.sshfl [vmem:[#allocation1] sm:$0xff pattern:$0x75316420] }
 0x909   : > { %6153 = vst [vmem:[#allocation1] ss:$2 sm:$0xff] %v6058_v29 }
 0x90a   : > { %6155 = vst [vmem:[#allocation1 + $0x1] ss:$2 sm:$0xff] %v6059_v20 }
 0x90c   : > { %v5986_v63 = vld.sshfl [vmem:[#allocation1 + $0x10] sm:$0xff pattern:$0x75316420]  ;;  %8489 = vmatmul.msk.f32.vlgmr.msrb.gmra.mxu2 %vm5241_vm7, %v6025_v18 }
 0x90d   : > { %6022 = vst [vmem:[#allocation1 + $0x10] ss:$2 sm:$0xff] %v5930_v10  ;;  %8488 = vmatmul.msk.f32.gmra.mxu3 %vm5241_vm7, %v5986_v63  ;;  %6231 = vmatpush.msrb.mxu2 %v6199_v23  ;;  %v6376_v10 = vld [vmem:[#allocation22 + $0x70] sm:$0xff]  ;;  %v6370_v23 = vld [vmem:[#allocation22 + $0x8] sm:$0xff] }
 0x90e   : > { %6024 = vst [vmem:[#allocation1 + $0x11] ss:$2 sm:$0xff] %v5931_v1  ;;  %6409 = vmatpush.msra.mxu1 %v6376_v10  ;;  %v6372_v1 = vld [vmem:[#allocation22 + $0x18] sm:$0xff]  ;;  %v6371_v63 = vld [vmem:[#allocation22 + $0x10] sm:$0xff]  ;;  %v6696_v10 = vld [vmem:[#allocation22 + $0xa8] sm:$0xff] }
 0x90f   : > { %6232 = vmatpush.msrb.mxu2 %v6198_v6  ;;  %v6369_v6 = vld [vmem:[#allocation22] sm:$0xff] }
 0x910   : > { %6410 = vmatpush.msra.mxu1 %v6375_v39 }
 0x911   : > { %v6160_v16 = vld.sshfl [vmem:[#allocation1] sm:$0xff pattern:$0x75316420] }
 0x912   : > { %6204 = vst [vmem:[#allocation1] ss:$2 sm:$0xff] %v6191_v37  ;;  %6411 = vmatpush.msra.mxu1 %v6374_v32 }
 0x913   : > { %6206 = vst [vmem:[#allocation1 + $0x1] ss:$2 sm:$0xff] %v6192_v42 }
 0x915   : > { %v6026_v61 = vld.sshfl [vmem:[#allocation1 + $0x10] sm:$0xff pattern:$0x75316420]  ;;  %8491 = vmatmul.msk.f32.vlgmr.msrb.gmra.mxu3 %vm5241_vm7, %v6076_v14 }
 0x916   : > { %6073 = vst [vmem:[#allocation1 + $0x10] ss:$2 sm:$0xff] %v6058_v29  ;;  %8490 = vmatmul.msk.f32.gmra.mxu2 %vm5241_vm7, %v6026_v61  ;;  %6273 = vmatpush.msrb.mxu3 %v6244_v54  ;;  %v6460_v54 = vld [vmem:[#allocation22 + $0xd8] sm:$0xff] }
 0x917   : > { %6075 = vst [vmem:[#allocation1 + $0x11] ss:$2 sm:$0xff] %v6059_v20 }
 0x918   : > { %6274 = vmatpush.msrb.mxu3 %v6243_v33  ;;  %v6459_v33 = vld [vmem:[#allocation22 + $0xd0] sm:$0xff] }
 0x91a   : > { %v6211_v26 = vld.sshfl [vmem:[#allocation1] sm:$0xff pattern:$0x75316420] }
 0x91b   : > { %6246 = vst [vmem:[#allocation1] ss:$2 sm:$0xff] %v6192_v42 }
 0x91c   : > { %6248 = vst [vmem:[#allocation1 + $0x1] ss:$2 sm:$0xff] %v6193_v9 }
 0x91e   : > { %v6077_v17 = vld.sshfl [vmem:[#allocation1 + $0x10] sm:$0xff pattern:$0x75316420]  ;;  %8493 = vmatmul.msk.f32.vlgmr.msra.gmra.mxu2 %vm5241_vm7, %v6118_v30 }
 0x91f   : > { %6115 = vst [vmem:[#allocation1 + $0x10] ss:$2 sm:$0xff] %v6059_v20  ;;  %8492 = vmatmul.msk.f32.gmra.mxu3 %vm5241_vm7, %v6077_v17  ;;  %6445 = vmatpush.msra.mxu2 %v6372_v1 }
 0x920   : > { %6117 = vst [vmem:[#allocation1 + $0x11] ss:$2 sm:$0xff] %v6060_v53 }
 0x921   : > { %6446 = vmatpush.msra.mxu2 %v6371_v63 }
 0x923   : > { %v6253_v34 = vld.sshfl [vmem:[#allocation1] sm:$0xff pattern:$0x75316420]  ;;  %6447 = vmatpush.msra.mxu2 %v6370_v23 }
 0x924   : > { %6288 = vst [vmem:[#allocation1] ss:$2 sm:$0xff] %v6193_v9 }
 0x925   : > { %6290 = vst [vmem:[#allocation1 + $0x1] ss:$2 sm:$0xff] %v6194_v44  ;;  %6448 = vmatpush.msra.mxu2 %v6369_v6 }
 0x927   : > { %v6119_v8 = vld.sshfl [vmem:[#allocation1 + $0x10] sm:$0xff pattern:$0x75316420]  ;;  %8495 = vmatmul.msk.f32.vlgmr.msra.gmra.mxu3 %vm5241_vm7, %v6160_v16 }
 0x928   : > { %6157 = vst [vmem:[#allocation1 + $0x10] ss:$2 sm:$0xff] %v6060_v53  ;;  %8494 = vmatmul.msk.f32.gmra.mxu2 %vm5241_vm7, %v6119_v8  ;;  %6487 = vmatpush.msra.mxu3 %v6460_v54  ;;  %v6510_v8 = vld [vmem:[#allocation22 + $0x38] sm:$0xff] }
 0x929   : > { %6159 = vst [vmem:[#allocation1 + $0x11] ss:$2 sm:$0xff] %v6061_v45  ;;  %v6457_v45 = vld [vmem:[#allocation22 + $0xc0] sm:$0xff]  ;;  %6540 = vmatpush.msra.mxu0 %v6510_v8 }
 0x92a   : > { %6488 = vmatpush.msra.mxu3 %v6459_v33 }
 0x92c   : > { %v6295_v2 = vld.sshfl [vmem:[#allocation1] sm:$0xff pattern:$0x75316420] }
 0x92d   : > { %8501 = vmatmul.msk.f32.vlgmr.msrb.gmra.mxu0 %vm5241_vm7, %v6295_v2  ;;  %v6363_v2 = vld [vmem:[#allocation7] sm:$0xf] }
 0x930   : > { %v6161_v56 = vld.sshfl [vmem:[#allocation1 + $0x10] sm:$0xff pattern:$0x75316420]  ;;  %8497 = vmatmul.msk.f32.vlgmr.msrb.gmra.mxu2 %vm5241_vm7, %v6211_v26 }
 0x931   : > { %6208 = vst [vmem:[#allocation1 + $0x10] ss:$2 sm:$0xff] %v6193_v9  ;;  %8496 = vmatmul.msk.f32.gmra.mxu3 %vm5241_vm7, %v6161_v56  ;;  %v6509_v56 = vld [vmem:[#allocation22 + $0x30] sm:$0xff] }
 0x932   : > { %6210 = vst [vmem:[#allocation1 + $0x11] ss:$2 sm:$0xff] %v6194_v44  ;;  %6541 = vmatpush.msra.mxu0 %v6509_v56 }
 0x939   : > { %v6212_v11 = vld.sshfl [vmem:[#allocation1 + $0x10] sm:$0xff pattern:$0x75316420]  ;;  %8499 = vmatmul.msk.f32.vlgmr.msrb.gmra.mxu3 %vm5241_vm7, %v6253_v34  ;;  %v6458_v34 = vld [vmem:[#allocation22 + $0xc8] sm:$0xff] }
 0x93a   : > { %6250 = vst [vmem:[#allocation1 + $0x10] ss:$2 sm:$0xff] %v6194_v44  ;;  %8498 = vmatmul.msk.f32.gmra.mxu2 %vm5241_vm7, %v6212_v11  ;;  %6489 = vmatpush.msra.mxu3 %v6458_v34 }
 0x93b   : > { %6252 = vst [vmem:[#allocation1 + $0x11] ss:$2 sm:$0xff] %v6195_v5 }
 0x93c   : > { %6490 = vmatpush.msra.mxu3 %v6457_v45 }
 0x942   : > { %v6254_v28 = vld.sshfl [vmem:[#allocation1 + $0x10] sm:$0xff pattern:$0x75316420] }
 0x943   : > { %6292 = vst [vmem:[#allocation1 + $0x10] ss:$2 sm:$0xff] %v6195_v5  ;;  %8500 = vmatmul.msk.f32.gmra.mxu3 %vm5241_vm7, %v6254_v28  ;;  %v6508_v5 = vld [vmem:[#allocation22 + $0x28] sm:$0xff]  ;;  %v6507_v28 = vld [vmem:[#allocation22 + $0x20] sm:$0xff] }
 0x944   : > { %6294 = vst [vmem:[#allocation1 + $0x11] ss:$2 sm:$0xff] %v6196_v47  ;;  %6542 = vmatpush.msra.mxu0 %v6508_v5 }
 0x946   : > { %6543 = vmatpush.msra.mxu0 %v6507_v28 }
 0x94b   : > { %v6296_v3 = vld.sshfl [vmem:[#allocation1 + $0x10] sm:$0xff pattern:$0x75316420] }
 0x94c   : > { %8502 = vmatmul.msk.f32.gmra.mxu0 %vm5241_vm7, %v6296_v3 }
 0x967   : > { %v5971_v25 = vpop.f32.mrf.mxu2 }
 0x970   : > { %v6008_v22 = vpop.f32.mrf.mxu3 }
 0x971   : > { %v6009_v59 = vadd.f32 %v6008_v22, %v5971_v25  ;;  %v6557_v25 = vld [vmem:[#allocation22 + $0x98] sm:$0xff] }
 0x972   : > { %6584 = vmatpush.msrb.mxu1 %v6557_v25 }
 0x987   : > { %v5974_v60 = vpop.f32.mrf.mxu2 }
 0x98f   : > { %v6048_v38 = vpop.f32.mrf.mxu2 }
 0x990   : > { %v6011_v52 = vpop.f32.mrf.mxu3  ;;  %v6054_v40 = vadd.f32 %v6048_v38, %v6009_v59  ;;  %v6554_v38 = vld [vmem:[#allocation22 + $0x80] sm:$0xff] }
 0x991   : > { %v6012_v49 = vadd.f32 %v6011_v52, %v5974_v60  ;;  %v6556_v60 = vld [vmem:[#allocation22 + $0x90] sm:$0xff]  ;;  %v6555_v52 = vld [vmem:[#allocation22 + $0x88] sm:$0xff]  ;;  %v6598_v59 = vld [vmem:[#allocation22 + $0xe0] sm:$0xff] }
 0x992   : > { %6585 = vmatpush.msrb.mxu1 %v6556_v60 }
 0x994   : > { %6586 = vmatpush.msrb.mxu1 %v6555_v52 }
 0x996   : > { %6587 = vmatpush.msrb.mxu1 %v6554_v38 }
 0x998   : > { %v6099_v21 = vpop.f32.mrf.mxu3 }
 0x999   : > { %v6051_v13 = vpop.f32.mrf.mxu2  ;;  %v6105_v50 = vadd.f32 %v6099_v21, %v6054_v40  ;;  %v6601_v21 = vld [vmem:[#allocation22 + $0xf8] sm:$0xff]  ;;  %v6368_v40 = vld [vmem:[#allocation7 + $0x28] sm:$0xf] }
 0x99a   : > { %v6055_v18 = vadd.f32 %v6051_v13, %v6012_v49  ;;  %6628 = vmatpush.msrb.mxu2 %v6601_v21  ;;  %v6600_v13 = vld [vmem:[#allocation22 + $0xf0] sm:$0xff]  ;;  %v6648_v49 = vld [vmem:[#allocation22 + $0x40] sm:$0xff] }
 0x99c   : > { %6629 = vmatpush.msrb.mxu2 %v6600_v13 }
 0x9a1   : > { %v6141_v43 = vpop.f32.mrf.mxu2 }
 0x9a2   : > { %v6102_v27 = vpop.f32.mrf.mxu3  ;;  %v6147_v41 = vadd.f32 %v6141_v43, %v6105_v50  ;;  %v6599_v43 = vld [vmem:[#allocation22 + $0xe8] sm:$0xff]  ;;  %v6651_v50 = vld [vmem:[#allocation22 + $0x58] sm:$0xff] }
 0x9a3   : > { %v6106_v14 = vadd.f32 %v6102_v27, %v6055_v18  ;;  %v6500_v27 = vld [vmem:[#allocation7 + $0x1] sm:$0xf]  ;;  %6630 = vmatpush.msrb.mxu2 %v6599_v43  ;;  %6681 = vmatpush.msrb.mxu3 %v6651_v50  ;;  %v8707_v43 = vld [vmem:[%s12630_s12] ss:$0 sm:$0xff] }
 0x9a5   : > { %6631 = vmatpush.msrb.mxu2 %v6598_v59 }
 0x9aa   : > { %v6183_v35 = vpop.f32.mrf.mxu3  ;;  %v6318_v48 = vpop.f32.mrf.mxu0 }
 0x9ab   : > { %v6144_v58 = vpop.f32.mrf.mxu2  ;;  %v6189_v62 = vadd.f32 %v6183_v35, %v6147_v41  ;;  %v6650_v41 = vld [vmem:[#allocation22 + $0x50] sm:$0xff] }
 0x9ac   : > { %v6148_v15 = vadd.f32 %v6144_v58, %v6106_v14  ;;  %6682 = vmatpush.msrb.mxu3 %v6650_v41 }
 0x9b3   : > { %v6234_v31 = vpop.f32.mrf.mxu2 }
 0x9b4   : > { %v6186_v36 = vpop.f32.mrf.mxu3  ;;  %v6240_v46 = vadd.f32 %v6234_v31, %v6189_v62  ;;  %v6649_v31 = vld [vmem:[#allocation22 + $0x48] sm:$0xff] }
 0x9b5   : > { %v6190_v20 = vadd.f32 %v6186_v36, %v6148_v15  ;;  %6683 = vmatpush.msrb.mxu3 %v6649_v31  ;;  %v6741_v15 = vld [vmem:[#allocation22 + $0x110] sm:$0xff] }
 0x9b7   : > { %6684 = vmatpush.msrb.mxu3 %v6648_v49 }
 0x9bc   : > { %v6276_v0 = vpop.f32.mrf.mxu3 }
 0x9bd   : > { %v6282_v12 = vadd.f32 %v6276_v0, %v6240_v46  ;;  %v6237_v30 = vpop.f32.mrf.mxu2  ;;  %v6698_v0 = vld [vmem:[#allocation22 + $0xb8] sm:$0xff] }
 0x9be   : > { %v6241_v19 = vadd.f32 %v6237_v30, %v6190_v20  ;;  %6725 = vmatpush.msrb.mxu0 %v6698_v0  ;;  %v6740_v30 = vld [vmem:[#allocation22 + $0x108] sm:$0xff]  ;;  %v6641_v20 = vld [vmem:[#allocation7 + $0x2] sm:$0xf] }
 0x9bf   : > { %v6324_v29 = vadd.f32 %v6318_v48, %v6282_v12  ;;  %v6695_v48 = vld [vmem:[#allocation22 + $0xa0] sm:$0xff] }
 0x9c1   : > { %v6330_v57 = vadd.f32 %v8706_v7, %v6324_v29  ;;  %v6742_v29 = vld [vmem:[#allocation22 + $0x118] sm:$0xff] }
 0x9c3   : > { %v6332_v4 = vmax.f32 %v6330_v57, 0.0 }
 0x9c5   : > { %v6336_v24 = vrot.slane %v6332_v4, 4  ;;  %6359 = vst.msk [vmem:[#allocation7 + $0x9] sm:$0xf] %vm6358_vm14, %v6332_v4  ;;  %v6739_v4 = vld [vmem:[#allocation22 + $0x100] sm:$0xff] }
 0x9c6   : > { %v6279_v37 = vpop.f32.mrf.mxu3 }
 0x9c7   : > { %6360 = vst.msk [vmem:[#allocation7 + $0x11] sm:$0xf] %vm6358_vm14, %v6336_v24  ;;  %v6283_v16 = vadd.f32 %v6279_v37, %v6241_v19  ;;  %v6505_v19 = vld [vmem:[#allocation7 + $0x29] sm:$0xf] }
 0x9c9   : > { %v6321_v42 = vpop.f32.mrf.mxu0 }
 0x9ca   : > { %v6325_v61 = vadd.f32 %v6321_v42, %v6283_v16 }
 0x9cc   : > { %v6364_v26 = vld [vmem:[#allocation7 + $0x8] sm:$0xf]  ;;  %v6331_v9 = vadd.f32 %v8706_v7, %v6325_v61  ;;  %v6697_v7 = vld [vmem:[#allocation22 + $0xb0] sm:$0xff] }
 0x9cd   : > { %6382 = vst [vmem:[#allocation1] ss:$2 sm:$0xff] %v6364_v26  ;;  %v6501_v58 = vld [vmem:[#allocation7 + $0x9] sm:$0xf]  ;;  %6726 = vmatpush.msrb.mxu0 %v6697_v7 }
 0x9ce   : > { %v6365_v17 = vld [vmem:[#allocation7 + $0x10] sm:$0xf]  ;;  %v6333_v53 = vmax.f32 %v6331_v9, 0.0  ;;  %v6642_v1 = vld [vmem:[#allocation7 + $0xa] sm:$0xf] }
 0x9cf   : > { %6384 = vst [vmem:[#allocation1 + $0x1] ss:$2 sm:$0xff] %v6365_v17  ;;  %v6502_v46 = vld [vmem:[#allocation7 + $0x11] sm:$0xf]  ;;  %6727 = vmatpush.msrb.mxu0 %v6696_v10 }
 0x9d0   : > { %v6337_v44 = vrot.slane %v6333_v53, 4  ;;  %6361 = vst.msk [vmem:[#allocation7 + $0x19] sm:$0xf] %vm6358_vm14, %v6333_v53  ;;  %v6643_v37 = vld [vmem:[#allocation7 + $0x12] sm:$0xf] }
 0x9d1   : > { %6728 = vmatpush.msrb.mxu0 %v6695_v48  ;;  %v6840_v48 = vld [vmem:[#allocation23 + $0x78] sm:$0xff] }
 0x9d2   : > { %6362 = vst.msk [vmem:[#allocation7 + $0x21] sm:$0xf] %vm6358_vm14, %v6337_v44 }
 0x9d6   : > { %v6389_v11 = vld.sshfl [vmem:[#allocation1] sm:$0xff pattern:$0x75316420] }
 0x9d7   : > { %6420 = vst [vmem:[#allocation1] ss:$2 sm:$0xff] %v6363_v2  ;;  %8503 = vmatmul.msk.f32.vlgmr.msra.gmra.mxu1 %vm6391_vm15, %v6389_v11  ;;  %v6366_v47 = vld [vmem:[#allocation7 + $0x18] sm:$0xf] }
 0x9d8   : > { %6422 = vst [vmem:[#allocation1 + $0x1] ss:$2 sm:$0xff] %v6364_v26  ;;  %v6503_v12 = vld [vmem:[#allocation7 + $0x19] sm:$0xf]  ;;  %6769 = vmatpush.msra.mxu1 %v6742_v29  ;;  %v6646_v26 = vld [vmem:[#allocation7 + $0x2a] sm:$0xf] }
 0x9d9   : > { %6386 = vst [vmem:[#allocation1 + $0x10] ss:$2 sm:$0xff] %v6366_v47  ;;  %v6367_v3 = vld [vmem:[#allocation7 + $0x20] sm:$0xf]  ;;  %v6644_v23 = vld [vmem:[#allocation7 + $0x1a] sm:$0xf] }
 0x9da   : > { %6388 = vst [vmem:[#allocation1 + $0x11] ss:$2 sm:$0xff] %v6367_v3  ;;  %v6504_v57 = vld [vmem:[#allocation7 + $0x21] sm:$0xf]  ;;  %6770 = vmatpush.msra.mxu1 %v6741_v15  ;;  %v6838_v15 = vld [vmem:[#allocation23 + $0x68] sm:$0xff] }
 0x9db   : > { %v6645_v61 = vld [vmem:[#allocation7 + $0x22] sm:$0xf] }
 0x9dc   : > { %6771 = vmatpush.msra.mxu1 %v6740_v30  ;;  %v6837_v30 = vld [vmem:[#allocation23 + $0x60] sm:$0xff] }
 0x9de   : > { %6772 = vmatpush.msra.mxu1 %v6739_v4 }
 0x9df   : > { %v6427_v22 = vld.sshfl [vmem:[#allocation1] sm:$0xff pattern:$0x75316420] }
 0x9e0   : > { %6462 = vst [vmem:[#allocation1] ss:$2 sm:$0xff] %v6365_v17  ;;  %8505 = vmatmul.msk.f32.vlgmr.msra.gmra.mxu2 %vm6391_vm15, %v6427_v22 }
 0x9e1   : > { %6464 = vst [vmem:[#allocation1 + $0x1] ss:$2 sm:$0xff] %v6366_v47  ;;  %v6390_v51 = vld.sshfl [vmem:[#allocation1 + $0x10] sm:$0xff pattern:$0x75316420]  ;;  %6861 = vmatpush.msra.mxu2 %v6840_v48 }
 0x9e2   : > { %6424 = vst [vmem:[#allocation1 + $0x10] ss:$2 sm:$0xff] %v6365_v17  ;;  %8504 = vmatmul.msk.f32.gmra.mxu1 %vm6391_vm15, %v6390_v51  ;;  %v7033_v48 = vld [vmem:[#allocation8 + $0x2] sm:$0x3] }
 0x9e3   : > { %6426 = vst [vmem:[#allocation1 + $0x11] ss:$2 sm:$0xff] %v6366_v47 }
 0x9e8   : > { %v6469_v35 = vld.sshfl [vmem:[#allocation1] sm:$0xff pattern:$0x75316420] }
 0x9e9   : > { %6515 = vst [vmem:[#allocation1] ss:$2 sm:$0xff] %v6500_v27  ;;  %8507 = vmatmul.msk.f32.vlgmr.msra.gmra.mxu3 %vm6391_vm15, %v6469_v35 }
 0x9ea   : > { %6517 = vst [vmem:[#allocation1 + $0x1] ss:$2 sm:$0xff] %v6501_v58  ;;  %v6428_v36 = vld.sshfl [vmem:[#allocation1 + $0x10] sm:$0xff pattern:$0x75316420] }
 0x9eb   : > { %6466 = vst [vmem:[#allocation1 + $0x10] ss:$2 sm:$0xff] %v6367_v3  ;;  %8506 = vmatmul.msk.f32.gmra.mxu2 %vm6391_vm15, %v6428_v36 }
 0x9ec   : > { %6468 = vst [vmem:[#allocation1 + $0x11] ss:$2 sm:$0xff] %v6368_v40 }
 0x9f1   : > { %v6522_v62 = vld.sshfl [vmem:[#allocation1] sm:$0xff pattern:$0x75316420] }
 0x9f2   : > { %6559 = vst [vmem:[#allocation1] ss:$2 sm:$0xff] %v6501_v58  ;;  %8509 = vmatmul.msk.f32.vlgmr.msra.gmra.mxu0 %vm6391_vm15, %v6522_v62 }
 0x9f3   : > { %6561 = vst [vmem:[#allocation1 + $0x1] ss:$2 sm:$0xff] %v6502_v46  ;;  %v6470_v18 = vld.sshfl [vmem:[#allocation1 + $0x10] sm:$0xff pattern:$0x75316420] }
 0x9f4   : > { %6519 = vst [vmem:[#allocation1 + $0x10] ss:$2 sm:$0xff] %v6502_v46  ;;  %8508 = vmatmul.msk.f32.gmra.mxu3 %vm6391_vm15, %v6470_v18 }
 0x9f5   : > { %6521 = vst [vmem:[#allocation1 + $0x11] ss:$2 sm:$0xff] %v6503_v12 }
 0x9fa   : > { %v6566_v14 = vld.sshfl [vmem:[#allocation1] sm:$0xff pattern:$0x75316420] }
 0x9fb   : > { %6603 = vst [vmem:[#allocation1] ss:$2 sm:$0xff] %v6502_v46  ;;  %8511 = vmatmul.msk.f32.vlgmr.msrb.gmra.mxu1 %vm6391_vm15, %v6566_v14  ;;  %v6839_v14 = vld [vmem:[#allocation23 + $0x70] sm:$0xff] }
 0x9fc   : > { %6605 = vst [vmem:[#allocation1 + $0x1] ss:$2 sm:$0xff] %v6503_v12  ;;  %v6523_v39 = vld.sshfl [vmem:[#allocation1 + $0x10] sm:$0xff pattern:$0x75316420]  ;;  %6862 = vmatpush.msra.mxu2 %v6839_v14 }
 0x9fd   : > { %6563 = vst [vmem:[#allocation1 + $0x10] ss:$2 sm:$0xff] %v6503_v12  ;;  %8510 = vmatmul.msk.f32.gmra.mxu0 %vm6391_vm15, %v6523_v39 }
 0x9fe   : > { %6565 = vst [vmem:[#allocation1 + $0x11] ss:$2 sm:$0xff] %v6504_v57  ;;  %6863 = vmatpush.msra.mxu2 %v6838_v15 }
 0xa00   : > { %6864 = vmatpush.msra.mxu2 %v6837_v30 }
 0xa03   : > { %v6610_v32 = vld.sshfl [vmem:[#allocation1] sm:$0xff pattern:$0x75316420] }
 0xa04   : > { %6656 = vst [vmem:[#allocation1] ss:$2 sm:$0xff] %v6641_v20  ;;  %8513 = vmatmul.msk.f32.vlgmr.msrb.gmra.mxu2 %vm6391_vm15, %v6610_v32 }
 0xa05   : > { %6658 = vst [vmem:[#allocation1 + $0x1] ss:$2 sm:$0xff] %v6642_v1  ;;  %v6567_v24 = vld.sshfl [vmem:[#allocation1 + $0x10] sm:$0xff pattern:$0x75316420] }
 0xa06   : > { %6607 = vst [vmem:[#allocation1 + $0x10] ss:$2 sm:$0xff] %v6504_v57  ;;  %8512 = vmatmul.msk.f32.gmra.mxu1 %vm6391_vm15, %v6567_v24  ;;  %v6835_v24 = vld [vmem:[#allocation23 + $0x18] sm:$0xff] }
 0xa07   : > { %6609 = vst [vmem:[#allocation1 + $0x11] ss:$2 sm:$0xff] %v6505_v19  ;;  %6888 = vmatpush.msra.mxu3 %v6835_v24  ;;  %v8535_v24 = vld [vmem:[%s12633_s15 + $0xe8] sm:$0xff] }
 0xa0c   : > { %v6663_v63 = vld.sshfl [vmem:[#allocation1] sm:$0xff pattern:$0x75316420] }
 0xa0d   : > { %6700 = vst [vmem:[#allocation1] ss:$2 sm:$0xff] %v6642_v1  ;;  %8515 = vmatmul.msk.f32.vlgmr.msrb.gmra.mxu3 %vm6391_vm15, %v6663_v63  ;;  %v6834_v63 = vld [vmem:[#allocation23 + $0x10] sm:$0xff] }
 0xa0e   : > { %6702 = vst [vmem:[#allocation1 + $0x1] ss:$2 sm:$0xff] %v6643_v37  ;;  %v6611_v16 = vld.sshfl [vmem:[#allocation1 + $0x10] sm:$0xff pattern:$0x75316420]  ;;  %6889 = vmatpush.msra.mxu3 %v6834_v63 }
 0xa0f   : > { %6660 = vst [vmem:[#allocation1 + $0x10] ss:$2 sm:$0xff] %v6643_v37  ;;  %8514 = vmatmul.msk.f32.gmra.mxu2 %vm6391_vm15, %v6611_v16 }
 0xa10   : > { %6662 = vst [vmem:[#allocation1 + $0x11] ss:$2 sm:$0xff] %v6644_v23 }
 0xa15   : > { %v6707_v42 = vld.sshfl [vmem:[#allocation1] sm:$0xff pattern:$0x75316420] }
 0xa16   : > { %6744 = vst [vmem:[#allocation1] ss:$2 sm:$0xff] %v6643_v37  ;;  %8517 = vmatmul.msk.f32.vlgmr.msrb.gmra.mxu0 %vm6391_vm15, %v6707_v42 }
 0xa17   : > { %6746 = vst [vmem:[#allocation1 + $0x1] ss:$2 sm:$0xff] %v6644_v23  ;;  %v6664_v6 = vld.sshfl [vmem:[#allocation1 + $0x10] sm:$0xff pattern:$0x75316420] }
 0xa18   : > { %6704 = vst [vmem:[#allocation1 + $0x10] ss:$2 sm:$0xff] %v6644_v23  ;;  %8516 = vmatmul.msk.f32.gmra.mxu3 %vm6391_vm15, %v6664_v6  ;;  %v6833_v23 = vld [vmem:[#allocation23 + $0x8] sm:$0xff]  ;;  %v6832_v6 = vld [vmem:[#allocation23] sm:$0xff] }
 0xa19   : > { %6706 = vst [vmem:[#allocation1 + $0x11] ss:$2 sm:$0xff] %v6645_v61  ;;  %6890 = vmatpush.msra.mxu3 %v6833_v23 }
 0xa1b   : > { %6891 = vmatpush.msra.mxu3 %v6832_v6  ;;  %v7174_v6 = vld [vmem:[%s12633_s15 + $0x38] sm:$0xff] }
 0xa1e   : > { %v6751_v54 = vld.sshfl [vmem:[#allocation1] sm:$0xff pattern:$0x75316420] }
 0xa1f   : > { %8519 = vmatmul.msk.f32.vlgmr.msra.gmra.mxu1 %vm6391_vm15, %v6751_v54  ;;  %v6900_v54 = vld [vmem:[#allocation23 + $0xd8] sm:$0xff] }
 0xa20   : > { %v6708_v9 = vld.sshfl [vmem:[#allocation1 + $0x10] sm:$0xff pattern:$0x75316420]  ;;  %6920 = vmatpush.msrb.mxu2 %v6900_v54 }
 0xa21   : > { %6748 = vst [vmem:[#allocation1 + $0x10] ss:$2 sm:$0xff] %v6645_v61  ;;  %8518 = vmatmul.msk.f32.gmra.mxu0 %vm6391_vm15, %v6708_v9  ;;  %v6898_v9 = vld [vmem:[#allocation23 + $0xc8] sm:$0xff]  ;;  %v8532_v54 = vld [vmem:[%s12633_s15 + $0xd0] sm:$0xff] }
 0xa22   : > { %6750 = vst [vmem:[#allocation1 + $0x11] ss:$2 sm:$0xff] %v6646_v26  ;;  %v6899_v26 = vld [vmem:[#allocation23 + $0xd0] sm:$0xff] }
 0xa23   : > { %6921 = vmatpush.msrb.mxu2 %v6899_v26  ;;  %v8531_v26 = vld [vmem:[%s12633_s15 + $0xc8] sm:$0xff] }
 0xa25   : > { %6922 = vmatpush.msrb.mxu2 %v6898_v9  ;;  %v7172_v9 = vld [vmem:[%s12633_s15 + $0x28] sm:$0xff] }
 0xa29   : > { %v6752_v33 = vld.sshfl [vmem:[#allocation1 + $0x10] sm:$0xff pattern:$0x75316420] }
 0xa2a   : > { %8520 = vmatmul.msk.f32.gmra.mxu1 %vm6391_vm15, %v6752_v33 }
 0xa54   : > { %v6413_v17 = vpop.f32.mrf.mxu1 }
 0xa5f   : > { %v6416_v34 = vpop.f32.mrf.mxu1 }
 0xa63   : > { %v6450_v53 = vpop.f32.mrf.mxu2 }
 0xa64   : > { %v6451_v56 = vadd.f32 %v6450_v53, %v6413_v17 }
 0xa6c   : > { %v6492_v44 = vpop.f32.mrf.mxu3 }
 0xa6d   : > { %v6498_v5 = vadd.f32 %v6492_v44, %v6451_v56  ;;  %v6937_v44 = vld [vmem:[#allocation23 + $0x38] sm:$0xff]  ;;  %v6934_v56 = vld [vmem:[#allocation23 + $0x20] sm:$0xff] }
 0xa6e   : > { %v6453_v8 = vpop.f32.mrf.mxu2  ;;  %6958 = vmatpush.msrb.mxu3 %v6937_v44 }
 0xa6f   : > { %v6545_v45 = vpop.f32.mrf.mxu0  ;;  %v6454_v38 = vadd.f32 %v6453_v8, %v6416_v34  ;;  %v6897_v34 = vld [vmem:[#allocation23 + $0xc0] sm:$0xff]  ;;  %v6935_v8 = vld [vmem:[#allocation23 + $0x28] sm:$0xff] }
 0xa70   : > { %v6551_v28 = vadd.f32 %v6545_v45, %v6498_v5  ;;  %6923 = vmatpush.msrb.mxu2 %v6897_v34  ;;  %v6936_v45 = vld [vmem:[#allocation23 + $0x30] sm:$0xff]  ;;  %v7171_v34 = vld [vmem:[%s12633_s15 + $0x20] sm:$0xff] }
 0xa71   : > { %6959 = vmatpush.msrb.mxu3 %v6936_v45  ;;  %v6970_v5 = vld [vmem:[#allocation23 + $0x90] sm:$0xff] }
 0xa73   : > { %6960 = vmatpush.msrb.mxu3 %v6935_v8 }
 0xa75   : > { %6961 = vmatpush.msrb.mxu3 %v6934_v56  ;;  %v7170_v56 = vld [vmem:[%s12633_s15 + $0x18] sm:$0xff] }
 0xa77   : > { %v6495_v11 = vpop.f32.mrf.mxu3 }
 0xa78   : > { %v6589_v2 = vpop.f32.mrf.mxu1  ;;  %v6499_v13 = vadd.f32 %v6495_v11, %v6454_v38  ;;  %v6971_v11 = vld [vmem:[#allocation23 + $0x98] sm:$0xff]  ;;  %v7002_v38 = vld [vmem:[#allocation23 + $0xe8] sm:$0xff] }
 0xa79   : > { %v6595_v25 = vadd.f32 %v6589_v2, %v6551_v28  ;;  %6991 = vmatpush.msra.mxu0 %v6971_v11  ;;  %v6969_v28 = vld [vmem:[#allocation23 + $0x88] sm:$0xff]  ;;  %v8547_v11 = vld [vmem:[%s12633_s15 + $0x1b8] sm:$0xff] }
 0xa7a   : > { %v6548_v47 = vpop.f32.mrf.mxu0 }
 0xa7b   : > { %v6552_v58 = vadd.f32 %v6548_v47, %v6499_v13  ;;  %v6828_v47 = vld [vmem:[#allocation8] sm:$0x3]  ;;  %6992 = vmatpush.msra.mxu0 %v6970_v5  ;;  %v7041_v13 = vld [vmem:[#allocation23 + $0x58] sm:$0xff] }
 0xa7c   : > { %v7169_v5 = vld [vmem:[%s12633_s15 + $0x10] sm:$0xff] }
 0xa7d   : > { %6993 = vmatpush.msra.mxu0 %v6969_v28 }
 0xa83   : > { %v6592_v60 = vpop.f32.mrf.mxu1 }
 0xa84   : > { %v6596_v36 = vadd.f32 %v6592_v60, %v6552_v58  ;;  %v7004_v60 = vld [vmem:[#allocation23 + $0xf8] sm:$0xff] }
 0xa85   : > { %7024 = vmatpush.msrb.mxu1 %v7004_v60 }
 0xa87   : > { %v6633_v3 = vpop.f32.mrf.mxu2 }
 0xa88   : > { %v6639_v52 = vadd.f32 %v6633_v3, %v6595_v25  ;;  %v6968_v25 = vld [vmem:[#allocation23 + $0x80] sm:$0xff] }
 0xa89   : > { %6994 = vmatpush.msra.mxu0 %v6968_v25  ;;  %v8545_v25 = vld [vmem:[%s12633_s15 + $0x1a8] sm:$0xff] }
 0xa90   : > { %v6686_v22 = vpop.f32.mrf.mxu3 }
 0xa91   : > { %v6692_v51 = vadd.f32 %v6686_v22, %v6639_v52  ;;  %v7003_v22 = vld [vmem:[#allocation23 + $0xf0] sm:$0xff] }
 0xa92   : > { %v6636_v40 = vpop.f32.mrf.mxu2  ;;  %v6831_v52 = vld [vmem:[#allocation8 + $0xc] sm:$0x3]  ;;  %7025 = vmatpush.msrb.mxu1 %v7003_v22 }
 0xa93   : > { %v6730_v21 = vpop.f32.mrf.mxu0  ;;  %v6640_v31 = vadd.f32 %v6636_v40, %v6596_v36  ;;  %v7038_v40 = vld [vmem:[#allocation23 + $0x40] sm:$0xff]  ;;  %v7075_v36 = vld [vmem:[#allocation23 + $0xb8] sm:$0xff] }
 0xa94   : > { %v6736_v27 = vadd.f32 %v6730_v21, %v6692_v51  ;;  %v7001_v21 = vld [vmem:[#allocation23 + $0xe0] sm:$0xff]  ;;  %7026 = vmatpush.msrb.mxu1 %v7002_v38 }
 0xa95   : > { %v8544_v38 = vld [vmem:[%s12633_s15 + $0x1a0] sm:$0xff] }
 0xa96   : > { %7027 = vmatpush.msrb.mxu1 %v7001_v21 }
 0xa9b   : > { %v6689_v41 = vpop.f32.mrf.mxu3 }
 0xa9c   : > { %v6774_v35 = vpop.f32.mrf.mxu1  ;;  %v6693_v49 = vadd.f32 %v6689_v41, %v6640_v31  ;;  %v7073_v41 = vld [vmem:[#allocation23 + $0xa8] sm:$0xff] }
 0xa9d   : > { %v6780_v59 = vadd.f32 %v6774_v35, %v6736_v27  ;;  %v7040_v27 = vld [vmem:[#allocation23 + $0x50] sm:$0xff]  ;;  %v7039_v35 = vld [vmem:[#allocation23 + $0x48] sm:$0xff] }
 0xa9e   : > { %v6733_v0 = vpop.f32.mrf.mxu0 }
 0xa9f   : > { %v6786_v50 = vadd.f32 %v8707_v43, %v6780_v59  ;;  %v6737_v10 = vadd.f32 %v6733_v0, %v6693_v49  ;;  %v7072_v49 = vld [vmem:[#allocation23 + $0xa0] sm:$0xff]  ;;  %v7107_v0 = vld [vmem:[#allocation23 + $0x110] sm:$0xff] }
 0xaa1   : > { %v6788_v62 = vmax.f32 %v6786_v50, 0.0  ;;  %v7074_v50 = vld [vmem:[#allocation23 + $0xb0] sm:$0xff] }
 0xaa3   : > { %v6792_v46 = vrot.slane %v6788_v62, 4  ;;  %v6796_v18 = vsel %vm6358_vm14, %v6788_v62, -inf }
 0xaa5   : > { %v6797_v12 = vsel %vm6358_vm14, %v6792_v46, -inf  ;;  %v7108_v46 = vld [vmem:[#allocation23 + $0x118] sm:$0xff] }
 0xaa6   : > { %v6798_v7 = vmax.f32 %v6796_v18, %v6797_v12  ;;  %7128 = vmatpush.msrb.mxu0 %v7108_v46  ;;  %v6932_v18 = vld [vmem:[#allocation8 + $0xd] sm:$0x3]  ;;  %v7106_v12 = vld [vmem:[#allocation23 + $0x108] sm:$0xff]  ;;  %v8565_v46 = vld [vmem:[%s12633_s15 + $0x138] sm:$0xff] }
 0xaa7   : > { %v6777_v29 = vpop.f32.mrf.mxu1 }
 0xaa8   : > { %6802 = vst.msk [vmem:[#allocation12] sm:$0xf] %vm6358_vm14, %v6798_v7  ;;  %v6781_v39 = vadd.f32 %v6777_v29, %v6737_v10  ;;  %7129 = vmatpush.msrb.mxu0 %v7107_v0  ;;  %v7105_v10 = vld [vmem:[#allocation23 + $0x100] sm:$0xff]  ;;  %v8551_v0 = vld [vmem:[%s12633_s15 + $0x50] sm:$0xff] }
 0xaaa   : > { %v6787_v57 = vadd.f32 %v8707_v43, %v6781_v39  ;;  %v6929_v43 = vld [vmem:[#allocation8 + $0x1] sm:$0x3]  ;;  %7130 = vmatpush.msrb.mxu0 %v7106_v12 }
 0xaac   : > { %v6789_v20 = vmax.f32 %v6787_v57, 0.0  ;;  %7131 = vmatpush.msrb.mxu0 %v7105_v10  ;;  %v7036_v57 = vld [vmem:[#allocation8 + $0xe] sm:$0x3]  ;;  %v8563_v10 = vld [vmem:[%s12633_s15 + $0x128] sm:$0xff] }
 0xaae   : > { %v6793_v19 = vrot.slane %v6789_v20, 4  ;;  %v6799_v37 = vsel %vm6358_vm14, %v6789_v20, -inf }
 0xaaf   : > { %v6804_v4 = vld [vmem:[#allocation12] ss:$2 sm:$0x3]  ;;  %v6808_v32 = vld [vmem:[#allocation12 + $0x1] ss:$2 sm:$0x3] }
 0xab0   : > { %v6811_v1 = vmax.f32 %v6804_v4, %v6808_v32  ;;  %v6800_v16 = vsel %vm6358_vm14, %v6793_v19, -inf  ;;  %v8536_v19 = vld [vmem:[%s12633_s15 + $0xf0] sm:$0xff] }
 0xab1   : > { %v6801_v42 = vmax.f32 %v6799_v37, %v6800_v16  ;;  %v8534_v37 = vld [vmem:[%s12633_s15 + $0xe0] sm:$0xff] }
 0xab2   : > { %6826 = vst.msk [vmem:[#allocation8 + $0x5] sm:$0x3] %vm6825_vm0, %v6811_v1  ;;  %v8537_v1 = vld [vmem:[%s12633_s15 + $0xf8] sm:$0xff] }
 0xab3   : > { %6803 = vst.msk [vmem:[#allocation12 + $0x4] sm:$0xf] %vm6358_vm14, %v6801_v42  ;;  %7201 = vmatpush.msra.mxu1 %v8537_v1  ;;  %v8533_v42 = vld [vmem:[%s12633_s15 + $0xd8] sm:$0xff] }
 0xab5   : > { %7202 = vmatpush.msra.mxu1 %v8536_v19  ;;  %v8558_v19 = vld [vmem:[%s12633_s15 + $0x100] sm:$0xff] }
 0xab7   : > { %7203 = vmatpush.msra.mxu1 %v8535_v24  ;;  %v8571_v24 = vld [vmem:[%s12633_s15 + $0x1e0] sm:$0xff] }
 0xab9   : > { %v6829_v61 = vld [vmem:[#allocation8 + $0x4] sm:$0x3]  ;;  %v7034_v29 = vld [vmem:[#allocation8 + $0x6] sm:$0x3]  ;;  %7204 = vmatpush.msra.mxu1 %v8534_v37  ;;  %v8583_v37 = vld [vmem:[%s12633_s15 + $0xb8] sm:$0xff] }
 0xaba   : > { %6843 = vst [vmem:[#allocation1] ss:$4 sm:$0xff] %v6829_v61  ;;  %v6806_v33 = vld [vmem:[#allocation12 + $0x4] ss:$2 sm:$0x3] }
 0xabb   : > { %v6810_v17 = vld [vmem:[#allocation12 + $0x5] ss:$2 sm:$0x3]  ;;  %7205 = vmatpush.msra.mxu1 %v8533_v42  ;;  %v7166_v42 = vld [vmem:[#allocation9 + $0xc] sm:$0x3] }
 0xabc   : > { %v6812_v53 = vmax.f32 %v6806_v33, %v6810_v17  ;;  %v6930_v59 = vld [vmem:[#allocation8 + $0x5] sm:$0x3] }
 0xabd   : > { %7206 = vmatpush.msra.mxu1 %v8532_v54 }
 0xabe   : > { %6827 = vst.msk [vmem:[#allocation8 + $0x9] sm:$0x3] %vm6825_vm0, %v6812_v53  ;;  %v8530_v53 = vld [vmem:[%s12633_s15 + $0xc0] sm:$0xff] }
 0xabf   : > { %7207 = vmatpush.msra.mxu1 %v8531_v26  ;;  %v8580_v26 = vld [vmem:[%s12633_s15 + $0xa0] sm:$0xff] }
 0xac1   : > { %7208 = vmatpush.msra.mxu1 %v8530_v53  ;;  %v7277_v53 = vld [vmem:[#allocation9 + $0x1] sm:$0x3] }
 0xac5   : > { %v6830_v2 = vld [vmem:[#allocation8 + $0x8] sm:$0x3]  ;;  %v7035_v15 = vld [vmem:[#allocation8 + $0xa] sm:$0x3] }
 0xac6   : > { %6845 = vst [vmem:[#allocation1 + $0x1] ss:$4 sm:$0xff] %v6830_v2  ;;  %v6931_v62 = vld [vmem:[#allocation8 + $0x9] sm:$0x3] }
 0xacd   : > { %v6846_v3 = vld.sshfl [vmem:[#allocation1] sm:$0xff pattern:$0x73625140] }
 0xace   : > { %8521 = vmatmul.msk.f32.vlgmr.msra.gmra.mxu2 %vm6391_vm15, %v6846_v3  ;;  %6870 = vst [vmem:[#allocation1] ss:$4 sm:$0xff] %v6828_v47  ;;  %v8546_v47 = vld [vmem:[%s12633_s15 + $0x1b0] sm:$0xff]  ;;  %v7168_v3 = vld [vmem:[%s12633_s15 + $0x8] sm:$0xff] }
 0xacf   : > { %6872 = vst [vmem:[#allocation1 + $0x1] ss:$4 sm:$0xff] %v6829_v61  ;;  %7062 = vmatpush.msra.mxu2 %v7041_v13 }
 0xad1   : > { %7063 = vmatpush.msra.mxu2 %v7040_v27 }
 0xad3   : > { %7064 = vmatpush.msra.mxu2 %v7039_v35  ;;  %v8556_v35 = vld [vmem:[%s12633_s15 + $0x78] sm:$0xff] }
 0xad5   : > { %7065 = vmatpush.msra.mxu2 %v7038_v40 }
 0xad6   : > { %v6873_v51 = vld.sshfl [vmem:[#allocation1] sm:$0xff pattern:$0x73625140] }
 0xad7   : > { %8522 = vmatmul.msk.f32.vlgmr.msra.gmra.mxu3 %vm6391_vm15, %v6873_v51  ;;  %6902 = vst [vmem:[#allocation1] ss:$4 sm:$0xff] %v6830_v2  ;;  %v8708_v51 = vld [vmem:[%s12632_s14] ss:$0 sm:$0xff] }
 0xad8   : > { %6904 = vst [vmem:[#allocation1 + $0x1] ss:$4 sm:$0xff] %v6831_v52  ;;  %7095 = vmatpush.msra.mxu3 %v7075_v36  ;;  %v7167_v52 = vld [vmem:[%s12633_s15] sm:$0xff]  ;;  %v8541_v36 = vld [vmem:[%s12633_s15 + $0x188] sm:$0xff] }
 0xada   : > { %7096 = vmatpush.msra.mxu3 %v7074_v50  ;;  %v8554_v50 = vld [vmem:[%s12633_s15 + $0x68] sm:$0xff] }
 0xadc   : > { %7097 = vmatpush.msra.mxu3 %v7073_v41 }
 0xade   : > { %7098 = vmatpush.msra.mxu3 %v7072_v49  ;;  %v8552_v49 = vld [vmem:[%s12633_s15 + $0x58] sm:$0xff] }
 0xadf   : > { %v6905_v58 = vld.sshfl [vmem:[#allocation1] sm:$0xff pattern:$0x73625140] }
 0xae0   : > { %8523 = vmatmul.msk.f32.vlgmr.msrb.gmra.mxu2 %vm6391_vm15, %v6905_v58  ;;  %6940 = vst [vmem:[#allocation1] ss:$4 sm:$0xff] %v6929_v43  ;;  %v8543_v43 = vld [vmem:[%s12633_s15 + $0x198] sm:$0xff]  ;;  %v8542_v58 = vld [vmem:[%s12633_s15 + $0x190] sm:$0xff] }
 0xae1   : > { %6942 = vst [vmem:[#allocation1 + $0x1] ss:$4 sm:$0xff] %v6930_v59  ;;  %7228 = vmatpush.msrb.mxu2 %v7174_v6  ;;  %v8568_v6 = vld [vmem:[%s12633_s15 + $0x1c8] sm:$0xff] }
 0xae3   : > { %7229 = vmatpush.msrb.mxu2 %v7173_v55  ;;  %v8567_v55 = vld [vmem:[%s12633_s15 + $0x1c0] sm:$0xff] }
 0xae5   : > { %7230 = vmatpush.msrb.mxu2 %v7172_v9  ;;  %v8579_v9 = vld [vmem:[%s12633_s15 + $0x98] sm:$0xff] }
 0xae7   : > { %7231 = vmatpush.msrb.mxu2 %v7171_v34  ;;  %v8591_v34 = vld [vmem:[%s12633_s15 + $0x170] sm:$0xff] }
 0xae8   : > { %v6943_v31 = vld.sshfl [vmem:[#allocation1] sm:$0xff pattern:$0x73625140] }
 0xae9   : > { %8524 = vmatmul.msk.f32.vlgmr.msrb.gmra.mxu3 %vm6391_vm15, %v6943_v31  ;;  %6973 = vst [vmem:[#allocation1] ss:$4 sm:$0xff] %v6930_v59  ;;  %7232 = vmatpush.msrb.mxu2 %v7170_v56  ;;  %v8555_v59 = vld [vmem:[%s12633_s15 + $0x70] sm:$0xff]  ;;  %v8540_v31 = vld [vmem:[%s12633_s15 + $0x180] sm:$0xff] }
 0xaea   : > { %6975 = vst [vmem:[#allocation1 + $0x1] ss:$4 sm:$0xff] %v6931_v62  ;;  %7264 = vmatpush.msrb.mxu3 %v8547_v11  ;;  %v8576_v56 = vld [vmem:[%s12633_s15 + $0x80] sm:$0xff] }
 0xaeb   : > { %7233 = vmatpush.msrb.mxu2 %v7169_v5  ;;  %v8589_v11 = vld [vmem:[%s12633_s15 + $0x160] sm:$0xff]  ;;  %v8588_v5 = vld [vmem:[%s12633_s15 + $0x158] sm:$0xff] }
 0xaec   : > { %7265 = vmatpush.msrb.mxu3 %v8546_v47  ;;  %v8601_v47 = vld [vmem:[%s12633_s15 + $0x238] sm:$0xff] }
 0xaed   : > { %7234 = vmatpush.msrb.mxu2 %v7168_v3  ;;  %v8600_v3 = vld [vmem:[%s12633_s15 + $0x230] sm:$0xff] }
 0xaee   : > { %7266 = vmatpush.msrb.mxu3 %v8545_v25  ;;  %v8586_v25 = vld [vmem:[%s12633_s15 + $0x148] sm:$0xff] }
 0xaef   : > { %7235 = vmatpush.msrb.mxu2 %v7167_v52 }
 0xaf0   : > { %7267 = vmatpush.msrb.mxu3 %v8544_v38  ;;  %v8585_v38 = vld [vmem:[%s12633_s15 + $0x140] sm:$0xff] }
 0xaf1   : > { %v6976_v7 = vld.sshfl [vmem:[#allocation1] sm:$0xff pattern:$0x73625140] }
 0xaf2   : > { %8525 = vmatmul.msk.f32.vlgmr.msra.gmra.mxu0 %vm6391_vm15, %v6976_v7  ;;  %7006 = vst [vmem:[#allocation1] ss:$4 sm:$0xff] %v6931_v62  ;;  %7268 = vmatpush.msrb.mxu3 %v8543_v43  ;;  %v8553_v62 = vld [vmem:[%s12633_s15 + $0x60] sm:$0xff]  ;;  %v8550_v7 = vld [vmem:[%s12633_s15 + $0x48] sm:$0xff] }
 0xaf3   : > { %7008 = vst [vmem:[#allocation1 + $0x1] ss:$4 sm:$0xff] %v6932_v18  ;;  %7306 = vmatpush.msra.mxu0 %v8556_v35  ;;  %v8564_v18 = vld [vmem:[%s12633_s15 + $0x130] sm:$0xff]  ;;  %v8595_v43 = vld [vmem:[%s12633_s15 + $0x208] sm:$0xff] }
 0xaf4   : > { %7269 = vmatpush.msrb.mxu3 %v8542_v58  ;;  %v8594_v58 = vld [vmem:[%s12633_s15 + $0x200] sm:$0xff] }
 0xaf5   : > { %7307 = vmatpush.msra.mxu0 %v8555_v59  ;;  %v7393_v59 = vld [vmem:[#allocation9 + $0x2] sm:$0x3] }
 0xaf6   : > { %7270 = vmatpush.msrb.mxu3 %v8541_v36 }
 0xaf7   : > { %7308 = vmatpush.msra.mxu0 %v8554_v50 }
 0xaf8   : > { %7271 = vmatpush.msrb.mxu3 %v8540_v31  ;;  %v7396_v31 = vld [vmem:[#allocation9 + $0xe] sm:$0x3] }
 0xaf9   : > { %7309 = vmatpush.msra.mxu0 %v8553_v62 }
 0xafa   : > { %v7009_v14 = vld.sshfl [vmem:[#allocation1] sm:$0xff pattern:$0x73625140] }
 0xafb   : > { %8526 = vmatmul.msk.f32.vlgmr.msrb.gmra.mxu1 %vm6391_vm15, %v7009_v14  ;;  %7044 = vst [vmem:[#allocation1] ss:$4 sm:$0xff] %v7033_v48  ;;  %7310 = vmatpush.msra.mxu0 %v8552_v49  ;;  %v8549_v14 = vld [vmem:[%s12633_s15 + $0x40] sm:$0xff] }
 0xafc   : > { %7046 = vst [vmem:[#allocation1 + $0x1] ss:$4 sm:$0xff] %v7034_v29  ;;  %7343 = vmatpush.msrb.mxu1 %v8565_v46  ;;  %v7534_v46 = vld [vmem:[#allocation25 + $0x38] sm:$0xff] }
 0xafd   : > { %7311 = vmatpush.msra.mxu0 %v8551_v0  ;;  %v7533_v0 = vld [vmem:[#allocation25 + $0x30] sm:$0xff] }
 0xafe   : > { %7344 = vmatpush.msrb.mxu1 %v8564_v18  ;;  %v7532_v18 = vld [vmem:[#allocation25 + $0x28] sm:$0xff] }
 0xaff   : > { %7312 = vmatpush.msra.mxu0 %v8550_v7 }
 0xb00   : > { %7345 = vmatpush.msrb.mxu1 %v8563_v10  ;;  %v7531_v10 = vld [vmem:[#allocation25 + $0x20] sm:$0xff] }
 0xb01   : > { %7313 = vmatpush.msra.mxu0 %v8549_v14 }
 0xb03   : > { %v7047_v39 = vld.sshfl [vmem:[#allocation1] sm:$0xff pattern:$0x73625140] }
 0xb04   : > { %8527 = vmatmul.msk.f32.vlgmr.msra.gmra.mxu2 %vm6391_vm15, %v7047_v39  ;;  %7077 = vst [vmem:[#allocation1] ss:$4 sm:$0xff] %v7034_v29  ;;  %v8562_v29 = vld [vmem:[%s12633_s15 + $0x120] sm:$0xff]  ;;  %v8561_v39 = vld [vmem:[%s12633_s15 + $0x118] sm:$0xff] }
 0xb05   : > { %7079 = vst [vmem:[#allocation1 + $0x1] ss:$4 sm:$0xff] %v7035_v15  ;;  %7346 = vmatpush.msrb.mxu1 %v8562_v29  ;;  %v7529_v29 = vld [vmem:[#allocation25 + $0x10] sm:$0xff] }
 0xb07   : > { %7347 = vmatpush.msrb.mxu1 %v8561_v39 }
 0xb0c   : > { %v7080_v30 = vld.sshfl [vmem:[#allocation1] sm:$0xff pattern:$0x73625140] }
 0xb0d   : > { %8528 = vmatmul.msk.f32.vlgmr.msra.gmra.mxu3 %vm6391_vm15, %v7080_v30  ;;  %7110 = vst [vmem:[#allocation1] ss:$4 sm:$0xff] %v7035_v15  ;;  %v8574_v15 = vld [vmem:[%s12633_s15 + $0x1f8] sm:$0xff] }
 0xb0e   : > { %7112 = vst [vmem:[#allocation1 + $0x1] ss:$4 sm:$0xff] %v7036_v57  ;;  %v8560_v57 = vld [vmem:[%s12633_s15 + $0x110] sm:$0xff]  ;;  %v7163_v30 = vld [vmem:[#allocation9] sm:$0x3]  ;;  %7380 = vmatpush.msra.mxu2 %v8574_v15  ;;  %7422 = vmatpush.msra.mxu3 %v8583_v37  ;;  %v7528_v15 = vld [vmem:[#allocation25 + $0x8] sm:$0xff] }
 0xb0f   : > { %7348 = vmatpush.msrb.mxu1 %v8560_v57 }
 0xb15   : > { %v7113_v20 = vld.sshfl [vmem:[#allocation1] sm:$0xff pattern:$0x73625140] }
 0xb16   : > { %8529 = vmatmul.msk.f32.vlgmr.msrb.gmra.mxu0 %vm6391_vm15, %v7113_v20  ;;  %v8573_v20 = vld [vmem:[%s12633_s15 + $0x1f0] sm:$0xff] }
 0xb17   : > { %7381 = vmatpush.msra.mxu2 %v8573_v20  ;;  %v7527_v20 = vld [vmem:[#allocation25] sm:$0xff] }
 0xb51   : > { %v6866_v4 = vpop.f32.mrf.mxu2 }
 0xb5a   : > { %v6893_v32 = vpop.f32.mrf.mxu3 }
 0xb5b   : > { %v6894_v16 = vadd.f32 %v6893_v32, %v6866_v4  ;;  %v8559_v4 = vld [vmem:[%s12633_s15 + $0x108] sm:$0xff] }
 0xb5c   : > { %v8572_v32 = vld [vmem:[%s12633_s15 + $0x1e8] sm:$0xff]  ;;  %7349 = vmatpush.msrb.mxu1 %v8559_v4 }
 0xb5d   : > { %7382 = vmatpush.msra.mxu2 %v8572_v32 }
 0xb5e   : > { %7350 = vmatpush.msrb.mxu1 %v8558_v19  ;;  %v7575_v19 = vld [vmem:[#allocation26 + $0x78] sm:$0xff] }
 0xb5f   : > { %7383 = vmatpush.msra.mxu2 %v8571_v24  ;;  %v7574_v24 = vld [vmem:[#allocation26 + $0x70] sm:$0xff] }
 0xb63   : > { %v6925_v63 = vpop.f32.mrf.mxu2 }
 0xb64   : > { %v6928_v61 = vadd.f32 %v6925_v63, %v6894_v16  ;;  %v8570_v63 = vld [vmem:[%s12633_s15 + $0x1d8] sm:$0xff]  ;;  %v8569_v16 = vld [vmem:[%s12633_s15 + $0x1d0] sm:$0xff] }
 0xb65   : > { %7384 = vmatpush.msra.mxu2 %v8570_v63 }
 0xb67   : > { %7385 = vmatpush.msra.mxu2 %v8569_v16  ;;  %v7573_v16 = vld [vmem:[#allocation26 + $0x68] sm:$0xff] }
 0xb69   : > { %7386 = vmatpush.msra.mxu2 %v8568_v6 }
 0xb6b   : > { %7387 = vmatpush.msra.mxu2 %v8567_v55  ;;  %v7570_v55 = vld [vmem:[#allocation26 + $0x50] sm:$0xff] }
 0xb6c   : > { %v6963_v23 = vpop.f32.mrf.mxu3 }
 0xb6d   : > { %v6966_v33 = vadd.f32 %v6963_v23, %v6928_v61  ;;  %v8582_v23 = vld [vmem:[%s12633_s15 + $0xb0] sm:$0xff]  ;;  %v8581_v61 = vld [vmem:[%s12633_s15 + $0xa8] sm:$0xff] }
 0xb6e   : > { %7423 = vmatpush.msra.mxu3 %v8582_v23 }
 0xb6f   : > { %v6996_v17 = vpop.f32.mrf.mxu0 }
 0xb70   : > { %v6999_v45 = vadd.f32 %v6996_v17, %v6966_v33  ;;  %7424 = vmatpush.msra.mxu3 %v8581_v61  ;;  %v8592_v33 = vld [vmem:[%s12633_s15 + $0x178] sm:$0xff]  ;;  %v8578_v17 = vld [vmem:[%s12633_s15 + $0x90] sm:$0xff] }
 0xb71   : > { %7459 = vmatpush.msrb.mxu0 %v8592_v33 }
 0xb72   : > { %7425 = vmatpush.msra.mxu3 %v8580_v26 }
 0xb73   : > { %7460 = vmatpush.msrb.mxu0 %v8591_v34  ;;  %v7568_v34 = vld [vmem:[#allocation26 + $0x40] sm:$0xff] }
 0xb74   : > { %7426 = vmatpush.msra.mxu3 %v8579_v9  ;;  %v8709_v9 = vld [vmem:[%s12634_s16] ss:$0 sm:$0xff] }
 0xb76   : > { %7427 = vmatpush.msra.mxu3 %v8578_v17  ;;  %v7569_v17 = vld [vmem:[#allocation26 + $0x48] sm:$0xff] }
 0xb78   : > { %v7029_v44 = vpop.f32.mrf.mxu1 }
 0xb79   : > { %v7032_v2 = vadd.f32 %v7029_v44, %v6999_v45  ;;  %v8577_v44 = vld [vmem:[%s12633_s15 + $0x88] sm:$0xff] }
 0xb7a   : > { %v8590_v45 = vld [vmem:[%s12633_s15 + $0x168] sm:$0xff]  ;;  %7428 = vmatpush.msra.mxu3 %v8577_v44 }
 0xb7b   : > { %7461 = vmatpush.msrb.mxu0 %v8590_v45  ;;  %v7567_v45 = vld [vmem:[#allocation26 + $0x38] sm:$0xff] }
 0xb7c   : > { %7429 = vmatpush.msra.mxu3 %v8576_v56 }
 0xb7d   : > { %7462 = vmatpush.msrb.mxu0 %v8589_v11  ;;  %v7565_v11 = vld [vmem:[#allocation26 + $0x28] sm:$0xff] }
 0xb7f   : > { %7463 = vmatpush.msrb.mxu0 %v8588_v5 }
 0xb87   : > { %v7067_v8 = vpop.f32.mrf.mxu2 }
 0xb88   : > { %v7070_v28 = vadd.f32 %v7067_v8, %v7032_v2 }
 0xb90   : > { %v7100_v60 = vpop.f32.mrf.mxu3 }
 0xb91   : > { %v7103_v22 = vadd.f32 %v7100_v60, %v7070_v28  ;;  %v8587_v28 = vld [vmem:[%s12633_s15 + $0x150] sm:$0xff]  ;;  %v8599_v60 = vld [vmem:[%s12633_s15 + $0x228] sm:$0xff] }
 0xb92   : > { %7464 = vmatpush.msrb.mxu0 %v8587_v28 }
 0xb93   : > { %v7133_v21 = vpop.f32.mrf.mxu0 }
 0xb94   : > { %v7136_v13 = vadd.f32 %v7133_v21, %v7103_v22  ;;  %7465 = vmatpush.msrb.mxu0 %v8586_v25  ;;  %v8597_v21 = vld [vmem:[%s12633_s15 + $0x218] sm:$0xff] }
 0xb95   : > { %v7563_v25 = vld [vmem:[#allocation26 + $0x18] sm:$0xff] }
 0xb96   : > { %v7141_v27 = vadd.f32 %v8708_v51, %v7136_v13  ;;  %v8598_v51 = vld [vmem:[%s12633_s15 + $0x220] sm:$0xff]  ;;  %7466 = vmatpush.msrb.mxu0 %v8585_v38  ;;  %v8596_v13 = vld [vmem:[%s12633_s15 + $0x210] sm:$0xff] }
 0xb97   : > { %v7562_v38 = vld [vmem:[#allocation26 + $0x10] sm:$0xff] }
 0xb98   : > { %v7142_v40 = vmax.f32 %v7141_v27, 0.0  ;;  %v7280_v27 = vld [vmem:[#allocation9 + $0xd] sm:$0x3] }
 0xb9a   : > { %v7144_v41 = vrot.slane %v7142_v40, 2  ;;  %7161 = vst.msk [vmem:[#allocation9 + $0x5] sm:$0x3] %vm7160_vm3, %v7142_v40 }
 0xb9c   : > { %7162 = vst.msk [vmem:[#allocation9 + $0x9] sm:$0x3] %vm7160_vm3, %v7144_v41 }
 0xba1   : > { %v7164_v12 = vld [vmem:[#allocation9 + $0x4] sm:$0x3]  ;;  %v7394_v36 = vld [vmem:[#allocation9 + $0x6] sm:$0x3] }
 0xba2   : > { %7186 = vst [vmem:[#allocation1] ss:$4 sm:$0xff] %v7164_v12  ;;  %v7278_v2 = vld [vmem:[#allocation9 + $0x5] sm:$0x3] }
 0xba3   : > { %v7165_v48 = vld [vmem:[#allocation9 + $0x8] sm:$0x3]  ;;  %v7395_v41 = vld [vmem:[#allocation9 + $0xa] sm:$0x3] }
 0xba4   : > { %7188 = vst [vmem:[#allocation1 + $0x1] ss:$4 sm:$0xff] %v7165_v48  ;;  %v7279_v52 = vld [vmem:[#allocation9 + $0x9] sm:$0x3] }
 0xbab   : > { %v7189_v1 = vld.sshfl [vmem:[#allocation1] sm:$0xff pattern:$0x73625140] }
 0xbac   : > { %8538 = vmatmul.msk.f32.vlgmr.msra.gmra.mxu1 %vm7190_vm4, %v7189_v1  ;;  %7214 = vst [vmem:[#allocation1] ss:$4 sm:$0xff] %v7163_v30 }
 0xbad   : > { %7216 = vst [vmem:[#allocation1 + $0x1] ss:$4 sm:$0xff] %v7164_v12  ;;  %7496 = vmatpush.msra.mxu1 %v8601_v47 }
 0xbaf   : > { %7497 = vmatpush.msra.mxu1 %v8600_v3  ;;  %v7564_v3 = vld [vmem:[#allocation26 + $0x20] sm:$0xff] }
 0xbb1   : > { %7498 = vmatpush.msra.mxu1 %v8599_v60 }
 0xbb3   : > { %7499 = vmatpush.msra.mxu1 %v8598_v51  ;;  %v7561_v51 = vld [vmem:[#allocation26 + $0x8] sm:$0xff] }
 0xbb4   : > { %v7217_v54 = vld.sshfl [vmem:[#allocation1] sm:$0xff pattern:$0x73625140] }
 0xbb5   : > { %8539 = vmatmul.msk.f32.vlgmr.msrb.gmra.mxu2 %vm7190_vm4, %v7217_v54  ;;  %7250 = vst [vmem:[#allocation1] ss:$4 sm:$0xff] %v7165_v48  ;;  %7500 = vmatpush.msra.mxu1 %v8597_v21  ;;  %v7530_v48 = vld [vmem:[#allocation25 + $0x18] sm:$0xff]  ;;  %v7560_v21 = vld [vmem:[#allocation26] sm:$0xff] }
 0xbb6   : > { %7252 = vst [vmem:[#allocation1 + $0x1] ss:$4 sm:$0xff] %v7166_v42  ;;  %7547 = vmatpush.msrb.mxu2 %v7534_v46  ;;  %v7572_v42 = vld [vmem:[#allocation26 + $0x60] sm:$0xff]  ;;  %v7571_v54 = vld [vmem:[#allocation26 + $0x58] sm:$0xff] }
 0xbb7   : > { %7501 = vmatpush.msra.mxu1 %v8596_v13  ;;  %v7535_v13 = vld [vmem:[%s12636_s18] sm:$0x1] }
 0xbb8   : > { %7548 = vmatpush.msrb.mxu2 %v7533_v0 }
 0xbb9   : > { %7502 = vmatpush.msra.mxu1 %v8595_v43 }
 0xbba   : > { %7549 = vmatpush.msrb.mxu2 %v7532_v18 }
 0xbbb   : > { %7503 = vmatpush.msra.mxu1 %v8594_v58  ;;  %v7576_v58 = vld [vmem:[#allocation14] sm:$0x1] }
 0xbbc   : > { %7550 = vmatpush.msrb.mxu2 %v7531_v10 }
 0xbbd   : > { %v7253_v8 = vld.sshfl [vmem:[#allocation1] sm:$0xff pattern:$0x73625140] }
 0xbbe   : > { %8548 = vmatmul.msk.f32.vlgmr.msrb.gmra.mxu3 %vm7190_vm4, %v7253_v8  ;;  %7292 = vst [vmem:[#allocation1] ss:$4 sm:$0xff] %v7277_v53  ;;  %7551 = vmatpush.msrb.mxu2 %v7530_v48 }
 0xbbf   : > { %7294 = vst [vmem:[#allocation1 + $0x1] ss:$4 sm:$0xff] %v7278_v2  ;;  %7577 = vmatpush.msrb.mxu3 %v7575_v19 }
 0xbc0   : > { %7552 = vmatpush.msrb.mxu2 %v7529_v29 }
 0xbc1   : > { %7578 = vmatpush.msrb.mxu3 %v7574_v24 }
 0xbc2   : > { %7553 = vmatpush.msrb.mxu2 %v7528_v15 }
 0xbc3   : > { %7579 = vmatpush.msrb.mxu3 %v7573_v16 }
 0xbc4   : > { %7554 = vmatpush.msrb.mxu2 %v7527_v20 }
 0xbc5   : > { %7580 = vmatpush.msrb.mxu3 %v7572_v42 }
 0xbc6   : > { %v7295_v22 = vld.sshfl [vmem:[#allocation1] sm:$0xff pattern:$0x73625140] }
 0xbc7   : > { %8557 = vmatmul.msk.f32.vlgmr.msra.gmra.mxu0 %vm7190_vm4, %v7295_v22  ;;  %7329 = vst [vmem:[#allocation1] ss:$4 sm:$0xff] %v7278_v2  ;;  %7581 = vmatpush.msrb.mxu3 %v7571_v54  ;;  %v7566_v2 = vld [vmem:[#allocation26 + $0x30] sm:$0xff] }
 0xbc8   : > { %7331 = vst [vmem:[#allocation1 + $0x1] ss:$4 sm:$0xff] %v7279_v52 }
 0xbc9   : > { %7582 = vmatpush.msrb.mxu3 %v7570_v55 }
 0xbcb   : > { %7583 = vmatpush.msrb.mxu3 %v7569_v17 }
 0xbcd   : > { %7584 = vmatpush.msrb.mxu3 %v7568_v34 }
 0xbcf   : > { %v7332_v35 = vld.sshfl [vmem:[#allocation1] sm:$0xff pattern:$0x73625140]  ;;  %7585 = vmatpush.msrb.mxu3 %v7567_v45 }
 0xbd0   : > { %8566 = vmatmul.msk.f32.vlgmr.msrb.gmra.mxu1 %vm7190_vm4, %v7332_v35  ;;  %7366 = vst [vmem:[#allocation1] ss:$4 sm:$0xff] %v7279_v52 }
 0xbd1   : > { %7368 = vst [vmem:[#allocation1 + $0x1] ss:$4 sm:$0xff] %v7280_v27  ;;  %7586 = vmatpush.msrb.mxu3 %v7566_v2 }
 0xbd3   : > { %7587 = vmatpush.msrb.mxu3 %v7565_v11 }
 0xbd5   : > { %7588 = vmatpush.msrb.mxu3 %v7564_v3 }
 0xbd7   : > { %7589 = vmatpush.msrb.mxu3 %v7563_v25 }
 0xbd8   : > { %v7369_v40 = vld.sshfl [vmem:[#allocation1] sm:$0xff pattern:$0x73625140] }
 0xbd9   : > { %8575 = vmatmul.msk.f32.vlgmr.msra.gmra.mxu2 %vm7190_vm4, %v7369_v40  ;;  %7408 = vst [vmem:[#allocation1] ss:$4 sm:$0xff] %v7393_v59  ;;  %7590 = vmatpush.msrb.mxu3 %v7562_v38 }
 0xbda   : > { %7410 = vst [vmem:[#allocation1 + $0x1] ss:$4 sm:$0xff] %v7394_v36 }
 0xbdb   : > { %7591 = vmatpush.msrb.mxu3 %v7561_v51 }
 0xbdd   : > { %7592 = vmatpush.msrb.mxu3 %v7560_v21 }
 0xbe1   : > { %v7411_v50 = vld.sshfl [vmem:[#allocation1] sm:$0xff pattern:$0x73625140] }
 0xbe2   : > { %8584 = vmatmul.msk.f32.vlgmr.msra.gmra.mxu3 %vm7190_vm4, %v7411_v50  ;;  %7445 = vst [vmem:[#allocation1] ss:$4 sm:$0xff] %v7394_v36 }
 0xbe3   : > { %7447 = vst [vmem:[#allocation1 + $0x1] ss:$4 sm:$0xff] %v7395_v41 }
 0xbea   : > { %v7448_v62 = vld.sshfl [vmem:[#allocation1] sm:$0xff pattern:$0x73625140] }
 0xbeb   : > { %8593 = vmatmul.msk.f32.vlgmr.msrb.gmra.mxu0 %vm7190_vm4, %v7448_v62  ;;  %7482 = vst [vmem:[#allocation1] ss:$4 sm:$0xff] %v7395_v41 }
 0xbec   : > { %7484 = vst [vmem:[#allocation1 + $0x1] ss:$4 sm:$0xff] %v7396_v31 }
 0xbf3   : > { %v7485_v49 = vld.sshfl [vmem:[#allocation1] sm:$0xff pattern:$0x73625140] }
 0xbf4   : > { %8602 = vmatmul.msk.f32.vlgmr.msra.gmra.mxu1 %vm7190_vm4, %v7485_v49 }
 0xc29   : > { %v7210_v12 = vpop.f32.mrf.mxu1 }
 0xc38   : > { %v7237_v7 = vpop.f32.mrf.mxu2 }
 0xc39   : > { %v7238_v39 = vadd.f32 %v7237_v7, %v7210_v12 }
 0xc41   : > { %v7273_v14 = vpop.f32.mrf.mxu3 }
 0xc42   : > { %v7276_v57 = vadd.f32 %v7273_v14, %v7238_v39 }
 0xc44   : > { %v7315_v30 = vpop.f32.mrf.mxu0 }
 0xc45   : > { %v7318_v32 = vadd.f32 %v7315_v30, %v7276_v57 }
 0xc4d   : > { %v7352_v4 = vpop.f32.mrf.mxu1 }
 0xc4e   : > { %v7355_v63 = vadd.f32 %v7352_v4, %v7318_v32 }
 0xc5c   : > { %v7389_v1 = vpop.f32.mrf.mxu2 }
 0xc5d   : > { %v7392_v23 = vadd.f32 %v7389_v1, %v7355_v63 }
 0xc65   : > { %v7431_v37 = vpop.f32.mrf.mxu3 }
 0xc66   : > { %v7434_v6 = vadd.f32 %v7431_v37, %v7392_v23 }
 0xc68   : > { %v7468_v61 = vpop.f32.mrf.mxu0 }
 0xc69   : > { %v7471_v26 = vadd.f32 %v7468_v61, %v7434_v6 }
 0xc71   : > { %v7505_v33 = vpop.f32.mrf.mxu1 }
 0xc72   : > { %v7508_v53 = vadd.f32 %v7505_v33, %v7471_v26 }
 0xc74   : > { %v7513_v44 = vadd.f32 %v8709_v9, %v7508_v53 }
 0xc76   : > { %v7514_v8 = vmax.f32 %v7513_v44, 0.0 }
 0xc78   : > { %v7516_v56 = vrot.slane %v7514_v8, 2  ;;  %v7518_v5 = vsel %vm7160_vm3, %v7514_v8, -inf }
 0xc7a   : > { %v7519_v47 = vsel %vm7160_vm3, %v7516_v56, -inf }
 0xc7b   : > { %v7520_v28 = vmax.f32 %v7518_v5, %v7519_v47 }
 0xc7d   : > { %7521 = vst.msk [vmem:[#allocation13] sm:$0x3] %vm7160_vm3, %v7520_v28 }
 0xc84   : > { %v7522_v60 = vld [vmem:[#allocation13] ss:$2 sm:$0x1]  ;;  %v7524_v22 = vld [vmem:[#allocation13 + $0x1] ss:$2 sm:$0x1] }
 0xc85   : > { %v7525_v52 = vmax.f32 %v7522_v60, %v7524_v22 }
 0xc87   : > { %8603 = vmatmul.msk.f32.vlgmr.msrb.gmra.mxu2 %vm7190_vm4, %v7525_v52 }
 0xd0a   : > { %v7556_v27 = vpop.f32.mrf.mxu2 }
 0xd0b   : > { %v7557_v43 = vadd.f32 %v7556_v27, %v7535_v13 }
 0xd0d   : > { %v7559_v35 = vmax.f32 %v7557_v43, 0.0 }
 0xd0f   : > { %7593 = vmatmul.f32.vlgmr.msrb.gmra.mxu3 %v7559_v35 }
 0xd92   : > { %v7594_v59 = vpop.f32.mrf.mxu3 }
 0xd93   : > { %v7595_v40 = vadd.f32 %v7594_v59, %v7576_v58 }
 0xd95   : > { %7598 = vst.msk [vmem:[%s787_s25] sm:$0x1] %vm7597_vm5, %v7595_v40 }
 0xd96 PF: > { %s12870_s0 = sld [smem:[#allocation33_spill]] }
 0xd9c   : > { %s38_s26 = sadd.s32 1, %s12870_s0  }
 0xd9d   : > { %p35_p7 = scmp.ge.s32.totalorder %s38_s26, 4  }
 0xd9f   :  { %37 = sbr.rel (!%p35_p7) target bundleno = 15 (0xf), region = 345 }
 0xda4   :  { %7616 = vsyncpa [#allocation16], 1 }
 0xda5   :  { %7618 = vsyncpa [#allocation16 + $0x1], 1 }
 0xda6   :  { %7619 = vsyncpa [#allocation18], 1 }
 0xda7   :  { %7620 = vsyncpa [#allocation21], 1 }
 0xda8   :  { %7621 = vsyncpa [#allocation24], 1 }
 0xda9   :  { %7622 = vsyncpa [#allocation27], 1 }

</bundles_post_ra>
